<compile_context>
chip_gen: v6e
topology: v6e:2x2x1
jax: 0.10.0
libtpu: 0.0.40
codegen_flags: <defaults>
</compile_context>

<pallas_src>
import numpy as np
import jax
import jax.numpy as jnp
from jax.experimental import pallas as pl
from jax.experimental.pallas import tpu as pltpu

# ---- model hyperparameters (mirrors BILSTM_Attention_Model.__init__) --------
SEQ_LEN = 8
EMBED_LEN = 32
VOCAB = 50          # token2idx_len
BATCH = 2
N_HIDDEN = 108      # self.n_hidden
NUM_CLASSES = 10
HP = 128            # hidden padded to one full lane tile (108 -> 128)
BP = 8              # batch padded to the f32 sublane minimum (2 -> 8)
CP = 128            # classes padded to one lane tile for a dense output store


# --------------------------- fused forward kernel ----------------------------
def _fused_kernel(x_ref, wih_ref, whh_ref, b_ref, wout_ref, bout_ref,
                  out_ref, gx_ref, hstate_ref, hid_ref):
    S, H2 = SEQ_LEN, 2 * HP

    # (1) input projection for every timestep / both directions in ONE matmul:
    #     (S*BP, E) @ (E, 8*HP) -> gate pre-activations (stored in VMEM scratch).
    gx_ref[...] = (jnp.dot(x_ref[...], wih_ref[...],
                           preferred_element_type=jnp.float32) + b_ref[...])

    # (2) recurrence, statically unrolled over S=8.  State layout:
    #     h, c : (BP, 2*HP) = [fwd | bwd];  whh is block-diagonal (2*HP, 8*HP),
    #     so both directions' recurrent matmuls fuse into one MXU op per step.
    h = jnp.zeros((BP, H2), jnp.float32)
    c = jnp.zeros((BP, H2), jnp.float32)
    hs_f = [None] * S
    hs_b = [None] * S
    for t in range(S):
        gh = jnp.dot(h, whh_ref[...], preferred_element_type=jnp.float32)     # (BP, 8*HP)
        gxf = gx_ref[pl.ds(t * BP, BP), pl.ds(0, 4 * HP)]                      # fwd: time t
        gxb = gx_ref[pl.ds((S - 1 - t) * BP, BP), pl.ds(4 * HP, 4 * HP)]       # bwd: time S-1-t
        g = jnp.concatenate([gxf, gxb], axis=1) + gh                           # (BP, 8*HP)
        # per-direction gate layout [i | f | g | o], each HP lanes (torch order)
        i_g = jax.nn.sigmoid(jnp.concatenate([g[:, 0 * HP:1 * HP], g[:, 4 * HP:5 * HP]], axis=1))
        f_g = jax.nn.sigmoid(jnp.concatenate([g[:, 1 * HP:2 * HP], g[:, 5 * HP:6 * HP]], axis=1))
        g_g = jnp.tanh(jnp.concatenate([g[:, 2 * HP:3 * HP], g[:, 6 * HP:7 * HP]], axis=1))
        o_g = jax.nn.sigmoid(jnp.concatenate([g[:, 3 * HP:4 * HP], g[:, 7 * HP:8 * HP]], axis=1))
        c = f_g * c + i_g * g_g
        h = o_g * jnp.tanh(c)
        hs_f[t] = h[:, 0:HP]            # forward output at time t
        hs_b[S - 1 - t] = h[:, HP:H2]   # backward output at time S-1-t

    # (3) attention "hidden": replicate torch's final_state.view(-1, 2H, 1),
    #     which for B=2 mixes the two batch rows of each direction.
    hstate_ref[...] = h                                   # final [h_fwd | h_bwd]
    hid_ref[...] = jnp.zeros((BP, H2), jnp.float32)
    hid_ref[0:1, 0:HP]   = hstate_ref[0:1, 0:HP]          # fwd final, batch 0
    hid_ref[0:1, HP:H2]  = hstate_ref[1:2, 0:HP]          # fwd final, batch 1
    hid_ref[1:2, 0:HP]   = hstate_ref[0:1, HP:H2]         # bwd final, batch 0
    hid_ref[1:2, HP:H2]  = hstate_ref[1:2, HP:H2]         # bwd final, batch 1
    hidden = hid_ref[...]                                 # (BP, 2*HP), rows >=2 are zero

    # (4) attention scores + softmax over the sequence (kept as per-step (BP,1)
    #     columns -> only lane-reduces and lane-broadcasts, no odd concats).
    out_rows = [jnp.concatenate([hs_f[s], hs_b[s]], axis=1) for s in range(S)]   # (BP, 2*HP)
    score = [jnp.sum(out_rows[s] * hidden, axis=1, keepdims=True) for s in range(S)]
    m = score[0]
    for s in range(1, S):
        m = jnp.maximum(m, score[s])
    e = [jnp.exp(score[s] - m) for s in range(S)]
    denom = e[0]
    for s in range(1, S):
        denom = denom + e[s]
    inv = 1.0 / denom                                     # (BP, 1)
    context = out_rows[0] * (e[0] * inv)
    for s in range(1, S):
        context = context + out_rows[s] * (e[s] * inv)    # (BP, 2*HP)

    # (5) output linear, lane-dense (BP, CP) store (real logits in [:BATCH, :C]).
    out_ref[...] = (jnp.dot(context, wout_ref[...],
                            preferred_element_type=jnp.float32) + bout_ref[...])


def fused_forward_pallas(x_p, wih, whh, bias, w_out_p, b_out_p):
    return pl.pallas_call(
        _fused_kernel,
        out_shape=jax.ShapeDtypeStruct((BP, CP), jnp.float32),
        grid=(1,),
        in_specs=[
            pl.BlockSpec((SEQ_LEN * BP, EMBED_LEN), lambda i: (0, 0)),   # embeddings
            pl.BlockSpec((EMBED_LEN, 8 * HP), lambda i: (0, 0)),         # wih (both dirs)
            pl.BlockSpec((2 * HP, 8 * HP), lambda i: (0, 0)),            # whh block-diag
            pl.BlockSpec((1, 8 * HP), lambda i: (0, 0)),                 # bias
            pl.BlockSpec((2 * HP, CP), lambda i: (0, 0)),                # out linear W
            pl.BlockSpec((1, CP), lambda i: (0, 0)),                     # out linear b
        ],
        out_specs=pl.BlockSpec((BP, CP), lambda i: (0, 0)),
        scratch_shapes=[
            pltpu.VMEM((SEQ_LEN * BP, 8 * HP), jnp.float32),   # gx (input projection)
            pltpu.VMEM((BP, 2 * HP), jnp.float32),             # final h state
            pltpu.VMEM((BP, 2 * HP), jnp.float32),             # quirky attention hidden
        ],
        compiler_params=pltpu.CompilerParams(dimension_semantics=("arbitrary",)),
    )(x_p, wih, whh, bias, w_out_p, b_out_p)


# ------------------------------ parameter setup -------------------------------
def init_params(key):
    H, E, C = N_HIDDEN, EMBED_LEN, NUM_CLASSES
    ks = jax.random.split(key, 11)
    lim = 1.0 / np.sqrt(H)
    lim_o = 1.0 / np.sqrt(2 * H)
    u = lambda k, shape, l: jax.random.uniform(k, shape, jnp.float32, -l, l)
    return dict(
        emb=jax.random.normal(ks[0], (VOCAB, E), jnp.float32),
        w_ih_f=u(ks[1], (4 * H, E), lim), w_hh_f=u(ks[2], (4 * H, H), lim),
        b_ih_f=u(ks[3], (4 * H,), lim), b_hh_f=u(ks[4], (4 * H,), lim),
        w_ih_b=u(ks[5], (4 * H, E), lim), w_hh_b=u(ks[6], (4 * H, H), lim),
        b_ih_b=u(ks[7], (4 * H,), lim), b_hh_b=u(ks[8], (4 * H,), lim),
        w_out=u(ks[9], (C, 2 * H), lim_o), b_out=u(ks[10], (C,), lim_o),
    )


def pack_params(params):
    """One-time host-side (numpy) packing of torch-layout weights into the padded
    kernel layout.  Done once, NOT per forward call."""
    H, E, C = N_HIDDEN, EMBED_LEN, NUM_CLASSES
    wih = np.zeros((E, 8 * HP), np.float32)         # [fwd i|f|g|o | bwd i|f|g|o]
    whh = np.zeros((2 * HP, 8 * HP), np.float32)    # block-diagonal, rows [fwd h | bwd h]
    bias = np.zeros((1, 8 * HP), np.float32)
    dirs = [
        (params['w_ih_f'], params['w_hh_f'], params['b_ih_f'], params['b_hh_f']),
        (params['w_ih_b'], params['w_hh_b'], params['b_ih_b'], params['b_hh_b']),
    ]
    for d, (w_ih, w_hh, b_ih, b_hh) in enumerate(dirs):
        w_ih = np.asarray(w_ih)
        w_hh = np.asarray(w_hh)
        b = np.asarray(b_ih) + np.asarray(b_hh)
        c0, r0 = d * 4 * HP, d * HP
        for g in range(4):                           # torch gate order i, f, g, o
            wih[:, c0 + g * HP:c0 + g * HP + H] = w_ih[g * H:(g + 1) * H, :].T
            whh[r0:r0 + H, c0 + g * HP:c0 + g * HP + H] = w_hh[g * H:(g + 1) * H, :].T
            bias[0, c0 + g * HP:c0 + g * HP + H] = b[g * H:(g + 1) * H]
    w_out_p = np.zeros((2 * HP, CP), np.float32)
    wo = np.asarray(params['w_out'])
    w_out_p[:H, :C] = wo[:, :H].T
    w_out_p[HP:HP + H, :C] = wo[:, H:].T
    b_out_p = np.zeros((1, CP), np.float32)
    b_out_p[0, :C] = np.asarray(params['b_out'])
    return dict(emb=params['emb'],
                wih=jnp.asarray(wih), whh=jnp.asarray(whh), bias=jnp.asarray(bias),
                w_out=jnp.asarray(w_out_p), b_out=jnp.asarray(b_out_p))


# ------------------------------- forward pass ---------------------------------
@jax.jit
def model_forward(packed, x_tokens):
    # Embedding gather + time-major layout + batch padding stay as plain-JAX glue.
    emb = packed['emb'][x_tokens].astype(jnp.float32)            # (B, S, E)
    x_tm = jnp.transpose(emb, (1, 0, 2))                         # (S, B, E)
    x_p = jnp.zeros((SEQ_LEN, BP, EMBED_LEN), jnp.float32).at[:, :BATCH, :].set(x_tm)
    x_p = x_p.reshape(SEQ_LEN * BP, EMBED_LEN)                   # (S*BP, E)
    logits_p = fused_forward_pallas(x_p, packed['wih'], packed['whh'], packed['bias'],
                                    packed['w_out'], packed['b_out'])
    return logits_p[:BATCH, :NUM_CLASSES]


# --------------------------- pure-JAX reference -------------------------------
def reference_forward(params, x_tokens):
    H = N_HIDDEN
    B, S = x_tokens.shape
    emb = params['emb'][x_tokens]
    x_tm = jnp.transpose(emb, (1, 0, 2))

    def run_dir(xs, w_ih, w_hh, b_ih, b_hh):
        def step(carry, x_t):
            h, c = carry
            gates = x_t @ w_ih.T + h @ w_hh.T + b_ih + b_hh
            i, f, g, o = jnp.split(gates, 4, axis=-1)
            c = jax.nn.sigmoid(f) * c + jax.nn.sigmoid(i) * jnp.tanh(g)
            h = jax.nn.sigmoid(o) * jnp.tanh(c)
            return (h, c), h
        init = (jnp.zeros((B, H)), jnp.zeros((B, H)))
        (h_last, _), hs = jax.lax.scan(step, init, xs)
        return hs, h_last

    hs_f, hf = run_dir(x_tm, params['w_ih_f'], params['w_hh_f'],
                       params['b_ih_f'], params['b_hh_f'])
    hs_b_rev, hb = run_dir(x_tm[::-1], params['w_ih_b'], params['w_hh_b'],
                           params['b_ih_b'], params['b_hh_b'])
    hs_b = hs_b_rev[::-1]
    output = jnp.transpose(jnp.concatenate([hs_f, hs_b], axis=-1), (1, 0, 2))  # (B,S,2H)
    final_hidden = jnp.stack([hf, hb], axis=0)                                 # (2,B,H)
    hidden = final_hidden.reshape(-1, 2 * H, 1)                                # (B,2H,1)
    attn = jnp.matmul(output, hidden)[..., 0]                                  # (B,S)
    soft = jax.nn.softmax(attn, axis=1)
    context = jnp.matmul(jnp.transpose(output, (0, 2, 1)), soft[..., None])[..., 0]
    return context @ params['w_out'].T + params['b_out']


if __name__ == "__main__":
    key = jax.random.PRNGKey(0)
    kp, kx = jax.random.split(key)
    params = init_params(kp)
    packed = pack_params(params)                          # packed once, host-side
    x = jax.random.randint(kx, (BATCH, SEQ_LEN), 0, VOCAB, dtype=jnp.int32)

    out = jax.block_until_ready(model_forward(packed, x))
    ref = jax.block_until_ready(reference_forward(params, x))

    assert out.shape == (BATCH, NUM_CLASSES)
    np.testing.assert_allclose(np.asarray(out), np.asarray(ref), rtol=5e-2, atol=5e-2)
    print("KERNEL_OK")
</pallas_src>

<mosaic_0001>
module attributes {stable_mosaic.version = 11 : i64} {
  func.func @_fused_kernel(%arg0: i32, %arg1: memref<64x32xf32, #tpu.memory_space<vmem>>, %arg2: memref<32x1024xf32, #tpu.memory_space<vmem>>, %arg3: memref<256x1024xf32, #tpu.memory_space<vmem>>, %arg4: memref<1x1024xf32, #tpu.memory_space<vmem>>, %arg5: memref<256x128xf32, #tpu.memory_space<vmem>>, %arg6: memref<1x128xf32, #tpu.memory_space<vmem>>, %arg7: memref<8x128xf32, #tpu.memory_space<vmem>>, %arg8: memref<64x1024xf32, #tpu.memory_space<vmem>>, %arg9: memref<8x256xf32, #tpu.memory_space<vmem>>, %arg10: memref<8x256xf32, #tpu.memory_space<vmem>>) attributes {dimension_semantics = [#tpu.dimension_semantics<arbitrary>], iteration_bounds = array<i64: 1>, scalar_prefetch = 0 : i64, scratch_operands = 3 : i64, tpu.core_type = #tpu.core_type<tc>, window_params = [{pipeline_mode = #tpu.pipeline_mode<synchronous>, transform_indices = @transform_0, window_bounds = array<i64: 64, 32>}, {pipeline_mode = #tpu.pipeline_mode<synchronous>, transform_indices = @transform_1, window_bounds = array<i64: 32, 1024>}, {pipeline_mode = #tpu.pipeline_mode<synchronous>, transform_indices = @transform_2, window_bounds = array<i64: 256, 1024>}, {pipeline_mode = #tpu.pipeline_mode<synchronous>, transform_indices = @transform_3, window_bounds = array<i64: 1, 1024>}, {pipeline_mode = #tpu.pipeline_mode<synchronous>, transform_indices = @transform_4, window_bounds = array<i64: 256, 128>}, {pipeline_mode = #tpu.pipeline_mode<synchronous>, transform_indices = @transform_5, window_bounds = array<i64: 1, 128>}, {pipeline_mode = #tpu.pipeline_mode<synchronous>, transform_indices = @transform_6, window_bounds = array<i64: 8, 128>}]} {
    %c0 = arith.constant 0 : index
    %c0_0 = arith.constant 0 : index
    %0 = vector.load %arg1[%c0, %c0_0] : memref<64x32xf32, #tpu.memory_space<vmem>>, vector<64x32xf32>
    %c0_1 = arith.constant 0 : index
    %c0_2 = arith.constant 0 : index
    %1 = vector.load %arg2[%c0_1, %c0_2] : memref<32x1024xf32, #tpu.memory_space<vmem>>, vector<32x1024xf32>
    %cst = arith.constant dense<0.000000e+00> : vector<64x1024xf32>
    %2 = tpu.matmul %0, %1, %cst {dimension_numbers = #tpu.dot_dimension_numbers<[1], [0], [0], [1], [0, 0, 1, 1], [], []>} : vector<64x32xf32>, vector<32x1024xf32>, vector<64x1024xf32> -> vector<64x1024xf32>
    %c0_3 = arith.constant 0 : index
    %c0_4 = arith.constant 0 : index
    %3 = vector.load %arg4[%c0_3, %c0_4] : memref<1x1024xf32, #tpu.memory_space<vmem>>, vector<1x1024xf32>
    %4 = vector.broadcast %3 : vector<1x1024xf32> to vector<64x1024xf32>
    %5 = arith.addf %2, %4 : vector<64x1024xf32>
    %c0_5 = arith.constant 0 : index
    %c0_6 = arith.constant 0 : index
    %6 = vector.load %arg8[%c0_5, %c0_6] : memref<64x1024xf32, #tpu.memory_space<vmem>>, vector<64x1024xf32>
    tpu.vector_store %arg8[%c0_5, %c0_6], %5 {strides = array<i32>} : memref<64x1024xf32, #tpu.memory_space<vmem>>, vector<64x1024xf32>,
    %cst_7 = arith.constant 0.000000e+00 : f32
    %7 = vector.broadcast %cst_7 : f32 to vector<8x256xf32>
    %cst_8 = arith.constant 0.000000e+00 : f32
    %8 = vector.broadcast %cst_8 : f32 to vector<8x256xf32>
    %c0_9 = arith.constant 0 : index
    %c0_10 = arith.constant 0 : index
    %9 = vector.load %arg3[%c0_9, %c0_10] : memref<256x1024xf32, #tpu.memory_space<vmem>>, vector<256x1024xf32>
    %cst_11 = arith.constant dense<0.000000e+00> : vector<8x1024xf32>
    %10 = tpu.matmul %7, %9, %cst_11 {dimension_numbers = #tpu.dot_dimension_numbers<[1], [0], [0], [1], [0, 0, 1, 1], [], []>} : vector<8x256xf32>, vector<256x1024xf32>, vector<8x1024xf32> -> vector<8x1024xf32>
    %c0_12 = arith.constant 0 : index
    %c0_13 = arith.constant 0 : index
    %11 = vector.load %arg8[%c0_12, %c0_13] : memref<64x1024xf32, #tpu.memory_space<vmem>>, vector<8x512xf32>
    %c56 = arith.constant 56 : index
    %c512 = arith.constant 512 : index
    %12 = vector.load %arg8[%c56, %c512] : memref<64x1024xf32, #tpu.memory_space<vmem>>, vector<8x512xf32>
    %13 = tpu.concatenate %11, %12 in 1 : vector<8x512xf32>, vector<8x512xf32> -> vector<8x1024xf32>
    %14 = arith.addf %13, %10 : vector<8x1024xf32>
    %15 = vector.extract_strided_slice %14 {offsets = [0, 0], sizes = [8, 128], strides = [1, 1]} : vector<8x1024xf32> to vector<8x128xf32>
    %16 = vector.extract_strided_slice %14 {offsets = [0, 512], sizes = [8, 128], strides = [1, 1]} : vector<8x1024xf32> to vector<8x128xf32>
    %17 = tpu.concatenate %15, %16 in 1 : vector<8x128xf32>, vector<8x128xf32> -> vector<8x256xf32>
    %18 = arith.negf %17 : vector<8x256xf32>
    %19 = math.exp %18 : vector<8x256xf32>
    %cst_14 = arith.constant 1.000000e+00 : f32
    %20 = vector.broadcast %cst_14 : f32 to vector<8x256xf32>
    %21 = arith.addf %20, %19 : vector<8x256xf32>
    %22 = arith.divf %20, %21 : vector<8x256xf32>
    %23 = vector.extract_strided_slice %14 {offsets = [0, 128], sizes = [8, 128], strides = [1, 1]} : vector<8x1024xf32> to vector<8x128xf32>
    %24 = vector.extract_strided_slice %14 {offsets = [0, 640], sizes = [8, 128], strides = [1, 1]} : vector<8x1024xf32> to vector<8x128xf32>
    %25 = tpu.concatenate %23, %24 in 1 : vector<8x128xf32>, vector<8x128xf32> -> vector<8x256xf32>
    %26 = arith.negf %25 : vector<8x256xf32>
    %27 = math.exp %26 : vector<8x256xf32>
    %cst_15 = arith.constant 1.000000e+00 : f32
    %28 = vector.broadcast %cst_15 : f32 to vector<8x256xf32>
    %29 = arith.addf %28, %27 : vector<8x256xf32>
    %30 = arith.divf %28, %29 : vector<8x256xf32>
    %31 = vector.extract_strided_slice %14 {offsets = [0, 256], sizes = [8, 128], strides = [1, 1]} : vector<8x1024xf32> to vector<8x128xf32>
    %32 = vector.extract_strided_slice %14 {offsets = [0, 768], sizes = [8, 128], strides = [1, 1]} : vector<8x1024xf32> to vector<8x128xf32>
    %33 = tpu.concatenate %31, %32 in 1 : vector<8x128xf32>, vector<8x128xf32> -> vector<8x256xf32>
    %34 = math.tanh %33 : vector<8x256xf32>
    %35 = vector.extract_strided_slice %14 {offsets = [0, 384], sizes = [8, 128], strides = [1, 1]} : vector<8x1024xf32> to vector<8x128xf32>
    %36 = vector.extract_strided_slice %14 {offsets = [0, 896], sizes = [8, 128], strides = [1, 1]} : vector<8x1024xf32> to vector<8x128xf32>
    %37 = tpu.concatenate %35, %36 in 1 : vector<8x128xf32>, vector<8x128xf32> -> vector<8x256xf32>
    %38 = arith.negf %37 : vector<8x256xf32>
    %39 = math.exp %38 : vector<8x256xf32>
    %cst_16 = arith.constant 1.000000e+00 : f32
    %40 = vector.broadcast %cst_16 : f32 to vector<8x256xf32>
    %41 = arith.addf %40, %39 : vector<8x256xf32>
    %42 = arith.divf %40, %41 : vector<8x256xf32>
    %43 = arith.mulf %30, %8 : vector<8x256xf32>
    %44 = arith.mulf %22, %34 : vector<8x256xf32>
    %45 = arith.addf %43, %44 : vector<8x256xf32>
    %46 = math.tanh %45 : vector<8x256xf32>
    %47 = arith.mulf %42, %46 : vector<8x256xf32>
    %48 = vector.extract_strided_slice %47 {offsets = [0, 0], sizes = [8, 128], strides = [1, 1]} : vector<8x256xf32> to vector<8x128xf32>
    %49 = vector.extract_strided_slice %47 {offsets = [0, 128], sizes = [8, 128], strides = [1, 1]} : vector<8x256xf32> to vector<8x128xf32>
    %c0_17 = arith.constant 0 : index
    %c0_18 = arith.constant 0 : index
    %50 = vector.load %arg3[%c0_17, %c0_18] : memref<256x1024xf32, #tpu.memory_space<vmem>>, vector<256x1024xf32>
    %cst_19 = arith.constant dense<0.000000e+00> : vector<8x1024xf32>
    %51 = tpu.matmul %47, %50, %cst_19 {dimension_numbers = #tpu.dot_dimension_numbers<[1], [0], [0], [1], [0, 0, 1, 1], [], []>} : vector<8x256xf32>, vector<256x1024xf32>, vector<8x1024xf32> -> vector<8x1024xf32>
    %c8 = arith.constant 8 : index
    %c0_20 = arith.constant 0 : index
    %52 = vector.load %arg8[%c8, %c0_20] : memref<64x1024xf32, #tpu.memory_space<vmem>>, vector<8x512xf32>
    %c48 = arith.constant 48 : index
    %c512_21 = arith.constant 512 : index
    %53 = vector.load %arg8[%c48, %c512_21] : memref<64x1024xf32, #tpu.memory_space<vmem>>, vector<8x512xf32>
    %54 = tpu.concatenate %52, %53 in 1 : vector<8x512xf32>, vector<8x512xf32> -> vector<8x1024xf32>
    %55 = arith.addf %54, %51 : vector<8x1024xf32>
    %56 = vector.extract_strided_slice %55 {offsets = [0, 0], sizes = [8, 128], strides = [1, 1]} : vector<8x1024xf32> to vector<8x128xf32>
    %57 = vector.extract_strided_slice %55 {offsets = [0, 512], sizes = [8, 128], strides = [1, 1]} : vector<8x1024xf32> to vector<8x128xf32>
    %58 = tpu.concatenate %56, %57 in 1 : vector<8x128xf32>, vector<8x128xf32> -> vector<8x256xf32>
    %59 = arith.negf %58 : vector<8x256xf32>
    %60 = math.exp %59 : vector<8x256xf32>
    %cst_22 = arith.constant 1.000000e+00 : f32
    %61 = vector.broadcast %cst_22 : f32 to vector<8x256xf32>
    %62 = arith.addf %61, %60 : vector<8x256xf32>
    %63 = arith.divf %61, %62 : vector<8x256xf32>
    %64 = vector.extract_strided_slice %55 {offsets = [0, 128], sizes = [8, 128], strides = [1, 1]} : vector<8x1024xf32> to vector<8x128xf32>
    %65 = vector.extract_strided_slice %55 {offsets = [0, 640], sizes = [8, 128], strides = [1, 1]} : vector<8x1024xf32> to vector<8x128xf32>
    %66 = tpu.concatenate %64, %65 in 1 : vector<8x128xf32>, vector<8x128xf32> -> vector<8x256xf32>
    %67 = arith.negf %66 : vector<8x256xf32>
    %68 = math.exp %67 : vector<8x256xf32>
    %cst_23 = arith.constant 1.000000e+00 : f32
    %69 = vector.broadcast %cst_23 : f32 to vector<8x256xf32>
    %70 = arith.addf %69, %68 : vector<8x256xf32>
    %71 = arith.divf %69, %70 : vector<8x256xf32>
    %72 = vector.extract_strided_slice %55 {offsets = [0, 256], sizes = [8, 128], strides = [1, 1]} : vector<8x1024xf32> to vector<8x128xf32>
    %73 = vector.extract_strided_slice %55 {offsets = [0, 768], sizes = [8, 128], strides = [1, 1]} : vector<8x1024xf32> to vector<8x128xf32>
    %74 = tpu.concatenate %72, %73 in 1 : vector<8x128xf32>, vector<8x128xf32> -> vector<8x256xf32>
    %75 = math.tanh %74 : vector<8x256xf32>
    %76 = vector.extract_strided_slice %55 {offsets = [0, 384], sizes = [8, 128], strides = [1, 1]} : vector<8x1024xf32> to vector<8x128xf32>
    %77 = vector.extract_strided_slice %55 {offsets = [0, 896], sizes = [8, 128], strides = [1, 1]} : vector<8x1024xf32> to vector<8x128xf32>
    %78 = tpu.concatenate %76, %77 in 1 : vector<8x128xf32>, vector<8x128xf32> -> vector<8x256xf32>
    %79 = arith.negf %78 : vector<8x256xf32>
    %80 = math.exp %79 : vector<8x256xf32>
    %cst_24 = arith.constant 1.000000e+00 : f32
    %81 = vector.broadcast %cst_24 : f32 to vector<8x256xf32>
    %82 = arith.addf %81, %80 : vector<8x256xf32>
    %83 = arith.divf %81, %82 : vector<8x256xf32>
    %84 = arith.mulf %71, %45 : vector<8x256xf32>
    %85 = arith.mulf %63, %75 : vector<8x256xf32>
    %86 = arith.addf %84, %85 : vector<8x256xf32>
    %87 = math.tanh %86 : vector<8x256xf32>
    %88 = arith.mulf %83, %87 : vector<8x256xf32>
    %89 = vector.extract_strided_slice %88 {offsets = [0, 0], sizes = [8, 128], strides = [1, 1]} : vector<8x256xf32> to vector<8x128xf32>
    %90 = vector.extract_strided_slice %88 {offsets = [0, 128], sizes = [8, 128], strides = [1, 1]} : vector<8x256xf32> to vector<8x128xf32>
    %c0_25 = arith.constant 0 : index
    %c0_26 = arith.constant 0 : index
    %91 = vector.load %arg3[%c0_25, %c0_26] : memref<256x1024xf32, #tpu.memory_space<vmem>>, vector<256x1024xf32>
    %cst_27 = arith.constant dense<0.000000e+00> : vector<8x1024xf32>
    %92 = tpu.matmul %88, %91, %cst_27 {dimension_numbers = #tpu.dot_dimension_numbers<[1], [0], [0], [1], [0, 0, 1, 1], [], []>} : vector<8x256xf32>, vector<256x1024xf32>, vector<8x1024xf32> -> vector<8x1024xf32>
    %c16 = arith.constant 16 : index
    %c0_28 = arith.constant 0 : index
    %93 = vector.load %arg8[%c16, %c0_28] : memref<64x1024xf32, #tpu.memory_space<vmem>>, vector<8x512xf32>
    %c40 = arith.constant 40 : index
    %c512_29 = arith.constant 512 : index
    %94 = vector.load %arg8[%c40, %c512_29] : memref<64x1024xf32, #tpu.memory_space<vmem>>, vector<8x512xf32>
    %95 = tpu.concatenate %93, %94 in 1 : vector<8x512xf32>, vector<8x512xf32> -> vector<8x1024xf32>
    %96 = arith.addf %95, %92 : vector<8x1024xf32>
    %97 = vector.extract_strided_slice %96 {offsets = [0, 0], sizes = [8, 128], strides = [1, 1]} : vector<8x1024xf32> to vector<8x128xf32>
    %98 = vector.extract_strided_slice %96 {offsets = [0, 512], sizes = [8, 128], strides = [1, 1]} : vector<8x1024xf32> to vector<8x128xf32>
    %99 = tpu.concatenate %97, %98 in 1 : vector<8x128xf32>, vector<8x128xf32> -> vector<8x256xf32>
    %100 = arith.negf %99 : vector<8x256xf32>
    %101 = math.exp %100 : vector<8x256xf32>
    %cst_30 = arith.constant 1.000000e+00 : f32
    %102 = vector.broadcast %cst_30 : f32 to vector<8x256xf32>
    %103 = arith.addf %102, %101 : vector<8x256xf32>
    %104 = arith.divf %102, %103 : vector<8x256xf32>
    %105 = vector.extract_strided_slice %96 {offsets = [0, 128], sizes = [8, 128], strides = [1, 1]} : vector<8x1024xf32> to vector<8x128xf32>
    %106 = vector.extract_strided_slice %96 {offsets = [0, 640], sizes = [8, 128], strides = [1, 1]} : vector<8x1024xf32> to vector<8x128xf32>
    %107 = tpu.concatenate %105, %106 in 1 : vector<8x128xf32>, vector<8x128xf32> -> vector<8x256xf32>
    %108 = arith.negf %107 : vector<8x256xf32>
    %109 = math.exp %108 : vector<8x256xf32>
    %cst_31 = arith.constant 1.000000e+00 : f32
    %110 = vector.broadcast %cst_31 : f32 to vector<8x256xf32>
    %111 = arith.addf %110, %109 : vector<8x256xf32>
    %112 = arith.divf %110, %111 : vector<8x256xf32>
    %113 = vector.extract_strided_slice %96 {offsets = [0, 256], sizes = [8, 128], strides = [1, 1]} : vector<8x1024xf32> to vector<8x128xf32>
    %114 = vector.extract_strided_slice %96 {offsets = [0, 768], sizes = [8, 128], strides = [1, 1]} : vector<8x1024xf32> to vector<8x128xf32>
    %115 = tpu.concatenate %113, %114 in 1 : vector<8x128xf32>, vector<8x128xf32> -> vector<8x256xf32>
    %116 = math.tanh %115 : vector<8x256xf32>
    %117 = vector.extract_strided_slice %96 {offsets = [0, 384], sizes = [8, 128], strides = [1, 1]} : vector<8x1024xf32> to vector<8x128xf32>
    %118 = vector.extract_strided_slice %96 {offsets = [0, 896], sizes = [8, 128], strides = [1, 1]} : vector<8x1024xf32> to vector<8x128xf32>
    %119 = tpu.concatenate %117, %118 in 1 : vector<8x128xf32>, vector<8x128xf32> -> vector<8x256xf32>
    %120 = arith.negf %119 : vector<8x256xf32>
    %121 = math.exp %120 : vector<8x256xf32>
    %cst_32 = arith.constant 1.000000e+00 : f32
    %122 = vector.broadcast %cst_32 : f32 to vector<8x256xf32>
    %123 = arith.addf %122, %121 : vector<8x256xf32>
    %124 = arith.divf %122, %123 : vector<8x256xf32>
    %125 = arith.mulf %112, %86 : vector<8x256xf32>
    %126 = arith.mulf %104, %116 : vector<8x256xf32>
    %127 = arith.addf %125, %126 : vector<8x256xf32>
    %128 = math.tanh %127 : vector<8x256xf32>
    %129 = arith.mulf %124, %128 : vector<8x256xf32>
    %130 = vector.extract_strided_slice %129 {offsets = [0, 0], sizes = [8, 128], strides = [1, 1]} : vector<8x256xf32> to vector<8x128xf32>
    %131 = vector.extract_strided_slice %129 {offsets = [0, 128], sizes = [8, 128], strides = [1, 1]} : vector<8x256xf32> to vector<8x128xf32>
    %c0_33 = arith.constant 0 : index
    %c0_34 = arith.constant 0 : index
    %132 = vector.load %arg3[%c0_33, %c0_34] : memref<256x1024xf32, #tpu.memory_space<vmem>>, vector<256x1024xf32>
    %cst_35 = arith.constant dense<0.000000e+00> : vector<8x1024xf32>
    %133 = tpu.matmul %129, %132, %cst_35 {dimension_numbers = #tpu.dot_dimension_numbers<[1], [0], [0], [1], [0, 0, 1, 1], [], []>} : vector<8x256xf32>, vector<256x1024xf32>, vector<8x1024xf32> -> vector<8x1024xf32>
    %c24 = arith.constant 24 : index
    %c0_36 = arith.constant 0 : index
    %134 = vector.load %arg8[%c24, %c0_36] : memref<64x1024xf32, #tpu.memory_space<vmem>>, vector<8x512xf32>
    %c32 = arith.constant 32 : index
    %c512_37 = arith.constant 512 : index
    %135 = vector.load %arg8[%c32, %c512_37] : memref<64x1024xf32, #tpu.memory_space<vmem>>, vector<8x512xf32>
    %136 = tpu.concatenate %134, %135 in 1 : vector<8x512xf32>, vector<8x512xf32> -> vector<8x1024xf32>
    %137 = arith.addf %136, %133 : vector<8x1024xf32>
    %138 = vector.extract_strided_slice %137 {offsets = [0, 0], sizes = [8, 128], strides = [1, 1]} : vector<8x1024xf32> to vector<8x128xf32>
    %139 = vector.extract_strided_slice %137 {offsets = [0, 512], sizes = [8, 128], strides = [1, 1]} : vector<8x1024xf32> to vector<8x128xf32>
    %140 = tpu.concatenate %138, %139 in 1 : vector<8x128xf32>, vector<8x128xf32> -> vector<8x256xf32>
    %141 = arith.negf %140 : vector<8x256xf32>
    %142 = math.exp %141 : vector<8x256xf32>
    %cst_38 = arith.constant 1.000000e+00 : f32
    %143 = vector.broadcast %cst_38 : f32 to vector<8x256xf32>
    %144 = arith.addf %143, %142 : vector<8x256xf32>
    %145 = arith.divf %143, %144 : vector<8x256xf32>
    %146 = vector.extract_strided_slice %137 {offsets = [0, 128], sizes = [8, 128], strides = [1, 1]} : vector<8x1024xf32> to vector<8x128xf32>
    %147 = vector.extract_strided_slice %137 {offsets = [0, 640], sizes = [8, 128], strides = [1, 1]} : vector<8x1024xf32> to vector<8x128xf32>
    %148 = tpu.concatenate %146, %147 in 1 : vector<8x128xf32>, vector<8x128xf32> -> vector<8x256xf32>
    %149 = arith.negf %148 : vector<8x256xf32>
    %150 = math.exp %149 : vector<8x256xf32>
    %cst_39 = arith.constant 1.000000e+00 : f32
    %151 = vector.broadcast %cst_39 : f32 to vector<8x256xf32>
    %152 = arith.addf %151, %150 : vector<8x256xf32>
    %153 = arith.divf %151, %152 : vector<8x256xf32>
    %154 = vector.extract_strided_slice %137 {offsets = [0, 256], sizes = [8, 128], strides = [1, 1]} : vector<8x1024xf32> to vector<8x128xf32>
    %155 = vector.extract_strided_slice %137 {offsets = [0, 768], sizes = [8, 128], strides = [1, 1]} : vector<8x1024xf32> to vector<8x128xf32>
    %156 = tpu.concatenate %154, %155 in 1 : vector<8x128xf32>, vector<8x128xf32> -> vector<8x256xf32>
    %157 = math.tanh %156 : vector<8x256xf32>
    %158 = vector.extract_strided_slice %137 {offsets = [0, 384], sizes = [8, 128], strides = [1, 1]} : vector<8x1024xf32> to vector<8x128xf32>
    %159 = vector.extract_strided_slice %137 {offsets = [0, 896], sizes = [8, 128], strides = [1, 1]} : vector<8x1024xf32> to vector<8x128xf32>
    %160 = tpu.concatenate %158, %159 in 1 : vector<8x128xf32>, vector<8x128xf32> -> vector<8x256xf32>
    %161 = arith.negf %160 : vector<8x256xf32>
    %162 = math.exp %161 : vector<8x256xf32>
    %cst_40 = arith.constant 1.000000e+00 : f32
    %163 = vector.broadcast %cst_40 : f32 to vector<8x256xf32>
    %164 = arith.addf %163, %162 : vector<8x256xf32>
    %165 = arith.divf %163, %164 : vector<8x256xf32>
    %166 = arith.mulf %153, %127 : vector<8x256xf32>
    %167 = arith.mulf %145, %157 : vector<8x256xf32>
    %168 = arith.addf %166, %167 : vector<8x256xf32>
    %169 = math.tanh %168 : vector<8x256xf32>
    %170 = arith.mulf %165, %169 : vector<8x256xf32>
    %171 = vector.extract_strided_slice %170 {offsets = [0, 0], sizes = [8, 128], strides = [1, 1]} : vector<8x256xf32> to vector<8x128xf32>
    %172 = vector.extract_strided_slice %170 {offsets = [0, 128], sizes = [8, 128], strides = [1, 1]} : vector<8x256xf32> to vector<8x128xf32>
    %c0_41 = arith.constant 0 : index
    %c0_42 = arith.constant 0 : index
    %173 = vector.load %arg3[%c0_41, %c0_42] : memref<256x1024xf32, #tpu.memory_space<vmem>>, vector<256x1024xf32>
    %cst_43 = arith.constant dense<0.000000e+00> : vector<8x1024xf32>
    %174 = tpu.matmul %170, %173, %cst_43 {dimension_numbers = #tpu.dot_dimension_numbers<[1], [0], [0], [1], [0, 0, 1, 1], [], []>} : vector<8x256xf32>, vector<256x1024xf32>, vector<8x1024xf32> -> vector<8x1024xf32>
    %c32_44 = arith.constant 32 : index
    %c0_45 = arith.constant 0 : index
    %175 = vector.load %arg8[%c32_44, %c0_45] : memref<64x1024xf32, #tpu.memory_space<vmem>>, vector<8x512xf32>
    %c24_46 = arith.constant 24 : index
    %c512_47 = arith.constant 512 : index
    %176 = vector.load %arg8[%c24_46, %c512_47] : memref<64x1024xf32, #tpu.memory_space<vmem>>, vector<8x512xf32>
    %177 = tpu.concatenate %175, %176 in 1 : vector<8x512xf32>, vector<8x512xf32> -> vector<8x1024xf32>
    %178 = arith.addf %177, %174 : vector<8x1024xf32>
    %179 = vector.extract_strided_slice %178 {offsets = [0, 0], sizes = [8, 128], strides = [1, 1]} : vector<8x1024xf32> to vector<8x128xf32>
    %180 = vector.extract_strided_slice %178 {offsets = [0, 512], sizes = [8, 128], strides = [1, 1]} : vector<8x1024xf32> to vector<8x128xf32>
    %181 = tpu.concatenate %179, %180 in 1 : vector<8x128xf32>, vector<8x128xf32> -> vector<8x256xf32>
    %182 = arith.negf %181 : vector<8x256xf32>
    %183 = math.exp %182 : vector<8x256xf32>
    %cst_48 = arith.constant 1.000000e+00 : f32
    %184 = vector.broadcast %cst_48 : f32 to vector<8x256xf32>
    %185 = arith.addf %184, %183 : vector<8x256xf32>
    %186 = arith.divf %184, %185 : vector<8x256xf32>
    %187 = vector.extract_strided_slice %178 {offsets = [0, 128], sizes = [8, 128], strides = [1, 1]} : vector<8x1024xf32> to vector<8x128xf32>
    %188 = vector.extract_strided_slice %178 {offsets = [0, 640], sizes = [8, 128], strides = [1, 1]} : vector<8x1024xf32> to vector<8x128xf32>
    %189 = tpu.concatenate %187, %188 in 1 : vector<8x128xf32>, vector<8x128xf32> -> vector<8x256xf32>
    %190 = arith.negf %189 : vector<8x256xf32>
    %191 = math.exp %190 : vector<8x256xf32>
    %cst_49 = arith.constant 1.000000e+00 : f32
    %192 = vector.broadcast %cst_49 : f32 to vector<8x256xf32>
    %193 = arith.addf %192, %191 : vector<8x256xf32>
    %194 = arith.divf %192, %193 : vector<8x256xf32>
    %195 = vector.extract_strided_slice %178 {offsets = [0, 256], sizes = [8, 128], strides = [1, 1]} : vector<8x1024xf32> to vector<8x128xf32>
    %196 = vector.extract_strided_slice %178 {offsets = [0, 768], sizes = [8, 128], strides = [1, 1]} : vector<8x1024xf32> to vector<8x128xf32>
    %197 = tpu.concatenate %195, %196 in 1 : vector<8x128xf32>, vector<8x128xf32> -> vector<8x256xf32>
    %198 = math.tanh %197 : vector<8x256xf32>
    %199 = vector.extract_strided_slice %178 {offsets = [0, 384], sizes = [8, 128], strides = [1, 1]} : vector<8x1024xf32> to vector<8x128xf32>
    %200 = vector.extract_strided_slice %178 {offsets = [0, 896], sizes = [8, 128], strides = [1, 1]} : vector<8x1024xf32> to vector<8x128xf32>
    %201 = tpu.concatenate %199, %200 in 1 : vector<8x128xf32>, vector<8x128xf32> -> vector<8x256xf32>
    %202 = arith.negf %201 : vector<8x256xf32>
    %203 = math.exp %202 : vector<8x256xf32>
    %cst_50 = arith.constant 1.000000e+00 : f32
    %204 = vector.broadcast %cst_50 : f32 to vector<8x256xf32>
    %205 = arith.addf %204, %203 : vector<8x256xf32>
    %206 = arith.divf %204, %205 : vector<8x256xf32>
    %207 = arith.mulf %194, %168 : vector<8x256xf32>
    %208 = arith.mulf %186, %198 : vector<8x256xf32>
    %209 = arith.addf %207, %208 : vector<8x256xf32>
    %210 = math.tanh %209 : vector<8x256xf32>
    %211 = arith.mulf %206, %210 : vector<8x256xf32>
    %212 = vector.extract_strided_slice %211 {offsets = [0, 0], sizes = [8, 128], strides = [1, 1]} : vector<8x256xf32> to vector<8x128xf32>
    %213 = vector.extract_strided_slice %211 {offsets = [0, 128], sizes = [8, 128], strides = [1, 1]} : vector<8x256xf32> to vector<8x128xf32>
    %c0_51 = arith.constant 0 : index
    %c0_52 = arith.constant 0 : index
    %214 = vector.load %arg3[%c0_51, %c0_52] : memref<256x1024xf32, #tpu.memory_space<vmem>>, vector<256x1024xf32>
    %cst_53 = arith.constant dense<0.000000e+00> : vector<8x1024xf32>
    %215 = tpu.matmul %211, %214, %cst_53 {dimension_numbers = #tpu.dot_dimension_numbers<[1], [0], [0], [1], [0, 0, 1, 1], [], []>} : vector<8x256xf32>, vector<256x1024xf32>, vector<8x1024xf32> -> vector<8x1024xf32>
    %c40_54 = arith.constant 40 : index
    %c0_55 = arith.constant 0 : index
    %216 = vector.load %arg8[%c40_54, %c0_55] : memref<64x1024xf32, #tpu.memory_space<vmem>>, vector<8x512xf32>
    %c16_56 = arith.constant 16 : index
    %c512_57 = arith.constant 512 : index
    %217 = vector.load %arg8[%c16_56, %c512_57] : memref<64x1024xf32, #tpu.memory_space<vmem>>, vector<8x512xf32>
    %218 = tpu.concatenate %216, %217 in 1 : vector<8x512xf32>, vector<8x512xf32> -> vector<8x1024xf32>
    %219 = arith.addf %218, %215 : vector<8x1024xf32>
    %220 = vector.extract_strided_slice %219 {offsets = [0, 0], sizes = [8, 128], strides = [1, 1]} : vector<8x1024xf32> to vector<8x128xf32>
    %221 = vector.extract_strided_slice %219 {offsets = [0, 512], sizes = [8, 128], strides = [1, 1]} : vector<8x1024xf32> to vector<8x128xf32>
    %222 = tpu.concatenate %220, %221 in 1 : vector<8x128xf32>, vector<8x128xf32> -> vector<8x256xf32>
    %223 = arith.negf %222 : vector<8x256xf32>
    %224 = math.exp %223 : vector<8x256xf32>
    %cst_58 = arith.constant 1.000000e+00 : f32
    %225 = vector.broadcast %cst_58 : f32 to vector<8x256xf32>
    %226 = arith.addf %225, %224 : vector<8x256xf32>
    %227 = arith.divf %225, %226 : vector<8x256xf32>
    %228 = vector.extract_strided_slice %219 {offsets = [0, 128], sizes = [8, 128], strides = [1, 1]} : vector<8x1024xf32> to vector<8x128xf32>
    %229 = vector.extract_strided_slice %219 {offsets = [0, 640], sizes = [8, 128], strides = [1, 1]} : vector<8x1024xf32> to vector<8x128xf32>
    %230 = tpu.concatenate %228, %229 in 1 : vector<8x128xf32>, vector<8x128xf32> -> vector<8x256xf32>
    %231 = arith.negf %230 : vector<8x256xf32>
    %232 = math.exp %231 : vector<8x256xf32>
    %cst_59 = arith.constant 1.000000e+00 : f32
    %233 = vector.broadcast %cst_59 : f32 to vector<8x256xf32>
    %234 = arith.addf %233, %232 : vector<8x256xf32>
    %235 = arith.divf %233, %234 : vector<8x256xf32>
    %236 = vector.extract_strided_slice %219 {offsets = [0, 256], sizes = [8, 128], strides = [1, 1]} : vector<8x1024xf32> to vector<8x128xf32>
    %237 = vector.extract_strided_slice %219 {offsets = [0, 768], sizes = [8, 128], strides = [1, 1]} : vector<8x1024xf32> to vector<8x128xf32>
    %238 = tpu.concatenate %236, %237 in 1 : vector<8x128xf32>, vector<8x128xf32> -> vector<8x256xf32>
    %239 = math.tanh %238 : vector<8x256xf32>
    %240 = vector.extract_strided_slice %219 {offsets = [0, 384], sizes = [8, 128], strides = [1, 1]} : vector<8x1024xf32> to vector<8x128xf32>
    %241 = vector.extract_strided_slice %219 {offsets = [0, 896], sizes = [8, 128], strides = [1, 1]} : vector<8x1024xf32> to vector<8x128xf32>
    %242 = tpu.concatenate %240, %241 in 1 : vector<8x128xf32>, vector<8x128xf32> -> vector<8x256xf32>
    %243 = arith.negf %242 : vector<8x256xf32>
    %244 = math.exp %243 : vector<8x256xf32>
    %cst_60 = arith.constant 1.000000e+00 : f32
    %245 = vector.broadcast %cst_60 : f32 to vector<8x256xf32>
    %246 = arith.addf %245, %244 : vector<8x256xf32>
    %247 = arith.divf %245, %246 : vector<8x256xf32>
    %248 = arith.mulf %235, %209 : vector<8x256xf32>
    %249 = arith.mulf %227, %239 : vector<8x256xf32>
    %250 = arith.addf %248, %249 : vector<8x256xf32>
    %251 = math.tanh %250 : vector<8x256xf32>
    %252 = arith.mulf %247, %251 : vector<8x256xf32>
    %253 = vector.extract_strided_slice %252 {offsets = [0, 0], sizes = [8, 128], strides = [1, 1]} : vector<8x256xf32> to vector<8x128xf32>
    %254 = vector.extract_strided_slice %252 {offsets = [0, 128], sizes = [8, 128], strides = [1, 1]} : vector<8x256xf32> to vector<8x128xf32>
    %c0_61 = arith.constant 0 : index
    %c0_62 = arith.constant 0 : index
    %255 = vector.load %arg3[%c0_61, %c0_62] : memref<256x1024xf32, #tpu.memory_space<vmem>>, vector<256x1024xf32>
    %cst_63 = arith.constant dense<0.000000e+00> : vector<8x1024xf32>
    %256 = tpu.matmul %252, %255, %cst_63 {dimension_numbers = #tpu.dot_dimension_numbers<[1], [0], [0], [1], [0, 0, 1, 1], [], []>} : vector<8x256xf32>, vector<256x1024xf32>, vector<8x1024xf32> -> vector<8x1024xf32>
    %c48_64 = arith.constant 48 : index
    %c0_65 = arith.constant 0 : index
    %257 = vector.load %arg8[%c48_64, %c0_65] : memref<64x1024xf32, #tpu.memory_space<vmem>>, vector<8x512xf32>
    %c8_66 = arith.constant 8 : index
    %c512_67 = arith.constant 512 : index
    %258 = vector.load %arg8[%c8_66, %c512_67] : memref<64x1024xf32, #tpu.memory_space<vmem>>, vector<8x512xf32>
    %259 = tpu.concatenate %257, %258 in 1 : vector<8x512xf32>, vector<8x512xf32> -> vector<8x1024xf32>
    %260 = arith.addf %259, %256 : vector<8x1024xf32>
    %261 = vector.extract_strided_slice %260 {offsets = [0, 0], sizes = [8, 128], strides = [1, 1]} : vector<8x1024xf32> to vector<8x128xf32>
    %262 = vector.extract_strided_slice %260 {offsets = [0, 512], sizes = [8, 128], strides = [1, 1]} : vector<8x1024xf32> to vector<8x128xf32>
    %263 = tpu.concatenate %261, %262 in 1 : vector<8x128xf32>, vector<8x128xf32> -> vector<8x256xf32>
    %264 = arith.negf %263 : vector<8x256xf32>
    %265 = math.exp %264 : vector<8x256xf32>
    %cst_68 = arith.constant 1.000000e+00 : f32
    %266 = vector.broadcast %cst_68 : f32 to vector<8x256xf32>
    %267 = arith.addf %266, %265 : vector<8x256xf32>
    %268 = arith.divf %266, %267 : vector<8x256xf32>
    %269 = vector.extract_strided_slice %260 {offsets = [0, 128], sizes = [8, 128], strides = [1, 1]} : vector<8x1024xf32> to vector<8x128xf32>
    %270 = vector.extract_strided_slice %260 {offsets = [0, 640], sizes = [8, 128], strides = [1, 1]} : vector<8x1024xf32> to vector<8x128xf32>
    %271 = tpu.concatenate %269, %270 in 1 : vector<8x128xf32>, vector<8x128xf32> -> vector<8x256xf32>
    %272 = arith.negf %271 : vector<8x256xf32>
    %273 = math.exp %272 : vector<8x256xf32>
    %cst_69 = arith.constant 1.000000e+00 : f32
    %274 = vector.broadcast %cst_69 : f32 to vector<8x256xf32>
    %275 = arith.addf %274, %273 : vector<8x256xf32>
    %276 = arith.divf %274, %275 : vector<8x256xf32>
    %277 = vector.extract_strided_slice %260 {offsets = [0, 256], sizes = [8, 128], strides = [1, 1]} : vector<8x1024xf32> to vector<8x128xf32>
    %278 = vector.extract_strided_slice %260 {offsets = [0, 768], sizes = [8, 128], strides = [1, 1]} : vector<8x1024xf32> to vector<8x128xf32>
    %279 = tpu.concatenate %277, %278 in 1 : vector<8x128xf32>, vector<8x128xf32> -> vector<8x256xf32>
    %280 = math.tanh %279 : vector<8x256xf32>
    %281 = vector.extract_strided_slice %260 {offsets = [0, 384], sizes = [8, 128], strides = [1, 1]} : vector<8x1024xf32> to vector<8x128xf32>
    %282 = vector.extract_strided_slice %260 {offsets = [0, 896], sizes = [8, 128], strides = [1, 1]} : vector<8x1024xf32> to vector<8x128xf32>
    %283 = tpu.concatenate %281, %282 in 1 : vector<8x128xf32>, vector<8x128xf32> -> vector<8x256xf32>
    %284 = arith.negf %283 : vector<8x256xf32>
    %285 = math.exp %284 : vector<8x256xf32>
    %cst_70 = arith.constant 1.000000e+00 : f32
    %286 = vector.broadcast %cst_70 : f32 to vector<8x256xf32>
    %287 = arith.addf %286, %285 : vector<8x256xf32>
    %288 = arith.divf %286, %287 : vector<8x256xf32>
    %289 = arith.mulf %276, %250 : vector<8x256xf32>
    %290 = arith.mulf %268, %280 : vector<8x256xf32>
    %291 = arith.addf %289, %290 : vector<8x256xf32>
    %292 = math.tanh %291 : vector<8x256xf32>
    %293 = arith.mulf %288, %292 : vector<8x256xf32>
    %294 = vector.extract_strided_slice %293 {offsets = [0, 0], sizes = [8, 128], strides = [1, 1]} : vector<8x256xf32> to vector<8x128xf32>
    %295 = vector.extract_strided_slice %293 {offsets = [0, 128], sizes = [8, 128], strides = [1, 1]} : vector<8x256xf32> to vector<8x128xf32>
    %c0_71 = arith.constant 0 : index
    %c0_72 = arith.constant 0 : index
    %296 = vector.load %arg3[%c0_71, %c0_72] : memref<256x1024xf32, #tpu.memory_space<vmem>>, vector<256x1024xf32>
    %cst_73 = arith.constant dense<0.000000e+00> : vector<8x1024xf32>
    %297 = tpu.matmul %293, %296, %cst_73 {dimension_numbers = #tpu.dot_dimension_numbers<[1], [0], [0], [1], [0, 0, 1, 1], [], []>} : vector<8x256xf32>, vector<256x1024xf32>, vector<8x1024xf32> -> vector<8x1024xf32>
    %c56_74 = arith.constant 56 : index
    %c0_75 = arith.constant 0 : index
    %298 = vector.load %arg8[%c56_74, %c0_75] : memref<64x1024xf32, #tpu.memory_space<vmem>>, vector<8x512xf32>
    %c0_76 = arith.constant 0 : index
    %c512_77 = arith.constant 512 : index
    %299 = vector.load %arg8[%c0_76, %c512_77] : memref<64x1024xf32, #tpu.memory_space<vmem>>, vector<8x512xf32>
    %300 = tpu.concatenate %298, %299 in 1 : vector<8x512xf32>, vector<8x512xf32> -> vector<8x1024xf32>
    %301 = arith.addf %300, %297 : vector<8x1024xf32>
    %302 = vector.extract_strided_slice %301 {offsets = [0, 0], sizes = [8, 128], strides = [1, 1]} : vector<8x1024xf32> to vector<8x128xf32>
    %303 = vector.extract_strided_slice %301 {offsets = [0, 512], sizes = [8, 128], strides = [1, 1]} : vector<8x1024xf32> to vector<8x128xf32>
    %304 = tpu.concatenate %302, %303 in 1 : vector<8x128xf32>, vector<8x128xf32> -> vector<8x256xf32>
    %305 = arith.negf %304 : vector<8x256xf32>
    %306 = math.exp %305 : vector<8x256xf32>
    %cst_78 = arith.constant 1.000000e+00 : f32
    %307 = vector.broadcast %cst_78 : f32 to vector<8x256xf32>
    %308 = arith.addf %307, %306 : vector<8x256xf32>
    %309 = arith.divf %307, %308 : vector<8x256xf32>
    %310 = vector.extract_strided_slice %301 {offsets = [0, 128], sizes = [8, 128], strides = [1, 1]} : vector<8x1024xf32> to vector<8x128xf32>
    %311 = vector.extract_strided_slice %301 {offsets = [0, 640], sizes = [8, 128], strides = [1, 1]} : vector<8x1024xf32> to vector<8x128xf32>
    %312 = tpu.concatenate %310, %311 in 1 : vector<8x128xf32>, vector<8x128xf32> -> vector<8x256xf32>
    %313 = arith.negf %312 : vector<8x256xf32>
    %314 = math.exp %313 : vector<8x256xf32>
    %cst_79 = arith.constant 1.000000e+00 : f32
    %315 = vector.broadcast %cst_79 : f32 to vector<8x256xf32>
    %316 = arith.addf %315, %314 : vector<8x256xf32>
    %317 = arith.divf %315, %316 : vector<8x256xf32>
    %318 = vector.extract_strided_slice %301 {offsets = [0, 256], sizes = [8, 128], strides = [1, 1]} : vector<8x1024xf32> to vector<8x128xf32>
    %319 = vector.extract_strided_slice %301 {offsets = [0, 768], sizes = [8, 128], strides = [1, 1]} : vector<8x1024xf32> to vector<8x128xf32>
    %320 = tpu.concatenate %318, %319 in 1 : vector<8x128xf32>, vector<8x128xf32> -> vector<8x256xf32>
    %321 = math.tanh %320 : vector<8x256xf32>
    %322 = vector.extract_strided_slice %301 {offsets = [0, 384], sizes = [8, 128], strides = [1, 1]} : vector<8x1024xf32> to vector<8x128xf32>
    %323 = vector.extract_strided_slice %301 {offsets = [0, 896], sizes = [8, 128], strides = [1, 1]} : vector<8x1024xf32> to vector<8x128xf32>
    %324 = tpu.concatenate %322, %323 in 1 : vector<8x128xf32>, vector<8x128xf32> -> vector<8x256xf32>
    %325 = arith.negf %324 : vector<8x256xf32>
    %326 = math.exp %325 : vector<8x256xf32>
    %cst_80 = arith.constant 1.000000e+00 : f32
    %327 = vector.broadcast %cst_80 : f32 to vector<8x256xf32>
    %328 = arith.addf %327, %326 : vector<8x256xf32>
    %329 = arith.divf %327, %328 : vector<8x256xf32>
    %330 = arith.mulf %317, %291 : vector<8x256xf32>
    %331 = arith.mulf %309, %321 : vector<8x256xf32>
    %332 = arith.addf %330, %331 : vector<8x256xf32>
    %333 = math.tanh %332 : vector<8x256xf32>
    %334 = arith.mulf %329, %333 : vector<8x256xf32>
    %335 = vector.extract_strided_slice %334 {offsets = [0, 0], sizes = [8, 128], strides = [1, 1]} : vector<8x256xf32> to vector<8x128xf32>
    %336 = vector.extract_strided_slice %334 {offsets = [0, 128], sizes = [8, 128], strides = [1, 1]} : vector<8x256xf32> to vector<8x128xf32>
    %c0_81 = arith.constant 0 : index
    %c0_82 = arith.constant 0 : index
    %337 = vector.load %arg9[%c0_81, %c0_82] : memref<8x256xf32, #tpu.memory_space<vmem>>, vector<8x256xf32>
    tpu.vector_store %arg9[%c0_81, %c0_82], %334 {strides = array<i32>} : memref<8x256xf32, #tpu.memory_space<vmem>>, vector<8x256xf32>,
    %cst_83 = arith.constant 0.000000e+00 : f32
    %338 = vector.broadcast %cst_83 : f32 to vector<8x256xf32>
    %c0_84 = arith.constant 0 : index
    %c0_85 = arith.constant 0 : index
    %339 = vector.load %arg10[%c0_84, %c0_85] : memref<8x256xf32, #tpu.memory_space<vmem>>, vector<8x256xf32>
    tpu.vector_store %arg10[%c0_84, %c0_85], %338 {strides = array<i32>} : memref<8x256xf32, #tpu.memory_space<vmem>>, vector<8x256xf32>,
    %c0_86 = arith.constant 0 : index
    %c0_87 = arith.constant 0 : index
    %340 = vector.load %arg9[%c0_86, %c0_87] : memref<8x256xf32, #tpu.memory_space<vmem>>, vector<1x128xf32>
    %c0_88 = arith.constant 0 : index
    %c0_89 = arith.constant 0 : index
    %341 = vector.load %arg10[%c0_88, %c0_89] : memref<8x256xf32, #tpu.memory_space<vmem>>, vector<1x128xf32>
    tpu.vector_store %arg10[%c0_88, %c0_89], %340 {strides = array<i32>} : memref<8x256xf32, #tpu.memory_space<vmem>>, vector<1x128xf32>,
    %c1 = arith.constant 1 : index
    %c0_90 = arith.constant 0 : index
    %342 = vector.load %arg9[%c1, %c0_90] : memref<8x256xf32, #tpu.memory_space<vmem>>, vector<1x128xf32>
    %c0_91 = arith.constant 0 : index
    %c128 = arith.constant 128 : index
    %343 = vector.load %arg10[%c0_91, %c128] : memref<8x256xf32, #tpu.memory_space<vmem>>, vector<1x128xf32>
    tpu.vector_store %arg10[%c0_91, %c128], %342 {strides = array<i32>} : memref<8x256xf32, #tpu.memory_space<vmem>>, vector<1x128xf32>,
    %c0_92 = arith.constant 0 : index
    %c128_93 = arith.constant 128 : index
    %344 = vector.load %arg9[%c0_92, %c128_93] : memref<8x256xf32, #tpu.memory_space<vmem>>, vector<1x128xf32>
    %c1_94 = arith.constant 1 : index
    %c0_95 = arith.constant 0 : index
    %345 = vector.load %arg10[%c1_94, %c0_95] : memref<8x256xf32, #tpu.memory_space<vmem>>, vector<1x128xf32>
    tpu.vector_store %arg10[%c1_94, %c0_95], %344 {strides = array<i32>} : memref<8x256xf32, #tpu.memory_space<vmem>>, vector<1x128xf32>,
    %c1_96 = arith.constant 1 : index
    %c128_97 = arith.constant 128 : index
    %346 = vector.load %arg9[%c1_96, %c128_97] : memref<8x256xf32, #tpu.memory_space<vmem>>, vector<1x128xf32>
    %c1_98 = arith.constant 1 : index
    %c128_99 = arith.constant 128 : index
    %347 = vector.load %arg10[%c1_98, %c128_99] : memref<8x256xf32, #tpu.memory_space<vmem>>, vector<1x128xf32>
    tpu.vector_store %arg10[%c1_98, %c128_99], %346 {strides = array<i32>} : memref<8x256xf32, #tpu.memory_space<vmem>>, vector<1x128xf32>,
    %c0_100 = arith.constant 0 : index
    %c0_101 = arith.constant 0 : index
    %348 = vector.load %arg10[%c0_100, %c0_101] : memref<8x256xf32, #tpu.memory_space<vmem>>, vector<8x256xf32>
    %349 = tpu.concatenate %48, %336 in 1 : vector<8x128xf32>, vector<8x128xf32> -> vector<8x256xf32>
    %350 = tpu.concatenate %89, %295 in 1 : vector<8x128xf32>, vector<8x128xf32> -> vector<8x256xf32>
    %351 = tpu.concatenate %130, %254 in 1 : vector<8x128xf32>, vector<8x128xf32> -> vector<8x256xf32>
    %352 = tpu.concatenate %171, %213 in 1 : vector<8x128xf32>, vector<8x128xf32> -> vector<8x256xf32>
    %353 = tpu.concatenate %212, %172 in 1 : vector<8x128xf32>, vector<8x128xf32> -> vector<8x256xf32>
    %354 = tpu.concatenate %253, %131 in 1 : vector<8x128xf32>, vector<8x128xf32> -> vector<8x256xf32>
    %355 = tpu.concatenate %294, %90 in 1 : vector<8x128xf32>, vector<8x128xf32> -> vector<8x256xf32>
    %356 = tpu.concatenate %335, %49 in 1 : vector<8x128xf32>, vector<8x128xf32> -> vector<8x256xf32>
    %357 = arith.mulf %349, %348 : vector<8x256xf32>
    %cst_102 = arith.constant dense<0.000000e+00> : vector<8xf32>
    %358 = vector.multi_reduction <add>, %357, %cst_102 [1] : vector<8x256xf32> to vector<8xf32>
    %359 = vector.shape_cast %358 : vector<8xf32> to vector<8x1xf32>
    %360 = arith.mulf %350, %348 : vector<8x256xf32>
    %cst_103 = arith.constant dense<0.000000e+00> : vector<8xf32>
    %361 = vector.multi_reduction <add>, %360, %cst_103 [1] : vector<8x256xf32> to vector<8xf32>
    %362 = vector.shape_cast %361 : vector<8xf32> to vector<8x1xf32>
    %363 = arith.mulf %351, %348 : vector<8x256xf32>
    %cst_104 = arith.constant dense<0.000000e+00> : vector<8xf32>
    %364 = vector.multi_reduction <add>, %363, %cst_104 [1] : vector<8x256xf32> to vector<8xf32>
    %365 = vector.shape_cast %364 : vector<8xf32> to vector<8x1xf32>
    %366 = arith.mulf %352, %348 : vector<8x256xf32>
    %cst_105 = arith.constant dense<0.000000e+00> : vector<8xf32>
    %367 = vector.multi_reduction <add>, %366, %cst_105 [1] : vector<8x256xf32> to vector<8xf32>
    %368 = vector.shape_cast %367 : vector<8xf32> to vector<8x1xf32>
    %369 = arith.mulf %353, %348 : vector<8x256xf32>
    %cst_106 = arith.constant dense<0.000000e+00> : vector<8xf32>
    %370 = vector.multi_reduction <add>, %369, %cst_106 [1] : vector<8x256xf32> to vector<8xf32>
    %371 = vector.shape_cast %370 : vector<8xf32> to vector<8x1xf32>
    %372 = arith.mulf %354, %348 : vector<8x256xf32>
    %cst_107 = arith.constant dense<0.000000e+00> : vector<8xf32>
    %373 = vector.multi_reduction <add>, %372, %cst_107 [1] : vector<8x256xf32> to vector<8xf32>
    %374 = vector.shape_cast %373 : vector<8xf32> to vector<8x1xf32>
    %375 = arith.mulf %355, %348 : vector<8x256xf32>
    %cst_108 = arith.constant dense<0.000000e+00> : vector<8xf32>
    %376 = vector.multi_reduction <add>, %375, %cst_108 [1] : vector<8x256xf32> to vector<8xf32>
    %377 = vector.shape_cast %376 : vector<8xf32> to vector<8x1xf32>
    %378 = arith.mulf %356, %348 : vector<8x256xf32>
    %cst_109 = arith.constant dense<0.000000e+00> : vector<8xf32>
    %379 = vector.multi_reduction <add>, %378, %cst_109 [1] : vector<8x256xf32> to vector<8xf32>
    %380 = vector.shape_cast %379 : vector<8xf32> to vector<8x1xf32>
    %381 = arith.maximumf %359, %362 : vector<8x1xf32>
    %382 = arith.maximumf %381, %365 : vector<8x1xf32>
    %383 = arith.maximumf %382, %368 : vector<8x1xf32>
    %384 = arith.maximumf %383, %371 : vector<8x1xf32>
    %385 = arith.maximumf %384, %374 : vector<8x1xf32>
    %386 = arith.maximumf %385, %377 : vector<8x1xf32>
    %387 = arith.maximumf %386, %380 : vector<8x1xf32>
    %388 = arith.subf %359, %387 : vector<8x1xf32>
    %389 = math.exp %388 : vector<8x1xf32>
    %390 = arith.subf %362, %387 : vector<8x1xf32>
    %391 = math.exp %390 : vector<8x1xf32>
    %392 = arith.subf %365, %387 : vector<8x1xf32>
    %393 = math.exp %392 : vector<8x1xf32>
    %394 = arith.subf %368, %387 : vector<8x1xf32>
    %395 = math.exp %394 : vector<8x1xf32>
    %396 = arith.subf %371, %387 : vector<8x1xf32>
    %397 = math.exp %396 : vector<8x1xf32>
    %398 = arith.subf %374, %387 : vector<8x1xf32>
    %399 = math.exp %398 : vector<8x1xf32>
    %400 = arith.subf %377, %387 : vector<8x1xf32>
    %401 = math.exp %400 : vector<8x1xf32>
    %402 = arith.subf %380, %387 : vector<8x1xf32>
    %403 = math.exp %402 : vector<8x1xf32>
    %404 = arith.addf %389, %391 : vector<8x1xf32>
    %405 = arith.addf %404, %393 : vector<8x1xf32>
    %406 = arith.addf %405, %395 : vector<8x1xf32>
    %407 = arith.addf %406, %397 : vector<8x1xf32>
    %408 = arith.addf %407, %399 : vector<8x1xf32>
    %409 = arith.addf %408, %401 : vector<8x1xf32>
    %410 = arith.addf %409, %403 : vector<8x1xf32>
    %cst_110 = arith.constant 1.000000e+00 : f32
    %411 = vector.broadcast %cst_110 : f32 to vector<8x1xf32>
    %412 = arith.divf %411, %410 : vector<8x1xf32>
    %413 = arith.mulf %389, %412 : vector<8x1xf32>
    %414 = vector.broadcast %413 : vector<8x1xf32> to vector<8x256xf32>
    %415 = arith.mulf %349, %414 : vector<8x256xf32>
    %416 = arith.mulf %391, %412 : vector<8x1xf32>
    %417 = vector.broadcast %416 : vector<8x1xf32> to vector<8x256xf32>
    %418 = arith.mulf %350, %417 : vector<8x256xf32>
    %419 = arith.addf %415, %418 : vector<8x256xf32>
    %420 = arith.mulf %393, %412 : vector<8x1xf32>
    %421 = vector.broadcast %420 : vector<8x1xf32> to vector<8x256xf32>
    %422 = arith.mulf %351, %421 : vector<8x256xf32>
    %423 = arith.addf %419, %422 : vector<8x256xf32>
    %424 = arith.mulf %395, %412 : vector<8x1xf32>
    %425 = vector.broadcast %424 : vector<8x1xf32> to vector<8x256xf32>
    %426 = arith.mulf %352, %425 : vector<8x256xf32>
    %427 = arith.addf %423, %426 : vector<8x256xf32>
    %428 = arith.mulf %397, %412 : vector<8x1xf32>
    %429 = vector.broadcast %428 : vector<8x1xf32> to vector<8x256xf32>
    %430 = arith.mulf %353, %429 : vector<8x256xf32>
    %431 = arith.addf %427, %430 : vector<8x256xf32>
    %432 = arith.mulf %399, %412 : vector<8x1xf32>
    %433 = vector.broadcast %432 : vector<8x1xf32> to vector<8x256xf32>
    %434 = arith.mulf %354, %433 : vector<8x256xf32>
    %435 = arith.addf %431, %434 : vector<8x256xf32>
    %436 = arith.mulf %401, %412 : vector<8x1xf32>
    %437 = vector.broadcast %436 : vector<8x1xf32> to vector<8x256xf32>
    %438 = arith.mulf %355, %437 : vector<8x256xf32>
    %439 = arith.addf %435, %438 : vector<8x256xf32>
    %440 = arith.mulf %403, %412 : vector<8x1xf32>
    %441 = vector.broadcast %440 : vector<8x1xf32> to vector<8x256xf32>
    %442 = arith.mulf %356, %441 : vector<8x256xf32>
    %443 = arith.addf %439, %442 : vector<8x256xf32>
    %c0_111 = arith.constant 0 : index
    %c0_112 = arith.constant 0 : index
    %444 = vector.load %arg5[%c0_111, %c0_112] : memref<256x128xf32, #tpu.memory_space<vmem>>, vector<256x128xf32>
    %cst_113 = arith.constant dense<0.000000e+00> : vector<8x128xf32>
    %445 = tpu.matmul %443, %444, %cst_113 {dimension_numbers = #tpu.dot_dimension_numbers<[1], [0], [0], [1], [0, 0, 1, 1], [], []>} : vector<8x256xf32>, vector<256x128xf32>, vector<8x128xf32> -> vector<8x128xf32>
    %c0_114 = arith.constant 0 : index
    %c0_115 = arith.constant 0 : index
    %446 = vector.load %arg6[%c0_114, %c0_115] : memref<1x128xf32, #tpu.memory_space<vmem>>, vector<1x128xf32>
    %447 = vector.broadcast %446 : vector<1x128xf32> to vector<8x128xf32>
    %448 = arith.addf %445, %447 : vector<8x128xf32>
    %c0_116 = arith.constant 0 : index
    %c0_117 = arith.constant 0 : index
    %449 = vector.load %arg7[%c0_116, %c0_117] : memref<8x128xf32, #tpu.memory_space<vmem>>, vector<8x128xf32>
    tpu.vector_store %arg7[%c0_116, %c0_117], %448 {strides = array<i32>} : memref<8x128xf32, #tpu.memory_space<vmem>>, vector<8x128xf32>,
    return
  }
  func.func @transform_0(%arg0: i32) -> (i32, i32) {
    %c0_i32 = arith.constant 0 : i32
    %c0_i32_0 = arith.constant 0 : i32
    %c0_i32_1 = arith.constant 0 : i32
    return %c0_i32, %c0_i32_0 : i32, i32
  }
  func.func @transform_1(%arg0: i32) -> (i32, i32) {
    %c0_i32 = arith.constant 0 : i32
    %c0_i32_0 = arith.constant 0 : i32
    %c0_i32_1 = arith.constant 0 : i32
    return %c0_i32, %c0_i32_0 : i32, i32
  }
  func.func @transform_2(%arg0: i32) -> (i32, i32) {
    %c0_i32 = arith.constant 0 : i32
    %c0_i32_0 = arith.constant 0 : i32
    %c0_i32_1 = arith.constant 0 : i32
    return %c0_i32, %c0_i32_0 : i32, i32
  }
  func.func @transform_3(%arg0: i32) -> (i32, i32) {
    %c0_i32 = arith.constant 0 : i32
    %c0_i32_0 = arith.constant 0 : i32
    %c0_i32_1 = arith.constant 0 : i32
    return %c0_i32, %c0_i32_0 : i32, i32
  }
  func.func @transform_4(%arg0: i32) -> (i32, i32) {
    %c0_i32 = arith.constant 0 : i32
    %c0_i32_0 = arith.constant 0 : i32
    %c0_i32_1 = arith.constant 0 : i32
    return %c0_i32, %c0_i32_0 : i32, i32
  }
  func.func @transform_5(%arg0: i32) -> (i32, i32) {
    %c0_i32 = arith.constant 0 : i32
    %c0_i32_0 = arith.constant 0 : i32
    %c0_i32_1 = arith.constant 0 : i32
    return %c0_i32, %c0_i32_0 : i32, i32
  }
  func.func @transform_6(%arg0: i32) -> (i32, i32) {
    %c0_i32 = arith.constant 0 : i32
    %c0_i32_0 = arith.constant 0 : i32
    %c0_i32_1 = arith.constant 0 : i32
    return %c0_i32, %c0_i32_0 : i32, i32
  }
}

</mosaic_0001>

<bundles_post_ra>
// kernel: model_forward.1
= control target key start
LH: loop header
LB: loop body
LE: loop exit
PB: predicated region body
PF: predicated region fallthrough
CT: control target
= control target key end

     0   :  { %11 = vsyncpa [#allocation6], 0  ;;  %s9549_s0 = inlined_call_operand.vmem [shape: f32[64,32], index: 0, kind: input, shape index: {}]   ;;  %s9550_s1 = inlined_call_operand.vmem [shape: f32[32,1024], index: 1, kind: input, shape index: {}]   ;;  %s9551_s2 = inlined_call_operand.hbm [shape: f32[256,1024], index: 2, kind: input, shape index: {}]   ;;  %s9552_s3 = inlined_call_operand.vmem [shape: f32[1,1024], index: 3, kind: input, shape index: {}]   ;;  %s9553_s4 = inlined_call_operand.hbm [shape: f32[256,128], index: 4, kind: input, shape index: {}]   ;;  %s9554_s5 = inlined_call_operand.vmem [shape: f32[1,128], index: 5, kind: input, shape index: {}]   ;;  %s9555_s6 = inlined_call_operand.vmem [shape: f32[8,128], index: 6, kind: output, shape index: {}]  }
   0x1   :  { %12 = vsyncpa [#allocation8], 0  ;;  %s5342_s21 = smov [#allocation5]  }
   0x2   :  { %s22_s22 = sshll.u32 %s5342_s21, 4  ;;  %s23_s22 = int_to_ptr.vmem [resolvable:$true] %s22_s22 }
   0x3   :  { %s5306_s23 = scalar_lea.vmem %s23_s22, 32768  ;;  %p5311_p1 = scmp.lt.s32.totalorder %s23_s22, %s23_s22 }
   0x4   :  { %p5307_p0 = scmp.ne.s32.totalorder %s23_s22, %s5306_s23  ;;  %p5312_p2 = scmp.lt.s32.totalorder %s5306_s23, %s5306_s23 }
   0x6   :  { %p5313_p3 = por %p5312_p2, %p5311_p1 }
   0x8   :  { %p5314_p4 = pnand %p5313_p3, %p5307_p0 }
   0xa   :  { %5317 = shalt.err (!%p5314_p4)
}
   0xb   :  { %s5343_s24 = smov 1024   ;;  %s5344_s25 = smov 64  }
   0xc   :  { %28 = dma.hbm_to_vmem [thread:$0]  %s9551_s2, 32768, %s23_s22, [#allocation6], %s5343_s24, %s5343_s24, %s5344_s25  }
   0xd   :  { %s5345_s28 = smov [#allocation7]  }
   0xe   :  { %s36_s29 = sshll.u32 %s5345_s28, 4  ;;  %s37_s29 = int_to_ptr.vmem [resolvable:$true] %s36_s29 }
   0xf   :  { %s5326_s30 = scalar_lea.vmem %s37_s29, 4096  ;;  %p5331_p6 = scmp.lt.s32.totalorder %s37_s29, %s37_s29 }
  0x10   :  { %p5327_p5 = scmp.ne.s32.totalorder %s37_s29, %s5326_s30  ;;  %p5332_p7 = scmp.lt.s32.totalorder %s5326_s30, %s5326_s30 }
  0x12   :  { %p5333_p8 = por %p5332_p7, %p5331_p6 }
  0x14   :  { %p5334_p9 = pnand %p5333_p8, %p5327_p5 }
  0x16   :  { %5337 = shalt.err (!%p5334_p9)
}
  0x17   :  { %s5346_s7 = smov 128   ;;  %s5347_s8 = smov 8  }
  0x18   :  { %42 = dma.hbm_to_vmem [thread:$0]  %s9553_s4, 4096, %s37_s29, [#allocation8], %s5346_s7, %s5346_s7, %s5347_s8  }
  0x19   :  { %5338 = dma.done.wait [#allocation6], 32768  }
  0x1a   :  { %5339 = vsyncadd [#allocation6], 4294934528 }
  0x1b   :  { %5340 = dma.done.wait [#allocation8], 4096  }
  0x1c   :  { %5341 = vsyncadd [#allocation8], 4294963200  ;;  %v5348_v0 = vmov 0.0   ;;  %v84_v1 = vld [vmem:[%s9550_s1 + $0xc8] sm:$0xff]  ;;  %v83_v2 = vld [vmem:[%s9550_s1 + $0xc0] sm:$0xff]  ;;  %vm133_vm0 = vcmask 261120  }
  0x1d   :  { %222 = vmatprep.mubr.f32.mxu0 %v5348_v0  ;;  %3716 = vst [vmem:[#allocation4] sm:$0xff] %v5348_v0  ;;  %3717 = vst [vmem:[#allocation4 + $0x8] sm:$0xff] %v5348_v0  ;;  %246 = vmatprep.mubr.f32.mxu1 %v5348_v0  ;;  %v76_v3 = vld [vmem:[%s9550_s1 + $0x88] sm:$0xff]  ;;  %v75_v4 = vld [vmem:[%s9550_s1 + $0x80] sm:$0xff] }
  0x1e   :  { %182 = vmatprep.subr.mxu0 %v84_v1  ;;  %4078 = vmatprep.subr.mxu1 %v84_v1  ;;  %v68_v5 = vld [vmem:[%s9550_s1 + $0x48] sm:$0xff]  ;;  %v67_v6 = vld [vmem:[%s9550_s1 + $0x40] sm:$0xff]  ;;  %v86_v11 = vld [vmem:[%s9550_s1 + $0xd8] sm:$0xff] }
  0x1f   :  { %183 = vmatpush1.msra.mxu0 %v83_v2  ;;  %4082 = vmatpush1.msra.mxu1 %v83_v2  ;;  %v60_v7 = vld [vmem:[%s9550_s1 + $0x8] sm:$0xff]  ;;  %v59_v8 = vld [vmem:[%s9550_s1] sm:$0xff]  ;;  %v85_v12 = vld [vmem:[%s9550_s1 + $0xd0] sm:$0xff] }
  0x20   :  { %184 = vmatprep.subr.mxu0 %v76_v3  ;;  %4079 = vmatprep.subr.mxu1 %v76_v3  ;;  %v5421_v9 = vld [vmem:[%s9549_s0] sm:$0xff]  ;;  %v78_v13 = vld [vmem:[%s9550_s1 + $0x98] sm:$0xff]  ;;  %v88_v14 = vld [vmem:[%s9550_s1 + $0xe8] sm:$0xff] }
  0x21   :  { %185 = vmatpush1.msra.mxu0 %v75_v4  ;;  %4083 = vmatpush1.msra.mxu1 %v75_v4  ;;  %v5426_v10 = vld [vmem:[%s9549_s0 + $0x20] sm:$0xff]  ;;  %v5448_v15 = vld [vmem:[%s9549_s0 + $0x8] sm:$0xff]  ;;  %v77_v17 = vld [vmem:[%s9550_s1 + $0x90] sm:$0xff] }
  0x22   :  { %186 = vmatprep.subr.mxu0 %v68_v5  ;;  %4080 = vmatprep.subr.mxu1 %v68_v5  ;;  %v5453_v16 = vld [vmem:[%s9549_s0 + $0x28] sm:$0xff]  ;;  %v70_v18 = vld [vmem:[%s9550_s1 + $0x58] sm:$0xff]  ;;  %v87_v19 = vld [vmem:[%s9550_s1 + $0xe0] sm:$0xff] }
  0x23   :  { %187 = vmatpush1.msra.mxu0 %v67_v6  ;;  %4084 = vmatpush1.msra.mxu1 %v67_v6  ;;  %v69_v20 = vld [vmem:[%s9550_s1 + $0x50] sm:$0xff]  ;;  %v80_v23 = vld [vmem:[%s9550_s1 + $0xa8] sm:$0xff]  ;;  %v79_v24 = vld [vmem:[%s9550_s1 + $0xa0] sm:$0xff] }
  0x24   :  { %188 = vmatprep.subr.mxu0 %v60_v7  ;;  %4081 = vmatprep.subr.mxu1 %v60_v7  ;;  %v5476_v21 = vld [vmem:[%s9549_s0 + $0x10] sm:$0xff]  ;;  %v72_v25 = vld [vmem:[%s9550_s1 + $0x68] sm:$0xff]  ;;  %v62_v26 = vld [vmem:[%s9550_s1 + $0x18] sm:$0xff] }
  0x25   :  { %189 = vmatpush1.msra.mxu0 %v59_v8  ;;  %4085 = vmatpush1.msra.mxu1 %v59_v8  ;;  %v5481_v22 = vld [vmem:[%s9549_s0 + $0x30] sm:$0xff]  ;;  %v5504_v27 = vld [vmem:[%s9549_s0 + $0x18] sm:$0xff]  ;;  %v71_v29 = vld [vmem:[%s9550_s1 + $0x60] sm:$0xff] }
  0x26   :  { %3962 = vmatmul.mubr.msk.f32.vlgmr.msra.gmra.mxu0 %vm133_vm0, %v5421_v9  ;;  %3966 = vmatmul.mubr.msk.f32.vlgmr.msra.gmra.mxu1 %vm133_vm0, %v5426_v10  ;;  %v5509_v28 = vld [vmem:[%s9549_s0 + $0x38] sm:$0xff]  ;;  %v61_v30 = vld [vmem:[%s9550_s1 + $0x10] sm:$0xff]  ;;  %v64_v31 = vld [vmem:[%s9550_s1 + $0x28] sm:$0xff] }
  0x27   :  { %295 = vmatprep.subr.mxu1 %v86_v11  ;;  %228 = vmatprep.mubr.f32.mxu0 %v5348_v0  ;;  %v63_v32 = vld [vmem:[%s9550_s1 + $0x20] sm:$0xff]  ;;  %v795_v33 = vld [vmem:[#allocation5 + $0x3c8] sm:$0xff]  ;;  %v90_v34 = vld [vmem:[%s9550_s1 + $0xf8] sm:$0xff] }
  0x28   :  { %296 = vmatpush1.msra.mxu1 %v85_v12  ;;  %252 = vmatprep.mubr.f32.mxu1 %v5348_v0  ;;  %v794_v35 = vld [vmem:[#allocation5 + $0x3c0] sm:$0xff]  ;;  %v89_v36 = vld [vmem:[%s9550_s1 + $0xf0] sm:$0xff]  ;;  %v787_v37 = vld [vmem:[#allocation5 + $0x388] sm:$0xff] }
  0x29   :  { %297 = vmatprep.subr.mxu1 %v78_v13  ;;  %408 = vmatprep.subr.mxu0 %v88_v14  ;;  %v786_v38 = vld [vmem:[#allocation5 + $0x380] sm:$0xff]  ;;  %v779_v39 = vld [vmem:[#allocation5 + $0x348] sm:$0xff]  ;;  %v82_v41 = vld [vmem:[%s9550_s1 + $0xb8] sm:$0xff] }
  0x2a   :  { %3963 = vmatmul.mubr.msk.f32.gmra.mxu0 %vm133_vm0, %v5448_v15  ;;  %3967 = vmatmul.mubr.msk.f32.gmra.mxu1 %vm133_vm0, %v5453_v16  ;;  %v778_v40 = vld [vmem:[#allocation5 + $0x340] sm:$0xff]  ;;  %v771_v42 = vld [vmem:[#allocation5 + $0x308] sm:$0xff]  ;;  %v81_v43 = vld [vmem:[%s9550_s1 + $0xb0] sm:$0xff] }
  0x2b   :  { %298 = vmatpush1.msra.mxu1 %v77_v17  ;;  %234 = vmatprep.mubr.f32.mxu0 %v5348_v0  ;;  %v770_v44 = vld [vmem:[#allocation5 + $0x300] sm:$0xff]  ;;  %v763_v45 = vld [vmem:[#allocation5 + $0x2c8] sm:$0xff]  ;;  %v74_v47 = vld [vmem:[%s9550_s1 + $0x78] sm:$0xff] }
  0x2c   :  { %258 = vmatprep.mubr.f32.mxu1 %v5348_v0  ;;  %299 = vmatprep.subr.mxu1 %v70_v18  ;;  %v762_v46 = vld [vmem:[#allocation5 + $0x2c0] sm:$0xff]  ;;  %v755_v48 = vld [vmem:[#allocation5 + $0x288] sm:$0xff]  ;;  %v73_v49 = vld [vmem:[%s9550_s1 + $0x70] sm:$0xff] }
  0x2d   :  { %409 = vmatpush1.msra.mxu0 %v87_v19  ;;  %300 = vmatpush1.msra.mxu1 %v69_v20  ;;  %v754_v50 = vld [vmem:[#allocation5 + $0x280] sm:$0xff]  ;;  %v747_v51 = vld [vmem:[#allocation5 + $0x248] sm:$0xff]  ;;  %v66_v53 = vld [vmem:[%s9550_s1 + $0x38] sm:$0xff] }
  0x2e   :  { %3964 = vmatmul.mubr.msk.f32.gmra.mxu0 %vm133_vm0, %v5476_v21  ;;  %3968 = vmatmul.mubr.msk.f32.gmra.mxu1 %vm133_vm0, %v5481_v22  ;;  %v746_v52 = vld [vmem:[#allocation5 + $0x240] sm:$0xff]  ;;  %v739_v54 = vld [vmem:[#allocation5 + $0x208] sm:$0xff]  ;;  %v65_v55 = vld [vmem:[%s9550_s1 + $0x30] sm:$0xff] }
  0x2f   :  { %410 = vmatprep.subr.mxu0 %v80_v23  ;;  %240 = vmatprep.mubr.f32.mxu0 %v5348_v0  ;;  %v738_v56 = vld [vmem:[#allocation5 + $0x200] sm:$0xff]  ;;  %v731_v57 = vld [vmem:[#allocation5 + $0x1c8] sm:$0xff]  ;;  %v797_v59 = vld [vmem:[#allocation5 + $0x3d8] sm:$0xff] }
  0x30   :  { %411 = vmatpush1.msra.mxu0 %v79_v24  ;;  %264 = vmatprep.mubr.f32.mxu1 %v5348_v0  ;;  %v730_v58 = vld [vmem:[#allocation5 + $0x1c0] sm:$0xff]  ;;  %v723_v60 = vld [vmem:[#allocation5 + $0x188] sm:$0xff]  ;;  %v796_v14 = vld [vmem:[#allocation5 + $0x3d0] sm:$0xff] }
  0x31   :  { %412 = vmatprep.subr.mxu0 %v72_v25  ;;  %301 = vmatprep.subr.mxu1 %v62_v26  ;;  %v722_v61 = vld [vmem:[#allocation5 + $0x180] sm:$0xff]  ;;  %v715_v62 = vld [vmem:[#allocation5 + $0x148] sm:$0xff]  ;;  %v789_v18 = vld [vmem:[#allocation5 + $0x398] sm:$0xff] }
  0x32   :  { %3965 = vmatmul.mubr.msk.f32.gmra.mxu0 %vm133_vm0, %v5504_v27  ;;  %3969 = vmatmul.mubr.msk.f32.gmra.mxu1 %vm133_vm0, %v5509_v28  ;;  %v714_v63 = vld [vmem:[#allocation5 + $0x140] sm:$0xff]  ;;  %v707_v1 = vld [vmem:[#allocation5 + $0x108] sm:$0xff]  ;;  %v788_v20 = vld [vmem:[#allocation5 + $0x390] sm:$0xff] }
  0x33   :  { %413 = vmatpush1.msra.mxu0 %v71_v29  ;;  %302 = vmatpush1.msra.mxu1 %v61_v30  ;;  %v706_v2 = vld [vmem:[#allocation5 + $0x100] sm:$0xff]  ;;  %v699_v3 = vld [vmem:[#allocation5 + $0xc8] sm:$0xff]  ;;  %v781_v24 = vld [vmem:[#allocation5 + $0x358] sm:$0xff] }
  0x34   :  { %414 = vmatprep.subr.mxu0 %v64_v31  ;;  %335 = vmatprep.mubr.f32.mxu1 %v5348_v0  ;;  %v698_v4 = vld [vmem:[#allocation5 + $0xc0] sm:$0xff]  ;;  %v691_v5 = vld [vmem:[#allocation5 + $0x88] sm:$0xff]  ;;  %v780_v26 = vld [vmem:[#allocation5 + $0x350] sm:$0xff] }
  0x35   :  { %415 = vmatpush1.msra.mxu0 %v63_v32  ;;  %448 = vmatprep.mubr.f32.mxu0 %v5348_v0  ;;  %v690_v6 = vld [vmem:[#allocation5 + $0x80] sm:$0xff]  ;;  %v683_v7 = vld [vmem:[#allocation5 + $0x48] sm:$0xff]  ;;  %v773_v30 = vld [vmem:[#allocation5 + $0x318] sm:$0xff] }
  0x36   :  { %930 = vmatprep.subr.mxu0 %v795_v33  ;;  %3970 = vmatmul.mubr.msk.f32.vlgmr.msra.gmra.mxu1 %vm133_vm0, %v5421_v9  ;;  %v682_v8 = vld [vmem:[#allocation5 + $0x40] sm:$0xff]  ;;  %v675_v11 = vld [vmem:[#allocation5 + $0x8] sm:$0xff]  ;;  %v772_v32 = vld [vmem:[#allocation5 + $0x310] sm:$0xff] }
  0x37   :  { %3978 = vmatmul.mubr.msk.f32.vlgmr.msra.gmra.mxu0 %vm133_vm0, %v5421_v9  ;;  %521 = vmatprep.subr.mxu1 %v90_v34  ;;  %v674_v12 = vld [vmem:[#allocation5] sm:$0xff]  ;;  %v923_v13 = vld [vmem:[#allocation5 + $0x7c8] sm:$0xff]  ;;  %v765_v33 = vld [vmem:[#allocation5 + $0x2d8] sm:$0xff] }
  0x38   :  { %931 = vmatpush1.msra.mxu0 %v794_v35  ;;  %522 = vmatpush1.msra.mxu1 %v89_v36  ;;  %v922_v17 = vld [vmem:[#allocation5 + $0x7c0] sm:$0xff]  ;;  %v915_v19 = vld [vmem:[#allocation5 + $0x788] sm:$0xff]  ;;  %v764_v35 = vld [vmem:[#allocation5 + $0x2d0] sm:$0xff] }
  0x39   :  { %932 = vmatprep.subr.mxu0 %v787_v37  ;;  %341 = vmatprep.mubr.f32.mxu1 %v5348_v0  ;;  %v914_v23 = vld [vmem:[#allocation5 + $0x780] sm:$0xff]  ;;  %v907_v25 = vld [vmem:[#allocation5 + $0x748] sm:$0xff]  ;;  %v757_v37 = vld [vmem:[#allocation5 + $0x298] sm:$0xff] }
  0x3a   :  { %933 = vmatpush1.msra.mxu0 %v786_v38  ;;  %3971 = vmatmul.mubr.msk.f32.gmra.mxu1 %vm133_vm0, %v5448_v15  ;;  %v906_v29 = vld [vmem:[#allocation5 + $0x740] sm:$0xff]  ;;  %v899_v31 = vld [vmem:[#allocation5 + $0x708] sm:$0xff] }
  0x3b   :  { %934 = vmatprep.subr.mxu0 %v779_v39  ;;  %347 = vmatprep.mubr.f32.mxu1 %v5348_v0  ;;  %v891_v34 = vld [vmem:[#allocation5 + $0x6c8] sm:$0xff]  ;;  %v890_v36 = vld [vmem:[#allocation5 + $0x6c0] sm:$0xff]  ;;  %v756_v39 = vld [vmem:[#allocation5 + $0x290] sm:$0xff] }
  0x3c   :  { %935 = vmatpush1.msra.mxu0 %v778_v40  ;;  %523 = vmatprep.subr.mxu1 %v82_v41  ;;  %v883_v38 = vld [vmem:[#allocation5 + $0x688] sm:$0xff]  ;;  %v882_v40 = vld [vmem:[#allocation5 + $0x680] sm:$0xff]  ;;  %v749_v41 = vld [vmem:[#allocation5 + $0x258] sm:$0xff] }
  0x3d   :  { %936 = vmatprep.subr.mxu0 %v771_v42  ;;  %524 = vmatpush1.msra.mxu1 %v81_v43  ;;  %v875_v42 = vld [vmem:[#allocation5 + $0x648] sm:$0xff]  ;;  %v748_v43 = vld [vmem:[#allocation5 + $0x250] sm:$0xff] }
  0x3e   :  { %937 = vmatpush1.msra.mxu0 %v770_v44  ;;  %3972 = vmatmul.mubr.msk.f32.gmra.mxu1 %vm133_vm0, %v5476_v21  ;;  %v874_v44 = vld [vmem:[#allocation5 + $0x640] sm:$0xff] }
  0x3f   :  { %938 = vmatprep.subr.mxu0 %v763_v45  ;;  %353 = vmatprep.mubr.f32.mxu1 %v5348_v0  ;;  %v741_v45 = vld [vmem:[#allocation5 + $0x218] sm:$0xff] }
  0x40   :  { %939 = vmatpush1.msra.mxu0 %v762_v46  ;;  %525 = vmatprep.subr.mxu1 %v74_v47  ;;  %v867_v46 = vld [vmem:[#allocation5 + $0x608] sm:$0xff]  ;;  %v866_v47 = vld [vmem:[#allocation5 + $0x600] sm:$0xff] }
  0x41   :  { %940 = vmatprep.subr.mxu0 %v755_v48  ;;  %526 = vmatpush1.msra.mxu1 %v73_v49  ;;  %v740_v48 = vld [vmem:[#allocation5 + $0x210] sm:$0xff]  ;;  %v859_v49 = vld [vmem:[#allocation5 + $0x5c8] sm:$0xff] }
  0x42   :  { %941 = vmatpush1.msra.mxu0 %v754_v50  ;;  %3973 = vmatmul.mubr.msk.f32.gmra.mxu1 %vm133_vm0, %v5504_v27  ;;  %v733_v50 = vld [vmem:[#allocation5 + $0x1d8] sm:$0xff] }
  0x43   :  { %942 = vmatprep.subr.mxu0 %v747_v51  ;;  %359 = vmatprep.mubr.f32.mxu1 %v5348_v0  ;;  %v858_v51 = vld [vmem:[#allocation5 + $0x5c0] sm:$0xff] }
  0x44   :  { %943 = vmatpush1.msra.mxu0 %v746_v52  ;;  %527 = vmatprep.subr.mxu1 %v66_v53  ;;  %v732_v52 = vld [vmem:[#allocation5 + $0x1d0] sm:$0xff]  ;;  %v851_v53 = vld [vmem:[#allocation5 + $0x588] sm:$0xff] }
  0x45   :  { %944 = vmatprep.subr.mxu0 %v739_v54  ;;  %528 = vmatpush1.msra.mxu1 %v65_v55  ;;  %v725_v54 = vld [vmem:[#allocation5 + $0x198] sm:$0xff]  ;;  %v850_v55 = vld [vmem:[#allocation5 + $0x580] sm:$0xff] }
  0x46   :  { %945 = vmatpush1.msra.mxu0 %v738_v56  ;;  %3974 = vmatmul.mubr.msk.f32.gmra.mxu1 %vm133_vm0, %v5426_v10  ;;  %v724_v56 = vld [vmem:[#allocation5 + $0x190] sm:$0xff] }
  0x47   :  { %946 = vmatprep.subr.mxu0 %v731_v57  ;;  %365 = vmatprep.mubr.f32.mxu1 %v5348_v0  ;;  %v843_v57 = vld [vmem:[#allocation5 + $0x548] sm:$0xff] }
  0x48   :  { %947 = vmatpush1.msra.mxu0 %v730_v58  ;;  %1001 = vmatprep.subr.mxu1 %v797_v59  ;;  %v717_v58 = vld [vmem:[#allocation5 + $0x158] sm:$0xff]  ;;  %v842_v59 = vld [vmem:[#allocation5 + $0x540] sm:$0xff] }
  0x49   :  { %948 = vmatprep.subr.mxu0 %v723_v60  ;;  %454 = vmatprep.mubr.f32.mxu0 %v5348_v0  ;;  %v716_v60 = vld [vmem:[#allocation5 + $0x150] sm:$0xff] }
  0x4a   :  { %949 = vmatpush1.msra.mxu0 %v722_v61  ;;  %3975 = vmatmul.mubr.msk.f32.gmra.mxu1 %vm133_vm0, %v5453_v16  ;;  %v835_v61 = vld [vmem:[#allocation5 + $0x508] sm:$0xff] }
  0x4b   :  { %950 = vmatprep.subr.mxu0 %v715_v62  ;;  %371 = vmatprep.mubr.f32.mxu1 %v5348_v0  ;;  %v709_v62 = vld [vmem:[#allocation5 + $0x118] sm:$0xff] }
  0x4c   :  { %951 = vmatpush1.msra.mxu0 %v714_v63  ;;  %v834_v63 = vld [vmem:[#allocation5 + $0x500] sm:$0xff] }
  0x4d   :  { %952 = vmatprep.subr.mxu0 %v707_v1  ;;  %3979 = vmatmul.mubr.msk.f32.gmra.mxu0 %vm133_vm0, %v5448_v15  ;;  %v708_v1 = vld [vmem:[#allocation5 + $0x110] sm:$0xff] }
  0x4e   :  { %953 = vmatpush1.msra.mxu0 %v706_v2  ;;  %3976 = vmatmul.mubr.msk.f32.gmra.mxu1 %vm133_vm0, %v5481_v22  ;;  %v827_v2 = vld [vmem:[#allocation5 + $0x4c8] sm:$0xff] }
  0x4f   :  { %954 = vmatprep.subr.mxu0 %v699_v3  ;;  %377 = vmatprep.mubr.f32.mxu1 %v5348_v0  ;;  %v5598_v3 = vld [vmem:[#allocation5 + $0xd8] sm:$0xff] }
  0x50   :  { %955 = vmatpush1.msra.mxu0 %v698_v4  ;;  %460 = vmatprep.mubr.f32.mxu0 %v5348_v0  ;;  %v826_v4 = vld [vmem:[#allocation5 + $0x4c0] sm:$0xff] }
  0x51   :  { %956 = vmatprep.subr.mxu0 %v691_v5  ;;  %3980 = vmatmul.mubr.msk.f32.gmra.mxu0 %vm133_vm0, %v5476_v21  ;;  %v5600_v5 = vld [vmem:[#allocation5 + $0xd0] sm:$0xff] }
  0x52   :  { %957 = vmatpush1.msra.mxu0 %v690_v6  ;;  %3977 = vmatmul.mubr.msk.f32.gmra.mxu1 %vm133_vm0, %v5509_v28  ;;  %v819_v6 = vld [vmem:[#allocation5 + $0x488] sm:$0xff] }
  0x53   :  { %958 = vmatprep.subr.mxu0 %v683_v7  ;;  %561 = vmatprep.mubr.f32.mxu1 %v5348_v0  ;;  %v5604_v7 = vld [vmem:[#allocation5 + $0x98] sm:$0xff] }
  0x54   :  { %959 = vmatpush1.msra.mxu0 %v682_v8  ;;  %466 = vmatprep.mubr.f32.mxu0 %v5348_v0  ;;  %v818_v8 = vld [vmem:[#allocation5 + $0x480] sm:$0xff] }
  0x55   :  { %960 = vmatprep.subr.mxu0 %v675_v11  ;;  %3981 = vmatmul.mubr.msk.f32.gmra.mxu0 %vm133_vm0, %v5504_v27  ;;  %v5607_v11 = vld [vmem:[#allocation5 + $0x90] sm:$0xff] }
  0x56   :  { %961 = vmatpush1.msra.mxu0 %v674_v12  ;;  %3986 = vmatmul.mubr.msk.f32.vlgmr.msra.gmra.mxu1 %vm133_vm0, %v5421_v9  ;;  %v898_v9 = vld [vmem:[#allocation5 + $0x700] sm:$0xff]  ;;  %v811_v12 = vld [vmem:[#allocation5 + $0x448] sm:$0xff] }
  0x57   :  { %962 = vmatprep.subr.mxu0 %v923_v13  ;;  %1002 = vmatpush1.msra.mxu1 %v796_v14  ;;  %v5612_v13 = vld [vmem:[#allocation5 + $0x58] sm:$0xff]  ;;  %v810_v14 = vld [vmem:[#allocation5 + $0x440] sm:$0xff] }
  0x58   :  { %963 = vmatpush2.msra.mxu0 %v922_v17  ;;  %1003 = vmatprep.subr.mxu1 %v789_v18  ;;  %v5615_v17 = vld [vmem:[#allocation5 + $0x50] sm:$0xff]  ;;  %v803_v18 = vld [vmem:[#allocation5 + $0x408] sm:$0xff] }
  0x59   :  { %964 = vmatprep.subr.mxu0 %v915_v19  ;;  %1004 = vmatpush1.msra.mxu1 %v788_v20  ;;  %v5619_v19 = vld [vmem:[#allocation5 + $0x18] sm:$0xff]  ;;  %v802_v20 = vld [vmem:[#allocation5 + $0x400] sm:$0xff] }
  0x5a   :  { %965 = vmatpush2.msra.mxu0 %v914_v23  ;;  %1005 = vmatprep.subr.mxu1 %v781_v24  ;;  %v5622_v23 = vld [vmem:[#allocation5 + $0x10] sm:$0xff]  ;;  %v5625_v24 = vld [vmem:[#allocation5 + $0x7d8] sm:$0xff] }
  0x5b   :  { %966 = vmatprep.subr.mxu0 %v907_v25  ;;  %1006 = vmatpush1.msra.mxu1 %v780_v26  ;;  %v5628_v25 = vld [vmem:[#allocation5 + $0x3e8] sm:$0xff]  ;;  %v5630_v26 = vld [vmem:[#allocation5 + $0x7d0] sm:$0xff] }
  0x5c   :  { %967 = vmatpush2.msra.mxu0 %v906_v29  ;;  %1007 = vmatprep.subr.mxu1 %v773_v30  ;;  %v798_v29 = vld [vmem:[#allocation5 + $0x3e0] sm:$0xff]  ;;  %v5634_v30 = vld [vmem:[#allocation5 + $0x798] sm:$0xff] }
  0x5d   :  { %968 = vmatprep.subr.mxu0 %v899_v31  ;;  %1008 = vmatpush1.msra.mxu1 %v772_v32  ;;  %v791_v31 = vld [vmem:[#allocation5 + $0x3a8] sm:$0xff]  ;;  %v5640_v32 = vld [vmem:[#allocation5 + $0x790] sm:$0xff] }
  0x5e   :  { %969 = vmatpush2.msra.mxu0 %v898_v9  ;;  %1009 = vmatprep.subr.mxu1 %v765_v33  ;;  %v790_v9 = vld [vmem:[#allocation5 + $0x3a0] sm:$0xff]  ;;  %v5643_v33 = vld [vmem:[#allocation5 + $0x758] sm:$0xff] }
  0x5f   :  { %970 = vmatprep.subr.mxu0 %v891_v34  ;;  %1010 = vmatpush1.msra.mxu1 %v764_v35  ;;  %v783_v34 = vld [vmem:[#allocation5 + $0x368] sm:$0xff]  ;;  %v5646_v35 = vld [vmem:[#allocation5 + $0x750] sm:$0xff] }
  0x60   :  { %971 = vmatpush2.msra.mxu0 %v890_v36  ;;  %1011 = vmatprep.subr.mxu1 %v757_v37  ;;  %v782_v36 = vld [vmem:[#allocation5 + $0x360] sm:$0xff]  ;;  %v5649_v37 = vld [vmem:[#allocation5 + $0x718] sm:$0xff] }
  0x61   :  { %972 = vmatprep.subr.mxu0 %v883_v38  ;;  %1012 = vmatpush1.msra.mxu1 %v756_v39  ;;  %v775_v38 = vld [vmem:[#allocation5 + $0x328] sm:$0xff]  ;;  %v5655_v39 = vld [vmem:[#allocation5 + $0x710] sm:$0xff] }
  0x62   :  { %973 = vmatpush2.msra.mxu0 %v882_v40  ;;  %1013 = vmatprep.subr.mxu1 %v749_v41  ;;  %v774_v40 = vld [vmem:[#allocation5 + $0x320] sm:$0xff]  ;;  %v5658_v41 = vld [vmem:[#allocation5 + $0x6d8] sm:$0xff] }
  0x63   :  { %974 = vmatprep.subr.mxu0 %v875_v42  ;;  %1014 = vmatpush1.msra.mxu1 %v748_v43  ;;  %v767_v42 = vld [vmem:[#allocation5 + $0x2e8] sm:$0xff]  ;;  %v5661_v43 = vld [vmem:[#allocation5 + $0x6d0] sm:$0xff] }
  0x64   :  { %975 = vmatpush2.msra.mxu0 %v874_v44  ;;  %1015 = vmatprep.subr.mxu1 %v741_v45  ;;  %v5664_v44 = vld [vmem:[#allocation5 + $0x698] sm:$0xff]  ;;  %v759_v45 = vld [vmem:[#allocation5 + $0x2a8] sm:$0xff] }
  0x65   :  { %976 = vmatprep.subr.mxu0 %v867_v46  ;;  %472 = vmatprep.mubr.f32.mxu0 %v5348_v0  ;;  %v5670_v46 = vld [vmem:[#allocation5 + $0x690] sm:$0xff] }
  0x66   :  { %977 = vmatpush2.msra.mxu0 %v866_v47  ;;  %1016 = vmatpush1.msra.mxu1 %v740_v48  ;;  %v758_v47 = vld [vmem:[#allocation5 + $0x2a0] sm:$0xff]  ;;  %v5673_v48 = vld [vmem:[#allocation5 + $0x658] sm:$0xff] }
  0x67   :  { %3982 = vmatmul.mubr.msk.f32.gmra.mxu0 %vm133_vm0, %v5426_v10  ;;  %978 = vmatprep.subr.mxu0 %v859_v49  ;;  %v751_v49 = vld [vmem:[#allocation5 + $0x268] sm:$0xff] }
  0x68   :  { %1017 = vmatprep.subr.mxu1 %v733_v50  ;;  %979 = vmatpush2.msra.mxu0 %v858_v51  ;;  %v5676_v50 = vld [vmem:[#allocation5 + $0x650] sm:$0xff]  ;;  %v5679_v51 = vld [vmem:[#allocation5 + $0x618] sm:$0xff] }
  0x69   :  { %1018 = vmatpush1.msra.mxu1 %v732_v52  ;;  %980 = vmatprep.subr.mxu0 %v851_v53  ;;  %v743_v52 = vld [vmem:[#allocation5 + $0x228] sm:$0xff]  ;;  %v5685_v53 = vld [vmem:[#allocation5 + $0x610] sm:$0xff] }
  0x6a   :  { %1019 = vmatprep.subr.mxu1 %v725_v54  ;;  %478 = vmatprep.mubr.f32.mxu0 %v5348_v0  ;;  %v742_v54 = vld [vmem:[#allocation5 + $0x220] sm:$0xff] }
  0x6b   :  { %981 = vmatpush2.msra.mxu0 %v850_v55  ;;  %1020 = vmatpush1.msra.mxu1 %v724_v56  ;;  %v5688_v55 = vld [vmem:[#allocation5 + $0x5d8] sm:$0xff]  ;;  %v735_v56 = vld [vmem:[#allocation5 + $0x1e8] sm:$0xff] }
  0x6c   :  { %3983 = vmatmul.mubr.msk.f32.gmra.mxu0 %vm133_vm0, %v5453_v16  ;;  %982 = vmatprep.subr.mxu0 %v843_v57  ;;  %v5691_v57 = vld [vmem:[#allocation5 + $0x5d0] sm:$0xff] }
  0x6d   :  { %1021 = vmatprep.subr.mxu1 %v717_v58  ;;  %983 = vmatpush2.msra.mxu0 %v842_v59  ;;  %v5694_v58 = vld [vmem:[#allocation5 + $0x598] sm:$0xff]  ;;  %v727_v59 = vld [vmem:[#allocation5 + $0x1a8] sm:$0xff] }
  0x6e   :  { %1022 = vmatpush1.msra.mxu1 %v716_v60  ;;  %984 = vmatprep.subr.mxu0 %v835_v61  ;;  %v5700_v60 = vld [vmem:[#allocation5 + $0x590] sm:$0xff]  ;;  %v726_v61 = vld [vmem:[#allocation5 + $0x1a0] sm:$0xff] }
  0x6f   :  { %1023 = vmatprep.subr.mxu1 %v709_v62  ;;  %484 = vmatprep.mubr.f32.mxu0 %v5348_v0  ;;  %v5703_v62 = vld [vmem:[#allocation5 + $0x558] sm:$0xff] }
  0x70   :  { %985 = vmatpush2.msra.mxu0 %v834_v63  ;;  %1024 = vmatpush1.msra.mxu1 %v708_v1  ;;  %v719_v63 = vld [vmem:[#allocation5 + $0x168] sm:$0xff]  ;;  %v5706_v1 = vld [vmem:[#allocation5 + $0x550] sm:$0xff] }
  0x71   :  { %3984 = vmatmul.mubr.msk.f32.gmra.mxu0 %vm133_vm0, %v5481_v22  ;;  %986 = vmatprep.subr.mxu0 %v827_v2  ;;  %v5709_v2 = vld [vmem:[#allocation5 + $0x518] sm:$0xff] }
  0x72   :  { %1025 = vmatprep.subr.mxu1 %v5598_v3  ;;  %987 = vmatpush2.msra.mxu0 %v826_v4  ;;  %v711_v4 = vld [vmem:[#allocation5 + $0x128] sm:$0xff] }
  0x73   :  { %1026 = vmatpush1.msra.mxu1 %v5600_v5  ;;  %988 = vmatprep.subr.mxu0 %v819_v6  ;;  %v5715_v6 = vld [vmem:[#allocation5 + $0x510] sm:$0xff] }
  0x74   :  { %1027 = vmatprep.subr.mxu1 %v5604_v7  ;;  %490 = vmatprep.mubr.f32.mxu0 %v5348_v0 }
  0x75   :  { %989 = vmatpush2.msra.mxu0 %v818_v8  ;;  %1028 = vmatpush1.msra.mxu1 %v5607_v11  ;;  %v710_v8 = vld [vmem:[#allocation5 + $0x120] sm:$0xff] }
  0x76   :  { %3985 = vmatmul.mubr.msk.f32.gmra.mxu0 %vm133_vm0, %v5509_v28  ;;  %990 = vmatprep.subr.mxu0 %v811_v12  ;;  %v5718_v12 = vld [vmem:[#allocation5 + $0x4d8] sm:$0xff] }
  0x77   :  { %1029 = vmatprep.subr.mxu1 %v5612_v13  ;;  %991 = vmatpush2.msra.mxu0 %v810_v14  ;;  %v703_v14 = vld [vmem:[#allocation5 + $0xe8] sm:$0xff] }
  0x78   :  { %1030 = vmatpush1.msra.mxu1 %v5615_v17  ;;  %992 = vmatprep.subr.mxu0 %v803_v18  ;;  %v5721_v18 = vld [vmem:[#allocation5 + $0x4d0] sm:$0xff] }
  0x79   :  { %1031 = vmatprep.subr.mxu1 %v5619_v19  ;;  %993 = vmatpush2.msra.mxu0 %v802_v20  ;;  %v5724_v20 = vld [vmem:[#allocation5 + $0x498] sm:$0xff] }
  0x7a   :  { %994 = vmatprep.mubr.f32.mxu0 %v5348_v0  ;;  %1032 = vmatpush1.msra.mxu1 %v5622_v23 }
  0x7b   :  { %995 = vmatmul.mubr.f32.vlgmr.msra.gmra.mxu0 %v5348_v0  ;;  %1033 = vmatprep.subr.mxu1 %v5625_v24 }
  0x7c   :  { %1072 = vmatprep.subr.mxu0 %v5628_v25  ;;  %1034 = vmatpush2.msra.mxu1 %v5630_v26 }
  0x7d   :  { %1073 = vmatpush1.msra.mxu0 %v798_v29  ;;  %1035 = vmatprep.subr.mxu1 %v5634_v30  ;;  %v695_v29 = vld [vmem:[#allocation5 + $0xa8] sm:$0xff] }
  0x7e   :  { %1074 = vmatprep.subr.mxu0 %v791_v31  ;;  %567 = vmatprep.mubr.f32.mxu1 %v5348_v0  ;;  %v5730_v31 = vld [vmem:[#allocation5 + $0x490] sm:$0xff] }
  0x7f   :  { %1036 = vmatpush2.msra.mxu1 %v5640_v32  ;;  %1075 = vmatpush1.msra.mxu0 %v790_v9  ;;  %v694_v9 = vld [vmem:[#allocation5 + $0xa0] sm:$0xff] }
  0x80   :  { %3987 = vmatmul.mubr.msk.f32.gmra.mxu1 %vm133_vm0, %v5448_v15  ;;  %1037 = vmatprep.subr.mxu1 %v5643_v33  ;;  %v766_v15 = vld [vmem:[#allocation5 + $0x2e0] sm:$0xff] }
  0x81   :  { %1076 = vmatprep.subr.mxu0 %v783_v34  ;;  %1038 = vmatpush2.msra.mxu1 %v5646_v35  ;;  %v5733_v34 = vld [vmem:[#allocation5 + $0x458] sm:$0xff] }
  0x82   :  { %1077 = vmatpush1.msra.mxu0 %v782_v36  ;;  %1039 = vmatprep.subr.mxu1 %v5649_v37  ;;  %v687_v36 = vld [vmem:[#allocation5 + $0x68] sm:$0xff] }
  0x83   :  { %1078 = vmatprep.subr.mxu0 %v775_v38  ;;  %573 = vmatprep.mubr.f32.mxu1 %v5348_v0  ;;  %v5736_v38 = vld [vmem:[#allocation5 + $0x450] sm:$0xff] }
  0x84   :  { %1040 = vmatpush2.msra.mxu1 %v5655_v39  ;;  %1079 = vmatpush1.msra.mxu0 %v774_v40  ;;  %v5739_v40 = vld [vmem:[#allocation5 + $0x418] sm:$0xff] }
  0x85   :  { %3988 = vmatmul.mubr.msk.f32.gmra.mxu1 %vm133_vm0, %v5476_v21  ;;  %1041 = vmatprep.subr.mxu1 %v5658_v41  ;;  %v750_v21 = vld [vmem:[#allocation5 + $0x260] sm:$0xff] }
  0x86   :  { %1080 = vmatprep.subr.mxu0 %v767_v42  ;;  %1042 = vmatpush2.msra.mxu1 %v5661_v43  ;;  %v679_v42 = vld [vmem:[#allocation5 + $0x28] sm:$0xff] }
  0x87   :  { %1081 = vmatpush1.msra.mxu0 %v766_v15  ;;  %1043 = vmatprep.subr.mxu1 %v5664_v44  ;;  %v5744_v15 = vld [vmem:[#allocation5 + $0x410] sm:$0xff] }
  0x88   :  { %1082 = vmatprep.subr.mxu0 %v759_v45  ;;  %579 = vmatprep.mubr.f32.mxu1 %v5348_v0  ;;  %v678_v45 = vld [vmem:[#allocation5 + $0x20] sm:$0xff] }
  0x89   :  { %1044 = vmatpush2.msra.mxu1 %v5670_v46  ;;  %1083 = vmatpush1.msra.mxu0 %v758_v47  ;;  %v927_v47 = vld [vmem:[#allocation5 + $0x7e8] sm:$0xff] }
  0x8a   :  { %3989 = vmatmul.mubr.msk.f32.gmra.mxu1 %vm133_vm0, %v5504_v27  ;;  %1045 = vmatprep.subr.mxu1 %v5673_v48  ;;  %v734_v27 = vld [vmem:[#allocation5 + $0x1e0] sm:$0xff] }
  0x8b   :  { %1084 = vmatprep.subr.mxu0 %v751_v49  ;;  %1046 = vmatpush2.msra.mxu1 %v5676_v50  ;;  %v5749_v49 = vld [vmem:[#allocation5 + $0x3f8] sm:$0xff] }
  0x8c   :  { %1085 = vmatpush1.msra.mxu0 %v750_v21  ;;  %1047 = vmatprep.subr.mxu1 %v5679_v51  ;;  %v926_v21 = vld [vmem:[#allocation5 + $0x7e0] sm:$0xff] }
  0x8d   :  { %1086 = vmatprep.subr.mxu0 %v743_v52  ;;  %585 = vmatprep.mubr.f32.mxu1 %v5348_v0  ;;  %v919_v52 = vld [vmem:[#allocation5 + $0x7a8] sm:$0xff] }
  0x8e   :  { %1048 = vmatpush2.msra.mxu1 %v5685_v53  ;;  %1087 = vmatpush1.msra.mxu0 %v742_v54  ;;  %v793_v54 = vld [vmem:[#allocation5 + $0x3b8] sm:$0xff] }
  0x8f   :  { %3990 = vmatmul.mubr.msk.f32.gmra.mxu1 %vm133_vm0, %v5426_v10  ;;  %1049 = vmatprep.subr.mxu1 %v5688_v55  ;;  %v718_v10 = vld [vmem:[#allocation5 + $0x160] sm:$0xff] }
  0x90   :  { %1088 = vmatprep.subr.mxu0 %v735_v56  ;;  %1050 = vmatpush2.msra.mxu1 %v5691_v57  ;;  %v918_v56 = vld [vmem:[#allocation5 + $0x7a0] sm:$0xff] }
  0x91   :  { %1089 = vmatpush1.msra.mxu0 %v734_v27  ;;  %1051 = vmatprep.subr.mxu1 %v5694_v58  ;;  %v792_v27 = vld [vmem:[#allocation5 + $0x3b0] sm:$0xff] }
  0x92   :  { %1090 = vmatprep.subr.mxu0 %v727_v59  ;;  %591 = vmatprep.mubr.f32.mxu1 %v5348_v0  ;;  %v911_v59 = vld [vmem:[#allocation5 + $0x768] sm:$0xff] }
  0x93   :  { %1052 = vmatpush2.msra.mxu1 %v5700_v60  ;;  %1091 = vmatpush1.msra.mxu0 %v726_v61  ;;  %v785_v61 = vld [vmem:[#allocation5 + $0x378] sm:$0xff] }
  0x94   :  { %3991 = vmatmul.mubr.msk.f32.gmra.mxu1 %vm133_vm0, %v5453_v16  ;;  %1053 = vmatprep.subr.mxu1 %v5703_v62  ;;  %v702_v16 = vld [vmem:[#allocation5 + $0xe0] sm:$0xff] }
  0x95   :  { %1092 = vmatprep.subr.mxu0 %v719_v63  ;;  %1054 = vmatpush2.msra.mxu1 %v5706_v1  ;;  %v910_v63 = vld [vmem:[#allocation5 + $0x760] sm:$0xff] }
  0x96   :  { %1093 = vmatpush1.msra.mxu0 %v718_v10  ;;  %1055 = vmatprep.subr.mxu1 %v5709_v2  ;;  %v784_v10 = vld [vmem:[#allocation5 + $0x370] sm:$0xff] }
  0x97   :  { %1094 = vmatprep.subr.mxu0 %v711_v4  ;;  %597 = vmatprep.mubr.f32.mxu1 %v5348_v0  ;;  %v903_v4 = vld [vmem:[#allocation5 + $0x728] sm:$0xff] }
  0x98   :  { %1056 = vmatpush2.msra.mxu1 %v5715_v6  ;;  %1095 = vmatpush1.msra.mxu0 %v710_v8  ;;  %v777_v8 = vld [vmem:[#allocation5 + $0x338] sm:$0xff] }
  0x99   :  { %3992 = vmatmul.mubr.msk.f32.gmra.mxu1 %vm133_vm0, %v5481_v22  ;;  %1057 = vmatprep.subr.mxu1 %v5718_v12  ;;  %v686_v22 = vld [vmem:[#allocation5 + $0x60] sm:$0xff] }
  0x9a   :  { %1096 = vmatprep.subr.mxu0 %v703_v14  ;;  %1058 = vmatpush2.msra.mxu1 %v5721_v18  ;;  %v776_v14 = vld [vmem:[#allocation5 + $0x330] sm:$0xff] }
  0x9b   :  { %1097 = vmatpush1.msra.mxu0 %v702_v16  ;;  %1059 = vmatprep.subr.mxu1 %v5724_v20  ;;  %v895_v16 = vld [vmem:[#allocation5 + $0x6e8] sm:$0xff] }
  0x9c   :  { %1098 = vmatprep.subr.mxu0 %v695_v29  ;;  %603 = vmatprep.mubr.f32.mxu1 %v5348_v0  ;;  %v769_v29 = vld [vmem:[#allocation5 + $0x2f8] sm:$0xff] }
  0x9d   :  { %1060 = vmatpush2.msra.mxu1 %v5730_v31  ;;  %1099 = vmatpush1.msra.mxu0 %v694_v9  ;;  %v894_v9 = vld [vmem:[#allocation5 + $0x6e0] sm:$0xff] }
  0x9e   :  { %3993 = vmatmul.mubr.msk.f32.gmra.mxu1 %vm133_vm0, %v5509_v28  ;;  %1061 = vmatprep.subr.mxu1 %v5733_v34  ;;  %v800_v28 = vld [vmem:[#allocation5 + $0x3f0] sm:$0xff] }
  0x9f   :  { %1100 = vmatprep.subr.mxu0 %v687_v36  ;;  %1062 = vmatpush2.msra.mxu1 %v5736_v38  ;;  %v768_v36 = vld [vmem:[#allocation5 + $0x2f0] sm:$0xff] }
  0xa0   :  { %1101 = vmatpush1.msra.mxu0 %v686_v22  ;;  %1063 = vmatprep.subr.mxu1 %v5739_v40  ;;  %v887_v22 = vld [vmem:[#allocation5 + $0x6a8] sm:$0xff] }
  0xa1   :  { %1102 = vmatprep.subr.mxu0 %v679_v42  ;;  %1064 = vmatpush2.msra.mxu1 %v5744_v15  ;;  %v761_v42 = vld [vmem:[#allocation5 + $0x2b8] sm:$0xff] }
  0xa2   :  { %1065 = vmatprep.mubr.f32.mxu1 %v5348_v0  ;;  %1103 = vmatpush1.msra.mxu0 %v678_v45  ;;  %v886_v45 = vld [vmem:[#allocation5 + $0x6a0] sm:$0xff] }
  0xa3   :  { %1066 = vmatmul.mubr.f32.vlgmr.msra.gmra.mxu1 %v5348_v0  ;;  %1104 = vmatprep.subr.mxu0 %v927_v47  ;;  %v902_v0 = vld [vmem:[#allocation5 + $0x720] sm:$0xff]  ;;  %v760_v47 = vld [vmem:[#allocation5 + $0x2b0] sm:$0xff] }
  0xa4   :  { %1143 = vmatprep.subr.mxu1 %v5749_v49  ;;  %1105 = vmatpush2.msra.mxu0 %v926_v21  ;;  %v879_v21 = vld [vmem:[#allocation5 + $0x668] sm:$0xff] }
  0xa5   :  { %1144 = vmatpush1.msra.mxu1 %v800_v28  ;;  %1106 = vmatprep.subr.mxu0 %v919_v52  ;;  %v5754_v28 = vld [vmem:[#allocation5 + $0x278] sm:$0xff]  ;;  %v878_v52 = vld [vmem:[#allocation5 + $0x660] sm:$0xff] }
  0xa6   :  { %1145 = vmatprep.subr.mxu1 %v793_v54  ;;  %1107 = vmatpush2.msra.mxu0 %v918_v56  ;;  %v5756_v54 = vld [vmem:[#allocation5 + $0x270] sm:$0xff]  ;;  %v871_v56 = vld [vmem:[#allocation5 + $0x628] sm:$0xff] }
  0xa7   :  { %1146 = vmatpush1.msra.mxu1 %v792_v27  ;;  %1108 = vmatprep.subr.mxu0 %v911_v59  ;;  %10146 = vst [vmem:[#allocation11_spill] sm:$0xff] %v5756_v54  ;;  %v5758_v27 = vld [vmem:[#allocation5 + $0x238] sm:$0xff]  ;;  %v870_v59 = vld [vmem:[#allocation5 + $0x620] sm:$0xff] }
  0xa8   :  { %1147 = vmatprep.subr.mxu1 %v785_v61  ;;  %1109 = vmatpush2.msra.mxu0 %v910_v63  ;;  %10147 = vst [vmem:[#allocation12_spill] sm:$0xff] %v5758_v27  ;;  %v5761_v61 = vld [vmem:[#allocation5 + $0x230] sm:$0xff]  ;;  %v863_v63 = vld [vmem:[#allocation5 + $0x5e8] sm:$0xff] }
  0xa9   :  { %1148 = vmatpush1.msra.mxu1 %v784_v10  ;;  %1110 = vmatprep.subr.mxu0 %v903_v4  ;;  %10148 = vst [vmem:[#allocation13_spill] sm:$0xff] %v5761_v61  ;;  %v5764_v10 = vld [vmem:[#allocation5 + $0x1f8] sm:$0xff]  ;;  %v862_v4 = vld [vmem:[#allocation5 + $0x5e0] sm:$0xff] }
  0xaa   :  { %1149 = vmatprep.subr.mxu1 %v777_v8  ;;  %1111 = vmatpush2.msra.mxu0 %v902_v0  ;;  %10149 = vst [vmem:[#allocation14_spill] sm:$0xff] %v5764_v10  ;;  %v5767_v8 = vld [vmem:[#allocation5 + $0x1f0] sm:$0xff]  ;;  %v855_v0 = vld [vmem:[#allocation5 + $0x5a8] sm:$0xff] }
  0xab   :  { %1150 = vmatpush1.msra.mxu1 %v776_v14  ;;  %1112 = vmatprep.subr.mxu0 %v895_v16  ;;  %10150 = vst [vmem:[#allocation15_spill] sm:$0xff] %v5767_v8  ;;  %v5770_v14 = vld [vmem:[#allocation5 + $0x1b8] sm:$0xff]  ;;  %v854_v16 = vld [vmem:[#allocation5 + $0x5a0] sm:$0xff] }
  0xac   :  { %1151 = vmatprep.subr.mxu1 %v769_v29  ;;  %1113 = vmatpush2.msra.mxu0 %v894_v9  ;;  %10151 = vst [vmem:[#allocation16_spill] sm:$0xff] %v5770_v14  ;;  %v5773_v29 = vld [vmem:[#allocation5 + $0x1b0] sm:$0xff]  ;;  %v847_v9 = vld [vmem:[#allocation5 + $0x568] sm:$0xff] }
  0xad   :  { %1152 = vmatpush1.msra.mxu1 %v768_v36  ;;  %1114 = vmatprep.subr.mxu0 %v887_v22  ;;  %10152 = vst [vmem:[#allocation17_spill] sm:$0xff] %v5773_v29  ;;  %v5776_v36 = vld [vmem:[#allocation5 + $0x178] sm:$0xff]  ;;  %v846_v22 = vld [vmem:[#allocation5 + $0x560] sm:$0xff] }
  0xae   :  { %1153 = vmatprep.subr.mxu1 %v761_v42  ;;  %1115 = vmatpush2.msra.mxu0 %v886_v45  ;;  %10153 = vst [vmem:[#allocation18_spill] sm:$0xff] %v5776_v36  ;;  %v5779_v42 = vld [vmem:[#allocation5 + $0x170] sm:$0xff]  ;;  %v839_v45 = vld [vmem:[#allocation5 + $0x528] sm:$0xff] }
  0xaf   :  { %1154 = vmatpush1.msra.mxu1 %v760_v47  ;;  %1116 = vmatprep.subr.mxu0 %v879_v21  ;;  %10154 = vst [vmem:[#allocation19_spill] sm:$0xff] %v5779_v42  ;;  %v5782_v47 = vld [vmem:[#allocation5 + $0x138] sm:$0xff]  ;;  %v838_v21 = vld [vmem:[#allocation5 + $0x520] sm:$0xff] }
  0xb0   :  { %1155 = vmatprep.subr.mxu1 %v5754_v28  ;;  %1117 = vmatpush2.msra.mxu0 %v878_v52  ;;  %10155 = vst [vmem:[#allocation20_spill] sm:$0xff] %v5782_v47  ;;  %v5785_v52 = vld [vmem:[#allocation5 + $0x130] sm:$0xff] }
  0xb1   :  { %1156 = vmatpush1.msra.mxu1 %v5756_v54  ;;  %1118 = vmatprep.subr.mxu0 %v871_v56  ;;  %10156 = vst [vmem:[#allocation21_spill] sm:$0xff] %v5785_v52  ;;  %v831_v56 = vld [vmem:[#allocation5 + $0x4e8] sm:$0xff]  ;;  %v6201_v54 = vld [vmem:[#allocation5 + $0x110] sm:$0xff] }
  0xb2   :  { %1157 = vmatprep.subr.mxu1 %v5758_v27  ;;  %1119 = vmatpush2.msra.mxu0 %v870_v59  ;;  %v5788_v59 = vld [vmem:[#allocation5 + $0xf8] sm:$0xff]  ;;  %v6180_v27 = vld [vmem:[#allocation5 + $0x150] sm:$0xff] }
  0xb3   :  { %1158 = vmatpush1.msra.mxu1 %v5761_v61  ;;  %1120 = vmatprep.subr.mxu0 %v863_v63  ;;  %10157 = vst [vmem:[#allocation22_spill] sm:$0xff] %v5788_v59  ;;  %v830_v63 = vld [vmem:[#allocation5 + $0x4e0] sm:$0xff]  ;;  %10273 = vst [vmem:[#allocation138_spill] sm:$0xff] %v6180_v27 }
  0xb4   :  { %1159 = vmatprep.subr.mxu1 %v5764_v10  ;;  %1121 = vmatpush2.msra.mxu0 %v862_v4  ;;  %v5791_v4 = vld [vmem:[#allocation5 + $0xf0] sm:$0xff]  ;;  %v6108_v10 = vld [vmem:[#allocation5 + $0x218] sm:$0xff] }
  0xb5   :  { %1160 = vmatpush1.msra.mxu1 %v5767_v8  ;;  %1122 = vmatprep.subr.mxu0 %v855_v0  ;;  %10158 = vst [vmem:[#allocation23_spill] sm:$0xff] %v5791_v4  ;;  %v823_v0 = vld [vmem:[#allocation5 + $0x4a8] sm:$0xff]  ;;  %v6089_v8 = vld [vmem:[#allocation5 + $0x258] sm:$0xff]  ;;  %10254 = vst [vmem:[#allocation119_spill] sm:$0xff] %v6108_v10 }
  0xb6   :  { %1161 = vmatprep.subr.mxu1 %v5770_v14  ;;  %1123 = vmatpush2.msra.mxu0 %v854_v16  ;;  %v5794_v16 = vld [vmem:[#allocation5 + $0xb8] sm:$0xff]  ;;  %10248 = vst [vmem:[#allocation113_spill] sm:$0xff] %v6089_v8 }
  0xb7   :  { %1162 = vmatpush1.msra.mxu1 %v5773_v29  ;;  %1124 = vmatprep.subr.mxu0 %v847_v9  ;;  %10159 = vst [vmem:[#allocation24_spill] sm:$0xff] %v5794_v16  ;;  %v822_v9 = vld [vmem:[#allocation5 + $0x4a0] sm:$0xff]  ;;  %v6034_v29 = vld [vmem:[#allocation5 + $0x318] sm:$0xff] }
  0xb8   :  { %1163 = vmatprep.subr.mxu1 %v5776_v36  ;;  %1125 = vmatpush2.msra.mxu0 %v846_v22  ;;  %v5797_v22 = vld [vmem:[#allocation5 + $0xb0] sm:$0xff]  ;;  %v6019_v36 = vld [vmem:[#allocation5 + $0x358] sm:$0xff]  ;;  %10230 = vst [vmem:[#allocation95_spill] sm:$0xff] %v6034_v29 }
  0xb9   :  { %1164 = vmatpush1.msra.mxu1 %v5779_v42  ;;  %1126 = vmatprep.subr.mxu0 %v839_v45  ;;  %10160 = vst [vmem:[#allocation25_spill] sm:$0xff] %v5797_v22  ;;  %v815_v45 = vld [vmem:[#allocation5 + $0x468] sm:$0xff]  ;;  %10225 = vst [vmem:[#allocation90_spill] sm:$0xff] %v6019_v36  ;;  %v6052_v14 = vld [vmem:[#allocation5 + $0x2d8] sm:$0xff] }
  0xba   :  { %1165 = vmatprep.subr.mxu1 %v5782_v47  ;;  %1127 = vmatpush2.msra.mxu0 %v838_v21  ;;  %v5800_v47 = vld [vmem:[#allocation5 + $0x78] sm:$0xff]  ;;  %v814_v21 = vld [vmem:[#allocation5 + $0x460] sm:$0xff]  ;;  %10236 = vst [vmem:[#allocation101_spill] sm:$0xff] %v6052_v14 }
  0xbb   :  { %1166 = vmatpush1.msra.mxu1 %v5785_v52  ;;  %1128 = vmatprep.subr.mxu0 %v831_v56  ;;  %10161 = vst [vmem:[#allocation26_spill] sm:$0xff] %v5800_v47  ;;  %v5803_v52 = vld [vmem:[#allocation5 + $0x70] sm:$0xff]  ;;  %v807_v56 = vld [vmem:[#allocation5 + $0x428] sm:$0xff] }
  0xbc   :  { %1167 = vmatprep.subr.mxu1 %v5788_v59  ;;  %1129 = vmatpush2.msra.mxu0 %v830_v63  ;;  %10162 = vst [vmem:[#allocation27_spill] sm:$0xff] %v5803_v52  ;;  %v5806_v59 = vld [vmem:[#allocation5 + $0x38] sm:$0xff]  ;;  %v806_v63 = vld [vmem:[#allocation5 + $0x420] sm:$0xff] }
  0xbd   :  { %1168 = vmatpush1.msra.mxu1 %v5791_v4  ;;  %1130 = vmatprep.subr.mxu0 %v823_v0  ;;  %10163 = vst [vmem:[#allocation28_spill] sm:$0xff] %v5806_v59  ;;  %v5809_v4 = vld [vmem:[#allocation5 + $0x30] sm:$0xff]  ;;  %v5812_v0 = vld [vmem:[#allocation5 + $0x7f8] sm:$0xff] }
  0xbe   :  { %1169 = vmatprep.subr.mxu1 %v5794_v16  ;;  %1131 = vmatpush2.msra.mxu0 %v822_v9  ;;  %10164 = vst [vmem:[#allocation29_spill] sm:$0xff] %v5809_v4  ;;  %10165 = vst [vmem:[#allocation30_spill] sm:$0xff] %v5812_v0  ;;  %v5815_v9 = vld [vmem:[#allocation5 + $0x7f0] sm:$0xff]  ;;  %v5973_v16 = vld [vmem:[#allocation5 + $0x80] sm:$0xff] }
  0xbf   :  { %1170 = vmatpush1.msra.mxu1 %v5797_v22  ;;  %1132 = vmatprep.subr.mxu0 %v815_v45  ;;  %10166 = vst [vmem:[#allocation31_spill] sm:$0xff] %v5815_v9  ;;  %v5817_v22 = vld [vmem:[#allocation4] sm:$0xff]  ;;  %v5821_v45 = vld [vmem:[#allocation5 + $0x7b8] sm:$0xff]  ;;  %10214 = vst [vmem:[#allocation79_spill] sm:$0xff] %v5973_v16 }
  0xc0   :  { %1171 = vmatprep.subr.mxu1 %v5800_v47  ;;  %1133 = vmatpush2.msra.mxu0 %v814_v21  ;;  %10167 = vst [vmem:[#allocation32_spill] sm:$0xff] %v5821_v45  ;;  %v5825_v21 = vld [vmem:[#allocation5 + $0x7b0] sm:$0xff]  ;;  %v5841_v47 = vld [vmem:[#allocation5 + $0x6f8] sm:$0xff] }
  0xc1   :  { %1172 = vmatpush1.msra.mxu1 %v5803_v52  ;;  %1134 = vmatprep.subr.mxu0 %v807_v56  ;;  %10168 = vst [vmem:[#allocation33_spill] sm:$0xff] %v5825_v21  ;;  %v5828_v56 = vld [vmem:[#allocation5 + $0x778] sm:$0xff]  ;;  %v4369_v52 = vld [vmem:[#allocation5 + $0x3c0] sm:$0xff]  ;;  %10173 = vst [vmem:[#allocation38_spill] sm:$0xff] %v5841_v47 }
  0xc2   :  { %1173 = vmatprep.subr.mxu1 %v5806_v59  ;;  %1135 = vmatpush2.msra.mxu0 %v806_v63  ;;  %10169 = vst [vmem:[#allocation34_spill] sm:$0xff] %v5828_v56  ;;  %v5832_v63 = vld [vmem:[#allocation5 + $0x770] sm:$0xff]  ;;  %v4368_v59 = vld [vmem:[#allocation5 + $0x3c8] sm:$0xff] }
  0xc3   :  { %1136 = vmatprep.mubr.f32.mxu0 %v5817_v22  ;;  %1174 = vmatpush1.msra.mxu1 %v5809_v4  ;;  %10170 = vst [vmem:[#allocation35_spill] sm:$0xff] %v5832_v63  ;;  %v5835_v4 = vld [vmem:[#allocation5 + $0x738] sm:$0xff] }
  0xc4   :  { %1137 = vmatmul.mubr.f32.vlgmr.msra.gmra.mxu0 %v5817_v22  ;;  %1175 = vmatprep.subr.mxu1 %v5812_v0  ;;  %10171 = vst [vmem:[#allocation36_spill] sm:$0xff] %v5835_v4  ;;  %v5838_v0 = vld [vmem:[#allocation5 + $0x730] sm:$0xff] }
  0xc5   :  { %1176 = vmatpush2.msra.mxu1 %v5815_v9  ;;  %1207 = vmatprep.mubr.f32.mxu1 %v5817_v22  ;;  %10172 = vst [vmem:[#allocation37_spill] sm:$0xff] %v5838_v0  ;;  %v4370_v9 = vld [vmem:[#allocation5 + $0x388] sm:$0xff] }
  0xc6   :  { %1177 = vmatprep.subr.mxu1 %v5821_v45  ;;  %1278 = vmatprep.subr.mxu0 %v4368_v59  ;;  %v4371_v45 = vld [vmem:[#allocation5 + $0x380] sm:$0xff]  ;;  %v5844_v59 = vld [vmem:[#allocation5 + $0x6f0] sm:$0xff] }
  0xc7   :  { %1178 = vmatpush2.msra.mxu1 %v5825_v21  ;;  %1279 = vmatpush1.msra.mxu0 %v4369_v52  ;;  %10174 = vst [vmem:[#allocation39_spill] sm:$0xff] %v5844_v59  ;;  %v4372_v21 = vld [vmem:[#allocation5 + $0x348] sm:$0xff]  ;;  %v5847_v52 = vld [vmem:[#allocation5 + $0x6b8] sm:$0xff] }
  0xc8   :  { %1179 = vmatprep.subr.mxu1 %v5828_v56  ;;  %1280 = vmatprep.subr.mxu0 %v4370_v9  ;;  %10175 = vst [vmem:[#allocation40_spill] sm:$0xff] %v5847_v52  ;;  %v4373_v56 = vld [vmem:[#allocation5 + $0x340] sm:$0xff]  ;;  %v5850_v9 = vld [vmem:[#allocation5 + $0x6b0] sm:$0xff] }
  0xc9   :  { %1180 = vmatpush2.msra.mxu1 %v5832_v63  ;;  %1281 = vmatpush1.msra.mxu0 %v4371_v45  ;;  %10176 = vst [vmem:[#allocation41_spill] sm:$0xff] %v5850_v9  ;;  %v4374_v63 = vld [vmem:[#allocation5 + $0x308] sm:$0xff]  ;;  %v5853_v45 = vld [vmem:[#allocation5 + $0x678] sm:$0xff] }
  0xca   :  { %1181 = vmatprep.subr.mxu1 %v5835_v4  ;;  %1282 = vmatprep.subr.mxu0 %v4372_v21  ;;  %10177 = vst [vmem:[#allocation42_spill] sm:$0xff] %v5853_v45  ;;  %v4375_v4 = vld [vmem:[#allocation5 + $0x300] sm:$0xff]  ;;  %v5856_v21 = vld [vmem:[#allocation5 + $0x670] sm:$0xff] }
  0xcb   :  { %1182 = vmatpush2.msra.mxu1 %v5838_v0  ;;  %1283 = vmatpush1.msra.mxu0 %v4373_v56  ;;  %10178 = vst [vmem:[#allocation43_spill] sm:$0xff] %v5856_v21  ;;  %v4376_v0 = vld [vmem:[#allocation5 + $0x2c8] sm:$0xff]  ;;  %v5859_v56 = vld [vmem:[#allocation5 + $0x638] sm:$0xff] }
  0xcc   :  { %1183 = vmatprep.subr.mxu1 %v5841_v47  ;;  %1284 = vmatprep.subr.mxu0 %v4374_v63  ;;  %10179 = vst [vmem:[#allocation44_spill] sm:$0xff] %v5859_v56  ;;  %v4377_v47 = vld [vmem:[#allocation5 + $0x2c0] sm:$0xff]  ;;  %v5862_v63 = vld [vmem:[#allocation5 + $0x630] sm:$0xff] }
  0xcd   :  { %1184 = vmatpush2.msra.mxu1 %v5844_v59  ;;  %1285 = vmatpush1.msra.mxu0 %v4375_v4  ;;  %10180 = vst [vmem:[#allocation45_spill] sm:$0xff] %v5862_v63  ;;  %v5864_v59 = vld [vmem:[#allocation5 + $0x288] sm:$0xff]  ;;  %v5868_v4 = vld [vmem:[#allocation5 + $0x5f8] sm:$0xff] }
  0xce   :  { %1185 = vmatprep.subr.mxu1 %v5847_v52  ;;  %1286 = vmatprep.subr.mxu0 %v4376_v0  ;;  %10181 = vst [vmem:[#allocation46_spill] sm:$0xff] %v5864_v59  ;;  %10182 = vst [vmem:[#allocation47_spill] sm:$0xff] %v5868_v4  ;;  %v5870_v52 = vld [vmem:[#allocation5 + $0x280] sm:$0xff]  ;;  %v5874_v0 = vld [vmem:[#allocation5 + $0x5f0] sm:$0xff] }
  0xcf   :  { %1186 = vmatpush2.msra.mxu1 %v5850_v9  ;;  %1287 = vmatpush1.msra.mxu0 %v4377_v47  ;;  %10183 = vst [vmem:[#allocation48_spill] sm:$0xff] %v5870_v52  ;;  %10184 = vst [vmem:[#allocation49_spill] sm:$0xff] %v5874_v0  ;;  %v5876_v47 = vld [vmem:[#allocation5 + $0x248] sm:$0xff]  ;;  %v5922_v9 = vld [vmem:[#allocation5 + $0x4f0] sm:$0xff] }
  0xd0   :  { %1187 = vmatprep.subr.mxu1 %v5853_v45  ;;  %1288 = vmatprep.subr.mxu0 %v5864_v59  ;;  %10185 = vst [vmem:[#allocation50_spill] sm:$0xff] %v5876_v47  ;;  %v5880_v45 = vld [vmem:[#allocation5 + $0x5b8] sm:$0xff]  ;;  %v5882_v59 = vld [vmem:[#allocation5 + $0x240] sm:$0xff]  ;;  %10200 = vst [vmem:[#allocation65_spill] sm:$0xff] %v5922_v9 }
  0xd1   :  { %1188 = vmatpush2.msra.mxu1 %v5856_v21  ;;  %1289 = vmatpush1.msra.mxu0 %v5870_v52  ;;  %10186 = vst [vmem:[#allocation51_spill] sm:$0xff] %v5880_v45  ;;  %10187 = vst [vmem:[#allocation52_spill] sm:$0xff] %v5882_v59  ;;  %v5886_v21 = vld [vmem:[#allocation5 + $0x5b0] sm:$0xff]  ;;  %v5888_v52 = vld [vmem:[#allocation5 + $0x208] sm:$0xff] }
  0xd2   :  { %1189 = vmatprep.subr.mxu1 %v5859_v56  ;;  %1290 = vmatprep.subr.mxu0 %v5876_v47  ;;  %10188 = vst [vmem:[#allocation53_spill] sm:$0xff] %v5886_v21  ;;  %10189 = vst [vmem:[#allocation54_spill] sm:$0xff] %v5888_v52  ;;  %v5892_v56 = vld [vmem:[#allocation5 + $0x578] sm:$0xff]  ;;  %v5894_v47 = vld [vmem:[#allocation5 + $0x200] sm:$0xff] }
  0xd3   :  { %1190 = vmatpush2.msra.mxu1 %v5862_v63  ;;  %1291 = vmatpush1.msra.mxu0 %v5882_v59  ;;  %10190 = vst [vmem:[#allocation55_spill] sm:$0xff] %v5892_v56  ;;  %10191 = vst [vmem:[#allocation56_spill] sm:$0xff] %v5894_v47  ;;  %v5898_v63 = vld [vmem:[#allocation5 + $0x570] sm:$0xff]  ;;  %v5900_v59 = vld [vmem:[#allocation5 + $0x1c8] sm:$0xff] }
  0xd4   :  { %1191 = vmatprep.subr.mxu1 %v5868_v4  ;;  %1292 = vmatprep.subr.mxu0 %v5888_v52  ;;  %10192 = vst [vmem:[#allocation57_spill] sm:$0xff] %v5898_v63  ;;  %10193 = vst [vmem:[#allocation58_spill] sm:$0xff] %v5900_v59  ;;  %v5904_v4 = vld [vmem:[#allocation5 + $0x538] sm:$0xff]  ;;  %v93_v52 = vlaneseq }
  0xd5   :  { %1192 = vmatpush2.msra.mxu1 %v5874_v0  ;;  %1293 = vmatpush1.msra.mxu0 %v5894_v47  ;;  %10194 = vst [vmem:[#allocation59_spill] sm:$0xff] %v5904_v4  ;;  %v5906_v0 = vld [vmem:[#allocation5 + $0x1c0] sm:$0xff]  ;;  %v5910_v47 = vld [vmem:[#allocation5 + $0x530] sm:$0xff] }
  0xd6   :  { %1193 = vmatprep.subr.mxu1 %v5880_v45  ;;  %1294 = vmatprep.subr.mxu0 %v5900_v59  ;;  %10195 = vst [vmem:[#allocation60_spill] sm:$0xff] %v5906_v0  ;;  %10196 = vst [vmem:[#allocation61_spill] sm:$0xff] %v5910_v47  ;;  %v5912_v45 = vld [vmem:[#allocation5 + $0x188] sm:$0xff]  ;;  %v5916_v59 = vld [vmem:[#allocation5 + $0x4f8] sm:$0xff] }
  0xd7   :  { %1194 = vmatpush2.msra.mxu1 %v5886_v21  ;;  %1295 = vmatpush1.msra.mxu0 %v5906_v0  ;;  %10197 = vst [vmem:[#allocation62_spill] sm:$0xff] %v5912_v45  ;;  %10198 = vst [vmem:[#allocation63_spill] sm:$0xff] %v5916_v59  ;;  %v5918_v21 = vld [vmem:[#allocation5 + $0x180] sm:$0xff]  ;;  %v5924_v0 = vld [vmem:[#allocation5 + $0x148] sm:$0xff] }
  0xd8   :  { %1195 = vmatprep.subr.mxu1 %v5892_v56  ;;  %1296 = vmatprep.subr.mxu0 %v5912_v45  ;;  %10199 = vst [vmem:[#allocation64_spill] sm:$0xff] %v5918_v21  ;;  %10201 = vst [vmem:[#allocation66_spill] sm:$0xff] %v5924_v0  ;;  %v5928_v56 = vld [vmem:[#allocation5 + $0x4b8] sm:$0xff]  ;;  %v5930_v45 = vshrl.u32 %v93_v52, 7  ;;  %v5948_v52 = vld [vmem:[#allocation5 + $0x470] sm:$0xff] }
  0xd9   :  { %1196 = vmatpush2.msra.mxu1 %v5898_v63  ;;  %1297 = vmatpush1.msra.mxu0 %v5918_v21  ;;  %10202 = vst [vmem:[#allocation67_spill] sm:$0xff] %v5928_v56  ;;  %v5932_v63 = vld [vmem:[#allocation5 + $0x140] sm:$0xff]  ;;  %v5936_v21 = vld [vmem:[#allocation5 + $0x4b0] sm:$0xff]  ;;  %10208 = vst [vmem:[#allocation73_spill] sm:$0xff] %v5948_v52 }
  0xda   :  { %1197 = vmatprep.subr.mxu1 %v5904_v4  ;;  %1298 = vmatprep.subr.mxu0 %v5924_v0  ;;  %10203 = vst [vmem:[#allocation68_spill] sm:$0xff] %v5932_v63  ;;  %10204 = vst [vmem:[#allocation69_spill] sm:$0xff] %v5936_v21  ;;  %v5938_v4 = vld [vmem:[#allocation5 + $0x108] sm:$0xff]  ;;  %v5942_v0 = vld [vmem:[#allocation5 + $0x478] sm:$0xff] }
  0xdb   :  { %1198 = vmatpush2.msra.mxu1 %v5910_v47  ;;  %1299 = vmatpush1.msra.mxu0 %v5932_v63  ;;  %10205 = vst [vmem:[#allocation70_spill] sm:$0xff] %v5938_v4  ;;  %10206 = vst [vmem:[#allocation71_spill] sm:$0xff] %v5942_v0  ;;  %v5944_v47 = vld [vmem:[#allocation5 + $0x100] sm:$0xff]  ;;  %v5950_v63 = vld [vmem:[#allocation5 + $0xc8] sm:$0xff] }
  0xdc   :  { %1199 = vmatprep.subr.mxu1 %v5916_v59  ;;  %1300 = vmatprep.subr.mxu0 %v5938_v4  ;;  %10207 = vst [vmem:[#allocation72_spill] sm:$0xff] %v5944_v47  ;;  %10209 = vst [vmem:[#allocation74_spill] sm:$0xff] %v5950_v63  ;;  %v5954_v59 = vld [vmem:[#allocation5 + $0x438] sm:$0xff]  ;;  %v95_v4 = vsub.s32 0, %v5930_v45 }
  0xdd   :  { %1200 = vmatpush2.msra.mxu1 %v5922_v9  ;;  %1301 = vmatpush1.msra.mxu0 %v5944_v47  ;;  %10210 = vst [vmem:[#allocation75_spill] sm:$0xff] %v5954_v59  ;;  %v5957_v9 = vld [vmem:[#allocation5 + $0xc0] sm:$0xff]  ;;  %v5961_v47 = vld [vmem:[#allocation5 + $0x430] sm:$0xff] }
  0xde   :  { %1201 = vmatprep.subr.mxu1 %v5928_v56  ;;  %1302 = vmatprep.subr.mxu0 %v5950_v63  ;;  %10211 = vst [vmem:[#allocation76_spill] sm:$0xff] %v5957_v9  ;;  %10212 = vst [vmem:[#allocation77_spill] sm:$0xff] %v5961_v47  ;;  %v5966_v56 = vld [vmem:[%s9552_s3] sm:$0xff]  ;;  %v5968_v63 = vld [vmem:[#allocation5 + $0x88] sm:$0xff] }
  0xdf   :  { %1202 = vmatpush2.msra.mxu1 %v5936_v21  ;;  %1303 = vmatpush1.msra.mxu0 %v5957_v9  ;;  %10213 = vst [vmem:[#allocation78_spill] sm:$0xff] %v5968_v63  ;;  %v99_v21 = vsub.s32 1, %v5930_v45  ;;  %v5977_v9 = vld [vmem:[#allocation5 + $0x48] sm:$0xff] }
  0xe0   :  { %1203 = vmatprep.subr.mxu1 %v5942_v0  ;;  %1304 = vmatprep.subr.mxu0 %v5968_v63  ;;  %10215 = vst [vmem:[#allocation80_spill] sm:$0xff] %v5977_v9  ;;  %v5982_v0 = vrot.slane %v5966_v56, %v95_v4  ;;  %v5984_v63 = vld [vmem:[#allocation5 + $0x40] sm:$0xff] }
  0xe1   :  { %1204 = vmatpush2.msra.mxu1 %v5948_v52  ;;  %1305 = vmatpush1.msra.mxu0 %v5973_v16  ;;  %10216 = vst [vmem:[#allocation81_spill] sm:$0xff] %v5984_v63  ;;  %v5988_v52 = vld [vmem:[#allocation5 + $0x3d8] sm:$0xff]  ;;  %v5992_v16 = vrot.slane %v5966_v56, %v99_v21 }
  0xe2   :  { %1205 = vmatprep.subr.mxu1 %v5954_v59  ;;  %1306 = vmatprep.subr.mxu0 %v5977_v9  ;;  %10217 = vst [vmem:[#allocation82_spill] sm:$0xff] %v5988_v52  ;;  %v5994_v59 = vld [vmem:[#allocation5 + $0x3d0] sm:$0xff]  ;;  %v5997_v9 = vld [vmem:[#allocation5 + $0x8] sm:$0xff] }
  0xe3   :  { %1206 = vmatpush2.msra.mxu1 %v5961_v47  ;;  %1307 = vmatpush1.msra.mxu0 %v5984_v63  ;;  %10218 = vst [vmem:[#allocation83_spill] sm:$0xff] %v5994_v59  ;;  %10219 = vst [vmem:[#allocation84_spill] sm:$0xff] %v5997_v9  ;;  %v6002_v63 = vld [vmem:[#allocation5 + $0x398] sm:$0xff] }
  0xe4   :  { %1208 = vmatmul.mubr.f32.vlgmr.msra.gmra.mxu1 %v5817_v22  ;;  %1349 = vmatprep.subr.mxu1 %v5988_v52  ;;  %10220 = vst [vmem:[#allocation85_spill] sm:$0xff] %v6002_v63  ;;  %v6005_v22 = vld [vmem:[#allocation5] sm:$0xff]  ;;  %v6011_v52 = vld [vmem:[#allocation5 + $0x390] sm:$0xff] }
  0xe5   :  { %1350 = vmatpush1.msra.mxu1 %v5994_v59  ;;  %1308 = vmatprep.subr.mxu0 %v5997_v9  ;;  %10221 = vst [vmem:[#allocation86_spill] sm:$0xff] %v6005_v22  ;;  %10223 = vst [vmem:[#allocation88_spill] sm:$0xff] %v6011_v52  ;;  %v6014_v59 = vld [vmem:[#allocation5 + $0x7c8] sm:$0xff] }
  0xe6   :  { %v248_v4 = vpop.f32.mrf.mxu1  ;;  %v6000_v47 = vpop.f32.mrf.mxu0  ;;  %1351 = vmatprep.subr.mxu1 %v6002_v63  ;;  %1309 = vmatpush1.msra.mxu0 %v6005_v22  ;;  %10224 = vst [vmem:[#allocation89_spill] sm:$0xff] %v6014_v59  ;;  %v6022_v63 = vld [vmem:[#allocation5 + $0x7c0] sm:$0xff]  ;;  %v6031_v22 = vld [vmem:[#allocation5 + $0x788] sm:$0xff] }
  0xe7   :  { %v6009_v21 = vadd.f32 %v248_v4, %v5982_v0  ;;  %1352 = vmatpush1.msra.mxu1 %v6011_v52  ;;  %1310 = vmatprep.subr.mxu0 %v6014_v59  ;;  %10226 = vst [vmem:[#allocation91_spill] sm:$0xff] %v6022_v63  ;;  %10229 = vst [vmem:[#allocation94_spill] sm:$0xff] %v6031_v22 }
  0xe8   :  { %v250_v9 = vpop.f32.mrf.mxu1  ;;  %v6017_v42 = vpop.f32.mrf.mxu0  ;;  %1353 = vmatprep.subr.mxu1 %v6019_v36  ;;  %1311 = vmatpush2.msra.mxu0 %v6022_v63  ;;  %v6037_v36 = vld [vmem:[#allocation5 + $0x780] sm:$0xff]  ;;  %v6046_v63 = vld [vmem:[#allocation5 + $0x310] sm:$0xff] }
  0xe9   :  { %10222 = vst [vmem:[#allocation87_spill] sm:$0xff] %v6009_v21  ;;  %v6026_v4 = vadd.f32 %v250_v9, %v5992_v16  ;;  %v6028_v21 = vld [vmem:[#allocation5 + $0x350] sm:$0xff]  ;;  %1312 = vmatprep.subr.mxu0 %v6031_v22  ;;  %10231 = vst [vmem:[#allocation96_spill] sm:$0xff] %v6037_v36  ;;  %v6049_v22 = vld [vmem:[#allocation5 + $0x748] sm:$0xff] }
  0xea   :  { %10228 = vst [vmem:[#allocation93_spill] sm:$0xff] %v6028_v21  ;;  %1354 = vmatpush1.msra.mxu1 %v6028_v21  ;;  %v254_v59 = vpop.f32.mrf.mxu1  ;;  %v230_v52 = vpop.f32.mrf.mxu0  ;;  %1313 = vmatpush2.msra.mxu0 %v6037_v36  ;;  %10234 = vst [vmem:[#allocation99_spill] sm:$0xff] %v6046_v63  ;;  %v6055_v36 = vld [vmem:[#allocation5 + $0x740] sm:$0xff] }
  0xeb   :  { %10227 = vst [vmem:[#allocation92_spill] sm:$0xff] %v6026_v4  ;;  %1355 = vmatprep.subr.mxu1 %v6034_v29  ;;  %v6041_v9 = vadd.f32 %v254_v59, %v5982_v0  ;;  %v6044_v4 = vadd.f32 %v230_v52, %v5982_v0  ;;  %10235 = vst [vmem:[#allocation100_spill] sm:$0xff] %v6049_v22  ;;  %1314 = vmatprep.subr.mxu0 %v6049_v22 }
  0xec   :  { %1356 = vmatpush1.msra.mxu1 %v6046_v63  ;;  %v256_v21 = vpop.f32.mrf.mxu1  ;;  %v232_v29 = vpop.f32.mrf.mxu0  ;;  %10237 = vst [vmem:[#allocation102_spill] sm:$0xff] %v6055_v36  ;;  %1315 = vmatpush2.msra.mxu0 %v6055_v36  ;;  %v6070_v63 = vld [vmem:[#allocation5 + $0x298] sm:$0xff]  ;;  %v6073_v36 = vld [vmem:[#allocation5 + $0x700] sm:$0xff] }
  0xed   :  { %10232 = vst [vmem:[#allocation97_spill] sm:$0xff] %v6041_v9  ;;  %10233 = vst [vmem:[#allocation98_spill] sm:$0xff] %v6044_v4  ;;  %1357 = vmatprep.subr.mxu1 %v6052_v14  ;;  %v6059_v59 = vadd.f32 %v256_v21, %v5992_v16  ;;  %v6062_v52 = vadd.f32 %v232_v29, %v5992_v16  ;;  %v6064_v9 = vld [vmem:[#allocation5 + $0x2d0] sm:$0xff]  ;;  %v6067_v4 = vld [vmem:[#allocation5 + $0x708] sm:$0xff] }
  0xee   :  { %10240 = vst [vmem:[#allocation105_spill] sm:$0xff] %v6064_v9  ;;  %1358 = vmatpush1.msra.mxu1 %v6064_v9  ;;  %10241 = vst [vmem:[#allocation106_spill] sm:$0xff] %v6067_v4  ;;  %1316 = vmatprep.subr.mxu0 %v6067_v4  ;;  %v260_v22 = vpop.f32.mrf.mxu1  ;;  %v236_v14 = vpop.f32.mrf.mxu0  ;;  %v111_v9 = vsub.s32 4, %v5930_v45 }
  0xef   :  { %10238 = vst [vmem:[#allocation103_spill] sm:$0xff] %v6059_v59  ;;  %10239 = vst [vmem:[#allocation104_spill] sm:$0xff] %v6062_v52  ;;  %1359 = vmatprep.subr.mxu1 %v6070_v63  ;;  %1317 = vmatpush2.msra.mxu0 %v6073_v36  ;;  %v6077_v29 = vadd.f32 %v260_v22, %v5982_v0  ;;  %v6080_v21 = vadd.f32 %v236_v14, %v5982_v0  ;;  %v6082_v59 = vld [vmem:[#allocation5 + $0x290] sm:$0xff]  ;;  %v6085_v52 = vld [vmem:[#allocation5 + $0x6c8] sm:$0xff] }
  0xf0   :  { %10242 = vst [vmem:[#allocation107_spill] sm:$0xff] %v6070_v63  ;;  %10243 = vst [vmem:[#allocation108_spill] sm:$0xff] %v6073_v36  ;;  %1360 = vmatpush1.msra.mxu1 %v6082_v59  ;;  %1318 = vmatprep.subr.mxu0 %v6085_v52  ;;  %v262_v4 = vpop.f32.mrf.mxu1  ;;  %v238_v63 = vpop.f32.mrf.mxu0  ;;  %v6092_v22 = vld [vmem:[#allocation5 + $0x6c0] sm:$0xff] }
  0xf1   :  { %10244 = vst [vmem:[#allocation109_spill] sm:$0xff] %v6077_v29  ;;  %10245 = vst [vmem:[#allocation110_spill] sm:$0xff] %v6080_v21  ;;  %1361 = vmatprep.subr.mxu1 %v6089_v8  ;;  %1319 = vmatpush2.msra.mxu0 %v6092_v22  ;;  %v6096_v14 = vadd.f32 %v262_v4, %v5992_v16  ;;  %v6099_v29 = vadd.f32 %v238_v63, %v5992_v16  ;;  %v6101_v21 = vld [vmem:[#allocation5 + $0x250] sm:$0xff]  ;;  %v6111_v4 = vld [vmem:[#allocation5 + $0x680] sm:$0xff] }
  0xf2   :  { %10246 = vst [vmem:[#allocation111_spill] sm:$0xff] %v6082_v59  ;;  %10247 = vst [vmem:[#allocation112_spill] sm:$0xff] %v6085_v52  ;;  %1362 = vmatpush1.msra.mxu1 %v6101_v21  ;;  %v6104_v52 = vld [vmem:[#allocation5 + $0x688] sm:$0xff]  ;;  %v266_v36 = vpop.f32.mrf.mxu1  ;;  %v242_v8 = vpop.f32.mrf.mxu0  ;;  %v115_v59 = vsub.s32 5, %v5930_v45 }
  0xf3   :  { %10249 = vst [vmem:[#allocation114_spill] sm:$0xff] %v6092_v22  ;;  %10250 = vst [vmem:[#allocation115_spill] sm:$0xff] %v6096_v14  ;;  %1320 = vmatprep.subr.mxu0 %v6104_v52  ;;  %1363 = vmatprep.subr.mxu1 %v6108_v10  ;;  %v6115_v63 = vadd.f32 %v266_v36, %v5982_v0  ;;  %v6118_v14 = vadd.f32 %v242_v8, %v5982_v0  ;;  %v6132_v36 = vld [vmem:[#allocation5 + $0x640] sm:$0xff] }
  0xf4   :  { %10251 = vst [vmem:[#allocation116_spill] sm:$0xff] %v6099_v29  ;;  %10252 = vst [vmem:[#allocation117_spill] sm:$0xff] %v6101_v21  ;;  %1321 = vmatpush2.msra.mxu0 %v6111_v4  ;;  %v6120_v29 = vld [vmem:[#allocation5 + $0x210] sm:$0xff]  ;;  %v268_v22 = vpop.f32.mrf.mxu1  ;;  %v244_v10 = vpop.f32.mrf.mxu0  ;;  %v6127_v21 = vrot.slane %v5966_v56, %v111_v9  ;;  %v6145_v9 = vld [vmem:[#allocation5 + $0x608] sm:$0xff] }
  0xf5   :  { %10253 = vst [vmem:[#allocation118_spill] sm:$0xff] %v6104_v52  ;;  %10255 = vst [vmem:[#allocation120_spill] sm:$0xff] %v6111_v4  ;;  %1364 = vmatpush1.msra.mxu1 %v6120_v29  ;;  %v6123_v52 = vld [vmem:[#allocation5 + $0x648] sm:$0xff]  ;;  %v6129_v4 = vld [vmem:[#allocation5 + $0x1d8] sm:$0xff]  ;;  %v6136_v8 = vadd.f32 %v268_v22, %v5992_v16 }
  0xf6   :  { %10256 = vst [vmem:[#allocation121_spill] sm:$0xff] %v6115_v63  ;;  %10257 = vst [vmem:[#allocation122_spill] sm:$0xff] %v6118_v14  ;;  %1322 = vmatprep.subr.mxu0 %v6123_v52  ;;  %1365 = vmatprep.subr.mxu1 %v6129_v4  ;;  %v103_v63 = vsub.s32 2, %v5930_v45  ;;  %v6140_v14 = vadd.f32 %v244_v10, %v5992_v16  ;;  %v6153_v22 = vld [vmem:[#allocation5 + $0x198] sm:$0xff]  ;;  %v107_v10 = vsub.s32 3, %v5930_v45 }
  0xf7   :  { %10258 = vst [vmem:[#allocation123_spill] sm:$0xff] %v6120_v29  ;;  %10259 = vst [vmem:[#allocation124_spill] sm:$0xff] %v6123_v52  ;;  %1323 = vmatpush2.msra.mxu0 %v6132_v36  ;;  %v6142_v52 = vld [vmem:[#allocation5 + $0x1d0] sm:$0xff] }
  0xf8   :  { %10260 = vst [vmem:[#allocation125_spill] sm:$0xff] %v6129_v4  ;;  %10261 = vst [vmem:[#allocation126_spill] sm:$0xff] %v6132_v36  ;;  %1366 = vmatpush1.msra.mxu1 %v6142_v52  ;;  %1324 = vmatprep.subr.mxu0 %v6145_v9  ;;  %v6148_v4 = vpop.f32.mrf.mxu1  ;;  %v6151_v36 = vrot.slane %v5966_v56, %v115_v59  ;;  %v6178_v61 = vrot.slane %v5966_v56, %v103_v63 }
  0xf9   :  { %10262 = vst [vmem:[#allocation127_spill] sm:$0xff] %v6136_v8  ;;  %10263 = vst [vmem:[#allocation128_spill] sm:$0xff] %v6140_v14  ;;  %1367 = vmatprep.subr.mxu1 %v6153_v22  ;;  %v6156_v8 = vld [vmem:[#allocation5 + $0x600] sm:$0xff]  ;;  %v450_v14 = vpop.f32.mrf.mxu0  ;;  %v6196_v63 = vrot.slane %v5966_v56, %v107_v10 }
  0xfa   :  { %10264 = vst [vmem:[#allocation129_spill] sm:$0xff] %v6142_v52  ;;  %10265 = vst [vmem:[#allocation130_spill] sm:$0xff] %v6145_v9  ;;  %1325 = vmatpush2.msra.mxu0 %v6156_v8  ;;  %v6160_v52 = vld [vmem:[#allocation5 + $0x190] sm:$0xff]  ;;  %v6163_v9 = vld [vmem:[#allocation5 + $0x5c8] sm:$0xff]  ;;  %v6166_v59 = vpop.f32.mrf.mxu1  ;;  %v6169_v29 = vadd.f32 %v450_v14, %v6127_v21 }
  0xfb   :  { %10266 = vst [vmem:[#allocation131_spill] sm:$0xff] %v6153_v22  ;;  %10267 = vst [vmem:[#allocation132_spill] sm:$0xff] %v6156_v8  ;;  %1368 = vmatpush1.msra.mxu1 %v6160_v52  ;;  %1326 = vmatprep.subr.mxu0 %v6163_v9  ;;  %v6171_v22 = vld [vmem:[#allocation5 + $0x158] sm:$0xff]  ;;  %v6174_v8 = vld [vmem:[#allocation5 + $0x5c0] sm:$0xff] }
  0xfc   :  { %10268 = vst [vmem:[#allocation133_spill] sm:$0xff] %v6160_v52  ;;  %10269 = vst [vmem:[#allocation134_spill] sm:$0xff] %v6163_v9  ;;  %1369 = vmatprep.subr.mxu1 %v6171_v22  ;;  %1327 = vmatpush2.msra.mxu0 %v6174_v8  ;;  %v452_v52 = vpop.f32.mrf.mxu0  ;;  %v6183_v9 = vld [vmem:[#allocation5 + $0x588] sm:$0xff]  ;;  %v343_v14 = vpop.f32.mrf.mxu1 }
  0xfd   :  { %10270 = vst [vmem:[#allocation135_spill] sm:$0xff] %v6169_v29  ;;  %10271 = vst [vmem:[#allocation136_spill] sm:$0xff] %v6171_v22  ;;  %1370 = vmatpush1.msra.mxu1 %v6180_v27  ;;  %1328 = vmatprep.subr.mxu0 %v6183_v9  ;;  %v6187_v29 = vadd.f32 %v452_v52, %v6151_v36  ;;  %v6189_v22 = vld [vmem:[#allocation5 + $0x118] sm:$0xff]  ;;  %v6199_v27 = vadd.f32 %v343_v14, %v6178_v61  ;;  %v6204_v52 = vld [vmem:[#allocation5 + $0x548] sm:$0xff] }
  0xfe   :  { %10272 = vst [vmem:[#allocation137_spill] sm:$0xff] %v6174_v8  ;;  %10274 = vst [vmem:[#allocation139_spill] sm:$0xff] %v6183_v9  ;;  %1371 = vmatprep.subr.mxu1 %v6189_v22  ;;  %v6192_v8 = vld [vmem:[#allocation5 + $0x580] sm:$0xff]  ;;  %v6215_v14 = vld [vmem:[#allocation5 + $0x508] sm:$0xff] }
  0xff   :  { %10275 = vst [vmem:[#allocation140_spill] sm:$0xff] %v6187_v29  ;;  %1329 = vmatpush2.msra.mxu0 %v6192_v8  ;;  %10276 = vst [vmem:[#allocation141_spill] sm:$0xff] %v6199_v27  ;;  %1372 = vmatpush1.msra.mxu1 %v6201_v54  ;;  %v345_v29 = vpop.f32.mrf.mxu1  ;;  %v6208_v9 = vld [vmem:[#allocation5 + $0x540] sm:$0xff] }
 0x100   :  { %10277 = vst [vmem:[#allocation142_spill] sm:$0xff] %v6204_v52  ;;  %1330 = vmatprep.subr.mxu0 %v6204_v52  ;;  %1373 = vmatprep.subr.mxu1 %v5598_v3  ;;  %v6212_v10 = vadd.f32 %v345_v29, %v6196_v63  ;;  %v6219_v52 = vld [vmem:[#allocation5 + $0x500] sm:$0xff]  ;;  %v6226_v29 = vld [vmem:[#allocation5 + $0x4c8] sm:$0xff] }
 0x101   :  { %1331 = vmatpush2.msra.mxu0 %v6208_v9  ;;  %1374 = vmatpush1.msra.mxu1 %v5600_v5  ;;  %v349_v27 = vpop.f32.mrf.mxu1 }
 0x102   :  { %10278 = vst [vmem:[#allocation143_spill] sm:$0xff] %v6212_v10  ;;  %1332 = vmatprep.subr.mxu0 %v6215_v14  ;;  %1375 = vmatprep.subr.mxu1 %v5604_v7  ;;  %v6223_v3 = vadd.f32 %v349_v27, %v6178_v61  ;;  %v6230_v10 = vld [vmem:[#allocation5 + $0x4c0] sm:$0xff]  ;;  %v6237_v27 = vld [vmem:[#allocation5 + $0x488] sm:$0xff] }
 0x103   :  { %1333 = vmatpush2.msra.mxu0 %v6219_v52  ;;  %1376 = vmatpush1.msra.mxu1 %v5607_v11  ;;  %v351_v5 = vpop.f32.mrf.mxu1 }
 0x104   :  { %10279 = vst [vmem:[#allocation144_spill] sm:$0xff] %v6223_v3  ;;  %1334 = vmatprep.subr.mxu0 %v6226_v29  ;;  %1377 = vmatprep.subr.mxu1 %v5612_v13  ;;  %v6234_v7 = vadd.f32 %v351_v5, %v6196_v63  ;;  %v6241_v3 = vld [vmem:[#allocation5 + $0x480] sm:$0xff]  ;;  %v6248_v5 = vld [vmem:[#allocation5 + $0x448] sm:$0xff] }
 0x105   :  { %1335 = vmatpush2.msra.mxu0 %v6230_v10  ;;  %1378 = vmatpush1.msra.mxu1 %v5615_v17  ;;  %v355_v11 = vpop.f32.mrf.mxu1 }
 0x106   :  { %10280 = vst [vmem:[#allocation145_spill] sm:$0xff] %v6234_v7  ;;  %1336 = vmatprep.subr.mxu0 %v6237_v27  ;;  %1379 = vmatprep.subr.mxu1 %v5619_v19  ;;  %v6245_v13 = vadd.f32 %v355_v11, %v6178_v61  ;;  %v6252_v7 = vld [vmem:[#allocation5 + $0x440] sm:$0xff]  ;;  %v6259_v11 = vld [vmem:[#allocation5 + $0x408] sm:$0xff] }
 0x107   :  { %1337 = vmatpush2.msra.mxu0 %v6241_v3  ;;  %1380 = vmatpush1.msra.mxu1 %v5622_v23  ;;  %v357_v17 = vpop.f32.mrf.mxu1 }
 0x108   :  { %10281 = vst [vmem:[#allocation146_spill] sm:$0xff] %v6245_v13  ;;  %1338 = vmatprep.subr.mxu0 %v6248_v5  ;;  %1381 = vmatprep.subr.mxu1 %v5625_v24  ;;  %v6256_v19 = vadd.f32 %v357_v17, %v6196_v63  ;;  %v6263_v13 = vld [vmem:[#allocation5 + $0x400] sm:$0xff] }
 0x109   :  { %1339 = vmatpush2.msra.mxu0 %v6252_v7  ;;  %1382 = vmatpush2.msra.mxu1 %v5630_v26  ;;  %v361_v23 = vpop.f32.mrf.mxu1 }
 0x10a   :  { %10282 = vst [vmem:[#allocation147_spill] sm:$0xff] %v6256_v19  ;;  %1340 = vmatprep.subr.mxu0 %v6259_v11  ;;  %1383 = vmatprep.subr.mxu1 %v5634_v30  ;;  %v6267_v24 = vadd.f32 %v361_v23, %v6178_v61 }
 0x10b   :  { %1341 = vmatpush2.msra.mxu0 %v6263_v13  ;;  %1384 = vmatpush2.msra.mxu1 %v5640_v32  ;;  %v363_v17 = vpop.f32.mrf.mxu1 }
 0x10c   :  { %10283 = vst [vmem:[#allocation148_spill] sm:$0xff] %v6267_v24  ;;  %1420 = vmatprep.subr.mxu0 %v5628_v25  ;;  %1385 = vmatprep.subr.mxu1 %v5643_v33  ;;  %v6273_v26 = vadd.f32 %v363_v17, %v6196_v63  ;;  %v6511_v24 = vld [vmem:[#allocation5 + $0x1a8] sm:$0xff] }
 0x10d   :  { %1386 = vmatpush2.msra.mxu1 %v5646_v35  ;;  %v367_v30 = vpop.f32.mrf.mxu1  ;;  %v456_v32 = vpop.f32.mrf.mxu0 }
 0x10e   :  { %10284 = vst [vmem:[#allocation149_spill] sm:$0xff] %v6273_v26  ;;  %1387 = vmatprep.subr.mxu1 %v5649_v37  ;;  %v6278_v19 = vadd.f32 %v367_v30, %v6178_v61  ;;  %v6287_v35 = vadd.f32 %v456_v32, %v6127_v21  ;;  %v10316_v26 = vld [vmem:[#allocation12_spill] sm:$0xff] }
 0x10f   :  { %1388 = vmatpush2.msra.mxu1 %v5655_v39  ;;  %v369_v23 = vpop.f32.mrf.mxu1  ;;  %v458_v17 = vpop.f32.mrf.mxu0 }
 0x110   :  { %10285 = vst [vmem:[#allocation150_spill] sm:$0xff] %v6278_v19  ;;  %1389 = vmatprep.subr.mxu1 %v5658_v41  ;;  %v6283_v25 = vadd.f32 %v369_v23, %v6196_v63  ;;  %10287 = vst [vmem:[#allocation152_spill] sm:$0xff] %v6287_v35  ;;  %v6295_v41 = vadd.f32 %v458_v17, %v6151_v36  ;;  %v6495_v19 = vld [vmem:[#allocation5 + $0x228] sm:$0xff] }
 0x111   :  { %1390 = vmatpush2.msra.mxu1 %v5661_v43  ;;  %v373_v33 = vpop.f32.mrf.mxu1  ;;  %v462_v30 = vpop.f32.mrf.mxu0 }
 0x112   :  { %10286 = vst [vmem:[#allocation151_spill] sm:$0xff] %v6283_v25  ;;  %1391 = vmatprep.subr.mxu1 %v5664_v44  ;;  %v6291_v37 = vadd.f32 %v373_v33, %v6178_v61  ;;  %10289 = vst [vmem:[#allocation154_spill] sm:$0xff] %v6295_v41  ;;  %v6303_v44 = vadd.f32 %v462_v30, %v6127_v21 }
 0x113   :  { %1392 = vmatpush2.msra.mxu1 %v5670_v46  ;;  %v375_v39 = vpop.f32.mrf.mxu1  ;;  %v464_v32 = vpop.f32.mrf.mxu0 }
 0x114   :  { %10288 = vst [vmem:[#allocation153_spill] sm:$0xff] %v6291_v37  ;;  %1393 = vmatprep.subr.mxu1 %v5673_v48  ;;  %v6299_v43 = vadd.f32 %v375_v39, %v6196_v63  ;;  %10291 = vst [vmem:[#allocation156_spill] sm:$0xff] %v6303_v44  ;;  %v6311_v48 = vadd.f32 %v464_v32, %v6151_v36  ;;  %v10315_v44 = vld [vmem:[#allocation11_spill] sm:$0xff] }
 0x115   :  { %1394 = vmatpush2.msra.mxu1 %v5676_v50  ;;  %v379_v23 = vpop.f32.mrf.mxu1  ;;  %v468_v17 = vpop.f32.mrf.mxu0 }
 0x116   :  { %10290 = vst [vmem:[#allocation155_spill] sm:$0xff] %v6299_v43  ;;  %1395 = vmatprep.subr.mxu1 %v5679_v51  ;;  %v6307_v46 = vadd.f32 %v379_v23, %v6178_v61  ;;  %10293 = vst [vmem:[#allocation158_spill] sm:$0xff] %v6311_v48  ;;  %v6319_v51 = vadd.f32 %v468_v17, %v6127_v21  ;;  %v6491_v48 = vld [vmem:[#allocation5 + $0x260] sm:$0xff] }
 0x117   :  { %1396 = vmatpush2.msra.mxu1 %v5685_v53  ;;  %v381_v33 = vpop.f32.mrf.mxu1  ;;  %v470_v39 = vpop.f32.mrf.mxu0 }
 0x118   :  { %10292 = vst [vmem:[#allocation157_spill] sm:$0xff] %v6307_v46  ;;  %1397 = vmatprep.subr.mxu1 %v5688_v55  ;;  %v6315_v50 = vadd.f32 %v381_v33, %v6196_v63  ;;  %10295 = vst [vmem:[#allocation160_spill] sm:$0xff] %v6319_v51  ;;  %v6324_v53 = vadd.f32 %v470_v39, %v6151_v36  ;;  %v6507_v51 = vld [vmem:[#allocation5 + $0x1e0] sm:$0xff] }
 0x119   :  { %1398 = vmatpush2.msra.mxu1 %v5691_v57 }
 0x11a   :  { %10294 = vst [vmem:[#allocation159_spill] sm:$0xff] %v6315_v50  ;;  %1399 = vmatprep.subr.mxu1 %v5694_v58  ;;  %10296 = vst [vmem:[#allocation161_spill] sm:$0xff] %v6324_v53  ;;  %v6503_v53 = vld [vmem:[#allocation5 + $0x1e8] sm:$0xff] }
 0x11b   :  { %1400 = vmatpush2.msra.mxu1 %v5700_v60 }
 0x11c   :  { %1401 = vmatprep.subr.mxu1 %v5703_v62 }
 0x11d   :  { %1402 = vmatpush2.msra.mxu1 %v5706_v1 }
 0x11e   :  { %1403 = vmatprep.subr.mxu1 %v5709_v2 }
 0x11f   :  { %1404 = vmatpush2.msra.mxu1 %v5715_v6 }
 0x120   :  { %1405 = vmatprep.subr.mxu1 %v5718_v12 }
 0x121   :  { %1406 = vmatpush2.msra.mxu1 %v5721_v18 }
 0x122   :  { %1407 = vmatprep.subr.mxu1 %v5724_v20 }
 0x123   :  { %1408 = vmatpush2.msra.mxu1 %v5730_v31 }
 0x124   :  { %1409 = vmatprep.subr.mxu1 %v5733_v34  ;;  %v6357_v34 = vpop.f32.mrf.mxu1 }
 0x125   :  { %1410 = vmatpush2.msra.mxu1 %v5736_v38  ;;  %10301 = vst [vmem:[#allocation166_spill] sm:$0xff] %v6357_v34  ;;  %v227_v34 = vadd.f32 %v6017_v42, %v5992_v16 }
 0x126   :  { %1411 = vmatprep.subr.mxu1 %v5739_v40  ;;  %v6359_v38 = vpop.f32.mrf.mxu1 }
 0x127   :  { %1412 = vmatpush2.msra.mxu1 %v5744_v15  ;;  %v474_v55 = vpop.f32.mrf.mxu0  ;;  %10302 = vst [vmem:[#allocation167_spill] sm:$0xff] %v6359_v38 }
 0x128   :  { %1491 = vmatprep.subr.mxu1 %v5749_v49  ;;  %v6340_v57 = vadd.f32 %v474_v55, %v6127_v21 }
 0x129   :  { %v476_v58 = vpop.f32.mrf.mxu0 }
 0x12a   :  { %10297 = vst [vmem:[#allocation162_spill] sm:$0xff] %v6340_v57  ;;  %v6343_v60 = vadd.f32 %v476_v58, %v6151_v36  ;;  %v6527_v57 = vld [vmem:[#allocation5 + $0x128] sm:$0xff] }
 0x12b   :  { %10325 = vst [vmem:[#allocation12_spill] sm:$0xff] %v6527_v57 }
 0x12c   :  { %10298 = vst [vmem:[#allocation163_spill] sm:$0xff] %v6343_v60  ;;  %v480_v62 = vpop.f32.mrf.mxu0  ;;  %v6523_v60 = vld [vmem:[#allocation5 + $0x160] sm:$0xff] }
 0x12d   :  { %v6346_v1 = vadd.f32 %v480_v62, %v6127_v21  ;;  %10323 = vst [vmem:[#allocation11_spill] sm:$0xff] %v6523_v60 }
 0x12e   :  { %v482_v2 = vpop.f32.mrf.mxu0 }
 0x12f   :  { %10299 = vst [vmem:[#allocation164_spill] sm:$0xff] %v6346_v1  ;;  %v6349_v6 = vadd.f32 %v482_v2, %v6151_v36  ;;  %v6543_v1 = vld [vmem:[#allocation5 + $0xa8] sm:$0xff] }
 0x131   :  { %10300 = vst [vmem:[#allocation165_spill] sm:$0xff] %v6349_v6  ;;  %v486_v12 = vpop.f32.mrf.mxu0  ;;  %v6539_v6 = vld [vmem:[#allocation5 + $0xe0] sm:$0xff] }
 0x132   :  { %v6352_v18 = vadd.f32 %v486_v12, %v6127_v21 }
 0x133   :  { %v488_v20 = vpop.f32.mrf.mxu0 }
 0x134   :  { %v6355_v31 = vadd.f32 %v488_v20, %v6151_v36  ;;  %v225_v20 = vadd.f32 %v6000_v47, %v5982_v0 }
 0x136   :  { %v492_v17 = vpop.f32.mrf.mxu0 }
 0x137   :  { %v493_v41 = vadd.f32 %v492_v17, %v6127_v21  ;;  %v340_v21 = vadd.f32 %v6166_v59, %v6196_v63 }
 0x138   :  { %v494_v55 = vpop.f32.mrf.mxu0 }
 0x13b   :  { %v996_v62 = vpop.f32.mrf.mxu0 }
 0x13c   :  { %v1222_v46 = vadd.f32 %v996_v62, %v225_v20 }
 0x13d   :  { %v998_v12 = vpop.f32.mrf.mxu0 }
 0x13e   :  { %v1223_v43 = vadd.f32 %v998_v12, %v227_v34  ;;  %v3994_v35 = vmul.f32 -1.442695, %v1222_v46 }
 0x140   :  { %v6361_v40 = vpop.f32.mrf.mxu1  ;;  %4093 = vpow2.f32 %v3994_v35  ;;  %v119_v35 = vsub.s32 6, %v5930_v45 }
 0x141   :  { %10303 = vst [vmem:[#allocation168_spill] sm:$0xff] %v6361_v40 }
 0x142   :  { %v6363_v15 = vpop.f32.mrf.mxu1  ;;  %v6398_v17 = vrot.slane %v5966_v56, %v119_v35 }
 0x143   :  { %10304 = vst [vmem:[#allocation169_spill] sm:$0xff] %v6363_v15  ;;  %v495_v15 = vadd.f32 %v494_v55, %v6151_v36 }
 0x145   :  { %v6365_v49 = vpop.f32.mrf.mxu1 }
 0x146   :  { %10305 = vst [vmem:[#allocation170_spill] sm:$0xff] %v6365_v49  ;;  %v3996_v49 = vmul.f32 -1.442695, %v1223_v43  ;;  %v338_v43 = vadd.f32 %v6148_v4, %v6178_v61 }
 0x147   :  { %v6367_v30 = vpop.f32.mrf.mxu1 }
 0x148   :  { %10306 = vst [vmem:[#allocation171_spill] sm:$0xff] %v6367_v30  ;;  %4095 = vpow2.f32 %v3996_v49 }
 0x14a   :  { %v6369_v23 = vpop.f32.mrf.mxu1 }
 0x14b   :  { %10307 = vst [vmem:[#allocation172_spill] sm:$0xff] %v6369_v23  ;;  %v6499_v23 = vld [vmem:[#allocation5 + $0x220] sm:$0xff] }
 0x14c   :  { %v6371_v32 = vpop.f32.mrf.mxu1 }
 0x14d   :  { %10308 = vst [vmem:[#allocation173_spill] sm:$0xff] %v6371_v32  ;;  %v4094_v12 = vpop.eup %4093  ;;  %v10317_v32 = vld [vmem:[#allocation13_spill] sm:$0xff] }
 0x14f   :  { %v6373_v33 = vpop.f32.mrf.mxu1 }
 0x150   :  { %10309 = vst [vmem:[#allocation174_spill] sm:$0xff] %v6373_v33  ;;  %v6515_v33 = vld [vmem:[#allocation5 + $0x1a0] sm:$0xff] }
 0x151   :  { %v6375_v39 = vpop.f32.mrf.mxu1 }
 0x152   :  { %10310 = vst [vmem:[#allocation175_spill] sm:$0xff] %v6375_v39  ;;  %v6519_v39 = vld [vmem:[#allocation5 + $0x168] sm:$0xff] }
 0x154   :  { %v6377_v58 = vpop.f32.mrf.mxu1 }
 0x155   :  { %10311 = vst [vmem:[#allocation176_spill] sm:$0xff] %v6377_v58  ;;  %v4096_v36 = vpop.eup %4095  ;;  %v6531_v58 = vld [vmem:[#allocation5 + $0x120] sm:$0xff] }
 0x156   :  { %v6379_v2 = vpop.f32.mrf.mxu1  ;;  %10327 = vst [vmem:[#allocation13_spill] sm:$0xff] %v6531_v58 }
 0x157   :  { %10312 = vst [vmem:[#allocation177_spill] sm:$0xff] %v6379_v2  ;;  %v6535_v2 = vld [vmem:[#allocation5 + $0xe8] sm:$0xff] }
 0x159   :  { %v6385_v50 = vpop.f32.mrf.mxu1 }
 0x15b   :  { %v6389_v37 = vpop.f32.mrf.mxu1 }
 0x15e   :  { %v605_v0 = vpop.f32.mrf.mxu1 }
 0x15f   :  { %v606_v61 = vadd.f32 %v605_v0, %v6398_v17 }
 0x160   :  { %v607_v16 = vpop.f32.mrf.mxu1 }
 0x163   :  { %v1067_v34 = vpop.f32.mrf.mxu1 }
 0x164   :  { %v1224_v49 = vadd.f32 %v1067_v34, %v338_v43 }
 0x165   :  { %v1069_v62 = vpop.f32.mrf.mxu1 }
 0x166   :  { %v1225_v46 = vadd.f32 %v1069_v62, %v340_v21 }
 0x184   :  { %v1138_v38 = vpop.f32.mrf.mxu0 }
 0x185   :  { %v1226_v30 = vadd.f32 %v1138_v38, %v493_v41  ;;  %v1236_v41 = vadd.f32 1.0, %v4094_v12  ;;  %v1248_v38 = vadd.f32 1.0, %v4096_v36 }
 0x186   :  { %v1140_v40 = vpop.f32.mrf.mxu0 }
 0x187   :  { %v1227_v25 = vadd.f32 %v1140_v40, %v495_v15  ;;  %v3995_v42 = vmul.f32 -1.442695, %v1226_v30  ;;  %v123_v15 = vsub.s32 7, %v5930_v45  ;;  %v3998_v30 = vmul.f32 -1.442695, %v1225_v46 }
 0x189   :  { %v3997_v47 = vmul.f32 -1.442695, %v1227_v25  ;;  %v6401_v55 = vrot.slane %v5966_v56, %v123_v15 }
 0x18b   :  { %4097 = vpow2.f32 %v3997_v47  ;;  %v608_v20 = vadd.f32 %v607_v16, %v6401_v55 }
 0x18c   :  { %4099 = vpow2.f32 %v3995_v42 }
 0x18d   :  { %4101 = vrcp.f32 %v1236_v41 }
 0x18e   :  { %4103 = vrcp.f32 %v1248_v38 }
 0x18f   :  { %4105 = vtanh.f32 %v1224_v49 }
 0x190   :  { %4107 = vpow2.f32 %v3998_v30 }
 0x198   :  { %v4098_v25 = vpop.eup %4097 }
 0x199   :  { %v4100_v40 = vpop.eup %4099  ;;  %v1249_v59 = vadd.f32 1.0, %v4098_v25 }
 0x19a   :  { %v1237_v63 = vadd.f32 1.0, %v4100_v40  ;;  %v4102_v62 = vpop.eup %4101 }
 0x19b   :  { %4109 = vrcp.f32 %v1249_v59  ;;  %v4104_v12 = vpop.eup %4103 }
 0x19c   :  { %4111 = vrcp.f32 %v1237_v63  ;;  %v4106_v21 = vpop.eup %4105  ;;  %v1268_v16 = vmul.f32 0.0, %v4104_v12  ;;  %v6436_v12 = vld [vmem:[#allocation5 + $0x3b0] sm:$0xff] }
 0x19d   :  { %v4108_v56 = vpop.eup %4107  ;;  %v1270_v43 = vmul.f32 %v4106_v21, %v4102_v62  ;;  %v6433_v62 = vld [vmem:[#allocation5 + $0x3a0] sm:$0xff]  ;;  %v6439_v21 = vld [vmem:[#allocation5 + $0x368] sm:$0xff] }
 0x19e   :  { %v1262_v35 = vadd.f32 1.0, %v4108_v56  ;;  %v6442_v56 = vld [vmem:[#allocation5 + $0x378] sm:$0xff] }
 0x19f   :  { %v6407_v15 = vadd.f32 %v1270_v43, %v1268_v16  ;;  %v6454_v43 = vld [vmem:[#allocation5 + $0x338] sm:$0xff] }
 0x1a0   :  { %v6466_v16 = vld [vmem:[#allocation5 + $0x2f8] sm:$0xff] }
 0x1a4   :  { %v1209_v4 = vpop.f32.mrf.mxu1 }
 0x1a5   :  { %v1228_v45 = vadd.f32 %v1209_v4, %v606_v61 }
 0x1a6   :  { %v1211_v47 = vpop.f32.mrf.mxu1 }
 0x1a7   :  { %4113 = vtanh.f32 %v1228_v45  ;;  %v1229_v42 = vadd.f32 %v1211_v47, %v608_v20  ;;  %v6419_v45 = vld [vmem:[#allocation5 + $0x3e0] sm:$0xff]  ;;  %v6422_v47 = vld [vmem:[#allocation5 + $0x3f0] sm:$0xff] }
 0x1a8   :  { %v4110_v36 = vpop.eup %4109 }
 0x1a9   :  { %v3999_v34 = vmul.f32 -1.442695, %v1229_v42  ;;  %v4112_v46 = vpop.eup %4111  ;;  %v1269_v41 = vmul.f32 0.0, %v4110_v36  ;;  %v6425_v42 = vld [vmem:[#allocation5 + $0x3a8] sm:$0xff]  ;;  %v6445_v36 = vld [vmem:[#allocation5 + $0x360] sm:$0xff] }
 0x1ab   :  { %4115 = vpow2.f32 %v3999_v34  ;;  %v6429_v34 = vld [vmem:[#allocation5 + $0x3b8] sm:$0xff] }
 0x1ac   :  { %4117 = vrcp.f32 %v1262_v35  ;;  %v6457_v35 = vld [vmem:[#allocation5 + $0x320] sm:$0xff] }
 0x1b4   :  { %v4114_v0 = vpop.eup %4113 }
 0x1b5   :  { %v1271_v25 = vmul.f32 %v4114_v0, %v4112_v46  ;;  %v6448_v46 = vld [vmem:[#allocation5 + $0x370] sm:$0xff]  ;;  %v6451_v0 = vld [vmem:[#allocation5 + $0x328] sm:$0xff] }
 0x1b7   :  { %v6405_v38 = vadd.f32 %v1271_v25, %v1269_v41  ;;  %v6460_v41 = vld [vmem:[#allocation5 + $0x330] sm:$0xff]  ;;  %v6463_v25 = vld [vmem:[#allocation5 + $0x2e8] sm:$0xff] }
 0x1b8   :  { %v4116_v40 = vpop.eup %4115 }
 0x1b9   :  { %v1263_v49 = vadd.f32 1.0, %v4116_v40  ;;  %4119 = vtanh.f32 %v6405_v38  ;;  %v4118_v30 = vpop.eup %4117  ;;  %v6469_v40 = vld [vmem:[#allocation5 + $0x2e0] sm:$0xff] }
 0x1bb   :  { %4121 = vrcp.f32 %v1263_v49  ;;  %v6472_v49 = vld [vmem:[#allocation5 + $0x2f0] sm:$0xff] }
 0x1bc   :  { %4123 = vtanh.f32 %v6407_v15 }
 0x1c6   :  { %v4120_v59 = vpop.eup %4119 }
 0x1c8   :  { %v4122_v63 = vpop.eup %4121 }
 0x1c9   :  { %v4124_v61 = vpop.eup %4123  ;;  %v6411_v4 = vmul.f32 %v4122_v63, %v4120_v59  ;;  %v6478_v59 = vld [vmem:[#allocation5 + $0x2b8] sm:$0xff]  ;;  %v6481_v63 = vld [vmem:[#allocation5 + $0x2a0] sm:$0xff] }
 0x1ca   :  { %v6413_v20 = vmul.f32 %v4124_v61, %v4118_v30  ;;  %v6475_v30 = vld [vmem:[#allocation5 + $0x2a8] sm:$0xff]  ;;  %v6484_v61 = vld [vmem:[#allocation5 + $0x2b0] sm:$0xff] }
 0x1cb   :  { %10313 = vst [vmem:[#allocation178_spill] sm:$0xff] %v6411_v4  ;;  %1342 = vmatprep.mubr.f32.mxu0 %v6411_v4  ;;  %1413 = vmatprep.mubr.f32.mxu1 %v6411_v4 }
 0x1cc   :  { %10314 = vst [vmem:[#allocation179_spill] sm:$0xff] %v6413_v20  ;;  %1343 = vmatmul.mubr.f32.vlgmr.msra.gmra.mxu0 %v6413_v20  ;;  %1414 = vmatmul.mubr.f32.vlgmr.msra.gmra.mxu1 %v6413_v20 }
 0x1cd   :  { %1421 = vmatpush1.msra.mxu0 %v6419_v45  ;;  %1492 = vmatpush1.msra.mxu1 %v6422_v47 }
 0x1ce   :  { %1422 = vmatprep.subr.mxu0 %v6425_v42  ;;  %1484 = vmatprep.mubr.f32.mxu0 %v6411_v4 }
 0x1cf   :  { %1493 = vmatprep.subr.mxu1 %v6429_v34  ;;  %1555 = vmatprep.mubr.f32.mxu1 %v6411_v4  ;;  %v6487_v4 = vld [vmem:[#allocation5 + $0x268] sm:$0xff] }
 0x1d0   :  { %1423 = vmatpush1.msra.mxu0 %v6433_v62  ;;  %1494 = vmatpush1.msra.mxu1 %v6436_v12 }
 0x1d1   :  { %1424 = vmatprep.subr.mxu0 %v6439_v21  ;;  %1495 = vmatprep.subr.mxu1 %v6442_v56 }
 0x1d2   :  { %1425 = vmatpush1.msra.mxu0 %v6445_v36  ;;  %1496 = vmatpush1.msra.mxu1 %v6448_v46 }
 0x1d3   :  { %1426 = vmatprep.subr.mxu0 %v6451_v0  ;;  %1497 = vmatprep.subr.mxu1 %v6454_v43 }
 0x1d4   :  { %1427 = vmatpush1.msra.mxu0 %v6457_v35  ;;  %1498 = vmatpush1.msra.mxu1 %v6460_v41 }
 0x1d5   :  { %1428 = vmatprep.subr.mxu0 %v6463_v25  ;;  %1499 = vmatprep.subr.mxu1 %v6466_v16 }
 0x1d6   :  { %1429 = vmatpush1.msra.mxu0 %v6469_v40  ;;  %1500 = vmatpush1.msra.mxu1 %v6472_v49 }
 0x1d7   :  { %1430 = vmatprep.subr.mxu0 %v6475_v30  ;;  %1501 = vmatprep.subr.mxu1 %v6478_v59 }
 0x1d8   :  { %1431 = vmatpush1.msra.mxu0 %v6481_v63  ;;  %1502 = vmatpush1.msra.mxu1 %v6484_v61 }
 0x1d9   :  { %1432 = vmatprep.subr.mxu0 %v6487_v4  ;;  %1503 = vmatprep.subr.mxu1 %v5754_v28  ;;  %v10318_v28 = vld [vmem:[#allocation14_spill] sm:$0xff] }
 0x1da   :  { %1433 = vmatpush1.msra.mxu0 %v6491_v48  ;;  %1504 = vmatpush1.msra.mxu1 %v10315_v44  ;;  %v10319_v44 = vld [vmem:[#allocation15_spill] sm:$0xff]  ;;  %10329 = vst [vmem:[#allocation14_spill] sm:$0xff] %v6535_v2 }
 0x1db   :  { %1434 = vmatprep.subr.mxu0 %v6495_v19  ;;  %1505 = vmatprep.subr.mxu1 %v10316_v26  ;;  %v10320_v26 = vld [vmem:[#allocation16_spill] sm:$0xff]  ;;  %10331 = vst [vmem:[#allocation15_spill] sm:$0xff] %v6539_v6 }
 0x1dc   :  { %1435 = vmatpush1.msra.mxu0 %v6499_v23  ;;  %1506 = vmatpush1.msra.mxu1 %v10317_v32  ;;  %v10321_v32 = vld [vmem:[#allocation17_spill] sm:$0xff]  ;;  %10333 = vst [vmem:[#allocation16_spill] sm:$0xff] %v6543_v1 }
 0x1dd   :  { %1436 = vmatprep.subr.mxu0 %v6503_v53  ;;  %1507 = vmatprep.subr.mxu1 %v10318_v28  ;;  %v10322_v28 = vld [vmem:[#allocation18_spill] sm:$0xff] }
 0x1de   :  { %1437 = vmatpush1.msra.mxu0 %v6507_v51  ;;  %1508 = vmatpush1.msra.mxu1 %v10319_v44  ;;  %v10324_v44 = vld [vmem:[#allocation19_spill] sm:$0xff] }
 0x1df   :  { %1438 = vmatprep.subr.mxu0 %v6511_v24  ;;  %1509 = vmatprep.subr.mxu1 %v10320_v26  ;;  %v10326_v26 = vld [vmem:[#allocation20_spill] sm:$0xff] }
 0x1e0   :  { %1439 = vmatpush1.msra.mxu0 %v6515_v33  ;;  %1510 = vmatpush1.msra.mxu1 %v10321_v32  ;;  %v10328_v32 = vld [vmem:[#allocation21_spill] sm:$0xff] }
 0x1e1   :  { %1440 = vmatprep.subr.mxu0 %v6519_v39  ;;  %1511 = vmatprep.subr.mxu1 %v10322_v28  ;;  %v10330_v28 = vld [vmem:[#allocation22_spill] sm:$0xff] }
 0x1e2   :  { %1441 = vmatpush1.msra.mxu0 %v6523_v60  ;;  %1512 = vmatpush1.msra.mxu1 %v10324_v44  ;;  %v10332_v44 = vld [vmem:[#allocation23_spill] sm:$0xff]  ;;  %v10437_v60 = vld [vmem:[#allocation54_spill] sm:$0xff] }
 0x1e3   :  { %1442 = vmatprep.subr.mxu0 %v6527_v57  ;;  %1513 = vmatprep.subr.mxu1 %v10326_v26  ;;  %v10334_v26 = vld [vmem:[#allocation24_spill] sm:$0xff]  ;;  %v10434_v57 = vld [vmem:[#allocation113_spill] sm:$0xff] }
 0x1e4   :  { %1443 = vmatpush1.msra.mxu0 %v6531_v58  ;;  %1514 = vmatpush1.msra.mxu1 %v10328_v32  ;;  %v6547_v58 = vld [vmem:[#allocation5 + $0xa0] sm:$0xff]  ;;  %v10336_v32 = vld [vmem:[#allocation25_spill] sm:$0xff] }
 0x1e5   :  { %1444 = vmatprep.subr.mxu0 %v6535_v2  ;;  %1515 = vmatprep.subr.mxu1 %v10330_v28  ;;  %10335 = vst [vmem:[#allocation17_spill] sm:$0xff] %v6547_v58  ;;  %v6551_v2 = vld [vmem:[#allocation5 + $0x68] sm:$0xff]  ;;  %v10338_v28 = vld [vmem:[#allocation26_spill] sm:$0xff] }
 0x1e6   :  { %1445 = vmatpush1.msra.mxu0 %v6539_v6  ;;  %1516 = vmatpush1.msra.mxu1 %v10332_v44  ;;  %10337 = vst [vmem:[#allocation18_spill] sm:$0xff] %v6551_v2  ;;  %v6555_v6 = vld [vmem:[#allocation5 + $0x60] sm:$0xff] }
 0x1e7   :  { %1446 = vmatprep.subr.mxu0 %v6543_v1  ;;  %1517 = vmatprep.subr.mxu1 %v10334_v26  ;;  %10339 = vst [vmem:[#allocation19_spill] sm:$0xff] %v6555_v6  ;;  %v10340_v44 = vld [vmem:[#allocation27_spill] sm:$0xff]  ;;  %v6559_v1 = vld [vmem:[#allocation5 + $0x28] sm:$0xff] }
 0x1e8   :  { %1447 = vmatpush1.msra.mxu0 %v6547_v58  ;;  %1518 = vmatpush1.msra.mxu1 %v10336_v32  ;;  %10341 = vst [vmem:[#allocation20_spill] sm:$0xff] %v6559_v1  ;;  %v10342_v26 = vld [vmem:[#allocation28_spill] sm:$0xff]  ;;  %v6563_v58 = vld [vmem:[#allocation5 + $0x20] sm:$0xff]  ;;  %v10344_v32 = vld [vmem:[#allocation29_spill] sm:$0xff] }
 0x1e9   :  { %1448 = vmatprep.subr.mxu0 %v6551_v2  ;;  %1519 = vmatprep.subr.mxu1 %v10338_v28  ;;  %10343 = vst [vmem:[#allocation21_spill] sm:$0xff] %v6563_v58  ;;  %v6567_v2 = vld [vmem:[#allocation5 + $0x7e8] sm:$0xff]  ;;  %v10346_v28 = vld [vmem:[#allocation30_spill] sm:$0xff] }
 0x1ea   :  { %1449 = vmatpush1.msra.mxu0 %v6555_v6  ;;  %1520 = vmatpush1.msra.mxu1 %v10340_v44  ;;  %10345 = vst [vmem:[#allocation22_spill] sm:$0xff] %v6567_v2  ;;  %v6571_v6 = vld [vmem:[#allocation5 + $0x7e0] sm:$0xff] }
 0x1eb   :  { %1450 = vmatprep.subr.mxu0 %v6559_v1  ;;  %1521 = vmatprep.subr.mxu1 %v10342_v26  ;;  %10347 = vst [vmem:[#allocation23_spill] sm:$0xff] %v6571_v6  ;;  %v10348_v44 = vld [vmem:[#allocation31_spill] sm:$0xff]  ;;  %v6575_v1 = vld [vmem:[#allocation5 + $0x7a8] sm:$0xff] }
 0x1ec   :  { %1451 = vmatpush1.msra.mxu0 %v6563_v58  ;;  %1522 = vmatpush1.msra.mxu1 %v10344_v32  ;;  %10349 = vst [vmem:[#allocation24_spill] sm:$0xff] %v6575_v1  ;;  %v10350_v26 = vld [vmem:[#allocation32_spill] sm:$0xff]  ;;  %v6579_v58 = vld [vmem:[#allocation5 + $0x7a0] sm:$0xff]  ;;  %v10352_v32 = vld [vmem:[#allocation33_spill] sm:$0xff] }
 0x1ed   :  { %1452 = vmatprep.subr.mxu0 %v6567_v2  ;;  %1523 = vmatprep.subr.mxu1 %v10346_v28  ;;  %10351 = vst [vmem:[#allocation25_spill] sm:$0xff] %v6579_v58  ;;  %v6583_v2 = vld [vmem:[#allocation5 + $0x768] sm:$0xff]  ;;  %v10354_v28 = vld [vmem:[#allocation34_spill] sm:$0xff] }
 0x1ee   :  { %1453 = vmatpush2.msra.mxu0 %v6571_v6  ;;  %1524 = vmatpush2.msra.mxu1 %v10348_v44  ;;  %10353 = vst [vmem:[#allocation26_spill] sm:$0xff] %v6583_v2  ;;  %v6587_v6 = vld [vmem:[#allocation5 + $0x760] sm:$0xff] }
 0x1ef   :  { %1454 = vmatprep.subr.mxu0 %v6575_v1  ;;  %1525 = vmatprep.subr.mxu1 %v10350_v26  ;;  %10355 = vst [vmem:[#allocation27_spill] sm:$0xff] %v6587_v6  ;;  %v10356_v44 = vld [vmem:[#allocation35_spill] sm:$0xff]  ;;  %v6591_v1 = vld [vmem:[#allocation5 + $0x728] sm:$0xff] }
 0x1f0   :  { %1455 = vmatpush2.msra.mxu0 %v6579_v58  ;;  %1526 = vmatpush2.msra.mxu1 %v10352_v32  ;;  %10357 = vst [vmem:[#allocation28_spill] sm:$0xff] %v6591_v1  ;;  %v10358_v26 = vld [vmem:[#allocation36_spill] sm:$0xff]  ;;  %v6595_v58 = vld [vmem:[#allocation5 + $0x720] sm:$0xff]  ;;  %v10360_v32 = vld [vmem:[#allocation37_spill] sm:$0xff] }
 0x1f1   :  { %1456 = vmatprep.subr.mxu0 %v6583_v2  ;;  %1527 = vmatprep.subr.mxu1 %v10354_v28  ;;  %10359 = vst [vmem:[#allocation29_spill] sm:$0xff] %v6595_v58  ;;  %v6599_v2 = vld [vmem:[#allocation5 + $0x6e8] sm:$0xff]  ;;  %v10362_v28 = vld [vmem:[#allocation38_spill] sm:$0xff] }
 0x1f2   :  { %1457 = vmatpush2.msra.mxu0 %v6587_v6  ;;  %1528 = vmatpush2.msra.mxu1 %v10356_v44  ;;  %10361 = vst [vmem:[#allocation30_spill] sm:$0xff] %v6599_v2  ;;  %v6603_v6 = vld [vmem:[#allocation5 + $0x6e0] sm:$0xff] }
 0x1f3   :  { %1458 = vmatprep.subr.mxu0 %v6591_v1  ;;  %1529 = vmatprep.subr.mxu1 %v10358_v26  ;;  %10363 = vst [vmem:[#allocation31_spill] sm:$0xff] %v6603_v6  ;;  %v10364_v44 = vld [vmem:[#allocation39_spill] sm:$0xff]  ;;  %v6607_v1 = vld [vmem:[#allocation5 + $0x6a8] sm:$0xff] }
 0x1f4   :  { %1459 = vmatpush2.msra.mxu0 %v6595_v58  ;;  %1530 = vmatpush2.msra.mxu1 %v10360_v32  ;;  %10365 = vst [vmem:[#allocation32_spill] sm:$0xff] %v6607_v1  ;;  %v10366_v26 = vld [vmem:[#allocation40_spill] sm:$0xff]  ;;  %v6611_v58 = vld [vmem:[#allocation5 + $0x6a0] sm:$0xff]  ;;  %v10368_v32 = vld [vmem:[#allocation41_spill] sm:$0xff] }
 0x1f5   :  { %1460 = vmatprep.subr.mxu0 %v6599_v2  ;;  %1531 = vmatprep.subr.mxu1 %v10362_v28  ;;  %10367 = vst [vmem:[#allocation33_spill] sm:$0xff] %v6611_v58  ;;  %v6615_v2 = vld [vmem:[#allocation5 + $0x668] sm:$0xff]  ;;  %v10370_v28 = vld [vmem:[#allocation42_spill] sm:$0xff] }
 0x1f6   :  { %1461 = vmatpush2.msra.mxu0 %v6603_v6  ;;  %1532 = vmatpush2.msra.mxu1 %v10364_v44  ;;  %10369 = vst [vmem:[#allocation34_spill] sm:$0xff] %v6615_v2  ;;  %v6619_v6 = vld [vmem:[#allocation5 + $0x660] sm:$0xff] }
 0x1f7   :  { %1462 = vmatprep.subr.mxu0 %v6607_v1  ;;  %1533 = vmatprep.subr.mxu1 %v10366_v26  ;;  %10371 = vst [vmem:[#allocation35_spill] sm:$0xff] %v6619_v6  ;;  %v10372_v44 = vld [vmem:[#allocation43_spill] sm:$0xff]  ;;  %v6623_v1 = vld [vmem:[#allocation5 + $0x628] sm:$0xff] }
 0x1f8   :  { %1463 = vmatpush2.msra.mxu0 %v6611_v58  ;;  %1534 = vmatpush2.msra.mxu1 %v10368_v32  ;;  %10373 = vst [vmem:[#allocation36_spill] sm:$0xff] %v6623_v1  ;;  %v10374_v26 = vld [vmem:[#allocation44_spill] sm:$0xff]  ;;  %v6627_v58 = vld [vmem:[#allocation5 + $0x620] sm:$0xff]  ;;  %v10376_v32 = vld [vmem:[#allocation45_spill] sm:$0xff] }
 0x1f9   :  { %1464 = vmatprep.subr.mxu0 %v6615_v2  ;;  %1535 = vmatprep.subr.mxu1 %v10370_v28  ;;  %10375 = vst [vmem:[#allocation37_spill] sm:$0xff] %v6627_v58  ;;  %v6631_v2 = vld [vmem:[#allocation5 + $0x5e8] sm:$0xff]  ;;  %v10378_v28 = vld [vmem:[#allocation47_spill] sm:$0xff] }
 0x1fa   :  { %1465 = vmatpush2.msra.mxu0 %v6619_v6  ;;  %1536 = vmatpush2.msra.mxu1 %v10372_v44  ;;  %10377 = vst [vmem:[#allocation38_spill] sm:$0xff] %v6631_v2  ;;  %v6635_v6 = vld [vmem:[#allocation5 + $0x5e0] sm:$0xff]  ;;  %v10380_v44 = vld [vmem:[#allocation49_spill] sm:$0xff] }
 0x1fb   :  { %1466 = vmatprep.subr.mxu0 %v6623_v1  ;;  %1537 = vmatprep.subr.mxu1 %v10374_v26  ;;  %10379 = vst [vmem:[#allocation39_spill] sm:$0xff] %v6635_v6  ;;  %v6639_v1 = vld [vmem:[#allocation5 + $0x5a8] sm:$0xff]  ;;  %v10382_v26 = vld [vmem:[#allocation51_spill] sm:$0xff] }
 0x1fc   :  { %1467 = vmatpush2.msra.mxu0 %v6627_v58  ;;  %1538 = vmatpush2.msra.mxu1 %v10376_v32  ;;  %10381 = vst [vmem:[#allocation40_spill] sm:$0xff] %v6639_v1  ;;  %v6643_v58 = vld [vmem:[#allocation5 + $0x5a0] sm:$0xff]  ;;  %v10384_v32 = vld [vmem:[#allocation53_spill] sm:$0xff] }
 0x1fd   :  { %1468 = vmatprep.subr.mxu0 %v6631_v2  ;;  %1539 = vmatprep.subr.mxu1 %v10378_v28  ;;  %10383 = vst [vmem:[#allocation41_spill] sm:$0xff] %v6643_v58  ;;  %v6647_v2 = vld [vmem:[#allocation5 + $0x568] sm:$0xff]  ;;  %v10386_v28 = vld [vmem:[#allocation55_spill] sm:$0xff] }
 0x1fe   :  { %1469 = vmatpush2.msra.mxu0 %v6635_v6  ;;  %1540 = vmatpush2.msra.mxu1 %v10380_v44  ;;  %10385 = vst [vmem:[#allocation42_spill] sm:$0xff] %v6647_v2  ;;  %v6651_v6 = vld [vmem:[#allocation5 + $0x560] sm:$0xff]  ;;  %v10388_v44 = vld [vmem:[#allocation57_spill] sm:$0xff] }
 0x1ff   :  { %1470 = vmatprep.subr.mxu0 %v6639_v1  ;;  %1541 = vmatprep.subr.mxu1 %v10382_v26  ;;  %10387 = vst [vmem:[#allocation43_spill] sm:$0xff] %v6651_v6  ;;  %v6655_v1 = vld [vmem:[#allocation5 + $0x528] sm:$0xff]  ;;  %v10390_v26 = vld [vmem:[#allocation59_spill] sm:$0xff] }
 0x200   :  { %1471 = vmatpush2.msra.mxu0 %v6643_v58  ;;  %1542 = vmatpush2.msra.mxu1 %v10384_v32  ;;  %10389 = vst [vmem:[#allocation44_spill] sm:$0xff] %v6655_v1  ;;  %v6659_v58 = vld [vmem:[#allocation5 + $0x520] sm:$0xff]  ;;  %v10392_v32 = vld [vmem:[#allocation61_spill] sm:$0xff] }
 0x201   :  { %1472 = vmatprep.subr.mxu0 %v6647_v2  ;;  %1543 = vmatprep.subr.mxu1 %v10386_v28  ;;  %10391 = vst [vmem:[#allocation45_spill] sm:$0xff] %v6659_v58  ;;  %v6663_v2 = vld [vmem:[#allocation5 + $0x4e8] sm:$0xff]  ;;  %v10394_v28 = vld [vmem:[#allocation63_spill] sm:$0xff] }
 0x202   :  { %1473 = vmatpush2.msra.mxu0 %v6651_v6  ;;  %1544 = vmatpush2.msra.mxu1 %v10388_v44  ;;  %10393 = vst [vmem:[#allocation47_spill] sm:$0xff] %v6663_v2  ;;  %v6667_v6 = vld [vmem:[#allocation5 + $0x4e0] sm:$0xff]  ;;  %v10396_v44 = vld [vmem:[#allocation65_spill] sm:$0xff] }
 0x203   :  { %1474 = vmatprep.subr.mxu0 %v6655_v1  ;;  %1545 = vmatprep.subr.mxu1 %v10390_v26  ;;  %10395 = vst [vmem:[#allocation49_spill] sm:$0xff] %v6667_v6  ;;  %v6671_v1 = vld [vmem:[#allocation5 + $0x4a8] sm:$0xff]  ;;  %v10398_v26 = vld [vmem:[#allocation67_spill] sm:$0xff] }
 0x204   :  { %1475 = vmatpush2.msra.mxu0 %v6659_v58  ;;  %1546 = vmatpush2.msra.mxu1 %v10392_v32  ;;  %10397 = vst [vmem:[#allocation51_spill] sm:$0xff] %v6671_v1  ;;  %v6675_v58 = vld [vmem:[#allocation5 + $0x4a0] sm:$0xff]  ;;  %v10400_v32 = vld [vmem:[#allocation69_spill] sm:$0xff] }
 0x205   :  { %1476 = vmatprep.subr.mxu0 %v6663_v2  ;;  %1547 = vmatprep.subr.mxu1 %v10394_v28  ;;  %10399 = vst [vmem:[#allocation53_spill] sm:$0xff] %v6675_v58  ;;  %v6679_v2 = vld [vmem:[#allocation5 + $0x468] sm:$0xff]  ;;  %v10402_v28 = vld [vmem:[#allocation71_spill] sm:$0xff] }
 0x206   :  { %1477 = vmatpush2.msra.mxu0 %v6667_v6  ;;  %1548 = vmatpush2.msra.mxu1 %v10396_v44  ;;  %10401 = vst [vmem:[#allocation55_spill] sm:$0xff] %v6679_v2  ;;  %v6683_v6 = vld [vmem:[#allocation5 + $0x460] sm:$0xff]  ;;  %v10404_v44 = vld [vmem:[#allocation73_spill] sm:$0xff] }
 0x207   :  { %1478 = vmatprep.subr.mxu0 %v6671_v1  ;;  %1549 = vmatprep.subr.mxu1 %v10398_v26  ;;  %10403 = vst [vmem:[#allocation57_spill] sm:$0xff] %v6683_v6  ;;  %v6687_v1 = vld [vmem:[#allocation5 + $0x428] sm:$0xff]  ;;  %v10406_v26 = vld [vmem:[#allocation75_spill] sm:$0xff] }
 0x208   :  { %1479 = vmatpush2.msra.mxu0 %v6675_v58  ;;  %1550 = vmatpush2.msra.mxu1 %v10400_v32  ;;  %10405 = vst [vmem:[#allocation59_spill] sm:$0xff] %v6687_v1  ;;  %v6691_v58 = vld [vmem:[#allocation5 + $0x420] sm:$0xff]  ;;  %v10408_v32 = vld [vmem:[#allocation77_spill] sm:$0xff] }
 0x209   :  { %1480 = vmatprep.subr.mxu0 %v6679_v2  ;;  %1551 = vmatprep.subr.mxu1 %v10402_v28  ;;  %10407 = vst [vmem:[#allocation61_spill] sm:$0xff] %v6691_v58  ;;  %v6697_v28 = vld [vmem:[#allocation5 + $0x3c8] sm:$0xff] }
 0x20a   :  { %1481 = vmatpush2.msra.mxu0 %v6683_v6  ;;  %1552 = vmatpush2.msra.mxu1 %v10404_v44  ;;  %10409 = vst [vmem:[#allocation63_spill] sm:$0xff] %v6697_v28  ;;  %v10410_v44 = vld [vmem:[#allocation82_spill] sm:$0xff]  ;;  %v6701_v6 = vld [vmem:[#allocation5 + $0x3c0] sm:$0xff]  ;;  %v10431_v2 = vld [vmem:[#allocation48_spill] sm:$0xff] }
 0x20b   :  { %1482 = vmatprep.subr.mxu0 %v6687_v1  ;;  %1553 = vmatprep.subr.mxu1 %v10406_v26  ;;  %10411 = vst [vmem:[#allocation65_spill] sm:$0xff] %v6701_v6  ;;  %v10412_v26 = vld [vmem:[#allocation83_spill] sm:$0xff]  ;;  %v6705_v1 = vld [vmem:[#allocation5 + $0x388] sm:$0xff] }
 0x20c   :  { %1483 = vmatpush2.msra.mxu0 %v6691_v58  ;;  %1554 = vmatpush2.msra.mxu1 %v10408_v32  ;;  %10413 = vst [vmem:[#allocation67_spill] sm:$0xff] %v6705_v1  ;;  %v10414_v32 = vld [vmem:[#allocation85_spill] sm:$0xff]  ;;  %v6709_v58 = vld [vmem:[#allocation5 + $0x380] sm:$0xff] }
 0x20d   :  { %1485 = vmatmul.mubr.f32.vlgmr.msra.gmra.mxu0 %v6413_v20  ;;  %1556 = vmatmul.mubr.f32.vlgmr.msra.gmra.mxu1 %v6413_v20  ;;  %10415 = vst [vmem:[#allocation69_spill] sm:$0xff] %v6709_v58  ;;  %v10416_v20 = vld [vmem:[#allocation88_spill] sm:$0xff] }
 0x20e   :  { %1626 = vmatprep.subr.mxu0 %v6697_v28  ;;  %1697 = vmatprep.subr.mxu1 %v10410_v44  ;;  %v6713_v28 = vld [vmem:[#allocation5 + $0x348] sm:$0xff]  ;;  %v10418_v44 = vld [vmem:[#allocation90_spill] sm:$0xff] }
 0x20f   :  { %1627 = vmatpush1.msra.mxu0 %v6701_v6  ;;  %1698 = vmatpush1.msra.mxu1 %v10412_v26  ;;  %10417 = vst [vmem:[#allocation71_spill] sm:$0xff] %v6713_v28  ;;  %v6717_v6 = vld [vmem:[#allocation5 + $0x340] sm:$0xff]  ;;  %v10420_v26 = vld [vmem:[#allocation93_spill] sm:$0xff] }
 0x210   :  { %1628 = vmatprep.subr.mxu0 %v6705_v1  ;;  %1699 = vmatprep.subr.mxu1 %v10414_v32  ;;  %10419 = vst [vmem:[#allocation73_spill] sm:$0xff] %v6717_v6  ;;  %v6721_v1 = vld [vmem:[#allocation5 + $0x308] sm:$0xff]  ;;  %v10422_v32 = vld [vmem:[#allocation95_spill] sm:$0xff] }
 0x211   :  { %1629 = vmatpush1.msra.mxu0 %v6709_v58  ;;  %1700 = vmatpush1.msra.mxu1 %v10416_v20  ;;  %10421 = vst [vmem:[#allocation75_spill] sm:$0xff] %v6721_v1  ;;  %v6725_v58 = vld [vmem:[#allocation5 + $0x300] sm:$0xff] }
 0x212   :  { %1630 = vmatprep.subr.mxu0 %v6713_v28  ;;  %1701 = vmatprep.subr.mxu1 %v10418_v44  ;;  %10423 = vst [vmem:[#allocation77_spill] sm:$0xff] %v6725_v58  ;;  %v10424_v20 = vld [vmem:[#allocation99_spill] sm:$0xff]  ;;  %v6729_v28 = vld [vmem:[#allocation5 + $0x2c8] sm:$0xff]  ;;  %v10426_v44 = vld [vmem:[#allocation101_spill] sm:$0xff] }
 0x213   :  { %1631 = vmatpush1.msra.mxu0 %v6717_v6  ;;  %1702 = vmatpush1.msra.mxu1 %v10420_v26  ;;  %10425 = vst [vmem:[#allocation82_spill] sm:$0xff] %v6729_v28  ;;  %v6733_v6 = vld [vmem:[#allocation5 + $0x2c0] sm:$0xff]  ;;  %v10428_v26 = vld [vmem:[#allocation105_spill] sm:$0xff] }
 0x214   :  { %1632 = vmatprep.subr.mxu0 %v6721_v1  ;;  %1703 = vmatprep.subr.mxu1 %v10422_v32  ;;  %10427 = vst [vmem:[#allocation83_spill] sm:$0xff] %v6733_v6  ;;  %v10429_v1 = vld [vmem:[#allocation46_spill] sm:$0xff]  ;;  %v10430_v32 = vld [vmem:[#allocation107_spill] sm:$0xff] }
 0x215   :  { %1633 = vmatpush1.msra.mxu0 %v6725_v58  ;;  %1704 = vmatpush1.msra.mxu1 %v10424_v20  ;;  %v10432_v58 = vld [vmem:[#allocation111_spill] sm:$0xff]  ;;  %v10433_v20 = vld [vmem:[#allocation50_spill] sm:$0xff] }
 0x216   :  { %1634 = vmatprep.subr.mxu0 %v6729_v28  ;;  %1705 = vmatprep.subr.mxu1 %v10426_v44  ;;  %v10435_v28 = vld [vmem:[#allocation52_spill] sm:$0xff]  ;;  %v10436_v44 = vld [vmem:[#allocation117_spill] sm:$0xff] }
 0x217   :  { %1635 = vmatpush1.msra.mxu0 %v6733_v6  ;;  %1706 = vmatpush1.msra.mxu1 %v10428_v26  ;;  %v10438_v6 = vld [vmem:[#allocation119_spill] sm:$0xff]  ;;  %v10439_v26 = vld [vmem:[#allocation56_spill] sm:$0xff] }
 0x218   :  { %1636 = vmatprep.subr.mxu0 %v10429_v1  ;;  %1707 = vmatprep.subr.mxu1 %v10430_v32  ;;  %v10440_v1 = vld [vmem:[#allocation123_spill] sm:$0xff]  ;;  %v10441_v32 = vld [vmem:[#allocation58_spill] sm:$0xff] }
 0x219   :  { %1637 = vmatpush1.msra.mxu0 %v10431_v2  ;;  %1708 = vmatpush1.msra.mxu1 %v10432_v58  ;;  %v10442_v2 = vld [vmem:[#allocation125_spill] sm:$0xff]  ;;  %v10443_v58 = vld [vmem:[#allocation60_spill] sm:$0xff] }
 0x21a   :  { %1638 = vmatprep.subr.mxu0 %v10433_v20  ;;  %1709 = vmatprep.subr.mxu1 %v10434_v57  ;;  %v10444_v20 = vld [vmem:[#allocation129_spill] sm:$0xff]  ;;  %v10445_v57 = vld [vmem:[#allocation62_spill] sm:$0xff] }
 0x21b   :  { %1639 = vmatpush1.msra.mxu0 %v10435_v28  ;;  %1710 = vmatpush1.msra.mxu1 %v10436_v44  ;;  %v10446_v28 = vld [vmem:[#allocation131_spill] sm:$0xff]  ;;  %v10447_v44 = vld [vmem:[#allocation64_spill] sm:$0xff] }
 0x21c   :  { %1640 = vmatprep.subr.mxu0 %v10437_v60  ;;  %1711 = vmatprep.subr.mxu1 %v10438_v6  ;;  %v10448_v60 = vld [vmem:[#allocation133_spill] sm:$0xff]  ;;  %v10449_v6 = vld [vmem:[#allocation66_spill] sm:$0xff] }
 0x21d   :  { %1641 = vmatpush1.msra.mxu0 %v10439_v26  ;;  %1712 = vmatpush1.msra.mxu1 %v10440_v1  ;;  %v10450_v26 = vld [vmem:[#allocation136_spill] sm:$0xff] }
 0x21e   :  { %1642 = vmatprep.subr.mxu0 %v10441_v32  ;;  %1713 = vmatprep.subr.mxu1 %v10442_v2  ;;  %v10451_v1 = vld [vmem:[#allocation68_spill] sm:$0xff]  ;;  %v10452_v32 = vld [vmem:[#allocation138_spill] sm:$0xff] }
 0x21f   :  { %1643 = vmatpush1.msra.mxu0 %v10443_v58  ;;  %1714 = vmatpush1.msra.mxu1 %v10444_v20  ;;  %v10453_v2 = vld [vmem:[#allocation70_spill] sm:$0xff]  ;;  %v10454_v58 = vld [vmem:[#allocation72_spill] sm:$0xff] }
 0x220   :  { %1644 = vmatprep.subr.mxu0 %v10445_v57  ;;  %1715 = vmatprep.subr.mxu1 %v10446_v28  ;;  %v10455_v20 = vld [vmem:[#allocation74_spill] sm:$0xff]  ;;  %v10456_v28 = vld [vmem:[#allocation76_spill] sm:$0xff] }
 0x221   :  { %1645 = vmatpush1.msra.mxu0 %v10447_v44  ;;  %1716 = vmatpush1.msra.mxu1 %v10448_v60  ;;  %v6766_v57 = vld [vmem:[#allocation5 + $0xd8] sm:$0xff]  ;;  %v6770_v44 = vld [vmem:[#allocation5 + $0xd0] sm:$0xff] }
 0x222   :  { %1646 = vmatprep.subr.mxu0 %v10449_v6  ;;  %1717 = vmatprep.subr.mxu1 %v10450_v26  ;;  %v10457_v60 = vld [vmem:[#allocation78_spill] sm:$0xff]  ;;  %v10459_v26 = vld [vmem:[#allocation80_spill] sm:$0xff] }
 0x223   :  { %1647 = vmatpush1.msra.mxu0 %v10451_v1  ;;  %1718 = vmatpush1.msra.mxu1 %v10452_v32  ;;  %v6774_v6 = vld [vmem:[#allocation5 + $0x98] sm:$0xff]  ;;  %v10460_v32 = vld [vmem:[#allocation81_spill] sm:$0xff] }
 0x224   :  { %1648 = vmatprep.subr.mxu0 %v10453_v2  ;;  %1719 = vmatprep.subr.mxu1 %v6189_v22  ;;  %v10458_v22 = vld [vmem:[#allocation79_spill] sm:$0xff]  ;;  %v6782_v1 = vld [vmem:[#allocation5 + $0x58] sm:$0xff]  ;;  %v6786_v2 = vld [vmem:[#allocation5 + $0x50] sm:$0xff] }
 0x225   :  { %1649 = vmatpush1.msra.mxu0 %v10454_v58  ;;  %1720 = vmatpush1.msra.mxu1 %v6201_v54  ;;  %v6778_v54 = vld [vmem:[#allocation5 + $0x90] sm:$0xff]  ;;  %10461 = vst [vmem:[#allocation85_spill] sm:$0xff] %v6786_v2  ;;  %v10462_v58 = vld [vmem:[#allocation84_spill] sm:$0xff] }
 0x226   :  { %1650 = vmatprep.subr.mxu0 %v10455_v20  ;;  %1721 = vmatprep.subr.mxu1 %v6766_v57  ;;  %v6790_v20 = vld [vmem:[#allocation5 + $0x18] sm:$0xff] }
 0x227   :  { %1651 = vmatpush1.msra.mxu0 %v10456_v28  ;;  %1722 = vmatpush1.msra.mxu1 %v6770_v44  ;;  %10463 = vst [vmem:[#allocation88_spill] sm:$0xff] %v6790_v20  ;;  %v10464_v28 = vld [vmem:[#allocation86_spill] sm:$0xff] }
 0x228   :  { %1652 = vmatprep.subr.mxu0 %v10457_v60  ;;  %1723 = vmatprep.subr.mxu1 %v6774_v6  ;;  %v6794_v60 = vld [vmem:[#allocation5 + $0x10] sm:$0xff] }
 0x229   :  { %1653 = vmatpush1.msra.mxu0 %v10458_v22  ;;  %1724 = vmatpush1.msra.mxu1 %v6778_v54  ;;  %10465 = vst [vmem:[#allocation90_spill] sm:$0xff] %v6794_v60  ;;  %v10466_v22 = vld [vmem:[#allocation89_spill] sm:$0xff] }
 0x22a   :  { %1654 = vmatprep.subr.mxu0 %v10459_v26  ;;  %1725 = vmatprep.subr.mxu1 %v6782_v1  ;;  %v6798_v26 = vld [vmem:[#allocation5 + $0x7d8] sm:$0xff] }
 0x22b   :  { %1655 = vmatpush1.msra.mxu0 %v10460_v32  ;;  %1726 = vmatpush1.msra.mxu1 %v6786_v2  ;;  %10467 = vst [vmem:[#allocation93_spill] sm:$0xff] %v6798_v26  ;;  %v10468_v32 = vld [vmem:[#allocation91_spill] sm:$0xff]  ;;  %v6802_v2 = vld [vmem:[#allocation5 + $0x7d0] sm:$0xff] }
 0x22c   :  { %1656 = vmatprep.subr.mxu0 %v10462_v58  ;;  %1727 = vmatprep.subr.mxu1 %v6790_v20  ;;  %10469 = vst [vmem:[#allocation95_spill] sm:$0xff] %v6802_v2  ;;  %v10470_v58 = vld [vmem:[#allocation94_spill] sm:$0xff] }
 0x22d   :  { %1657 = vmatpush1.msra.mxu0 %v10464_v28  ;;  %1728 = vmatpush1.msra.mxu1 %v6794_v60  ;;  %v6806_v20 = vld [vmem:[#allocation5 + $0x798] sm:$0xff]  ;;  %v10472_v28 = vld [vmem:[#allocation96_spill] sm:$0xff]  ;;  %v6810_v60 = vld [vmem:[#allocation5 + $0x790] sm:$0xff] }
 0x22e   :  { %1658 = vmatprep.subr.mxu0 %v10466_v22  ;;  %1729 = vmatprep.subr.mxu1 %v6798_v26  ;;  %10471 = vst [vmem:[#allocation99_spill] sm:$0xff] %v6806_v20  ;;  %10473 = vst [vmem:[#allocation101_spill] sm:$0xff] %v6810_v60  ;;  %v10474_v22 = vld [vmem:[#allocation100_spill] sm:$0xff]  ;;  %v6814_v26 = vld [vmem:[#allocation5 + $0x758] sm:$0xff] }
 0x22f   :  { %1659 = vmatpush2.msra.mxu0 %v10468_v32  ;;  %1730 = vmatpush2.msra.mxu1 %v6802_v2  ;;  %10475 = vst [vmem:[#allocation105_spill] sm:$0xff] %v6814_v26  ;;  %v10476_v32 = vld [vmem:[#allocation102_spill] sm:$0xff]  ;;  %v6818_v2 = vld [vmem:[#allocation5 + $0x750] sm:$0xff] }
 0x230   :  { %1660 = vmatprep.subr.mxu0 %v10470_v58  ;;  %1731 = vmatprep.subr.mxu1 %v6806_v20  ;;  %10477 = vst [vmem:[#allocation46_spill] sm:$0xff] %v6818_v2  ;;  %v10478_v58 = vld [vmem:[#allocation106_spill] sm:$0xff] }
 0x231   :  { %1661 = vmatpush2.msra.mxu0 %v10472_v28  ;;  %1732 = vmatpush2.msra.mxu1 %v6810_v60  ;;  %v6822_v20 = vld [vmem:[#allocation5 + $0x718] sm:$0xff]  ;;  %v10480_v28 = vld [vmem:[#allocation108_spill] sm:$0xff]  ;;  %v6826_v60 = vld [vmem:[#allocation5 + $0x710] sm:$0xff] }
 0x232   :  { %1662 = vmatprep.subr.mxu0 %v10474_v22  ;;  %1733 = vmatprep.subr.mxu1 %v6814_v26  ;;  %10479 = vst [vmem:[#allocation107_spill] sm:$0xff] %v6822_v20  ;;  %10481 = vst [vmem:[#allocation48_spill] sm:$0xff] %v6826_v60  ;;  %v10482_v22 = vld [vmem:[#allocation112_spill] sm:$0xff]  ;;  %v6830_v26 = vld [vmem:[#allocation5 + $0x6d8] sm:$0xff] }
 0x233   :  { %1663 = vmatpush2.msra.mxu0 %v10476_v32  ;;  %1734 = vmatpush2.msra.mxu1 %v6818_v2  ;;  %10483 = vst [vmem:[#allocation111_spill] sm:$0xff] %v6830_v26  ;;  %v10484_v32 = vld [vmem:[#allocation114_spill] sm:$0xff]  ;;  %v6834_v2 = vld [vmem:[#allocation5 + $0x6d0] sm:$0xff] }
 0x234   :  { %1664 = vmatprep.subr.mxu0 %v10478_v58  ;;  %1735 = vmatprep.subr.mxu1 %v6822_v20  ;;  %10485 = vst [vmem:[#allocation50_spill] sm:$0xff] %v6834_v2  ;;  %v10486_v58 = vld [vmem:[#allocation118_spill] sm:$0xff] }
 0x235   :  { %1665 = vmatpush2.msra.mxu0 %v10480_v28  ;;  %1736 = vmatpush2.msra.mxu1 %v6826_v60  ;;  %v6838_v20 = vld [vmem:[#allocation5 + $0x698] sm:$0xff]  ;;  %v10488_v28 = vld [vmem:[#allocation120_spill] sm:$0xff]  ;;  %v6842_v60 = vld [vmem:[#allocation5 + $0x690] sm:$0xff] }
 0x236   :  { %1666 = vmatprep.subr.mxu0 %v10482_v22  ;;  %1737 = vmatprep.subr.mxu1 %v6830_v26  ;;  %10487 = vst [vmem:[#allocation113_spill] sm:$0xff] %v6838_v20  ;;  %10489 = vst [vmem:[#allocation52_spill] sm:$0xff] %v6842_v60  ;;  %v10490_v22 = vld [vmem:[#allocation124_spill] sm:$0xff]  ;;  %v6846_v26 = vld [vmem:[#allocation5 + $0x658] sm:$0xff] }
 0x237   :  { %1667 = vmatpush2.msra.mxu0 %v10484_v32  ;;  %1738 = vmatpush2.msra.mxu1 %v6834_v2  ;;  %10491 = vst [vmem:[#allocation117_spill] sm:$0xff] %v6846_v26  ;;  %v10492_v32 = vld [vmem:[#allocation126_spill] sm:$0xff]  ;;  %v6850_v2 = vld [vmem:[#allocation5 + $0x650] sm:$0xff] }
 0x238   :  { %1668 = vmatprep.subr.mxu0 %v10486_v58  ;;  %1739 = vmatprep.subr.mxu1 %v6838_v20  ;;  %10493 = vst [vmem:[#allocation54_spill] sm:$0xff] %v6850_v2  ;;  %v10494_v58 = vld [vmem:[#allocation130_spill] sm:$0xff] }
 0x239   :  { %1669 = vmatpush2.msra.mxu0 %v10488_v28  ;;  %1740 = vmatpush2.msra.mxu1 %v6842_v60  ;;  %v6854_v20 = vld [vmem:[#allocation5 + $0x618] sm:$0xff]  ;;  %v10496_v28 = vld [vmem:[#allocation132_spill] sm:$0xff]  ;;  %v6858_v60 = vld [vmem:[#allocation5 + $0x610] sm:$0xff] }
 0x23a   :  { %1670 = vmatprep.subr.mxu0 %v10490_v22  ;;  %1741 = vmatprep.subr.mxu1 %v6846_v26  ;;  %10495 = vst [vmem:[#allocation119_spill] sm:$0xff] %v6854_v20  ;;  %v10497_v22 = vld [vmem:[#allocation134_spill] sm:$0xff] }
 0x23b   :  { %1671 = vmatpush2.msra.mxu0 %v10492_v32  ;;  %1742 = vmatpush2.msra.mxu1 %v6850_v2  ;;  %v6862_v26 = vld [vmem:[#allocation5 + $0x5d8] sm:$0xff]  ;;  %v10499_v32 = vld [vmem:[#allocation137_spill] sm:$0xff] }
 0x23c   :  { %1672 = vmatprep.subr.mxu0 %v10494_v58  ;;  %1743 = vmatprep.subr.mxu1 %v6854_v20  ;;  %10498 = vst [vmem:[#allocation56_spill] sm:$0xff] %v6862_v26  ;;  %v6866_v2 = vld [vmem:[#allocation5 + $0x5d0] sm:$0xff]  ;;  %v10500_v58 = vld [vmem:[#allocation139_spill] sm:$0xff]  ;;  %v6870_v20 = vld [vmem:[#allocation5 + $0x598] sm:$0xff] }
 0x23d   :  { %1673 = vmatpush2.msra.mxu0 %v10496_v28  ;;  %1744 = vmatpush2.msra.mxu1 %v6858_v60  ;;  %v6874_v28 = vld [vmem:[#allocation5 + $0x590] sm:$0xff] }
 0x23e   :  { %1674 = vmatprep.subr.mxu0 %v10497_v22  ;;  %1745 = vmatprep.subr.mxu1 %v6862_v26  ;;  %10501 = vst [vmem:[#allocation123_spill] sm:$0xff] %v6874_v28  ;;  %v10502_v22 = vld [vmem:[#allocation142_spill] sm:$0xff] }
 0x23f   :  { %1675 = vmatpush2.msra.mxu0 %v10499_v32  ;;  %1746 = vmatpush2.msra.mxu1 %v6866_v2  ;;  %v6878_v26 = vld [vmem:[#allocation5 + $0x558] sm:$0xff]  ;;  %v6882_v32 = vld [vmem:[#allocation5 + $0x550] sm:$0xff] }
 0x240   :  { %1676 = vmatprep.subr.mxu0 %v10500_v58  ;;  %1747 = vmatprep.subr.mxu1 %v6870_v20  ;;  %10503 = vst [vmem:[#allocation58_spill] sm:$0xff] %v6878_v26  ;;  %10504 = vst [vmem:[#allocation125_spill] sm:$0xff] %v6882_v32  ;;  %v6886_v58 = vld [vmem:[#allocation5 + $0x518] sm:$0xff] }
 0x241   :  { %1677 = vmatpush2.msra.mxu0 %v6192_v8  ;;  %1748 = vmatpush2.msra.mxu1 %v6874_v28  ;;  %10505 = vst [vmem:[#allocation60_spill] sm:$0xff] %v6886_v58  ;;  %v6890_v8 = vld [vmem:[#allocation5 + $0x510] sm:$0xff] }
 0x242   :  { %1678 = vmatprep.subr.mxu0 %v10502_v22  ;;  %1749 = vmatprep.subr.mxu1 %v6878_v26  ;;  %10506 = vst [vmem:[#allocation129_spill] sm:$0xff] %v6890_v8  ;;  %v6894_v22 = vld [vmem:[#allocation5 + $0x4d8] sm:$0xff] }
 0x243   :  { %1679 = vmatpush2.msra.mxu0 %v6208_v9  ;;  %1750 = vmatpush2.msra.mxu1 %v6882_v32  ;;  %10507 = vst [vmem:[#allocation62_spill] sm:$0xff] %v6894_v22  ;;  %v6898_v9 = vld [vmem:[#allocation5 + $0x4d0] sm:$0xff] }
 0x244   :  { %1680 = vmatprep.subr.mxu0 %v6215_v14  ;;  %1751 = vmatprep.subr.mxu1 %v6886_v58  ;;  %10508 = vst [vmem:[#allocation131_spill] sm:$0xff] %v6898_v9  ;;  %v6902_v14 = vld [vmem:[#allocation5 + $0x498] sm:$0xff] }
 0x245   :  { %1681 = vmatpush2.msra.mxu0 %v6219_v52  ;;  %1752 = vmatpush2.msra.mxu1 %v6890_v8  ;;  %10509 = vst [vmem:[#allocation64_spill] sm:$0xff] %v6902_v14  ;;  %v6906_v52 = vld [vmem:[#allocation5 + $0x490] sm:$0xff] }
 0x246   :  { %1682 = vmatprep.subr.mxu0 %v6226_v29  ;;  %1753 = vmatprep.subr.mxu1 %v6894_v22  ;;  %10510 = vst [vmem:[#allocation133_spill] sm:$0xff] %v6906_v52  ;;  %v6910_v29 = vld [vmem:[#allocation5 + $0x458] sm:$0xff] }
 0x247   :  { %1683 = vmatpush2.msra.mxu0 %v6230_v10  ;;  %1754 = vmatpush2.msra.mxu1 %v6898_v9  ;;  %10511 = vst [vmem:[#allocation66_spill] sm:$0xff] %v6910_v29  ;;  %v6914_v10 = vld [vmem:[#allocation5 + $0x450] sm:$0xff] }
 0x248   :  { %1684 = vmatprep.subr.mxu0 %v6237_v27  ;;  %1755 = vmatprep.subr.mxu1 %v6902_v14  ;;  %10512 = vst [vmem:[#allocation136_spill] sm:$0xff] %v6914_v10  ;;  %v6918_v27 = vld [vmem:[#allocation5 + $0x418] sm:$0xff] }
 0x249   :  { %1685 = vmatpush2.msra.mxu0 %v6241_v3  ;;  %1756 = vmatpush2.msra.mxu1 %v6906_v52  ;;  %10513 = vst [vmem:[#allocation68_spill] sm:$0xff] %v6918_v27  ;;  %v6922_v3 = vld [vmem:[#allocation5 + $0x410] sm:$0xff] }
 0x24a   :  { %1686 = vmatprep.subr.mxu0 %v6248_v5  ;;  %1757 = vmatprep.subr.mxu1 %v6910_v29  ;;  %10514 = vst [vmem:[#allocation138_spill] sm:$0xff] %v6922_v3  ;;  %v6925_v5 = vld [vmem:[#allocation5 + $0x3e8] sm:$0xff] }
 0x24b   :  { %1687 = vmatpush2.msra.mxu0 %v6252_v7  ;;  %1758 = vmatpush2.msra.mxu1 %v6914_v10  ;;  %10515 = vst [vmem:[#allocation70_spill] sm:$0xff] %v6925_v5  ;;  %v6928_v7 = vld [vmem:[#allocation5 + $0x3f8] sm:$0xff] }
 0x24c   :  { %1688 = vmatprep.subr.mxu0 %v6259_v11  ;;  %1759 = vmatprep.subr.mxu1 %v6918_v27  ;;  %10516 = vst [vmem:[#allocation72_spill] sm:$0xff] %v6928_v7  ;;  %v10517_v11 = vld [vmem:[#allocation98_spill] sm:$0xff]  ;;  %v10518_v27 = vld [vmem:[#allocation104_spill] sm:$0xff] }
 0x24d   :  { %1689 = vmatpush2.msra.mxu0 %v6263_v13  ;;  %1760 = vmatpush2.msra.mxu1 %v6922_v3  ;;  %v10519_v3 = vld [vmem:[#allocation141_spill] sm:$0xff] }
 0x24e   :  { %1768 = vmatprep.subr.mxu0 %v6925_v5  ;;  %1839 = vmatprep.subr.mxu1 %v6928_v7 }
 0x28c   :  { %v1344_v10 = vpop.f32.mrf.mxu0  ;;  %v1415_v22 = vpop.f32.mrf.mxu1 }
 0x28d   :  { %v1570_v29 = vadd.f32 %v1344_v10, %v10517_v11  ;;  %v1572_v8 = vadd.f32 %v1415_v22, %v10519_v3 }
 0x28e   :  { %v1346_v52 = vpop.f32.mrf.mxu0  ;;  %v1417_v22 = vpop.f32.mrf.mxu1 }
 0x28f   :  { %v4000_v14 = vmul.f32 -1.442695, %v1570_v29  ;;  %v1571_v9 = vadd.f32 %v1346_v52, %v10518_v27 }
 0x291   :  { %4125 = vpow2.f32 %v4000_v14  ;;  %v4002_v13 = vmul.f32 -1.442695, %v1571_v9 }
 0x293   :  { %4127 = vpow2.f32 %v4002_v13 }
 0x294   :  { %4129 = vtanh.f32 %v1572_v8 }
 0x29e   :  { %v4126_v58 = vpop.eup %4125 }
 0x29f   :  { %v1584_v32 = vadd.f32 1.0, %v4126_v58 }
 0x2a0   :  { %v4128_v5 = vpop.eup %4127 }
 0x2a1   :  { %4131 = vrcp.f32 %v1584_v32  ;;  %v1596_v26 = vadd.f32 1.0, %v4128_v5  ;;  %v4130_v7 = vpop.eup %4129 }
 0x2a3   :  { %4133 = vrcp.f32 %v1596_v26 }
 0x2ae   :  { %v4132_v28 = vpop.eup %4131 }
 0x2af   :  { %v1618_v10 = vmul.f32 %v4132_v28, %v4130_v7  ;;  %v602_v28 = vadd.f32 %v6389_v37, %v6401_v55  ;;  %v10520_v7 = vld [vmem:[#allocation143_spill] sm:$0xff] }
 0x2b0   :  { %v4134_v11 = vpop.eup %4133  ;;  %v1573_v13 = vadd.f32 %v1417_v22, %v10520_v7 }
 0x2b1   :  { %v1616_v29 = vmul.f32 %v4134_v11, %v6407_v15  ;;  %v600_v15 = vadd.f32 %v6385_v50, %v6398_v17 }
 0x2b3   :  { %v6935_v52 = vadd.f32 %v1618_v10, %v1616_v29  ;;  %v4004_v29 = vmul.f32 -1.442695, %v1573_v13 }
 0x2cd   :  { %v1486_v9 = vpop.f32.mrf.mxu0  ;;  %v1557_v32 = vpop.f32.mrf.mxu1 }
 0x2ce   :  { %v1574_v14 = vadd.f32 %v1486_v9, %v6352_v18  ;;  %v1576_v18 = vadd.f32 %v1557_v32, %v600_v15 }
 0x2cf   :  { %v1488_v27 = vpop.f32.mrf.mxu0  ;;  %v1559_v26 = vpop.f32.mrf.mxu1 }
 0x2d0   :  { %v4001_v3 = vmul.f32 -1.442695, %v1574_v14  ;;  %v1575_v58 = vadd.f32 %v1488_v27, %v6355_v31  ;;  %v1577_v5 = vadd.f32 %v1559_v26, %v602_v28 }
 0x2d2   :  { %4135 = vpow2.f32 %v4001_v3  ;;  %v4003_v8 = vmul.f32 -1.442695, %v1575_v58  ;;  %v4005_v10 = vmul.f32 -1.442695, %v1577_v5 }
 0x2d4   :  { %4137 = vpow2.f32 %v4003_v8 }
 0x2d5   :  { %4139 = vtanh.f32 %v1576_v18 }
 0x2d6   :  { %4141 = vpow2.f32 %v4005_v10 }
 0x2df   :  { %v4136_v11 = vpop.eup %4135 }
 0x2e0   :  { %v1585_v9 = vadd.f32 1.0, %v4136_v11  ;;  %v7062_v11 = vld [vmem:[#allocation5 + $0x7f8] sm:$0xff] }
 0x2e1   :  { %v4138_v31 = vpop.eup %4137 }
 0x2e2   :  { %4143 = vrcp.f32 %v1585_v9  ;;  %v1597_v14 = vadd.f32 1.0, %v4138_v31  ;;  %v4140_v27 = vpop.eup %4139  ;;  %v7066_v9 = vld [vmem:[#allocation5 + $0x7f0] sm:$0xff]  ;;  %v10536_v31 = vld [vmem:[#allocation24_spill] sm:$0xff] }
 0x2e3   :  { %4145 = vpow2.f32 %v4004_v29  ;;  %v4142_v37 = vpop.eup %4141  ;;  %v10535_v29 = vld [vmem:[#allocation23_spill] sm:$0xff] }
 0x2e4   :  { %4147 = vrcp.f32 %v1597_v14  ;;  %v1611_v26 = vadd.f32 1.0, %v4142_v37  ;;  %v7070_v14 = vld [vmem:[#allocation5 + $0x7b8] sm:$0xff]  ;;  %v7074_v37 = vld [vmem:[#allocation5 + $0x7b0] sm:$0xff] }
 0x2e5   :  { %4149 = vtanh.f32 %v6935_v52 }
 0x2e6   :  { %4151 = vrcp.f32 %v1611_v26  ;;  %v10540_v26 = vld [vmem:[#allocation28_spill] sm:$0xff] }
 0x2ef   :  { %v4144_v3 = vpop.eup %4143 }
 0x2f0   :  { %v4146_v58 = vpop.eup %4145  ;;  %v1619_v8 = vmul.f32 %v4144_v3, %v4140_v27  ;;  %v10537_v27 = vld [vmem:[#allocation25_spill] sm:$0xff]  ;;  %v10538_v3 = vld [vmem:[#allocation26_spill] sm:$0xff] }
 0x2f1   :  { %v4148_v50 = vpop.eup %4147  ;;  %v1610_v32 = vadd.f32 1.0, %v4146_v58  ;;  %v7078_v58 = vld [vmem:[#allocation5 + $0x778] sm:$0xff] }
 0x2f2   :  { %v1617_v22 = vmul.f32 %v4148_v50, %v6405_v38  ;;  %v4150_v5 = vpop.eup %4149  ;;  %v6982_v38 = vld [vmem:[#allocation5 + $0x278] sm:$0xff]  ;;  %v7082_v50 = vld [vmem:[#allocation5 + $0x770] sm:$0xff] }
 0x2f3   :  { %v4152_v15 = vpop.eup %4151 }
 0x2f4   :  { %v6946_v28 = vadd.f32 %v1619_v8, %v1617_v22  ;;  %v10539_v8 = vld [vmem:[#allocation27_spill] sm:$0xff]  ;;  %v7086_v22 = vld [vmem:[#allocation5 + $0x738] sm:$0xff] }
 0x2f6   :  { %4153 = vtanh.f32 %v6946_v28 }
 0x2f7   :  { %4155 = vrcp.f32 %v1610_v32  ;;  %v10541_v32 = vld [vmem:[#allocation29_spill] sm:$0xff] }
 0x303   :  { %v4154_v7 = vpop.eup %4153 }
 0x304   :  { %v4156_v13 = vpop.eup %4155  ;;  %v6949_v18 = vmul.f32 %v4154_v7, %v4152_v15  ;;  %v10542_v15 = vld [vmem:[#allocation30_spill] sm:$0xff] }
 0x305   :  { %v6951_v10 = vmul.f32 %v4156_v13, %v4150_v5  ;;  %v7090_v5 = vld [vmem:[#allocation5 + $0x730] sm:$0xff]  ;;  %v7094_v7 = vld [vmem:[#allocation5 + $0x6f8] sm:$0xff]  ;;  %v10543_v13 = vld [vmem:[#allocation31_spill] sm:$0xff] }
 0x306   :  { %10521 = vst [vmem:[#allocation74_spill] sm:$0xff] %v6949_v18  ;;  %1690 = vmatprep.mubr.f32.mxu0 %v6949_v18  ;;  %1761 = vmatprep.mubr.f32.mxu1 %v6949_v18 }
 0x307   :  { %10522 = vst [vmem:[#allocation76_spill] sm:$0xff] %v6951_v10  ;;  %1691 = vmatmul.mubr.f32.vlgmr.msra.gmra.mxu0 %v6951_v10  ;;  %1762 = vmatmul.mubr.f32.vlgmr.msra.gmra.mxu1 %v6951_v10 }
 0x308   :  { %1769 = vmatpush1.msra.mxu0 %v6419_v45  ;;  %1840 = vmatpush1.msra.mxu1 %v6422_v47  ;;  %v6986_v45 = vld [vmem:[#allocation5 + $0x270] sm:$0xff]  ;;  %v6990_v47 = vld [vmem:[#allocation5 + $0x238] sm:$0xff] }
 0x309   :  { %1770 = vmatprep.subr.mxu0 %v6425_v42  ;;  %1832 = vmatprep.mubr.f32.mxu0 %v6949_v18  ;;  %v6994_v42 = vld [vmem:[#allocation5 + $0x230] sm:$0xff] }
 0x30a   :  { %1841 = vmatprep.subr.mxu1 %v6429_v34  ;;  %1903 = vmatprep.mubr.f32.mxu1 %v6949_v18  ;;  %v7018_v34 = vld [vmem:[#allocation5 + $0x170] sm:$0xff]  ;;  %v7166_v18 = vld [vmem:[#allocation5 + $0x4b8] sm:$0xff] }
 0x30b   :  { %1771 = vmatpush1.msra.mxu0 %v6433_v62  ;;  %1842 = vmatpush1.msra.mxu1 %v6436_v12  ;;  %v7022_v62 = vld [vmem:[#allocation5 + $0x138] sm:$0xff]  ;;  %v7026_v12 = vld [vmem:[#allocation5 + $0x130] sm:$0xff]  ;;  %10567 = vst [vmem:[#allocation89_spill] sm:$0xff] %v7166_v18 }
 0x30c   :  { %1772 = vmatprep.subr.mxu0 %v6439_v21  ;;  %1843 = vmatprep.subr.mxu1 %v6442_v56  ;;  %v7030_v21 = vld [vmem:[#allocation5 + $0xf8] sm:$0xff]  ;;  %v10527_v56 = vld [vmem:[#allocation15_spill] sm:$0xff] }
 0x30d   :  { %1773 = vmatpush1.msra.mxu0 %v6445_v36  ;;  %1844 = vmatpush1.msra.mxu1 %v6448_v46  ;;  %v7034_v36 = vld [vmem:[#allocation5 + $0xf0] sm:$0xff]  ;;  %v10528_v46 = vld [vmem:[#allocation16_spill] sm:$0xff] }
 0x30e   :  { %1774 = vmatprep.subr.mxu0 %v6451_v0  ;;  %1845 = vmatprep.subr.mxu1 %v6454_v43  ;;  %v7038_v0 = vld [vmem:[#allocation5 + $0xb8] sm:$0xff]  ;;  %v10529_v43 = vld [vmem:[#allocation17_spill] sm:$0xff] }
 0x30f   :  { %1775 = vmatpush1.msra.mxu0 %v6457_v35  ;;  %1846 = vmatpush1.msra.mxu1 %v6460_v41  ;;  %v7042_v35 = vld [vmem:[#allocation5 + $0xb0] sm:$0xff]  ;;  %v10530_v41 = vld [vmem:[#allocation18_spill] sm:$0xff] }
 0x310   :  { %1776 = vmatprep.subr.mxu0 %v6463_v25  ;;  %1847 = vmatprep.subr.mxu1 %v6466_v16  ;;  %v7046_v25 = vld [vmem:[#allocation5 + $0x78] sm:$0xff]  ;;  %v10531_v16 = vld [vmem:[#allocation19_spill] sm:$0xff] }
 0x311   :  { %1777 = vmatpush1.msra.mxu0 %v6469_v40  ;;  %1848 = vmatpush1.msra.mxu1 %v6472_v49  ;;  %v7050_v40 = vld [vmem:[#allocation5 + $0x70] sm:$0xff]  ;;  %v10532_v49 = vld [vmem:[#allocation20_spill] sm:$0xff] }
 0x312   :  { %1778 = vmatprep.subr.mxu0 %v6475_v30  ;;  %1849 = vmatprep.subr.mxu1 %v6478_v59  ;;  %v7054_v30 = vld [vmem:[#allocation5 + $0x38] sm:$0xff]  ;;  %v10533_v59 = vld [vmem:[#allocation21_spill] sm:$0xff] }
 0x313   :  { %1779 = vmatpush1.msra.mxu0 %v6481_v63  ;;  %1850 = vmatpush1.msra.mxu1 %v6484_v61  ;;  %v7058_v63 = vld [vmem:[#allocation5 + $0x30] sm:$0xff]  ;;  %v10534_v61 = vld [vmem:[#allocation22_spill] sm:$0xff] }
 0x314   :  { %1780 = vmatprep.subr.mxu0 %v6487_v4  ;;  %1851 = vmatprep.subr.mxu1 %v6982_v38  ;;  %v6998_v4 = vld [vmem:[#allocation5 + $0x1f8] sm:$0xff] }
 0x315   :  { %1781 = vmatpush1.msra.mxu0 %v6491_v48  ;;  %1852 = vmatpush1.msra.mxu1 %v6986_v45  ;;  %v7002_v48 = vld [vmem:[#allocation5 + $0x1f0] sm:$0xff] }
 0x316   :  { %1782 = vmatprep.subr.mxu0 %v6495_v19  ;;  %1853 = vmatprep.subr.mxu1 %v6990_v47  ;;  %v7006_v19 = vld [vmem:[#allocation5 + $0x1b8] sm:$0xff] }
 0x317   :  { %1783 = vmatpush1.msra.mxu0 %v6499_v23  ;;  %1854 = vmatpush1.msra.mxu1 %v6994_v42  ;;  %v7010_v23 = vld [vmem:[#allocation5 + $0x1b0] sm:$0xff] }
 0x318   :  { %1784 = vmatprep.subr.mxu0 %v6503_v53  ;;  %1855 = vmatprep.subr.mxu1 %v6998_v4  ;;  %v7014_v53 = vld [vmem:[#allocation5 + $0x178] sm:$0xff] }
 0x319   :  { %1785 = vmatpush1.msra.mxu0 %v6507_v51  ;;  %1856 = vmatpush1.msra.mxu1 %v7002_v48  ;;  %v10523_v51 = vld [vmem:[#allocation11_spill] sm:$0xff] }
 0x31a   :  { %1786 = vmatprep.subr.mxu0 %v6511_v24  ;;  %1857 = vmatprep.subr.mxu1 %v7006_v19  ;;  %v10524_v24 = vld [vmem:[#allocation12_spill] sm:$0xff] }
 0x31b   :  { %1787 = vmatpush1.msra.mxu0 %v6515_v33  ;;  %1858 = vmatpush1.msra.mxu1 %v7010_v23  ;;  %v10525_v33 = vld [vmem:[#allocation13_spill] sm:$0xff] }
 0x31c   :  { %1788 = vmatprep.subr.mxu0 %v6519_v39  ;;  %1859 = vmatprep.subr.mxu1 %v7014_v53  ;;  %v10526_v39 = vld [vmem:[#allocation14_spill] sm:$0xff] }
 0x31d   :  { %1789 = vmatpush1.msra.mxu0 %v10523_v51  ;;  %1860 = vmatpush1.msra.mxu1 %v7018_v34  ;;  %v7098_v51 = vld [vmem:[#allocation5 + $0x6f0] sm:$0xff] }
 0x31e   :  { %1790 = vmatprep.subr.mxu0 %v10524_v24  ;;  %1861 = vmatprep.subr.mxu1 %v7022_v62  ;;  %v10544_v24 = vld [vmem:[#allocation32_spill] sm:$0xff] }
 0x31f   :  { %1791 = vmatpush1.msra.mxu0 %v10525_v33  ;;  %1862 = vmatpush1.msra.mxu1 %v7026_v12  ;;  %v7102_v33 = vld [vmem:[#allocation5 + $0x6b8] sm:$0xff] }
 0x320   :  { %1792 = vmatprep.subr.mxu0 %v10526_v39  ;;  %1863 = vmatprep.subr.mxu1 %v7030_v21  ;;  %v10545_v39 = vld [vmem:[#allocation33_spill] sm:$0xff] }
 0x321   :  { %1793 = vmatpush1.msra.mxu0 %v10527_v56  ;;  %1864 = vmatpush1.msra.mxu1 %v7034_v36  ;;  %v7106_v56 = vld [vmem:[#allocation5 + $0x6b0] sm:$0xff] }
 0x322   :  { %1794 = vmatprep.subr.mxu0 %v10528_v46  ;;  %1865 = vmatprep.subr.mxu1 %v7038_v0  ;;  %v10546_v46 = vld [vmem:[#allocation34_spill] sm:$0xff] }
 0x323   :  { %1795 = vmatpush1.msra.mxu0 %v10529_v43  ;;  %1866 = vmatpush1.msra.mxu1 %v7042_v35  ;;  %v7110_v43 = vld [vmem:[#allocation5 + $0x678] sm:$0xff] }
 0x324   :  { %1796 = vmatprep.subr.mxu0 %v10530_v41  ;;  %1867 = vmatprep.subr.mxu1 %v7046_v25  ;;  %v10547_v41 = vld [vmem:[#allocation35_spill] sm:$0xff] }
 0x325   :  { %1797 = vmatpush1.msra.mxu0 %v10531_v16  ;;  %1868 = vmatpush1.msra.mxu1 %v7050_v40  ;;  %v7114_v16 = vld [vmem:[#allocation5 + $0x670] sm:$0xff] }
 0x326   :  { %1798 = vmatprep.subr.mxu0 %v10532_v49  ;;  %1869 = vmatprep.subr.mxu1 %v7054_v30  ;;  %v10548_v49 = vld [vmem:[#allocation36_spill] sm:$0xff] }
 0x327   :  { %1799 = vmatpush1.msra.mxu0 %v10533_v59  ;;  %1870 = vmatpush1.msra.mxu1 %v7058_v63  ;;  %v7118_v59 = vld [vmem:[#allocation5 + $0x638] sm:$0xff] }
 0x328   :  { %1800 = vmatprep.subr.mxu0 %v10534_v61  ;;  %1871 = vmatprep.subr.mxu1 %v7062_v11  ;;  %v10549_v61 = vld [vmem:[#allocation37_spill] sm:$0xff] }
 0x329   :  { %1801 = vmatpush2.msra.mxu0 %v10535_v29  ;;  %1872 = vmatpush2.msra.mxu1 %v7066_v9  ;;  %v7122_v29 = vld [vmem:[#allocation5 + $0x630] sm:$0xff] }
 0x32a   :  { %1802 = vmatprep.subr.mxu0 %v10536_v31  ;;  %1873 = vmatprep.subr.mxu1 %v7070_v14  ;;  %v10550_v31 = vld [vmem:[#allocation38_spill] sm:$0xff] }
 0x32b   :  { %1803 = vmatpush2.msra.mxu0 %v10537_v27  ;;  %1874 = vmatpush2.msra.mxu1 %v7074_v37  ;;  %v7126_v27 = vld [vmem:[#allocation5 + $0x5f8] sm:$0xff] }
 0x32c   :  { %1804 = vmatprep.subr.mxu0 %v10538_v3  ;;  %1875 = vmatprep.subr.mxu1 %v7078_v58  ;;  %v10551_v3 = vld [vmem:[#allocation39_spill] sm:$0xff] }
 0x32d   :  { %1805 = vmatpush2.msra.mxu0 %v10539_v8  ;;  %1876 = vmatpush2.msra.mxu1 %v7082_v50  ;;  %v7130_v8 = vld [vmem:[#allocation5 + $0x5f0] sm:$0xff] }
 0x32e   :  { %1806 = vmatprep.subr.mxu0 %v10540_v26  ;;  %1877 = vmatprep.subr.mxu1 %v7086_v22  ;;  %v10552_v26 = vld [vmem:[#allocation40_spill] sm:$0xff] }
 0x32f   :  { %1807 = vmatpush2.msra.mxu0 %v10541_v32  ;;  %1878 = vmatpush2.msra.mxu1 %v7090_v5  ;;  %v7134_v32 = vld [vmem:[#allocation5 + $0x5b8] sm:$0xff] }
 0x330   :  { %1808 = vmatprep.subr.mxu0 %v10542_v15  ;;  %1879 = vmatprep.subr.mxu1 %v7094_v7  ;;  %v10553_v15 = vld [vmem:[#allocation41_spill] sm:$0xff] }
 0x331   :  { %1809 = vmatpush2.msra.mxu0 %v10543_v13  ;;  %1880 = vmatpush2.msra.mxu1 %v7098_v51  ;;  %v7138_v13 = vld [vmem:[#allocation5 + $0x5b0] sm:$0xff] }
 0x332   :  { %1810 = vmatprep.subr.mxu0 %v10544_v24  ;;  %1881 = vmatprep.subr.mxu1 %v7102_v33  ;;  %v10554_v24 = vld [vmem:[#allocation42_spill] sm:$0xff] }
 0x333   :  { %1811 = vmatpush2.msra.mxu0 %v10545_v39  ;;  %1882 = vmatpush2.msra.mxu1 %v7106_v56  ;;  %v7142_v39 = vld [vmem:[#allocation5 + $0x578] sm:$0xff] }
 0x334   :  { %1812 = vmatprep.subr.mxu0 %v10546_v46  ;;  %1883 = vmatprep.subr.mxu1 %v7110_v43  ;;  %10555 = vst [vmem:[#allocation78_spill] sm:$0xff] %v7142_v39  ;;  %v10556_v46 = vld [vmem:[#allocation43_spill] sm:$0xff] }
 0x335   :  { %1813 = vmatpush2.msra.mxu0 %v10547_v41  ;;  %1884 = vmatpush2.msra.mxu1 %v7114_v16  ;;  %v7146_v41 = vld [vmem:[#allocation5 + $0x570] sm:$0xff] }
 0x336   :  { %1814 = vmatprep.subr.mxu0 %v10548_v49  ;;  %1885 = vmatprep.subr.mxu1 %v7118_v59  ;;  %10557 = vst [vmem:[#allocation79_spill] sm:$0xff] %v7146_v41  ;;  %v10558_v49 = vld [vmem:[#allocation44_spill] sm:$0xff] }
 0x337   :  { %1815 = vmatpush2.msra.mxu0 %v10549_v61  ;;  %1886 = vmatpush2.msra.mxu1 %v7122_v29  ;;  %v7150_v61 = vld [vmem:[#allocation5 + $0x538] sm:$0xff] }
 0x338   :  { %1816 = vmatprep.subr.mxu0 %v10550_v31  ;;  %1887 = vmatprep.subr.mxu1 %v7126_v27  ;;  %10559 = vst [vmem:[#allocation80_spill] sm:$0xff] %v7150_v61  ;;  %v10560_v31 = vld [vmem:[#allocation45_spill] sm:$0xff] }
 0x339   :  { %1817 = vmatpush2.msra.mxu0 %v10551_v3  ;;  %1888 = vmatpush2.msra.mxu1 %v7130_v8  ;;  %v7154_v3 = vld [vmem:[#allocation5 + $0x530] sm:$0xff] }
 0x33a   :  { %1818 = vmatprep.subr.mxu0 %v10552_v26  ;;  %1889 = vmatprep.subr.mxu1 %v7134_v32  ;;  %10561 = vst [vmem:[#allocation81_spill] sm:$0xff] %v7154_v3  ;;  %v10562_v26 = vld [vmem:[#allocation47_spill] sm:$0xff] }
 0x33b   :  { %1819 = vmatpush2.msra.mxu0 %v10553_v15  ;;  %1890 = vmatpush2.msra.mxu1 %v7138_v13  ;;  %v7158_v15 = vld [vmem:[#allocation5 + $0x4f8] sm:$0xff] }
 0x33c   :  { %1820 = vmatprep.subr.mxu0 %v10554_v24  ;;  %1891 = vmatprep.subr.mxu1 %v7142_v39  ;;  %10563 = vst [vmem:[#allocation84_spill] sm:$0xff] %v7158_v15  ;;  %v10564_v24 = vld [vmem:[#allocation49_spill] sm:$0xff] }
 0x33d   :  { %1821 = vmatpush2.msra.mxu0 %v10556_v46  ;;  %1892 = vmatpush2.msra.mxu1 %v7146_v41  ;;  %v7162_v46 = vld [vmem:[#allocation5 + $0x4f0] sm:$0xff] }
 0x33e   :  { %1822 = vmatprep.subr.mxu0 %v10558_v49  ;;  %1893 = vmatprep.subr.mxu1 %v7150_v61  ;;  %10565 = vst [vmem:[#allocation86_spill] sm:$0xff] %v7162_v46  ;;  %v10566_v49 = vld [vmem:[#allocation51_spill] sm:$0xff] }
 0x33f   :  { %1823 = vmatpush2.msra.mxu0 %v10560_v31  ;;  %1894 = vmatpush2.msra.mxu1 %v7154_v3  ;;  %v10568_v31 = vld [vmem:[#allocation53_spill] sm:$0xff] }
 0x340   :  { %1824 = vmatprep.subr.mxu0 %v10562_v26  ;;  %1895 = vmatprep.subr.mxu1 %v7158_v15  ;;  %v7170_v3 = vld [vmem:[#allocation5 + $0x4b0] sm:$0xff]  ;;  %v10570_v26 = vld [vmem:[#allocation55_spill] sm:$0xff]  ;;  %v7174_v15 = vld [vmem:[#allocation5 + $0x478] sm:$0xff] }
 0x341   :  { %1825 = vmatpush2.msra.mxu0 %v10564_v24  ;;  %1896 = vmatpush2.msra.mxu1 %v7162_v46  ;;  %10569 = vst [vmem:[#allocation91_spill] sm:$0xff] %v7170_v3  ;;  %10571 = vst [vmem:[#allocation94_spill] sm:$0xff] %v7174_v15  ;;  %v10572_v24 = vld [vmem:[#allocation57_spill] sm:$0xff] }
 0x342   :  { %1826 = vmatprep.subr.mxu0 %v10566_v49  ;;  %1897 = vmatprep.subr.mxu1 %v7166_v18  ;;  %v7178_v46 = vld [vmem:[#allocation5 + $0x470] sm:$0xff]  ;;  %v10574_v49 = vld [vmem:[#allocation59_spill] sm:$0xff]  ;;  %v7182_v18 = vld [vmem:[#allocation5 + $0x438] sm:$0xff] }
 0x343   :  { %1827 = vmatpush2.msra.mxu0 %v10568_v31  ;;  %1898 = vmatpush2.msra.mxu1 %v7170_v3  ;;  %10573 = vst [vmem:[#allocation96_spill] sm:$0xff] %v7178_v46  ;;  %10575 = vst [vmem:[#allocation100_spill] sm:$0xff] %v7182_v18  ;;  %v10576_v31 = vld [vmem:[#allocation61_spill] sm:$0xff] }
 0x344   :  { %1828 = vmatprep.subr.mxu0 %v10570_v26  ;;  %1899 = vmatprep.subr.mxu1 %v7174_v15  ;;  %v7186_v3 = vld [vmem:[#allocation5 + $0x430] sm:$0xff]  ;;  %v10578_v26 = vld [vmem:[#allocation63_spill] sm:$0xff] }
 0x345   :  { %1829 = vmatpush2.msra.mxu0 %v10572_v24  ;;  %1900 = vmatpush2.msra.mxu1 %v7178_v46  ;;  %10577 = vst [vmem:[#allocation102_spill] sm:$0xff] %v7186_v3  ;;  %v7192_v24 = vld [vmem:[#allocation5 + $0x3d8] sm:$0xff]  ;;  %v7196_v46 = vld [vmem:[#allocation5 + $0x3d0] sm:$0xff] }
 0x346   :  { %1830 = vmatprep.subr.mxu0 %v10574_v49  ;;  %1901 = vmatprep.subr.mxu1 %v7182_v18  ;;  %10579 = vst [vmem:[#allocation106_spill] sm:$0xff] %v7192_v24  ;;  %v10580_v49 = vld [vmem:[#allocation65_spill] sm:$0xff]  ;;  %10581 = vst [vmem:[#allocation108_spill] sm:$0xff] %v7196_v46  ;;  %v7200_v18 = vld [vmem:[#allocation5 + $0x398] sm:$0xff] }
 0x347   :  { %1831 = vmatpush2.msra.mxu0 %v10576_v31  ;;  %1902 = vmatpush2.msra.mxu1 %v7186_v3  ;;  %v10582_v31 = vld [vmem:[#allocation67_spill] sm:$0xff]  ;;  %10583 = vst [vmem:[#allocation112_spill] sm:$0xff] %v7200_v18  ;;  %v10584_v3 = vld [vmem:[#allocation69_spill] sm:$0xff] }
 0x348   :  { %1833 = vmatmul.mubr.f32.vlgmr.msra.gmra.mxu0 %v6951_v10  ;;  %1904 = vmatmul.mubr.f32.vlgmr.msra.gmra.mxu1 %v6951_v10  ;;  %v7204_v10 = vld [vmem:[#allocation5 + $0x390] sm:$0xff] }
 0x349   :  { %1974 = vmatprep.subr.mxu0 %v10578_v26  ;;  %2045 = vmatprep.subr.mxu1 %v7192_v24  ;;  %10585 = vst [vmem:[#allocation114_spill] sm:$0xff] %v7204_v10  ;;  %v10586_v26 = vld [vmem:[#allocation71_spill] sm:$0xff]  ;;  %v7208_v24 = vld [vmem:[#allocation5 + $0x358] sm:$0xff] }
 0x34a   :  { %1975 = vmatpush1.msra.mxu0 %v10580_v49  ;;  %2046 = vmatpush1.msra.mxu1 %v7196_v46  ;;  %10587 = vst [vmem:[#allocation118_spill] sm:$0xff] %v7208_v24  ;;  %v10588_v49 = vld [vmem:[#allocation73_spill] sm:$0xff] }
 0x34b   :  { %1976 = vmatprep.subr.mxu0 %v10582_v31  ;;  %2047 = vmatprep.subr.mxu1 %v7200_v18  ;;  %v7212_v46 = vld [vmem:[#allocation5 + $0x350] sm:$0xff]  ;;  %v10590_v31 = vld [vmem:[#allocation75_spill] sm:$0xff]  ;;  %v7216_v18 = vld [vmem:[#allocation5 + $0x318] sm:$0xff] }
 0x34c   :  { %1977 = vmatpush1.msra.mxu0 %v10584_v3  ;;  %2048 = vmatpush1.msra.mxu1 %v7204_v10  ;;  %10589 = vst [vmem:[#allocation120_spill] sm:$0xff] %v7212_v46  ;;  %10591 = vst [vmem:[#allocation124_spill] sm:$0xff] %v7216_v18  ;;  %v10592_v3 = vld [vmem:[#allocation77_spill] sm:$0xff] }
 0x34d   :  { %1978 = vmatprep.subr.mxu0 %v10586_v26  ;;  %2049 = vmatprep.subr.mxu1 %v7208_v24  ;;  %v7220_v10 = vld [vmem:[#allocation5 + $0x310] sm:$0xff]  ;;  %v10594_v26 = vld [vmem:[#allocation82_spill] sm:$0xff] }
 0x34e   :  { %1979 = vmatpush1.msra.mxu0 %v10588_v49  ;;  %2050 = vmatpush1.msra.mxu1 %v7212_v46  ;;  %10593 = vst [vmem:[#allocation126_spill] sm:$0xff] %v7220_v10  ;;  %v7224_v24 = vld [vmem:[#allocation5 + $0x2d8] sm:$0xff]  ;;  %v10596_v49 = vld [vmem:[#allocation83_spill] sm:$0xff]  ;;  %v7228_v46 = vld [vmem:[#allocation5 + $0x2d0] sm:$0xff] }
 0x34f   :  { %1980 = vmatprep.subr.mxu0 %v10590_v31  ;;  %2051 = vmatprep.subr.mxu1 %v7216_v18  ;;  %10595 = vst [vmem:[#allocation130_spill] sm:$0xff] %v7224_v24  ;;  %10597 = vst [vmem:[#allocation132_spill] sm:$0xff] %v7228_v46  ;;  %v7231_v31 = vld [vmem:[#allocation5 + $0x288] sm:$0xff] }
 0x350   :  { %1981 = vmatpush1.msra.mxu0 %v10592_v3  ;;  %2052 = vmatpush1.msra.mxu1 %v7220_v10  ;;  %10598 = vst [vmem:[#allocation134_spill] sm:$0xff] %v7231_v31  ;;  %v7234_v3 = vld [vmem:[#allocation5 + $0x298] sm:$0xff]  ;;  %v7237_v10 = vld [vmem:[#allocation5 + $0x280] sm:$0xff] }
 0x351   :  { %1982 = vmatprep.subr.mxu0 %v10594_v26  ;;  %2053 = vmatprep.subr.mxu1 %v7224_v24  ;;  %10599 = vst [vmem:[#allocation137_spill] sm:$0xff] %v7234_v3  ;;  %10600 = vst [vmem:[#allocation139_spill] sm:$0xff] %v7237_v10  ;;  %v7240_v26 = vld [vmem:[#allocation5 + $0x290] sm:$0xff] }
 0x352   :  { %1983 = vmatpush1.msra.mxu0 %v10596_v49  ;;  %2054 = vmatpush1.msra.mxu1 %v7228_v46  ;;  %10601 = vst [vmem:[#allocation142_spill] sm:$0xff] %v7240_v26  ;;  %v7243_v49 = vld [vmem:[#allocation5 + $0x248] sm:$0xff]  ;;  %v7246_v46 = vld [vmem:[#allocation5 + $0x258] sm:$0xff] }
 0x353   :  { %1984 = vmatprep.subr.mxu0 %v7231_v31  ;;  %2055 = vmatprep.subr.mxu1 %v7234_v3  ;;  %10602 = vst [vmem:[#allocation98_spill] sm:$0xff] %v7243_v49  ;;  %10603 = vst [vmem:[#allocation104_spill] sm:$0xff] %v7246_v46  ;;  %v7249_v31 = vld [vmem:[#allocation5 + $0x240] sm:$0xff]  ;;  %v7252_v3 = vld [vmem:[#allocation5 + $0x250] sm:$0xff] }
 0x354   :  { %1985 = vmatpush1.msra.mxu0 %v7237_v10  ;;  %2056 = vmatpush1.msra.mxu1 %v7240_v26  ;;  %10604 = vst [vmem:[#allocation141_spill] sm:$0xff] %v7249_v31  ;;  %10605 = vst [vmem:[#allocation143_spill] sm:$0xff] %v7252_v3  ;;  %v7255_v10 = vld [vmem:[#allocation5 + $0x208] sm:$0xff]  ;;  %v7258_v26 = vld [vmem:[#allocation5 + $0x218] sm:$0xff] }
 0x355   :  { %1986 = vmatprep.subr.mxu0 %v7243_v49  ;;  %2057 = vmatprep.subr.mxu1 %v7246_v46  ;;  %10606 = vst [vmem:[#allocation11_spill] sm:$0xff] %v7255_v10  ;;  %10607 = vst [vmem:[#allocation12_spill] sm:$0xff] %v7258_v26  ;;  %v7261_v49 = vld [vmem:[#allocation5 + $0x200] sm:$0xff]  ;;  %v7264_v46 = vld [vmem:[#allocation5 + $0x210] sm:$0xff] }
 0x356   :  { %1987 = vmatpush1.msra.mxu0 %v7249_v31  ;;  %2058 = vmatpush1.msra.mxu1 %v7252_v3  ;;  %10608 = vst [vmem:[#allocation13_spill] sm:$0xff] %v7261_v49  ;;  %10609 = vst [vmem:[#allocation14_spill] sm:$0xff] %v7264_v46  ;;  %v7267_v31 = vld [vmem:[#allocation5 + $0x1c8] sm:$0xff]  ;;  %v7270_v3 = vld [vmem:[#allocation5 + $0x1d8] sm:$0xff] }
 0x357   :  { %1988 = vmatprep.subr.mxu0 %v7255_v10  ;;  %2059 = vmatprep.subr.mxu1 %v7258_v26  ;;  %10610 = vst [vmem:[#allocation15_spill] sm:$0xff] %v7267_v31  ;;  %10611 = vst [vmem:[#allocation16_spill] sm:$0xff] %v7270_v3  ;;  %v7273_v10 = vld [vmem:[#allocation5 + $0x1c0] sm:$0xff]  ;;  %v7276_v26 = vld [vmem:[#allocation5 + $0x1d0] sm:$0xff] }
 0x358   :  { %1989 = vmatpush1.msra.mxu0 %v7261_v49  ;;  %2060 = vmatpush1.msra.mxu1 %v7264_v46  ;;  %10612 = vst [vmem:[#allocation17_spill] sm:$0xff] %v7273_v10  ;;  %10613 = vst [vmem:[#allocation18_spill] sm:$0xff] %v7276_v26  ;;  %v7279_v49 = vld [vmem:[#allocation5 + $0x188] sm:$0xff]  ;;  %v7282_v46 = vld [vmem:[#allocation5 + $0x198] sm:$0xff] }
 0x359   :  { %1990 = vmatprep.subr.mxu0 %v7267_v31  ;;  %2061 = vmatprep.subr.mxu1 %v7270_v3  ;;  %10614 = vst [vmem:[#allocation19_spill] sm:$0xff] %v7279_v49  ;;  %10615 = vst [vmem:[#allocation20_spill] sm:$0xff] %v7282_v46  ;;  %v7285_v31 = vld [vmem:[#allocation5 + $0x180] sm:$0xff]  ;;  %v7288_v3 = vld [vmem:[#allocation5 + $0x190] sm:$0xff] }
 0x35a   :  { %1991 = vmatpush1.msra.mxu0 %v7273_v10  ;;  %2062 = vmatpush1.msra.mxu1 %v7276_v26  ;;  %10616 = vst [vmem:[#allocation21_spill] sm:$0xff] %v7285_v31  ;;  %10617 = vst [vmem:[#allocation22_spill] sm:$0xff] %v7288_v3  ;;  %v7291_v10 = vld [vmem:[#allocation5 + $0x148] sm:$0xff]  ;;  %v7294_v26 = vld [vmem:[#allocation5 + $0x158] sm:$0xff] }
 0x35b   :  { %1992 = vmatprep.subr.mxu0 %v7279_v49  ;;  %2063 = vmatprep.subr.mxu1 %v7282_v46  ;;  %10618 = vst [vmem:[#allocation23_spill] sm:$0xff] %v7291_v10  ;;  %10619 = vst [vmem:[#allocation24_spill] sm:$0xff] %v7294_v26  ;;  %v7297_v49 = vld [vmem:[#allocation5 + $0x140] sm:$0xff]  ;;  %v7300_v46 = vld [vmem:[#allocation5 + $0x150] sm:$0xff] }
 0x35c   :  { %1993 = vmatpush1.msra.mxu0 %v7285_v31  ;;  %2064 = vmatpush1.msra.mxu1 %v7288_v3  ;;  %10620 = vst [vmem:[#allocation25_spill] sm:$0xff] %v7297_v49  ;;  %10621 = vst [vmem:[#allocation26_spill] sm:$0xff] %v7300_v46  ;;  %v7303_v31 = vld [vmem:[#allocation5 + $0x108] sm:$0xff]  ;;  %v7306_v3 = vld [vmem:[#allocation5 + $0x118] sm:$0xff] }
 0x35d   :  { %1994 = vmatprep.subr.mxu0 %v7291_v10  ;;  %2065 = vmatprep.subr.mxu1 %v7294_v26  ;;  %10622 = vst [vmem:[#allocation27_spill] sm:$0xff] %v7303_v31  ;;  %10623 = vst [vmem:[#allocation28_spill] sm:$0xff] %v7306_v3  ;;  %v7309_v10 = vld [vmem:[#allocation5 + $0x100] sm:$0xff]  ;;  %v7312_v26 = vld [vmem:[#allocation5 + $0x110] sm:$0xff] }
 0x35e   :  { %1995 = vmatpush1.msra.mxu0 %v7297_v49  ;;  %2066 = vmatpush1.msra.mxu1 %v7300_v46  ;;  %10624 = vst [vmem:[#allocation29_spill] sm:$0xff] %v7309_v10  ;;  %10625 = vst [vmem:[#allocation30_spill] sm:$0xff] %v7312_v26  ;;  %v7315_v49 = vld [vmem:[#allocation5 + $0xc8] sm:$0xff]  ;;  %v7319_v46 = vld [vmem:[#allocation5 + $0xc0] sm:$0xff] }
 0x35f   :  { %1996 = vmatprep.subr.mxu0 %v7303_v31  ;;  %2067 = vmatprep.subr.mxu1 %v7306_v3  ;;  %10626 = vst [vmem:[#allocation31_spill] sm:$0xff] %v7315_v49  ;;  %10627 = vst [vmem:[#allocation32_spill] sm:$0xff] %v7319_v46  ;;  %v7323_v3 = vld [vmem:[#allocation5 + $0x88] sm:$0xff] }
 0x360   :  { %1997 = vmatpush1.msra.mxu0 %v7309_v10  ;;  %2068 = vmatpush1.msra.mxu1 %v7312_v26  ;;  %10628 = vst [vmem:[#allocation33_spill] sm:$0xff] %v7323_v3  ;;  %v7327_v10 = vld [vmem:[#allocation5 + $0x80] sm:$0xff]  ;;  %v10702_v31 = vld [vmem:[#allocation144_spill] sm:$0xff] }
 0x361   :  { %1998 = vmatprep.subr.mxu0 %v7315_v49  ;;  %2069 = vmatprep.subr.mxu1 %v6766_v57  ;;  %10629 = vst [vmem:[#allocation34_spill] sm:$0xff] %v7327_v10  ;;  %v7331_v49 = vld [vmem:[#allocation5 + $0x48] sm:$0xff]  ;;  %v7335_v57 = vld [vmem:[#allocation5 + $0x40] sm:$0xff] }
 0x362   :  { %1999 = vmatpush1.msra.mxu0 %v7319_v46  ;;  %2070 = vmatpush1.msra.mxu1 %v6770_v44  ;;  %10630 = vst [vmem:[#allocation35_spill] sm:$0xff] %v7331_v49  ;;  %10631 = vst [vmem:[#allocation36_spill] sm:$0xff] %v7335_v57  ;;  %v10632_v44 = vld [vmem:[#allocation85_spill] sm:$0xff]  ;;  %v10701_v46 = vld [vmem:[#allocation116_spill] sm:$0xff] }
 0x363   :  { %2000 = vmatprep.subr.mxu0 %v7323_v3  ;;  %2071 = vmatprep.subr.mxu1 %v6774_v6  ;;  %v7339_v3 = vld [vmem:[#allocation5 + $0x8] sm:$0xff] }
 0x364   :  { %2001 = vmatpush1.msra.mxu0 %v7327_v10  ;;  %2072 = vmatpush1.msra.mxu1 %v6778_v54  ;;  %10633 = vst [vmem:[#allocation37_spill] sm:$0xff] %v7339_v3  ;;  %v10634_v6 = vld [vmem:[#allocation88_spill] sm:$0xff]  ;;  %v7343_v10 = vld [vmem:[#allocation5] sm:$0xff]  ;;  %v10636_v54 = vld [vmem:[#allocation90_spill] sm:$0xff] }
 0x365   :  { %2002 = vmatprep.subr.mxu0 %v7331_v49  ;;  %2073 = vmatprep.subr.mxu1 %v6782_v1  ;;  %10635 = vst [vmem:[#allocation38_spill] sm:$0xff] %v7343_v10  ;;  %v7347_v49 = vld [vmem:[#allocation5 + $0x7c8] sm:$0xff]  ;;  %v10638_v1 = vld [vmem:[#allocation93_spill] sm:$0xff] }
 0x366   :  { %2003 = vmatpush1.msra.mxu0 %v7335_v57  ;;  %2074 = vmatpush1.msra.mxu1 %v10632_v44  ;;  %10637 = vst [vmem:[#allocation39_spill] sm:$0xff] %v7347_v49  ;;  %v7351_v57 = vld [vmem:[#allocation5 + $0x7c0] sm:$0xff] }
 0x367   :  { %2004 = vmatprep.subr.mxu0 %v7339_v3  ;;  %2075 = vmatprep.subr.mxu1 %v10634_v6  ;;  %10639 = vst [vmem:[#allocation40_spill] sm:$0xff] %v7351_v57  ;;  %v10640_v44 = vld [vmem:[#allocation95_spill] sm:$0xff]  ;;  %v7355_v3 = vld [vmem:[#allocation5 + $0x788] sm:$0xff] }
 0x368   :  { %2005 = vmatpush1.msra.mxu0 %v7343_v10  ;;  %2076 = vmatpush1.msra.mxu1 %v10636_v54  ;;  %10641 = vst [vmem:[#allocation41_spill] sm:$0xff] %v7355_v3  ;;  %v10642_v6 = vld [vmem:[#allocation99_spill] sm:$0xff]  ;;  %v10644_v54 = vld [vmem:[#allocation101_spill] sm:$0xff] }
 0x369   :  { %2006 = vmatprep.subr.mxu0 %v7347_v49  ;;  %2077 = vmatprep.subr.mxu1 %v10638_v1  ;;  %v7359_v10 = vld [vmem:[#allocation5 + $0x780] sm:$0xff]  ;;  %v7363_v49 = vld [vmem:[#allocation5 + $0x748] sm:$0xff]  ;;  %v10646_v1 = vld [vmem:[#allocation105_spill] sm:$0xff] }
 0x36a   :  { %2007 = vmatpush2.msra.mxu0 %v7351_v57  ;;  %2078 = vmatpush2.msra.mxu1 %v10640_v44  ;;  %10643 = vst [vmem:[#allocation42_spill] sm:$0xff] %v7359_v10  ;;  %10645 = vst [vmem:[#allocation43_spill] sm:$0xff] %v7363_v49  ;;  %v7367_v57 = vld [vmem:[#allocation5 + $0x740] sm:$0xff]  ;;  %v10648_v44 = vld [vmem:[#allocation46_spill] sm:$0xff] }
 0x36b   :  { %2008 = vmatprep.subr.mxu0 %v7355_v3  ;;  %2079 = vmatprep.subr.mxu1 %v10642_v6  ;;  %10647 = vst [vmem:[#allocation44_spill] sm:$0xff] %v7367_v57  ;;  %v7371_v3 = vld [vmem:[#allocation5 + $0x708] sm:$0xff]  ;;  %v10650_v6 = vld [vmem:[#allocation107_spill] sm:$0xff] }
 0x36c   :  { %2009 = vmatpush2.msra.mxu0 %v7359_v10  ;;  %2080 = vmatpush2.msra.mxu1 %v10644_v54  ;;  %10649 = vst [vmem:[#allocation45_spill] sm:$0xff] %v7371_v3  ;;  %v7375_v10 = vld [vmem:[#allocation5 + $0x700] sm:$0xff]  ;;  %v10652_v54 = vld [vmem:[#allocation48_spill] sm:$0xff] }
 0x36d   :  { %2010 = vmatprep.subr.mxu0 %v7363_v49  ;;  %2081 = vmatprep.subr.mxu1 %v10646_v1  ;;  %10651 = vst [vmem:[#allocation47_spill] sm:$0xff] %v7375_v10  ;;  %v7379_v49 = vld [vmem:[#allocation5 + $0x6c8] sm:$0xff]  ;;  %v10654_v1 = vld [vmem:[#allocation111_spill] sm:$0xff] }
 0x36e   :  { %2011 = vmatpush2.msra.mxu0 %v7367_v57  ;;  %2082 = vmatpush2.msra.mxu1 %v10648_v44  ;;  %10653 = vst [vmem:[#allocation49_spill] sm:$0xff] %v7379_v49  ;;  %v7383_v57 = vld [vmem:[#allocation5 + $0x6c0] sm:$0xff]  ;;  %v10656_v44 = vld [vmem:[#allocation50_spill] sm:$0xff] }
 0x36f   :  { %2012 = vmatprep.subr.mxu0 %v7371_v3  ;;  %2083 = vmatprep.subr.mxu1 %v10650_v6  ;;  %10655 = vst [vmem:[#allocation51_spill] sm:$0xff] %v7383_v57  ;;  %v7387_v3 = vld [vmem:[#allocation5 + $0x688] sm:$0xff]  ;;  %v10658_v6 = vld [vmem:[#allocation113_spill] sm:$0xff] }
 0x370   :  { %2013 = vmatpush2.msra.mxu0 %v7375_v10  ;;  %2084 = vmatpush2.msra.mxu1 %v10652_v54  ;;  %10657 = vst [vmem:[#allocation53_spill] sm:$0xff] %v7387_v3  ;;  %v7391_v10 = vld [vmem:[#allocation5 + $0x680] sm:$0xff]  ;;  %v10660_v54 = vld [vmem:[#allocation52_spill] sm:$0xff] }
 0x371   :  { %2014 = vmatprep.subr.mxu0 %v7379_v49  ;;  %2085 = vmatprep.subr.mxu1 %v10654_v1  ;;  %10659 = vst [vmem:[#allocation55_spill] sm:$0xff] %v7391_v10  ;;  %v7395_v49 = vld [vmem:[#allocation5 + $0x648] sm:$0xff]  ;;  %v10662_v1 = vld [vmem:[#allocation117_spill] sm:$0xff] }
 0x372   :  { %2015 = vmatpush2.msra.mxu0 %v7383_v57  ;;  %2086 = vmatpush2.msra.mxu1 %v10656_v44  ;;  %10661 = vst [vmem:[#allocation57_spill] sm:$0xff] %v7395_v49  ;;  %v7399_v57 = vld [vmem:[#allocation5 + $0x640] sm:$0xff]  ;;  %v10664_v44 = vld [vmem:[#allocation54_spill] sm:$0xff] }
 0x373   :  { %2016 = vmatprep.subr.mxu0 %v7387_v3  ;;  %2087 = vmatprep.subr.mxu1 %v10658_v6  ;;  %10663 = vst [vmem:[#allocation59_spill] sm:$0xff] %v7399_v57  ;;  %v7403_v3 = vld [vmem:[#allocation5 + $0x608] sm:$0xff]  ;;  %v10666_v6 = vld [vmem:[#allocation119_spill] sm:$0xff] }
 0x374   :  { %2017 = vmatpush2.msra.mxu0 %v7391_v10  ;;  %2088 = vmatpush2.msra.mxu1 %v10660_v54  ;;  %10665 = vst [vmem:[#allocation61_spill] sm:$0xff] %v7403_v3  ;;  %v7407_v10 = vld [vmem:[#allocation5 + $0x600] sm:$0xff]  ;;  %v7411_v54 = vld [vmem:[#allocation5 + $0x5c8] sm:$0xff] }
 0x375   :  { %2018 = vmatprep.subr.mxu0 %v7395_v49  ;;  %2089 = vmatprep.subr.mxu1 %v10662_v1  ;;  %10667 = vst [vmem:[#allocation63_spill] sm:$0xff] %v7407_v10  ;;  %10668 = vst [vmem:[#allocation65_spill] sm:$0xff] %v7411_v54  ;;  %v10669_v1 = vld [vmem:[#allocation56_spill] sm:$0xff] }
 0x376   :  { %2019 = vmatpush2.msra.mxu0 %v7399_v57  ;;  %2090 = vmatpush2.msra.mxu1 %v10664_v44  ;;  %v7415_v57 = vld [vmem:[#allocation5 + $0x5c0] sm:$0xff]  ;;  %v7419_v44 = vld [vmem:[#allocation5 + $0x588] sm:$0xff] }
 0x377   :  { %2020 = vmatprep.subr.mxu0 %v7403_v3  ;;  %2091 = vmatprep.subr.mxu1 %v10666_v6  ;;  %10670 = vst [vmem:[#allocation67_spill] sm:$0xff] %v7415_v57  ;;  %10671 = vst [vmem:[#allocation69_spill] sm:$0xff] %v7419_v44  ;;  %v7423_v6 = vld [vmem:[#allocation5 + $0x580] sm:$0xff] }
 0x378   :  { %2021 = vmatpush2.msra.mxu0 %v7407_v10  ;;  %2092 = vmatpush2.msra.mxu1 %v6858_v60  ;;  %10672 = vst [vmem:[#allocation71_spill] sm:$0xff] %v7423_v6  ;;  %v10673_v60 = vld [vmem:[#allocation123_spill] sm:$0xff] }
 0x379   :  { %2022 = vmatprep.subr.mxu0 %v7411_v54  ;;  %2093 = vmatprep.subr.mxu1 %v10669_v1  ;;  %v7427_v54 = vld [vmem:[#allocation5 + $0x548] sm:$0xff]  ;;  %v10675_v1 = vld [vmem:[#allocation58_spill] sm:$0xff] }
 0x37a   :  { %2023 = vmatpush2.msra.mxu0 %v7415_v57  ;;  %2094 = vmatpush2.msra.mxu1 %v6866_v2  ;;  %10674 = vst [vmem:[#allocation73_spill] sm:$0xff] %v7427_v54  ;;  %v7431_v57 = vld [vmem:[#allocation5 + $0x540] sm:$0xff]  ;;  %v10677_v2 = vld [vmem:[#allocation125_spill] sm:$0xff] }
 0x37b   :  { %2024 = vmatprep.subr.mxu0 %v7419_v44  ;;  %2095 = vmatprep.subr.mxu1 %v6870_v20  ;;  %10676 = vst [vmem:[#allocation75_spill] sm:$0xff] %v7431_v57  ;;  %v7435_v44 = vld [vmem:[#allocation5 + $0x508] sm:$0xff] }
 0x37c   :  { %2025 = vmatpush2.msra.mxu0 %v7423_v6  ;;  %2096 = vmatpush2.msra.mxu1 %v10673_v60  ;;  %10678 = vst [vmem:[#allocation77_spill] sm:$0xff] %v7435_v44  ;;  %v10679_v20 = vld [vmem:[#allocation60_spill] sm:$0xff]  ;;  %v7439_v6 = vld [vmem:[#allocation5 + $0x500] sm:$0xff]  ;;  %v10681_v60 = vld [vmem:[#allocation129_spill] sm:$0xff] }
 0x37d   :  { %2026 = vmatprep.subr.mxu0 %v7427_v54  ;;  %2097 = vmatprep.subr.mxu1 %v10675_v1  ;;  %10680 = vst [vmem:[#allocation82_spill] sm:$0xff] %v7439_v6  ;;  %v7443_v54 = vld [vmem:[#allocation5 + $0x4c8] sm:$0xff]  ;;  %v10683_v1 = vld [vmem:[#allocation62_spill] sm:$0xff] }
 0x37e   :  { %2027 = vmatpush2.msra.mxu0 %v7431_v57  ;;  %2098 = vmatpush2.msra.mxu1 %v10677_v2  ;;  %10682 = vst [vmem:[#allocation83_spill] sm:$0xff] %v7443_v54  ;;  %v7447_v57 = vld [vmem:[#allocation5 + $0x4c0] sm:$0xff] }
 0x37f   :  { %2028 = vmatprep.subr.mxu0 %v7435_v44  ;;  %2099 = vmatprep.subr.mxu1 %v10679_v20  ;;  %10684 = vst [vmem:[#allocation85_spill] sm:$0xff] %v7447_v57  ;;  %v10685_v2 = vld [vmem:[#allocation131_spill] sm:$0xff]  ;;  %v7451_v44 = vld [vmem:[#allocation5 + $0x488] sm:$0xff] }
 0x380   :  { %2029 = vmatpush2.msra.mxu0 %v7439_v6  ;;  %2100 = vmatpush2.msra.mxu1 %v10681_v60  ;;  %10686 = vst [vmem:[#allocation88_spill] sm:$0xff] %v7451_v44  ;;  %v10687_v20 = vld [vmem:[#allocation64_spill] sm:$0xff]  ;;  %v7455_v6 = vld [vmem:[#allocation5 + $0x480] sm:$0xff]  ;;  %v10689_v60 = vld [vmem:[#allocation133_spill] sm:$0xff] }
 0x381   :  { %2030 = vmatprep.subr.mxu0 %v7443_v54  ;;  %2101 = vmatprep.subr.mxu1 %v10683_v1  ;;  %10688 = vst [vmem:[#allocation90_spill] sm:$0xff] %v7455_v6  ;;  %v7459_v54 = vld [vmem:[#allocation5 + $0x448] sm:$0xff]  ;;  %v10691_v1 = vld [vmem:[#allocation66_spill] sm:$0xff] }
 0x382   :  { %2031 = vmatpush2.msra.mxu0 %v7447_v57  ;;  %2102 = vmatpush2.msra.mxu1 %v10685_v2  ;;  %10690 = vst [vmem:[#allocation93_spill] sm:$0xff] %v7459_v54  ;;  %v7463_v57 = vld [vmem:[#allocation5 + $0x440] sm:$0xff]  ;;  %v10693_v2 = vld [vmem:[#allocation136_spill] sm:$0xff] }
 0x383   :  { %2032 = vmatprep.subr.mxu0 %v7451_v44  ;;  %2103 = vmatprep.subr.mxu1 %v10687_v20  ;;  %10692 = vst [vmem:[#allocation95_spill] sm:$0xff] %v7463_v57  ;;  %v7467_v44 = vld [vmem:[#allocation5 + $0x408] sm:$0xff] }
 0x384   :  { %2033 = vmatpush2.msra.mxu0 %v7455_v6  ;;  %2104 = vmatpush2.msra.mxu1 %v10689_v60  ;;  %10694 = vst [vmem:[#allocation99_spill] sm:$0xff] %v7467_v44  ;;  %v10695_v20 = vld [vmem:[#allocation68_spill] sm:$0xff]  ;;  %v7471_v6 = vld [vmem:[#allocation5 + $0x400] sm:$0xff]  ;;  %v10697_v60 = vld [vmem:[#allocation138_spill] sm:$0xff] }
 0x385   :  { %2034 = vmatprep.subr.mxu0 %v7459_v54  ;;  %2105 = vmatprep.subr.mxu1 %v10691_v1  ;;  %10696 = vst [vmem:[#allocation101_spill] sm:$0xff] %v7471_v6  ;;  %v10698_v54 = vld [vmem:[#allocation70_spill] sm:$0xff]  ;;  %v10699_v1 = vld [vmem:[#allocation72_spill] sm:$0xff] }
 0x386   :  { %2035 = vmatpush2.msra.mxu0 %v7463_v57  ;;  %2106 = vmatpush2.msra.mxu1 %v10693_v2  ;;  %v10700_v57 = vld [vmem:[#allocation110_spill] sm:$0xff] }
 0x387   :  { %2036 = vmatprep.subr.mxu0 %v7467_v44  ;;  %2107 = vmatprep.subr.mxu1 %v10695_v20 }
 0x388   :  { %2037 = vmatpush2.msra.mxu0 %v7471_v6  ;;  %2108 = vmatpush2.msra.mxu1 %v10697_v60 }
 0x389   :  { %2116 = vmatprep.subr.mxu0 %v10698_v54  ;;  %2187 = vmatprep.subr.mxu1 %v10699_v1 }
 0x3c7   :  { %v1692_v10 = vpop.f32.mrf.mxu0  ;;  %v1763_v20 = vpop.f32.mrf.mxu1 }
 0x3c8   :  { %v1918_v3 = vadd.f32 %v1692_v10, %v10700_v57  ;;  %v1920_v24 = vadd.f32 %v1763_v20, %v10702_v31 }
 0x3c9   :  { %v1694_v2 = vpop.f32.mrf.mxu0  ;;  %v1765_v31 = vpop.f32.mrf.mxu1 }
 0x3ca   :  { %v4006_v49 = vmul.f32 -1.442695, %v1918_v3  ;;  %v1919_v26 = vadd.f32 %v1694_v2, %v10701_v46 }
 0x3cc   :  { %4157 = vpow2.f32 %v4006_v49  ;;  %v4008_v44 = vmul.f32 -1.442695, %v1919_v26  ;;  %v10703_v49 = vld [vmem:[#allocation164_spill] sm:$0xff] }
 0x3ce   :  { %4159 = vpow2.f32 %v4008_v44 }
 0x3cf   :  { %4161 = vtanh.f32 %v1920_v24 }
 0x3d9   :  { %v4158_v6 = vpop.eup %4157 }
 0x3da   :  { %v1932_v18 = vadd.f32 1.0, %v4158_v6  ;;  %v10704_v6 = vld [vmem:[#allocation165_spill] sm:$0xff] }
 0x3db   :  { %v4160_v60 = vpop.eup %4159 }
 0x3dc   :  { %4163 = vrcp.f32 %v1932_v18  ;;  %v1944_v54 = vadd.f32 1.0, %v4160_v60  ;;  %v4162_v1 = vpop.eup %4161 }
 0x3de   :  { %4165 = vrcp.f32 %v1944_v54 }
 0x3e9   :  { %v4164_v15 = vpop.eup %4163 }
 0x3ea   :  { %v1966_v10 = vmul.f32 %v4164_v15, %v4162_v1  ;;  %v10705_v15 = vld [vmem:[#allocation177_spill] sm:$0xff] }
 0x3eb   :  { %v4166_v57 = vpop.eup %4165  ;;  %v596_v54 = vadd.f32 %v10705_v15, %v6401_v55 }
 0x3ec   :  { %v1964_v3 = vmul.f32 %v4166_v57, %v6935_v52  ;;  %v10706_v52 = vld [vmem:[#allocation176_spill] sm:$0xff]  ;;  %v10707_v57 = vld [vmem:[#allocation145_spill] sm:$0xff] }
 0x3ee   :  { %v7481_v46 = vadd.f32 %v1966_v10, %v1964_v3  ;;  %v594_v10 = vadd.f32 %v10706_v52, %v6398_v17  ;;  %v1921_v3 = vadd.f32 %v1765_v31, %v10707_v57 }
 0x408   :  { %v1834_v26 = vpop.f32.mrf.mxu0  ;;  %v1905_v18 = vpop.f32.mrf.mxu1 }
 0x409   :  { %v1922_v44 = vadd.f32 %v1834_v26, %v10703_v49  ;;  %v1924_v26 = vadd.f32 %v1905_v18, %v594_v10 }
 0x40a   :  { %v1836_v2 = vpop.f32.mrf.mxu0  ;;  %v1907_v60 = vpop.f32.mrf.mxu1 }
 0x40b   :  { %v4007_v20 = vmul.f32 -1.442695, %v1922_v44  ;;  %v1923_v61 = vadd.f32 %v1836_v2, %v10704_v6  ;;  %v1925_v1 = vadd.f32 %v1907_v60, %v596_v54  ;;  %v4010_v44 = vmul.f32 -1.442695, %v1921_v3 }
 0x40d   :  { %4167 = vpow2.f32 %v4007_v20  ;;  %v4009_v24 = vmul.f32 -1.442695, %v1923_v61  ;;  %v4011_v49 = vmul.f32 -1.442695, %v1925_v1 }
 0x40f   :  { %4169 = vpow2.f32 %v4009_v24 }
 0x410   :  { %4171 = vtanh.f32 %v1924_v26 }
 0x411   :  { %4173 = vpow2.f32 %v4011_v49  ;;  %v7506_v49 = vld [vmem:[#allocation5 + $0x3f0] sm:$0xff] }
 0x41a   :  { %v4168_v41 = vpop.eup %4167 }
 0x41b   :  { %v1933_v39 = vadd.f32 1.0, %v4168_v41 }
 0x41c   :  { %v4170_v2 = vpop.eup %4169 }
 0x41d   :  { %4175 = vrcp.f32 %v1933_v39  ;;  %v1945_v61 = vadd.f32 1.0, %v4170_v2  ;;  %v4172_v20 = vpop.eup %4171  ;;  %v7513_v2 = vld [vmem:[#allocation5 + $0x3b8] sm:$0xff] }
 0x41e   :  { %4177 = vpow2.f32 %v4010_v44  ;;  %v4174_v6 = vpop.eup %4173  ;;  %v7509_v44 = vld [vmem:[#allocation5 + $0x3a8] sm:$0xff] }
 0x41f   :  { %4179 = vrcp.f32 %v1945_v61  ;;  %v1959_v52 = vadd.f32 1.0, %v4174_v6  ;;  %v7517_v61 = vld [vmem:[#allocation5 + $0x3a0] sm:$0xff]  ;;  %v7523_v6 = vld [vmem:[#allocation5 + $0x368] sm:$0xff] }
 0x420   :  { %4181 = vtanh.f32 %v7481_v46 }
 0x421   :  { %4183 = vrcp.f32 %v1959_v52  ;;  %v7538_v52 = vld [vmem:[#allocation5 + $0x338] sm:$0xff] }
 0x42a   :  { %v4176_v24 = vpop.eup %4175 }
 0x42b   :  { %v4178_v60 = vpop.eup %4177  ;;  %v1967_v15 = vmul.f32 %v4176_v24, %v4172_v20  ;;  %v7520_v20 = vld [vmem:[#allocation5 + $0x3b0] sm:$0xff]  ;;  %v7526_v24 = vld [vmem:[#allocation5 + $0x378] sm:$0xff] }
 0x42c   :  { %v4180_v54 = vpop.eup %4179  ;;  %v1958_v18 = vadd.f32 1.0, %v4178_v60  ;;  %v7529_v60 = vld [vmem:[#allocation5 + $0x360] sm:$0xff] }
 0x42d   :  { %v1965_v31 = vmul.f32 %v4180_v54, %v6946_v28  ;;  %v4182_v39 = vpop.eup %4181  ;;  %v7503_v28 = vld [vmem:[#allocation5 + $0x3e0] sm:$0xff]  ;;  %v7535_v54 = vld [vmem:[#allocation5 + $0x328] sm:$0xff] }
 0x42e   :  { %v4184_v1 = vpop.eup %4183 }
 0x42f   :  { %v7492_v41 = vadd.f32 %v1967_v15, %v1965_v31  ;;  %v7532_v15 = vld [vmem:[#allocation5 + $0x370] sm:$0xff]  ;;  %v7541_v31 = vld [vmem:[#allocation5 + $0x320] sm:$0xff] }
 0x431   :  { %4185 = vtanh.f32 %v7492_v41 }
 0x432   :  { %4187 = vrcp.f32 %v1958_v18  ;;  %v7544_v18 = vld [vmem:[#allocation5 + $0x330] sm:$0xff] }
 0x433   :  { %10710 = vst [vmem:[#allocation107_spill] sm:$0xff] %v7544_v18 }
 0x43e   :  { %v4186_v10 = vpop.eup %4185 }
 0x43f   :  { %v4188_v57 = vpop.eup %4187  ;;  %v7495_v3 = vmul.f32 %v4186_v10, %v4184_v1  ;;  %v7550_v1 = vld [vmem:[#allocation5 + $0x2f8] sm:$0xff]  ;;  %v7553_v10 = vld [vmem:[#allocation5 + $0x2e0] sm:$0xff] }
 0x440   :  { %v7497_v26 = vmul.f32 %v4188_v57, %v4182_v39  ;;  %v7547_v39 = vld [vmem:[#allocation5 + $0x2e8] sm:$0xff]  ;;  %10712 = vst [vmem:[#allocation111_spill] sm:$0xff] %v7550_v1  ;;  %10713 = vst [vmem:[#allocation50_spill] sm:$0xff] %v7553_v10  ;;  %v7556_v57 = vld [vmem:[#allocation5 + $0x2f0] sm:$0xff] }
 0x441   :  { %10708 = vst [vmem:[#allocation105_spill] sm:$0xff] %v7495_v3  ;;  %2038 = vmatprep.mubr.f32.mxu0 %v7495_v3  ;;  %2109 = vmatprep.mubr.f32.mxu1 %v7495_v3  ;;  %10711 = vst [vmem:[#allocation48_spill] sm:$0xff] %v7547_v39 }
 0x442   :  { %10709 = vst [vmem:[#allocation46_spill] sm:$0xff] %v7497_v26  ;;  %2039 = vmatmul.mubr.f32.vlgmr.msra.gmra.mxu0 %v7497_v26  ;;  %2110 = vmatmul.mubr.f32.vlgmr.msra.gmra.mxu1 %v7497_v26  ;;  %10714 = vst [vmem:[#allocation113_spill] sm:$0xff] %v7556_v57 }
 0x443   :  { %2117 = vmatpush1.msra.mxu0 %v7503_v28  ;;  %2188 = vmatpush1.msra.mxu1 %v7506_v49 }
 0x444   :  { %2118 = vmatprep.subr.mxu0 %v7509_v44  ;;  %2180 = vmatprep.mubr.f32.mxu0 %v7495_v3 }
 0x445   :  { %2189 = vmatprep.subr.mxu1 %v7513_v2  ;;  %2251 = vmatprep.mubr.f32.mxu1 %v7495_v3  ;;  %v7559_v3 = vld [vmem:[#allocation5 + $0x2a8] sm:$0xff] }
 0x446   :  { %2119 = vmatpush1.msra.mxu0 %v7517_v61  ;;  %2190 = vmatpush1.msra.mxu1 %v7520_v20 }
 0x447   :  { %2120 = vmatprep.subr.mxu0 %v7523_v6  ;;  %2191 = vmatprep.subr.mxu1 %v7526_v24 }
 0x448   :  { %2121 = vmatpush1.msra.mxu0 %v7529_v60  ;;  %2192 = vmatpush1.msra.mxu1 %v7532_v15 }
 0x449   :  { %2122 = vmatprep.subr.mxu0 %v7535_v54  ;;  %2193 = vmatprep.subr.mxu1 %v7538_v52 }
 0x44a   :  { %2123 = vmatpush1.msra.mxu0 %v7541_v31  ;;  %2194 = vmatpush1.msra.mxu1 %v7544_v18  ;;  %v7562_v18 = vld [vmem:[#allocation5 + $0x2b8] sm:$0xff] }
 0x44b   :  { %2124 = vmatprep.subr.mxu0 %v7547_v39  ;;  %2195 = vmatprep.subr.mxu1 %v7550_v1  ;;  %10715 = vst [vmem:[#allocation52_spill] sm:$0xff] %v7562_v18  ;;  %v7565_v39 = vld [vmem:[#allocation5 + $0x2a0] sm:$0xff]  ;;  %v7568_v1 = vld [vmem:[#allocation5 + $0x2b0] sm:$0xff] }
 0x44c   :  { %2125 = vmatpush1.msra.mxu0 %v7553_v10  ;;  %2196 = vmatpush1.msra.mxu1 %v7556_v57  ;;  %10716 = vst [vmem:[#allocation117_spill] sm:$0xff] %v7565_v39  ;;  %v7571_v10 = vld [vmem:[#allocation5 + $0x268] sm:$0xff]  ;;  %v7575_v57 = vld [vmem:[#allocation5 + $0x260] sm:$0xff] }
 0x44d   :  { %2126 = vmatprep.subr.mxu0 %v7559_v3  ;;  %2197 = vmatprep.subr.mxu1 %v7562_v18  ;;  %10717 = vst [vmem:[#allocation54_spill] sm:$0xff] %v7571_v10  ;;  %v7579_v18 = vld [vmem:[#allocation5 + $0x228] sm:$0xff] }
 0x44e   :  { %2127 = vmatpush1.msra.mxu0 %v7565_v39  ;;  %2198 = vmatpush1.msra.mxu1 %v7568_v1  ;;  %v7583_v39 = vld [vmem:[#allocation5 + $0x220] sm:$0xff] }
 0x44f   :  { %2128 = vmatprep.subr.mxu0 %v7571_v10  ;;  %2199 = vmatprep.subr.mxu1 %v6982_v38  ;;  %v7587_v10 = vld [vmem:[#allocation5 + $0x1e8] sm:$0xff]  ;;  %v7591_v38 = vld [vmem:[#allocation5 + $0x1e0] sm:$0xff] }
 0x450   :  { %2129 = vmatpush1.msra.mxu0 %v7575_v57  ;;  %2200 = vmatpush1.msra.mxu1 %v6986_v45  ;;  %v7595_v45 = vld [vmem:[#allocation5 + $0x1a8] sm:$0xff] }
 0x451   :  { %2130 = vmatprep.subr.mxu0 %v7579_v18  ;;  %2201 = vmatprep.subr.mxu1 %v6990_v47  ;;  %v7599_v47 = vld [vmem:[#allocation5 + $0x1a0] sm:$0xff] }
 0x452   :  { %2131 = vmatpush1.msra.mxu0 %v7583_v39  ;;  %2202 = vmatpush1.msra.mxu1 %v6994_v42  ;;  %v7603_v42 = vld [vmem:[#allocation5 + $0x168] sm:$0xff] }
 0x453   :  { %2132 = vmatprep.subr.mxu0 %v7587_v10  ;;  %2203 = vmatprep.subr.mxu1 %v6998_v4  ;;  %v7607_v4 = vld [vmem:[#allocation5 + $0x160] sm:$0xff] }
 0x454   :  { %2133 = vmatpush1.msra.mxu0 %v7591_v38  ;;  %2204 = vmatpush1.msra.mxu1 %v7002_v48  ;;  %v7611_v48 = vld [vmem:[#allocation5 + $0x128] sm:$0xff] }
 0x455   :  { %2134 = vmatprep.subr.mxu0 %v7595_v45  ;;  %2205 = vmatprep.subr.mxu1 %v7006_v19  ;;  %v7615_v19 = vld [vmem:[#allocation5 + $0x120] sm:$0xff] }
 0x456   :  { %2135 = vmatpush1.msra.mxu0 %v7599_v47  ;;  %2206 = vmatpush1.msra.mxu1 %v7010_v23  ;;  %v7619_v23 = vld [vmem:[#allocation5 + $0xe8] sm:$0xff] }
 0x457   :  { %2136 = vmatprep.subr.mxu0 %v7603_v42  ;;  %2207 = vmatprep.subr.mxu1 %v7014_v53  ;;  %v7623_v53 = vld [vmem:[#allocation5 + $0xe0] sm:$0xff] }
 0x458   :  { %2137 = vmatpush1.msra.mxu0 %v7607_v4  ;;  %2208 = vmatpush1.msra.mxu1 %v7018_v34  ;;  %v7627_v34 = vld [vmem:[#allocation5 + $0xa8] sm:$0xff] }
 0x459   :  { %2138 = vmatprep.subr.mxu0 %v7611_v48  ;;  %2209 = vmatprep.subr.mxu1 %v7022_v62  ;;  %v7631_v62 = vld [vmem:[#allocation5 + $0xa0] sm:$0xff] }
 0x45a   :  { %2139 = vmatpush1.msra.mxu0 %v7615_v19  ;;  %2210 = vmatpush1.msra.mxu1 %v7026_v12  ;;  %v7635_v12 = vld [vmem:[#allocation5 + $0x68] sm:$0xff] }
 0x45b   :  { %2140 = vmatprep.subr.mxu0 %v7619_v23  ;;  %2211 = vmatprep.subr.mxu1 %v7030_v21  ;;  %v7639_v21 = vld [vmem:[#allocation5 + $0x60] sm:$0xff] }
 0x45c   :  { %2141 = vmatpush1.msra.mxu0 %v7623_v53  ;;  %2212 = vmatpush1.msra.mxu1 %v7034_v36  ;;  %v7643_v36 = vld [vmem:[#allocation5 + $0x28] sm:$0xff] }
 0x45d   :  { %2142 = vmatprep.subr.mxu0 %v7627_v34  ;;  %2213 = vmatprep.subr.mxu1 %v7038_v0  ;;  %v7647_v0 = vld [vmem:[#allocation5 + $0x20] sm:$0xff] }
 0x45e   :  { %2143 = vmatpush1.msra.mxu0 %v7631_v62  ;;  %2214 = vmatpush1.msra.mxu1 %v7042_v35  ;;  %v7651_v35 = vld [vmem:[#allocation5 + $0x7e8] sm:$0xff] }
 0x45f   :  { %2144 = vmatprep.subr.mxu0 %v7635_v12  ;;  %2215 = vmatprep.subr.mxu1 %v7046_v25  ;;  %v7655_v25 = vld [vmem:[#allocation5 + $0x7e0] sm:$0xff] }
 0x460   :  { %2145 = vmatpush1.msra.mxu0 %v7639_v21  ;;  %2216 = vmatpush1.msra.mxu1 %v7050_v40  ;;  %v7659_v40 = vld [vmem:[#allocation5 + $0x7a8] sm:$0xff] }
 0x461   :  { %2146 = vmatprep.subr.mxu0 %v7643_v36  ;;  %2217 = vmatprep.subr.mxu1 %v7054_v30  ;;  %v7663_v30 = vld [vmem:[#allocation5 + $0x7a0] sm:$0xff] }
 0x462   :  { %2147 = vmatpush1.msra.mxu0 %v7647_v0  ;;  %2218 = vmatpush1.msra.mxu1 %v7058_v63  ;;  %v7667_v63 = vld [vmem:[#allocation5 + $0x768] sm:$0xff] }
 0x463   :  { %2148 = vmatprep.subr.mxu0 %v7651_v35  ;;  %2219 = vmatprep.subr.mxu1 %v7062_v11  ;;  %v7671_v11 = vld [vmem:[#allocation5 + $0x760] sm:$0xff] }
 0x464   :  { %2149 = vmatpush2.msra.mxu0 %v7655_v25  ;;  %2220 = vmatpush2.msra.mxu1 %v7066_v9  ;;  %v7675_v9 = vld [vmem:[#allocation5 + $0x728] sm:$0xff] }
 0x465   :  { %2150 = vmatprep.subr.mxu0 %v7659_v40  ;;  %2221 = vmatprep.subr.mxu1 %v7070_v14  ;;  %10718 = vst [vmem:[#allocation119_spill] sm:$0xff] %v7675_v9  ;;  %v7679_v14 = vld [vmem:[#allocation5 + $0x720] sm:$0xff] }
 0x466   :  { %2151 = vmatpush2.msra.mxu0 %v7663_v30  ;;  %2222 = vmatpush2.msra.mxu1 %v7074_v37  ;;  %10719 = vst [vmem:[#allocation56_spill] sm:$0xff] %v7679_v14  ;;  %v7683_v37 = vld [vmem:[#allocation5 + $0x6e8] sm:$0xff] }
 0x467   :  { %2152 = vmatprep.subr.mxu0 %v7667_v63  ;;  %2223 = vmatprep.subr.mxu1 %v7078_v58  ;;  %10720 = vst [vmem:[#allocation123_spill] sm:$0xff] %v7683_v37  ;;  %v7687_v58 = vld [vmem:[#allocation5 + $0x6e0] sm:$0xff] }
 0x468   :  { %2153 = vmatpush2.msra.mxu0 %v7671_v11  ;;  %2224 = vmatpush2.msra.mxu1 %v7082_v50  ;;  %10721 = vst [vmem:[#allocation58_spill] sm:$0xff] %v7687_v58  ;;  %v7691_v50 = vld [vmem:[#allocation5 + $0x6a8] sm:$0xff] }
 0x469   :  { %2154 = vmatprep.subr.mxu0 %v7675_v9  ;;  %2225 = vmatprep.subr.mxu1 %v7086_v22  ;;  %10722 = vst [vmem:[#allocation125_spill] sm:$0xff] %v7691_v50  ;;  %v7695_v22 = vld [vmem:[#allocation5 + $0x6a0] sm:$0xff] }
 0x46a   :  { %2155 = vmatpush2.msra.mxu0 %v7679_v14  ;;  %2226 = vmatpush2.msra.mxu1 %v7090_v5  ;;  %10723 = vst [vmem:[#allocation60_spill] sm:$0xff] %v7695_v22  ;;  %v7699_v5 = vld [vmem:[#allocation5 + $0x668] sm:$0xff] }
 0x46b   :  { %2156 = vmatprep.subr.mxu0 %v7683_v37  ;;  %2227 = vmatprep.subr.mxu1 %v7094_v7  ;;  %10724 = vst [vmem:[#allocation129_spill] sm:$0xff] %v7699_v5  ;;  %v7703_v7 = vld [vmem:[#allocation5 + $0x660] sm:$0xff] }
 0x46c   :  { %2157 = vmatpush2.msra.mxu0 %v7687_v58  ;;  %2228 = vmatpush2.msra.mxu1 %v7098_v51  ;;  %10725 = vst [vmem:[#allocation62_spill] sm:$0xff] %v7703_v7  ;;  %v7707_v51 = vld [vmem:[#allocation5 + $0x628] sm:$0xff] }
 0x46d   :  { %2158 = vmatprep.subr.mxu0 %v7691_v50  ;;  %2229 = vmatprep.subr.mxu1 %v7102_v33  ;;  %10726 = vst [vmem:[#allocation131_spill] sm:$0xff] %v7707_v51  ;;  %v7711_v33 = vld [vmem:[#allocation5 + $0x620] sm:$0xff] }
 0x46e   :  { %2159 = vmatpush2.msra.mxu0 %v7695_v22  ;;  %2230 = vmatpush2.msra.mxu1 %v7106_v56  ;;  %10727 = vst [vmem:[#allocation64_spill] sm:$0xff] %v7711_v33  ;;  %v7715_v56 = vld [vmem:[#allocation5 + $0x5e8] sm:$0xff] }
 0x46f   :  { %2160 = vmatprep.subr.mxu0 %v7699_v5  ;;  %2231 = vmatprep.subr.mxu1 %v7110_v43  ;;  %10728 = vst [vmem:[#allocation133_spill] sm:$0xff] %v7715_v56  ;;  %v7719_v43 = vld [vmem:[#allocation5 + $0x5e0] sm:$0xff] }
 0x470   :  { %2161 = vmatpush2.msra.mxu0 %v7703_v7  ;;  %2232 = vmatpush2.msra.mxu1 %v7114_v16  ;;  %10729 = vst [vmem:[#allocation66_spill] sm:$0xff] %v7719_v43  ;;  %v7723_v16 = vld [vmem:[#allocation5 + $0x5a8] sm:$0xff] }
 0x471   :  { %2162 = vmatprep.subr.mxu0 %v7707_v51  ;;  %2233 = vmatprep.subr.mxu1 %v7118_v59  ;;  %10730 = vst [vmem:[#allocation136_spill] sm:$0xff] %v7723_v16  ;;  %v7727_v59 = vld [vmem:[#allocation5 + $0x5a0] sm:$0xff] }
 0x472   :  { %2163 = vmatpush2.msra.mxu0 %v7711_v33  ;;  %2234 = vmatpush2.msra.mxu1 %v7122_v29  ;;  %10731 = vst [vmem:[#allocation68_spill] sm:$0xff] %v7727_v59  ;;  %v7731_v29 = vld [vmem:[#allocation5 + $0x568] sm:$0xff]  ;;  %v10784_v33 = vld [vmem:[#allocation11_spill] sm:$0xff] }
 0x473   :  { %2164 = vmatprep.subr.mxu0 %v7715_v56  ;;  %2235 = vmatprep.subr.mxu1 %v7126_v27  ;;  %10732 = vst [vmem:[#allocation138_spill] sm:$0xff] %v7731_v29  ;;  %v10733_v27 = vld [vmem:[#allocation78_spill] sm:$0xff]  ;;  %v10781_v56 = vld [vmem:[#allocation104_spill] sm:$0xff] }
 0x474   :  { %2165 = vmatpush2.msra.mxu0 %v7719_v43  ;;  %2236 = vmatpush2.msra.mxu1 %v7130_v8  ;;  %v7735_v43 = vld [vmem:[#allocation5 + $0x560] sm:$0xff] }
 0x475   :  { %2166 = vmatprep.subr.mxu0 %v7723_v16  ;;  %2237 = vmatprep.subr.mxu1 %v7134_v32  ;;  %10734 = vst [vmem:[#allocation70_spill] sm:$0xff] %v7735_v43  ;;  %v10735_v8 = vld [vmem:[#allocation79_spill] sm:$0xff]  ;;  %v7739_v16 = vld [vmem:[#allocation5 + $0x528] sm:$0xff] }
 0x476   :  { %2167 = vmatpush2.msra.mxu0 %v7727_v59  ;;  %2238 = vmatpush2.msra.mxu1 %v7138_v13  ;;  %10736 = vst [vmem:[#allocation72_spill] sm:$0xff] %v7739_v16  ;;  %v10737_v32 = vld [vmem:[#allocation80_spill] sm:$0xff]  ;;  %v7743_v59 = vld [vmem:[#allocation5 + $0x520] sm:$0xff]  ;;  %v10739_v13 = vld [vmem:[#allocation81_spill] sm:$0xff] }
 0x477   :  { %2168 = vmatprep.subr.mxu0 %v7731_v29  ;;  %2239 = vmatprep.subr.mxu1 %v10733_v27  ;;  %10738 = vst [vmem:[#allocation110_spill] sm:$0xff] %v7743_v59  ;;  %v7747_v29 = vld [vmem:[#allocation5 + $0x4e8] sm:$0xff] }
 0x478   :  { %2169 = vmatpush2.msra.mxu0 %v7735_v43  ;;  %2240 = vmatpush2.msra.mxu1 %v10735_v8  ;;  %10740 = vst [vmem:[#allocation116_spill] sm:$0xff] %v7747_v29  ;;  %v10741_v27 = vld [vmem:[#allocation84_spill] sm:$0xff]  ;;  %v7751_v43 = vld [vmem:[#allocation5 + $0x4e0] sm:$0xff]  ;;  %v10743_v8 = vld [vmem:[#allocation86_spill] sm:$0xff] }
 0x479   :  { %2170 = vmatprep.subr.mxu0 %v7739_v16  ;;  %2241 = vmatprep.subr.mxu1 %v10737_v32  ;;  %10742 = vst [vmem:[#allocation144_spill] sm:$0xff] %v7751_v43  ;;  %v7755_v16 = vld [vmem:[#allocation5 + $0x4a8] sm:$0xff]  ;;  %v10745_v32 = vld [vmem:[#allocation89_spill] sm:$0xff] }
 0x47a   :  { %2171 = vmatpush2.msra.mxu0 %v7743_v59  ;;  %2242 = vmatpush2.msra.mxu1 %v10739_v13  ;;  %10744 = vst [vmem:[#allocation164_spill] sm:$0xff] %v7755_v16  ;;  %v7759_v59 = vld [vmem:[#allocation5 + $0x4a0] sm:$0xff] }
 0x47b   :  { %2172 = vmatprep.subr.mxu0 %v7747_v29  ;;  %2243 = vmatprep.subr.mxu1 %v10741_v27  ;;  %10746 = vst [vmem:[#allocation165_spill] sm:$0xff] %v7759_v59  ;;  %v10747_v13 = vld [vmem:[#allocation91_spill] sm:$0xff]  ;;  %v7763_v29 = vld [vmem:[#allocation5 + $0x468] sm:$0xff]  ;;  %v10749_v27 = vld [vmem:[#allocation94_spill] sm:$0xff] }
 0x47c   :  { %2173 = vmatpush2.msra.mxu0 %v7751_v43  ;;  %2244 = vmatpush2.msra.mxu1 %v10743_v8  ;;  %10748 = vst [vmem:[#allocation177_spill] sm:$0xff] %v7763_v29  ;;  %v7767_v43 = vld [vmem:[#allocation5 + $0x460] sm:$0xff]  ;;  %v10751_v8 = vld [vmem:[#allocation96_spill] sm:$0xff] }
 0x47d   :  { %2174 = vmatprep.subr.mxu0 %v7755_v16  ;;  %2245 = vmatprep.subr.mxu1 %v10745_v32  ;;  %10750 = vst [vmem:[#allocation176_spill] sm:$0xff] %v7767_v43  ;;  %v7771_v16 = vld [vmem:[#allocation5 + $0x428] sm:$0xff] }
 0x47e   :  { %2175 = vmatpush2.msra.mxu0 %v7759_v59  ;;  %2246 = vmatpush2.msra.mxu1 %v10747_v13  ;;  %10752 = vst [vmem:[#allocation145_spill] sm:$0xff] %v7771_v16  ;;  %v10753_v32 = vld [vmem:[#allocation100_spill] sm:$0xff]  ;;  %v7775_v59 = vld [vmem:[#allocation5 + $0x420] sm:$0xff]  ;;  %v10755_v13 = vld [vmem:[#allocation102_spill] sm:$0xff] }
 0x47f   :  { %2176 = vmatprep.subr.mxu0 %v7763_v29  ;;  %2247 = vmatprep.subr.mxu1 %v10749_v27  ;;  %10754 = vst [vmem:[#allocation78_spill] sm:$0xff] %v7775_v59  ;;  %v7781_v27 = vld [vmem:[#allocation5 + $0x3c8] sm:$0xff]  ;;  %v10778_v29 = vld [vmem:[#allocation139_spill] sm:$0xff] }
 0x480   :  { %2177 = vmatpush2.msra.mxu0 %v7767_v43  ;;  %2248 = vmatpush2.msra.mxu1 %v10751_v8  ;;  %10756 = vst [vmem:[#allocation79_spill] sm:$0xff] %v7781_v27  ;;  %v10757_v8 = vld [vmem:[#allocation106_spill] sm:$0xff]  ;;  %v7785_v43 = vld [vmem:[#allocation5 + $0x3c0] sm:$0xff] }
 0x481   :  { %2178 = vmatprep.subr.mxu0 %v7771_v16  ;;  %2249 = vmatprep.subr.mxu1 %v10753_v32  ;;  %10758 = vst [vmem:[#allocation80_spill] sm:$0xff] %v7785_v43  ;;  %v10759_v32 = vld [vmem:[#allocation108_spill] sm:$0xff] }
 0x482   :  { %2179 = vmatpush2.msra.mxu0 %v7775_v59  ;;  %2250 = vmatpush2.msra.mxu1 %v10755_v13  ;;  %v7789_v16 = vld [vmem:[#allocation5 + $0x388] sm:$0xff]  ;;  %v7793_v59 = vld [vmem:[#allocation5 + $0x380] sm:$0xff] }
 0x483   :  { %2181 = vmatmul.mubr.f32.vlgmr.msra.gmra.mxu0 %v7497_v26  ;;  %2252 = vmatmul.mubr.f32.vlgmr.msra.gmra.mxu1 %v7497_v26  ;;  %10760 = vst [vmem:[#allocation81_spill] sm:$0xff] %v7789_v16  ;;  %v10761_v13 = vld [vmem:[#allocation112_spill] sm:$0xff]  ;;  %10762 = vst [vmem:[#allocation84_spill] sm:$0xff] %v7793_v59  ;;  %v10763_v26 = vld [vmem:[#allocation114_spill] sm:$0xff] }
 0x484   :  { %2322 = vmatprep.subr.mxu0 %v7781_v27  ;;  %2393 = vmatprep.subr.mxu1 %v10757_v8  ;;  %v7797_v27 = vld [vmem:[#allocation5 + $0x348] sm:$0xff]  ;;  %v10765_v8 = vld [vmem:[#allocation118_spill] sm:$0xff] }
 0x485   :  { %2323 = vmatpush1.msra.mxu0 %v7785_v43  ;;  %2394 = vmatpush1.msra.mxu1 %v10759_v32  ;;  %10764 = vst [vmem:[#allocation86_spill] sm:$0xff] %v7797_v27  ;;  %v7801_v43 = vld [vmem:[#allocation5 + $0x340] sm:$0xff]  ;;  %v10767_v32 = vld [vmem:[#allocation120_spill] sm:$0xff] }
 0x486   :  { %2324 = vmatprep.subr.mxu0 %v7789_v16  ;;  %2395 = vmatprep.subr.mxu1 %v10761_v13  ;;  %10766 = vst [vmem:[#allocation89_spill] sm:$0xff] %v7801_v43  ;;  %v7805_v16 = vld [vmem:[#allocation5 + $0x308] sm:$0xff] }
 0x487   :  { %2325 = vmatpush1.msra.mxu0 %v7793_v59  ;;  %2396 = vmatpush1.msra.mxu1 %v10763_v26  ;;  %10768 = vst [vmem:[#allocation91_spill] sm:$0xff] %v7805_v16  ;;  %v10769_v13 = vld [vmem:[#allocation124_spill] sm:$0xff]  ;;  %v7809_v59 = vld [vmem:[#allocation5 + $0x300] sm:$0xff]  ;;  %v10771_v26 = vld [vmem:[#allocation126_spill] sm:$0xff] }
 0x488   :  { %2326 = vmatprep.subr.mxu0 %v7797_v27  ;;  %2397 = vmatprep.subr.mxu1 %v10765_v8  ;;  %10770 = vst [vmem:[#allocation94_spill] sm:$0xff] %v7809_v59  ;;  %v7813_v27 = vld [vmem:[#allocation5 + $0x2c8] sm:$0xff]  ;;  %v10773_v8 = vld [vmem:[#allocation130_spill] sm:$0xff] }
 0x489   :  { %2327 = vmatpush1.msra.mxu0 %v7801_v43  ;;  %2398 = vmatpush1.msra.mxu1 %v10767_v32  ;;  %10772 = vst [vmem:[#allocation96_spill] sm:$0xff] %v7813_v27  ;;  %v7817_v43 = vld [vmem:[#allocation5 + $0x2c0] sm:$0xff]  ;;  %v10775_v32 = vld [vmem:[#allocation132_spill] sm:$0xff] }
 0x48a   :  { %2328 = vmatprep.subr.mxu0 %v7805_v16  ;;  %2399 = vmatprep.subr.mxu1 %v10769_v13  ;;  %10774 = vst [vmem:[#allocation100_spill] sm:$0xff] %v7817_v43  ;;  %v10776_v16 = vld [vmem:[#allocation134_spill] sm:$0xff]  ;;  %v10777_v13 = vld [vmem:[#allocation137_spill] sm:$0xff] }
 0x48b   :  { %2329 = vmatpush1.msra.mxu0 %v7809_v59  ;;  %2400 = vmatpush1.msra.mxu1 %v10771_v26  ;;  %v10779_v59 = vld [vmem:[#allocation142_spill] sm:$0xff] }
 0x48c   :  { %2330 = vmatprep.subr.mxu0 %v7813_v27  ;;  %2401 = vmatprep.subr.mxu1 %v10773_v8  ;;  %v10780_v26 = vld [vmem:[#allocation98_spill] sm:$0xff]  ;;  %v10782_v27 = vld [vmem:[#allocation141_spill] sm:$0xff]  ;;  %v10783_v8 = vld [vmem:[#allocation143_spill] sm:$0xff] }
 0x48d   :  { %2331 = vmatpush1.msra.mxu0 %v7817_v43  ;;  %2402 = vmatpush1.msra.mxu1 %v10775_v32  ;;  %v10785_v43 = vld [vmem:[#allocation12_spill] sm:$0xff]  ;;  %v10786_v32 = vld [vmem:[#allocation13_spill] sm:$0xff] }
 0x48e   :  { %2332 = vmatprep.subr.mxu0 %v10776_v16  ;;  %2403 = vmatprep.subr.mxu1 %v10777_v13  ;;  %v10787_v16 = vld [vmem:[#allocation14_spill] sm:$0xff]  ;;  %v10788_v13 = vld [vmem:[#allocation15_spill] sm:$0xff] }
 0x48f   :  { %2333 = vmatpush1.msra.mxu0 %v10778_v29  ;;  %2404 = vmatpush1.msra.mxu1 %v10779_v59  ;;  %v10789_v29 = vld [vmem:[#allocation16_spill] sm:$0xff]  ;;  %v10790_v59 = vld [vmem:[#allocation17_spill] sm:$0xff] }
 0x490   :  { %2334 = vmatprep.subr.mxu0 %v10780_v26  ;;  %2405 = vmatprep.subr.mxu1 %v10781_v56  ;;  %v10791_v26 = vld [vmem:[#allocation18_spill] sm:$0xff]  ;;  %v10792_v56 = vld [vmem:[#allocation19_spill] sm:$0xff] }
 0x491   :  { %2335 = vmatpush1.msra.mxu0 %v10782_v27  ;;  %2406 = vmatpush1.msra.mxu1 %v10783_v8  ;;  %v10793_v27 = vld [vmem:[#allocation20_spill] sm:$0xff]  ;;  %v10794_v8 = vld [vmem:[#allocation21_spill] sm:$0xff] }
 0x492   :  { %2336 = vmatprep.subr.mxu0 %v10784_v33  ;;  %2407 = vmatprep.subr.mxu1 %v10785_v43  ;;  %v10795_v33 = vld [vmem:[#allocation22_spill] sm:$0xff]  ;;  %v10796_v43 = vld [vmem:[#allocation23_spill] sm:$0xff] }
 0x493   :  { %2337 = vmatpush1.msra.mxu0 %v10786_v32  ;;  %2408 = vmatpush1.msra.mxu1 %v10787_v16  ;;  %v10797_v32 = vld [vmem:[#allocation24_spill] sm:$0xff]  ;;  %v10798_v16 = vld [vmem:[#allocation25_spill] sm:$0xff] }
 0x494   :  { %2338 = vmatprep.subr.mxu0 %v10788_v13  ;;  %2409 = vmatprep.subr.mxu1 %v10789_v29  ;;  %v10799_v13 = vld [vmem:[#allocation26_spill] sm:$0xff]  ;;  %v10800_v29 = vld [vmem:[#allocation27_spill] sm:$0xff] }
 0x495   :  { %2339 = vmatpush1.msra.mxu0 %v10790_v59  ;;  %2410 = vmatpush1.msra.mxu1 %v10791_v26  ;;  %v10801_v59 = vld [vmem:[#allocation28_spill] sm:$0xff]  ;;  %v10802_v26 = vld [vmem:[#allocation29_spill] sm:$0xff] }
 0x496   :  { %2340 = vmatprep.subr.mxu0 %v10792_v56  ;;  %2411 = vmatprep.subr.mxu1 %v10793_v27  ;;  %v10803_v56 = vld [vmem:[#allocation30_spill] sm:$0xff]  ;;  %v10804_v27 = vld [vmem:[#allocation31_spill] sm:$0xff] }
 0x497   :  { %2341 = vmatpush1.msra.mxu0 %v10794_v8  ;;  %2412 = vmatpush1.msra.mxu1 %v10795_v33  ;;  %v7850_v8 = vld [vmem:[#allocation5 + $0xd8] sm:$0xff]  ;;  %v10806_v33 = vld [vmem:[#allocation32_spill] sm:$0xff] }
 0x498   :  { %2342 = vmatprep.subr.mxu0 %v10796_v43  ;;  %2413 = vmatprep.subr.mxu1 %v10797_v32  ;;  %10805 = vst [vmem:[#allocation102_spill] sm:$0xff] %v7850_v8  ;;  %v7854_v43 = vld [vmem:[#allocation5 + $0xd0] sm:$0xff] }
 0x499   :  { %2343 = vmatpush1.msra.mxu0 %v10798_v16  ;;  %2414 = vmatpush1.msra.mxu1 %v10799_v13  ;;  %10807 = vst [vmem:[#allocation106_spill] sm:$0xff] %v7854_v43  ;;  %v10808_v32 = vld [vmem:[#allocation33_spill] sm:$0xff]  ;;  %v7858_v16 = vld [vmem:[#allocation5 + $0x98] sm:$0xff] }
 0x49a   :  { %2344 = vmatprep.subr.mxu0 %v10800_v29  ;;  %2415 = vmatprep.subr.mxu1 %v10801_v59  ;;  %10809 = vst [vmem:[#allocation108_spill] sm:$0xff] %v7858_v16  ;;  %v10810_v13 = vld [vmem:[#allocation34_spill] sm:$0xff]  ;;  %v7862_v29 = vld [vmem:[#allocation5 + $0x90] sm:$0xff]  ;;  %v10812_v59 = vld [vmem:[#allocation35_spill] sm:$0xff] }
 0x49b   :  { %2345 = vmatpush1.msra.mxu0 %v10802_v26  ;;  %2416 = vmatpush1.msra.mxu1 %v10803_v56  ;;  %10811 = vst [vmem:[#allocation112_spill] sm:$0xff] %v7862_v29  ;;  %v7866_v26 = vld [vmem:[#allocation5 + $0x58] sm:$0xff]  ;;  %v10814_v56 = vld [vmem:[#allocation36_spill] sm:$0xff] }
 0x49c   :  { %2346 = vmatprep.subr.mxu0 %v10804_v27  ;;  %2417 = vmatprep.subr.mxu1 %v7850_v8  ;;  %10813 = vst [vmem:[#allocation114_spill] sm:$0xff] %v7866_v26  ;;  %v7870_v27 = vld [vmem:[#allocation5 + $0x50] sm:$0xff] }
 0x49d   :  { %2347 = vmatpush1.msra.mxu0 %v10806_v33  ;;  %2418 = vmatpush1.msra.mxu1 %v7854_v43  ;;  %10815 = vst [vmem:[#allocation118_spill] sm:$0xff] %v7870_v27  ;;  %v10816_v33 = vld [vmem:[#allocation37_spill] sm:$0xff] }
 0x49e   :  { %2348 = vmatprep.subr.mxu0 %v10808_v32  ;;  %2419 = vmatprep.subr.mxu1 %v7858_v16  ;;  %v7874_v32 = vld [vmem:[#allocation5 + $0x18] sm:$0xff] }
 0x49f   :  { %2349 = vmatpush1.msra.mxu0 %v10810_v13  ;;  %2420 = vmatpush1.msra.mxu1 %v7862_v29  ;;  %10817 = vst [vmem:[#allocation120_spill] sm:$0xff] %v7874_v32  ;;  %v10818_v13 = vld [vmem:[#allocation38_spill] sm:$0xff]  ;;  %v7878_v29 = vld [vmem:[#allocation5 + $0x10] sm:$0xff] }
 0x4a0   :  { %2350 = vmatprep.subr.mxu0 %v10812_v59  ;;  %2421 = vmatprep.subr.mxu1 %v7866_v26  ;;  %10819 = vst [vmem:[#allocation124_spill] sm:$0xff] %v7878_v29  ;;  %v10820_v59 = vld [vmem:[#allocation39_spill] sm:$0xff]  ;;  %v7882_v26 = vld [vmem:[#allocation5 + $0x7d8] sm:$0xff] }
 0x4a1   :  { %2351 = vmatpush1.msra.mxu0 %v10814_v56  ;;  %2422 = vmatpush1.msra.mxu1 %v7870_v27  ;;  %10821 = vst [vmem:[#allocation126_spill] sm:$0xff] %v7882_v26  ;;  %v10822_v56 = vld [vmem:[#allocation40_spill] sm:$0xff]  ;;  %v7886_v27 = vld [vmem:[#allocation5 + $0x7d0] sm:$0xff] }
 0x4a2   :  { %2352 = vmatprep.subr.mxu0 %v10816_v33  ;;  %2423 = vmatprep.subr.mxu1 %v7874_v32  ;;  %10823 = vst [vmem:[#allocation130_spill] sm:$0xff] %v7886_v27  ;;  %v10824_v33 = vld [vmem:[#allocation41_spill] sm:$0xff]  ;;  %v7890_v32 = vld [vmem:[#allocation5 + $0x798] sm:$0xff] }
 0x4a3   :  { %2353 = vmatpush1.msra.mxu0 %v10818_v13  ;;  %2424 = vmatpush1.msra.mxu1 %v7878_v29  ;;  %10825 = vst [vmem:[#allocation132_spill] sm:$0xff] %v7890_v32  ;;  %v10826_v13 = vld [vmem:[#allocation42_spill] sm:$0xff]  ;;  %v7894_v29 = vld [vmem:[#allocation5 + $0x790] sm:$0xff] }
 0x4a4   :  { %2354 = vmatprep.subr.mxu0 %v10820_v59  ;;  %2425 = vmatprep.subr.mxu1 %v7882_v26  ;;  %10827 = vst [vmem:[#allocation134_spill] sm:$0xff] %v7894_v29  ;;  %v10828_v59 = vld [vmem:[#allocation43_spill] sm:$0xff]  ;;  %v7898_v26 = vld [vmem:[#allocation5 + $0x758] sm:$0xff] }
 0x4a5   :  { %2355 = vmatpush2.msra.mxu0 %v10822_v56  ;;  %2426 = vmatpush2.msra.mxu1 %v7886_v27  ;;  %10829 = vst [vmem:[#allocation137_spill] sm:$0xff] %v7898_v26  ;;  %v10830_v56 = vld [vmem:[#allocation44_spill] sm:$0xff]  ;;  %v7902_v27 = vld [vmem:[#allocation5 + $0x750] sm:$0xff] }
 0x4a6   :  { %2356 = vmatprep.subr.mxu0 %v10824_v33  ;;  %2427 = vmatprep.subr.mxu1 %v7890_v32  ;;  %10831 = vst [vmem:[#allocation139_spill] sm:$0xff] %v7902_v27  ;;  %v10832_v33 = vld [vmem:[#allocation45_spill] sm:$0xff]  ;;  %v7906_v32 = vld [vmem:[#allocation5 + $0x718] sm:$0xff] }
 0x4a7   :  { %2357 = vmatpush2.msra.mxu0 %v10826_v13  ;;  %2428 = vmatpush2.msra.mxu1 %v7894_v29  ;;  %10833 = vst [vmem:[#allocation142_spill] sm:$0xff] %v7906_v32  ;;  %v10834_v13 = vld [vmem:[#allocation47_spill] sm:$0xff]  ;;  %v7910_v29 = vld [vmem:[#allocation5 + $0x710] sm:$0xff] }
 0x4a8   :  { %2358 = vmatprep.subr.mxu0 %v10828_v59  ;;  %2429 = vmatprep.subr.mxu1 %v7898_v26  ;;  %10835 = vst [vmem:[#allocation98_spill] sm:$0xff] %v7910_v29  ;;  %v10836_v59 = vld [vmem:[#allocation49_spill] sm:$0xff]  ;;  %v7914_v26 = vld [vmem:[#allocation5 + $0x6d8] sm:$0xff] }
 0x4a9   :  { %2359 = vmatpush2.msra.mxu0 %v10830_v56  ;;  %2430 = vmatpush2.msra.mxu1 %v7902_v27  ;;  %10837 = vst [vmem:[#allocation104_spill] sm:$0xff] %v7914_v26  ;;  %v10838_v56 = vld [vmem:[#allocation51_spill] sm:$0xff]  ;;  %v7918_v27 = vld [vmem:[#allocation5 + $0x6d0] sm:$0xff] }
 0x4aa   :  { %2360 = vmatprep.subr.mxu0 %v10832_v33  ;;  %2431 = vmatprep.subr.mxu1 %v7906_v32  ;;  %10839 = vst [vmem:[#allocation141_spill] sm:$0xff] %v7918_v27  ;;  %v10840_v33 = vld [vmem:[#allocation53_spill] sm:$0xff]  ;;  %v7922_v32 = vld [vmem:[#allocation5 + $0x698] sm:$0xff] }
 0x4ab   :  { %2361 = vmatpush2.msra.mxu0 %v10834_v13  ;;  %2432 = vmatpush2.msra.mxu1 %v7910_v29  ;;  %10841 = vst [vmem:[#allocation143_spill] sm:$0xff] %v7922_v32  ;;  %v10842_v13 = vld [vmem:[#allocation55_spill] sm:$0xff]  ;;  %v7926_v29 = vld [vmem:[#allocation5 + $0x690] sm:$0xff] }
 0x4ac   :  { %2362 = vmatprep.subr.mxu0 %v10836_v59  ;;  %2433 = vmatprep.subr.mxu1 %v7914_v26  ;;  %10843 = vst [vmem:[#allocation11_spill] sm:$0xff] %v7926_v29  ;;  %v10844_v59 = vld [vmem:[#allocation57_spill] sm:$0xff]  ;;  %v7930_v26 = vld [vmem:[#allocation5 + $0x658] sm:$0xff] }
 0x4ad   :  { %2363 = vmatpush2.msra.mxu0 %v10838_v56  ;;  %2434 = vmatpush2.msra.mxu1 %v7918_v27  ;;  %10845 = vst [vmem:[#allocation12_spill] sm:$0xff] %v7930_v26  ;;  %v10846_v56 = vld [vmem:[#allocation59_spill] sm:$0xff]  ;;  %v7934_v27 = vld [vmem:[#allocation5 + $0x650] sm:$0xff] }
 0x4ae   :  { %2364 = vmatprep.subr.mxu0 %v10840_v33  ;;  %2435 = vmatprep.subr.mxu1 %v7922_v32  ;;  %10847 = vst [vmem:[#allocation13_spill] sm:$0xff] %v7934_v27  ;;  %v10848_v33 = vld [vmem:[#allocation61_spill] sm:$0xff]  ;;  %v7938_v32 = vld [vmem:[#allocation5 + $0x618] sm:$0xff] }
 0x4af   :  { %2365 = vmatpush2.msra.mxu0 %v10842_v13  ;;  %2436 = vmatpush2.msra.mxu1 %v7926_v29  ;;  %10849 = vst [vmem:[#allocation14_spill] sm:$0xff] %v7938_v32  ;;  %v10850_v13 = vld [vmem:[#allocation63_spill] sm:$0xff]  ;;  %v7942_v29 = vld [vmem:[#allocation5 + $0x610] sm:$0xff] }
 0x4b0   :  { %2366 = vmatprep.subr.mxu0 %v10844_v59  ;;  %2437 = vmatprep.subr.mxu1 %v7930_v26  ;;  %10851 = vst [vmem:[#allocation15_spill] sm:$0xff] %v7942_v29  ;;  %v10852_v59 = vld [vmem:[#allocation65_spill] sm:$0xff]  ;;  %v7946_v26 = vld [vmem:[#allocation5 + $0x5d8] sm:$0xff] }
 0x4b1   :  { %2367 = vmatpush2.msra.mxu0 %v10846_v56  ;;  %2438 = vmatpush2.msra.mxu1 %v7934_v27  ;;  %10853 = vst [vmem:[#allocation16_spill] sm:$0xff] %v7946_v26  ;;  %v10854_v56 = vld [vmem:[#allocation67_spill] sm:$0xff]  ;;  %v7950_v27 = vld [vmem:[#allocation5 + $0x5d0] sm:$0xff] }
 0x4b2   :  { %2368 = vmatprep.subr.mxu0 %v10848_v33  ;;  %2439 = vmatprep.subr.mxu1 %v7938_v32  ;;  %10855 = vst [vmem:[#allocation17_spill] sm:$0xff] %v7950_v27  ;;  %v10856_v33 = vld [vmem:[#allocation69_spill] sm:$0xff]  ;;  %v7954_v32 = vld [vmem:[#allocation5 + $0x598] sm:$0xff] }
 0x4b3   :  { %2369 = vmatpush2.msra.mxu0 %v10850_v13  ;;  %2440 = vmatpush2.msra.mxu1 %v7942_v29  ;;  %10857 = vst [vmem:[#allocation18_spill] sm:$0xff] %v7954_v32  ;;  %v10858_v13 = vld [vmem:[#allocation71_spill] sm:$0xff]  ;;  %v7958_v29 = vld [vmem:[#allocation5 + $0x590] sm:$0xff] }
 0x4b4   :  { %2370 = vmatprep.subr.mxu0 %v10852_v59  ;;  %2441 = vmatprep.subr.mxu1 %v7946_v26  ;;  %10859 = vst [vmem:[#allocation19_spill] sm:$0xff] %v7958_v29  ;;  %v10860_v59 = vld [vmem:[#allocation73_spill] sm:$0xff]  ;;  %v7962_v26 = vld [vmem:[#allocation5 + $0x558] sm:$0xff] }
 0x4b5   :  { %2371 = vmatpush2.msra.mxu0 %v10854_v56  ;;  %2442 = vmatpush2.msra.mxu1 %v7950_v27  ;;  %10861 = vst [vmem:[#allocation20_spill] sm:$0xff] %v7962_v26  ;;  %v10862_v56 = vld [vmem:[#allocation75_spill] sm:$0xff]  ;;  %v7966_v27 = vld [vmem:[#allocation5 + $0x550] sm:$0xff] }
 0x4b6   :  { %2372 = vmatprep.subr.mxu0 %v10856_v33  ;;  %2443 = vmatprep.subr.mxu1 %v7954_v32  ;;  %10863 = vst [vmem:[#allocation21_spill] sm:$0xff] %v7966_v27  ;;  %v10864_v33 = vld [vmem:[#allocation77_spill] sm:$0xff]  ;;  %v7970_v32 = vld [vmem:[#allocation5 + $0x518] sm:$0xff] }
 0x4b7   :  { %2373 = vmatpush2.msra.mxu0 %v10858_v13  ;;  %2444 = vmatpush2.msra.mxu1 %v7958_v29  ;;  %10865 = vst [vmem:[#allocation22_spill] sm:$0xff] %v7970_v32  ;;  %v10866_v13 = vld [vmem:[#allocation82_spill] sm:$0xff]  ;;  %v7974_v29 = vld [vmem:[#allocation5 + $0x510] sm:$0xff] }
 0x4b8   :  { %2374 = vmatprep.subr.mxu0 %v10860_v59  ;;  %2445 = vmatprep.subr.mxu1 %v7962_v26  ;;  %10867 = vst [vmem:[#allocation23_spill] sm:$0xff] %v7974_v29  ;;  %v10868_v59 = vld [vmem:[#allocation83_spill] sm:$0xff]  ;;  %v7978_v26 = vld [vmem:[#allocation5 + $0x4d8] sm:$0xff] }
 0x4b9   :  { %2375 = vmatpush2.msra.mxu0 %v10862_v56  ;;  %2446 = vmatpush2.msra.mxu1 %v7966_v27  ;;  %10869 = vst [vmem:[#allocation24_spill] sm:$0xff] %v7978_v26  ;;  %v10870_v56 = vld [vmem:[#allocation85_spill] sm:$0xff] }
 0x4ba   :  { %2376 = vmatprep.subr.mxu0 %v10864_v33  ;;  %2447 = vmatprep.subr.mxu1 %v7970_v32  ;;  %v7982_v27 = vld [vmem:[#allocation5 + $0x4d0] sm:$0xff]  ;;  %v10872_v33 = vld [vmem:[#allocation88_spill] sm:$0xff]  ;;  %v7986_v32 = vld [vmem:[#allocation5 + $0x498] sm:$0xff] }
 0x4bb   :  { %2377 = vmatpush2.msra.mxu0 %v10866_v13  ;;  %2448 = vmatpush2.msra.mxu1 %v7974_v29  ;;  %10871 = vst [vmem:[#allocation25_spill] sm:$0xff] %v7982_v27  ;;  %10873 = vst [vmem:[#allocation26_spill] sm:$0xff] %v7986_v32  ;;  %v10874_v13 = vld [vmem:[#allocation90_spill] sm:$0xff]  ;;  %v7990_v29 = vld [vmem:[#allocation5 + $0x490] sm:$0xff] }
 0x4bc   :  { %2378 = vmatprep.subr.mxu0 %v10868_v59  ;;  %2449 = vmatprep.subr.mxu1 %v7978_v26  ;;  %10875 = vst [vmem:[#allocation27_spill] sm:$0xff] %v7990_v29  ;;  %v10876_v59 = vld [vmem:[#allocation93_spill] sm:$0xff]  ;;  %v7994_v26 = vld [vmem:[#allocation5 + $0x458] sm:$0xff] }
 0x4bd   :  { %2379 = vmatpush2.msra.mxu0 %v10870_v56  ;;  %2450 = vmatpush2.msra.mxu1 %v7982_v27  ;;  %10877 = vst [vmem:[#allocation28_spill] sm:$0xff] %v7994_v26  ;;  %v10878_v56 = vld [vmem:[#allocation95_spill] sm:$0xff]  ;;  %v7998_v27 = vld [vmem:[#allocation5 + $0x450] sm:$0xff] }
 0x4be   :  { %2380 = vmatprep.subr.mxu0 %v10872_v33  ;;  %2451 = vmatprep.subr.mxu1 %v7986_v32  ;;  %10879 = vst [vmem:[#allocation29_spill] sm:$0xff] %v7998_v27  ;;  %v10880_v33 = vld [vmem:[#allocation99_spill] sm:$0xff]  ;;  %v8002_v32 = vld [vmem:[#allocation5 + $0x418] sm:$0xff] }
 0x4bf   :  { %2381 = vmatpush2.msra.mxu0 %v10874_v13  ;;  %2452 = vmatpush2.msra.mxu1 %v7990_v29  ;;  %10881 = vst [vmem:[#allocation30_spill] sm:$0xff] %v8002_v32  ;;  %v10882_v13 = vld [vmem:[#allocation101_spill] sm:$0xff] }
 0x4c0   :  { %2382 = vmatprep.subr.mxu0 %v10876_v59  ;;  %2453 = vmatprep.subr.mxu1 %v7994_v26  ;;  %v8006_v29 = vld [vmem:[#allocation5 + $0x410] sm:$0xff]  ;;  %v8009_v59 = vld [vmem:[#allocation5 + $0x3e8] sm:$0xff] }
 0x4c1   :  { %2383 = vmatpush2.msra.mxu0 %v10878_v56  ;;  %2454 = vmatpush2.msra.mxu1 %v7998_v27  ;;  %10883 = vst [vmem:[#allocation31_spill] sm:$0xff] %v8006_v29  ;;  %10884 = vst [vmem:[#allocation32_spill] sm:$0xff] %v8009_v59  ;;  %v8012_v56 = vld [vmem:[#allocation5 + $0x3f8] sm:$0xff] }
 0x4c2   :  { %2384 = vmatprep.subr.mxu0 %v10880_v33  ;;  %2455 = vmatprep.subr.mxu1 %v8002_v32  ;;  %10885 = vst [vmem:[#allocation33_spill] sm:$0xff] %v8012_v56  ;;  %v10886_v33 = vld [vmem:[#allocation122_spill] sm:$0xff]  ;;  %v10887_v32 = vld [vmem:[#allocation128_spill] sm:$0xff] }
 0x4c3   :  { %2385 = vmatpush2.msra.mxu0 %v10882_v13  ;;  %2456 = vmatpush2.msra.mxu1 %v8006_v29  ;;  %v10888_v29 = vld [vmem:[#allocation146_spill] sm:$0xff] }
 0x4c4   :  { %2464 = vmatprep.subr.mxu0 %v8009_v59  ;;  %2535 = vmatprep.subr.mxu1 %v8012_v56 }
 0x502   :  { %v2040_v27 = vpop.f32.mrf.mxu0  ;;  %v2111_v51 = vpop.f32.mrf.mxu1 }
 0x503   :  { %v2266_v26 = vadd.f32 %v2040_v27, %v10886_v33  ;;  %v2268_v7 = vadd.f32 %v2111_v51, %v10888_v29 }
 0x504   :  { %v2042_v16 = vpop.f32.mrf.mxu0  ;;  %v2113_v51 = vpop.f32.mrf.mxu1 }
 0x505   :  { %v4012_v43 = vmul.f32 -1.442695, %v2266_v26  ;;  %v2267_v8 = vadd.f32 %v2042_v16, %v10887_v32 }
 0x507   :  { %4189 = vpow2.f32 %v4012_v43  ;;  %v4014_v13 = vmul.f32 -1.442695, %v2267_v8  ;;  %v10889_v43 = vld [vmem:[#allocation162_spill] sm:$0xff] }
 0x509   :  { %4191 = vpow2.f32 %v4014_v13 }
 0x50a   :  { %4193 = vtanh.f32 %v2268_v7 }
 0x514   :  { %v4190_v5 = vpop.eup %4189 }
 0x515   :  { %v2280_v22 = vadd.f32 1.0, %v4190_v5  ;;  %v10890_v5 = vld [vmem:[#allocation163_spill] sm:$0xff] }
 0x516   :  { %v4192_v59 = vpop.eup %4191 }
 0x517   :  { %4195 = vrcp.f32 %v2280_v22  ;;  %v2292_v50 = vadd.f32 1.0, %v4192_v59  ;;  %v4194_v56 = vpop.eup %4193 }
 0x519   :  { %4197 = vrcp.f32 %v2292_v50 }
 0x524   :  { %v4196_v58 = vpop.eup %4195 }
 0x525   :  { %v2314_v27 = vmul.f32 %v4196_v58, %v4194_v56  ;;  %v10891_v58 = vld [vmem:[#allocation175_spill] sm:$0xff] }
 0x526   :  { %v4198_v33 = vpop.eup %4197  ;;  %v590_v59 = vadd.f32 %v10891_v58, %v6401_v55 }
 0x527   :  { %v2312_v26 = vmul.f32 %v4198_v33, %v7481_v46  ;;  %v10892_v46 = vld [vmem:[#allocation174_spill] sm:$0xff]  ;;  %v10893_v33 = vld [vmem:[#allocation147_spill] sm:$0xff] }
 0x529   :  { %v8019_v16 = vadd.f32 %v2314_v27, %v2312_v26  ;;  %v588_v27 = vadd.f32 %v10892_v46, %v6398_v17  ;;  %v2269_v26 = vadd.f32 %v2113_v51, %v10893_v33 }
 0x543   :  { %v2182_v8 = vpop.f32.mrf.mxu0  ;;  %v2253_v22 = vpop.f32.mrf.mxu1 }
 0x544   :  { %v2270_v32 = vadd.f32 %v2182_v8, %v10889_v43  ;;  %v2272_v8 = vadd.f32 %v2253_v22, %v588_v27 }
 0x545   :  { %v2184_v13 = vpop.f32.mrf.mxu0  ;;  %v2255_v50 = vpop.f32.mrf.mxu1 }
 0x546   :  { %v4013_v29 = vmul.f32 -1.442695, %v2270_v32  ;;  %v2271_v37 = vadd.f32 %v2184_v13, %v10890_v5  ;;  %v2273_v56 = vadd.f32 %v2255_v50, %v590_v59  ;;  %v4016_v32 = vmul.f32 -1.442695, %v2269_v26 }
 0x548   :  { %4199 = vpow2.f32 %v4013_v29  ;;  %v4015_v7 = vmul.f32 -1.442695, %v2271_v37  ;;  %v4017_v43 = vmul.f32 -1.442695, %v2273_v56 }
 0x54a   :  { %4201 = vpow2.f32 %v4015_v7 }
 0x54b   :  { %4203 = vtanh.f32 %v2272_v8 }
 0x54c   :  { %4205 = vpow2.f32 %v4017_v43  ;;  %v8182_v43 = vld [vmem:[#allocation5 + $0x6f0] sm:$0xff] }
 0x555   :  { %v4200_v14 = vpop.eup %4199 }
 0x556   :  { %v2281_v9 = vadd.f32 1.0, %v4200_v14 }
 0x557   :  { %v4202_v13 = vpop.eup %4201 }
 0x558   :  { %4207 = vrcp.f32 %v2281_v9  ;;  %v2293_v37 = vadd.f32 1.0, %v4202_v13  ;;  %v4204_v29 = vpop.eup %4203  ;;  %v8186_v13 = vld [vmem:[#allocation5 + $0x6b8] sm:$0xff] }
 0x559   :  { %4209 = vpow2.f32 %v4016_v32  ;;  %v4206_v5 = vpop.eup %4205  ;;  %v10908_v32 = vld [vmem:[#allocation125_spill] sm:$0xff] }
 0x55a   :  { %4211 = vrcp.f32 %v2293_v37  ;;  %v2307_v46 = vadd.f32 1.0, %v4206_v5  ;;  %v10909_v37 = vld [vmem:[#allocation60_spill] sm:$0xff]  ;;  %v10910_v5 = vld [vmem:[#allocation129_spill] sm:$0xff] }
 0x55b   :  { %4213 = vtanh.f32 %v8019_v16 }
 0x55c   :  { %4215 = vrcp.f32 %v2307_v46  ;;  %v8202_v46 = vld [vmem:[#allocation5 + $0x638] sm:$0xff] }
 0x565   :  { %v4208_v7 = vpop.eup %4207 }
 0x566   :  { %v4210_v50 = vpop.eup %4209  ;;  %v2315_v58 = vmul.f32 %v4208_v7, %v4204_v29  ;;  %v8190_v29 = vld [vmem:[#allocation5 + $0x6b0] sm:$0xff]  ;;  %v8194_v7 = vld [vmem:[#allocation5 + $0x678] sm:$0xff] }
 0x567   :  { %v4212_v59 = vpop.eup %4211  ;;  %v2306_v22 = vadd.f32 1.0, %v4210_v50  ;;  %v10911_v50 = vld [vmem:[#allocation62_spill] sm:$0xff] }
 0x568   :  { %v2313_v51 = vmul.f32 %v4212_v59, %v7492_v41  ;;  %v4214_v9 = vpop.eup %4213  ;;  %v10896_v41 = vld [vmem:[#allocation107_spill] sm:$0xff] }
 0x569   :  { %v4216_v56 = vpop.eup %4215  ;;  %v10912_v59 = vld [vmem:[#allocation131_spill] sm:$0xff] }
 0x56a   :  { %v8030_v14 = vadd.f32 %v2315_v58, %v2313_v51  ;;  %v8198_v58 = vld [vmem:[#allocation5 + $0x670] sm:$0xff]  ;;  %v10913_v51 = vld [vmem:[#allocation64_spill] sm:$0xff] }
 0x56c   :  { %4217 = vtanh.f32 %v8030_v14 }
 0x56d   :  { %4219 = vrcp.f32 %v2306_v22  ;;  %v8206_v22 = vld [vmem:[#allocation5 + $0x630] sm:$0xff] }
 0x579   :  { %v4218_v27 = vpop.eup %4217 }
 0x57a   :  { %v4220_v33 = vpop.eup %4219  ;;  %v8033_v26 = vmul.f32 %v4218_v27, %v4216_v56  ;;  %v8210_v56 = vld [vmem:[#allocation5 + $0x5f8] sm:$0xff] }
 0x57b   :  { %v8035_v8 = vmul.f32 %v4220_v33, %v4214_v9  ;;  %v10914_v9 = vld [vmem:[#allocation133_spill] sm:$0xff]  ;;  %v10915_v27 = vld [vmem:[#allocation66_spill] sm:$0xff] }
 0x57c   :  { %10894 = vst [vmem:[#allocation34_spill] sm:$0xff] %v8033_v26  ;;  %2386 = vmatprep.mubr.f32.mxu0 %v8033_v26  ;;  %2457 = vmatprep.mubr.f32.mxu1 %v8033_v26  ;;  %v8214_v33 = vld [vmem:[#allocation5 + $0x5f0] sm:$0xff] }
 0x57d   :  { %10895 = vst [vmem:[#allocation35_spill] sm:$0xff] %v8035_v8  ;;  %2387 = vmatmul.mubr.f32.vlgmr.msra.gmra.mxu0 %v8035_v8  ;;  %2458 = vmatmul.mubr.f32.vlgmr.msra.gmra.mxu1 %v8035_v8 }
 0x57e   :  { %2465 = vmatpush1.msra.mxu0 %v7503_v28  ;;  %2536 = vmatpush1.msra.mxu1 %v7506_v49  ;;  %v10897_v28 = vld [vmem:[#allocation48_spill] sm:$0xff]  ;;  %v10898_v49 = vld [vmem:[#allocation111_spill] sm:$0xff] }
 0x57f   :  { %2466 = vmatprep.subr.mxu0 %v7509_v44  ;;  %2528 = vmatprep.mubr.f32.mxu0 %v8033_v26  ;;  %v10899_v44 = vld [vmem:[#allocation50_spill] sm:$0xff] }
 0x580   :  { %2537 = vmatprep.subr.mxu1 %v7513_v2  ;;  %2599 = vmatprep.mubr.f32.mxu1 %v8033_v26  ;;  %v10900_v2 = vld [vmem:[#allocation113_spill] sm:$0xff]  ;;  %v10948_v26 = vld [vmem:[#allocation84_spill] sm:$0xff] }
 0x581   :  { %2467 = vmatpush1.msra.mxu0 %v7517_v61  ;;  %2538 = vmatpush1.msra.mxu1 %v7520_v20  ;;  %v10901_v61 = vld [vmem:[#allocation52_spill] sm:$0xff]  ;;  %v10902_v20 = vld [vmem:[#allocation117_spill] sm:$0xff] }
 0x582   :  { %2468 = vmatprep.subr.mxu0 %v7523_v6  ;;  %2539 = vmatprep.subr.mxu1 %v7526_v24  ;;  %v10903_v6 = vld [vmem:[#allocation54_spill] sm:$0xff] }
 0x583   :  { %2469 = vmatpush1.msra.mxu0 %v7529_v60  ;;  %2540 = vmatpush1.msra.mxu1 %v7532_v15  ;;  %v8066_v24 = vld [vmem:[#allocation5 + $0x278] sm:$0xff]  ;;  %v8070_v60 = vld [vmem:[#allocation5 + $0x270] sm:$0xff] }
 0x584   :  { %2470 = vmatprep.subr.mxu0 %v7535_v54  ;;  %2541 = vmatprep.subr.mxu1 %v7538_v52  ;;  %v8078_v15 = vld [vmem:[#allocation5 + $0x230] sm:$0xff]  ;;  %v8082_v54 = vld [vmem:[#allocation5 + $0x1f8] sm:$0xff] }
 0x585   :  { %2471 = vmatpush1.msra.mxu0 %v7541_v31  ;;  %2542 = vmatpush1.msra.mxu1 %v10896_v41  ;;  %v8086_v52 = vld [vmem:[#allocation5 + $0x1f0] sm:$0xff]  ;;  %v8090_v31 = vld [vmem:[#allocation5 + $0x1b8] sm:$0xff]  ;;  %v10916_v41 = vld [vmem:[#allocation136_spill] sm:$0xff] }
 0x586   :  { %2472 = vmatprep.subr.mxu0 %v10897_v28  ;;  %2543 = vmatprep.subr.mxu1 %v10898_v49  ;;  %v8218_v28 = vld [vmem:[#allocation5 + $0x5b8] sm:$0xff]  ;;  %v10917_v49 = vld [vmem:[#allocation68_spill] sm:$0xff] }
 0x587   :  { %2473 = vmatpush1.msra.mxu0 %v10899_v44  ;;  %2544 = vmatpush1.msra.mxu1 %v10900_v2  ;;  %v8222_v44 = vld [vmem:[#allocation5 + $0x5b0] sm:$0xff]  ;;  %v10918_v2 = vld [vmem:[#allocation138_spill] sm:$0xff] }
 0x588   :  { %2474 = vmatprep.subr.mxu0 %v7559_v3  ;;  %2545 = vmatprep.subr.mxu1 %v10901_v61  ;;  %v8074_v3 = vld [vmem:[#allocation5 + $0x238] sm:$0xff] }
 0x589   :  { %2475 = vmatpush1.msra.mxu0 %v10902_v20  ;;  %2546 = vmatpush1.msra.mxu1 %v7568_v1  ;;  %v8102_v1 = vld [vmem:[#allocation5 + $0x170] sm:$0xff]  ;;  %v8226_v61 = vld [vmem:[#allocation5 + $0x578] sm:$0xff] }
 0x58a   :  { %2476 = vmatprep.subr.mxu0 %v10903_v6  ;;  %2547 = vmatprep.subr.mxu1 %v8066_v24  ;;  %10919 = vst [vmem:[#allocation36_spill] sm:$0xff] %v8226_v61  ;;  %v10920_v20 = vld [vmem:[#allocation70_spill] sm:$0xff]  ;;  %v8230_v6 = vld [vmem:[#allocation5 + $0x570] sm:$0xff] }
 0x58b   :  { %2477 = vmatpush1.msra.mxu0 %v7575_v57  ;;  %2548 = vmatpush1.msra.mxu1 %v8070_v60  ;;  %v8110_v57 = vld [vmem:[#allocation5 + $0x130] sm:$0xff]  ;;  %10921 = vst [vmem:[#allocation37_spill] sm:$0xff] %v8230_v6 }
 0x58c   :  { %2478 = vmatprep.subr.mxu0 %v7579_v18  ;;  %2549 = vmatprep.subr.mxu1 %v8074_v3  ;;  %v8094_v18 = vld [vmem:[#allocation5 + $0x1b0] sm:$0xff] }
 0x58d   :  { %2479 = vmatpush1.msra.mxu0 %v7583_v39  ;;  %2550 = vmatpush1.msra.mxu1 %v8078_v15  ;;  %v8098_v39 = vld [vmem:[#allocation5 + $0x178] sm:$0xff] }
 0x58e   :  { %2480 = vmatprep.subr.mxu0 %v7587_v10  ;;  %2551 = vmatprep.subr.mxu1 %v8082_v54  ;;  %v8106_v10 = vld [vmem:[#allocation5 + $0x138] sm:$0xff] }
 0x58f   :  { %2481 = vmatpush1.msra.mxu0 %v7591_v38  ;;  %2552 = vmatpush1.msra.mxu1 %v8086_v52  ;;  %v8114_v38 = vld [vmem:[#allocation5 + $0xf8] sm:$0xff] }
 0x590   :  { %2482 = vmatprep.subr.mxu0 %v7595_v45  ;;  %2553 = vmatprep.subr.mxu1 %v8090_v31  ;;  %v8118_v45 = vld [vmem:[#allocation5 + $0xf0] sm:$0xff] }
 0x591   :  { %2483 = vmatpush1.msra.mxu0 %v7599_v47  ;;  %2554 = vmatpush1.msra.mxu1 %v8094_v18  ;;  %v8122_v47 = vld [vmem:[#allocation5 + $0xb8] sm:$0xff] }
 0x592   :  { %2484 = vmatprep.subr.mxu0 %v7603_v42  ;;  %2555 = vmatprep.subr.mxu1 %v8098_v39  ;;  %v8126_v42 = vld [vmem:[#allocation5 + $0xb0] sm:$0xff] }
 0x593   :  { %2485 = vmatpush1.msra.mxu0 %v7607_v4  ;;  %2556 = vmatpush1.msra.mxu1 %v8102_v1  ;;  %v8130_v4 = vld [vmem:[#allocation5 + $0x78] sm:$0xff] }
 0x594   :  { %2486 = vmatprep.subr.mxu0 %v7611_v48  ;;  %2557 = vmatprep.subr.mxu1 %v8106_v10  ;;  %v8134_v48 = vld [vmem:[#allocation5 + $0x70] sm:$0xff] }
 0x595   :  { %2487 = vmatpush1.msra.mxu0 %v7615_v19  ;;  %2558 = vmatpush1.msra.mxu1 %v8110_v57  ;;  %v8138_v19 = vld [vmem:[#allocation5 + $0x38] sm:$0xff] }
 0x596   :  { %2488 = vmatprep.subr.mxu0 %v7619_v23  ;;  %2559 = vmatprep.subr.mxu1 %v8114_v38  ;;  %v8142_v23 = vld [vmem:[#allocation5 + $0x30] sm:$0xff] }
 0x597   :  { %2489 = vmatpush1.msra.mxu0 %v7623_v53  ;;  %2560 = vmatpush1.msra.mxu1 %v8118_v45  ;;  %v8146_v53 = vld [vmem:[#allocation5 + $0x7f8] sm:$0xff] }
 0x598   :  { %2490 = vmatprep.subr.mxu0 %v7627_v34  ;;  %2561 = vmatprep.subr.mxu1 %v8122_v47  ;;  %v8150_v34 = vld [vmem:[#allocation5 + $0x7f0] sm:$0xff] }
 0x599   :  { %2491 = vmatpush1.msra.mxu0 %v7631_v62  ;;  %2562 = vmatpush1.msra.mxu1 %v8126_v42  ;;  %v8154_v62 = vld [vmem:[#allocation5 + $0x7b8] sm:$0xff] }
 0x59a   :  { %2492 = vmatprep.subr.mxu0 %v7635_v12  ;;  %2563 = vmatprep.subr.mxu1 %v8130_v4  ;;  %v8158_v12 = vld [vmem:[#allocation5 + $0x7b0] sm:$0xff] }
 0x59b   :  { %2493 = vmatpush1.msra.mxu0 %v7639_v21  ;;  %2564 = vmatpush1.msra.mxu1 %v8134_v48  ;;  %v8162_v21 = vld [vmem:[#allocation5 + $0x778] sm:$0xff] }
 0x59c   :  { %2494 = vmatprep.subr.mxu0 %v7643_v36  ;;  %2565 = vmatprep.subr.mxu1 %v8138_v19  ;;  %v8166_v36 = vld [vmem:[#allocation5 + $0x770] sm:$0xff] }
 0x59d   :  { %2495 = vmatpush1.msra.mxu0 %v7647_v0  ;;  %2566 = vmatpush1.msra.mxu1 %v8142_v23  ;;  %v10904_v0 = vld [vmem:[#allocation119_spill] sm:$0xff] }
 0x59e   :  { %2496 = vmatprep.subr.mxu0 %v7651_v35  ;;  %2567 = vmatprep.subr.mxu1 %v8146_v53  ;;  %v8170_v35 = vld [vmem:[#allocation5 + $0x738] sm:$0xff] }
 0x59f   :  { %2497 = vmatpush2.msra.mxu0 %v7655_v25  ;;  %2568 = vmatpush2.msra.mxu1 %v8150_v34  ;;  %v10905_v25 = vld [vmem:[#allocation56_spill] sm:$0xff] }
 0x5a0   :  { %2498 = vmatprep.subr.mxu0 %v7659_v40  ;;  %2569 = vmatprep.subr.mxu1 %v8154_v62  ;;  %v8174_v40 = vld [vmem:[#allocation5 + $0x730] sm:$0xff] }
 0x5a1   :  { %2499 = vmatpush2.msra.mxu0 %v7663_v30  ;;  %2570 = vmatpush2.msra.mxu1 %v8158_v12  ;;  %v10906_v30 = vld [vmem:[#allocation123_spill] sm:$0xff] }
 0x5a2   :  { %2500 = vmatprep.subr.mxu0 %v7667_v63  ;;  %2571 = vmatprep.subr.mxu1 %v8162_v21  ;;  %v8178_v63 = vld [vmem:[#allocation5 + $0x6f8] sm:$0xff] }
 0x5a3   :  { %2501 = vmatpush2.msra.mxu0 %v7671_v11  ;;  %2572 = vmatpush2.msra.mxu1 %v8166_v36  ;;  %v10907_v11 = vld [vmem:[#allocation58_spill] sm:$0xff] }
 0x5a4   :  { %2502 = vmatprep.subr.mxu0 %v10904_v0  ;;  %2573 = vmatprep.subr.mxu1 %v8170_v35  ;;  %v10922_v0 = vld [vmem:[#allocation72_spill] sm:$0xff] }
 0x5a5   :  { %2503 = vmatpush2.msra.mxu0 %v10905_v25  ;;  %2574 = vmatpush2.msra.mxu1 %v8174_v40  ;;  %v8234_v25 = vld [vmem:[#allocation5 + $0x538] sm:$0xff] }
 0x5a6   :  { %2504 = vmatprep.subr.mxu0 %v10906_v30  ;;  %2575 = vmatprep.subr.mxu1 %v8178_v63  ;;  %10923 = vst [vmem:[#allocation38_spill] sm:$0xff] %v8234_v25  ;;  %v10924_v30 = vld [vmem:[#allocation110_spill] sm:$0xff] }
 0x5a7   :  { %2505 = vmatpush2.msra.mxu0 %v10907_v11  ;;  %2576 = vmatpush2.msra.mxu1 %v8182_v43  ;;  %v8238_v11 = vld [vmem:[#allocation5 + $0x530] sm:$0xff] }
 0x5a8   :  { %2506 = vmatprep.subr.mxu0 %v10908_v32  ;;  %2577 = vmatprep.subr.mxu1 %v8186_v13  ;;  %10925 = vst [vmem:[#allocation39_spill] sm:$0xff] %v8238_v11  ;;  %v10926_v32 = vld [vmem:[#allocation116_spill] sm:$0xff] }
 0x5a9   :  { %2507 = vmatpush2.msra.mxu0 %v10909_v37  ;;  %2578 = vmatpush2.msra.mxu1 %v8190_v29  ;;  %v8242_v37 = vld [vmem:[#allocation5 + $0x4f8] sm:$0xff] }
 0x5aa   :  { %2508 = vmatprep.subr.mxu0 %v10910_v5  ;;  %2579 = vmatprep.subr.mxu1 %v8194_v7  ;;  %10927 = vst [vmem:[#allocation40_spill] sm:$0xff] %v8242_v37  ;;  %v10928_v5 = vld [vmem:[#allocation144_spill] sm:$0xff] }
 0x5ab   :  { %2509 = vmatpush2.msra.mxu0 %v10911_v50  ;;  %2580 = vmatpush2.msra.mxu1 %v8198_v58  ;;  %v8246_v50 = vld [vmem:[#allocation5 + $0x4f0] sm:$0xff] }
 0x5ac   :  { %2510 = vmatprep.subr.mxu0 %v10912_v59  ;;  %2581 = vmatprep.subr.mxu1 %v8202_v46  ;;  %10929 = vst [vmem:[#allocation41_spill] sm:$0xff] %v8246_v50  ;;  %v10930_v59 = vld [vmem:[#allocation164_spill] sm:$0xff] }
 0x5ad   :  { %2511 = vmatpush2.msra.mxu0 %v10913_v51  ;;  %2582 = vmatpush2.msra.mxu1 %v8206_v22  ;;  %v8250_v51 = vld [vmem:[#allocation5 + $0x4b8] sm:$0xff] }
 0x5ae   :  { %2512 = vmatprep.subr.mxu0 %v10914_v9  ;;  %2583 = vmatprep.subr.mxu1 %v8210_v56  ;;  %10931 = vst [vmem:[#allocation42_spill] sm:$0xff] %v8250_v51  ;;  %v10932_v9 = vld [vmem:[#allocation165_spill] sm:$0xff] }
 0x5af   :  { %2513 = vmatpush2.msra.mxu0 %v10915_v27  ;;  %2584 = vmatpush2.msra.mxu1 %v8214_v33  ;;  %v8254_v27 = vld [vmem:[#allocation5 + $0x4b0] sm:$0xff] }
 0x5b0   :  { %2514 = vmatprep.subr.mxu0 %v10916_v41  ;;  %2585 = vmatprep.subr.mxu1 %v8218_v28  ;;  %10933 = vst [vmem:[#allocation43_spill] sm:$0xff] %v8254_v27  ;;  %v10934_v41 = vld [vmem:[#allocation177_spill] sm:$0xff] }
 0x5b1   :  { %2515 = vmatpush2.msra.mxu0 %v10917_v49  ;;  %2586 = vmatpush2.msra.mxu1 %v8222_v44  ;;  %v8258_v49 = vld [vmem:[#allocation5 + $0x478] sm:$0xff] }
 0x5b2   :  { %2516 = vmatprep.subr.mxu0 %v10918_v2  ;;  %2587 = vmatprep.subr.mxu1 %v8226_v61  ;;  %10935 = vst [vmem:[#allocation44_spill] sm:$0xff] %v8258_v49  ;;  %v10936_v2 = vld [vmem:[#allocation176_spill] sm:$0xff] }
 0x5b3   :  { %2517 = vmatpush2.msra.mxu0 %v10920_v20  ;;  %2588 = vmatpush2.msra.mxu1 %v8230_v6  ;;  %v8262_v20 = vld [vmem:[#allocation5 + $0x470] sm:$0xff] }
 0x5b4   :  { %2518 = vmatprep.subr.mxu0 %v10922_v0  ;;  %2589 = vmatprep.subr.mxu1 %v8234_v25  ;;  %10937 = vst [vmem:[#allocation45_spill] sm:$0xff] %v8262_v20  ;;  %v10938_v0 = vld [vmem:[#allocation145_spill] sm:$0xff] }
 0x5b5   :  { %2519 = vmatpush2.msra.mxu0 %v10924_v30  ;;  %2590 = vmatpush2.msra.mxu1 %v8238_v11  ;;  %v8266_v30 = vld [vmem:[#allocation5 + $0x438] sm:$0xff] }
 0x5b6   :  { %2520 = vmatprep.subr.mxu0 %v10926_v32  ;;  %2591 = vmatprep.subr.mxu1 %v8242_v37  ;;  %10939 = vst [vmem:[#allocation47_spill] sm:$0xff] %v8266_v30  ;;  %v10940_v32 = vld [vmem:[#allocation78_spill] sm:$0xff] }
 0x5b7   :  { %2521 = vmatpush2.msra.mxu0 %v10928_v5  ;;  %2592 = vmatpush2.msra.mxu1 %v8246_v50  ;;  %v8270_v5 = vld [vmem:[#allocation5 + $0x430] sm:$0xff] }
 0x5b8   :  { %2522 = vmatprep.subr.mxu0 %v10930_v59  ;;  %2593 = vmatprep.subr.mxu1 %v8250_v51  ;;  %10941 = vst [vmem:[#allocation49_spill] sm:$0xff] %v8270_v5  ;;  %v10942_v59 = vld [vmem:[#allocation79_spill] sm:$0xff]  ;;  %v11074_v51 = vld [vmem:[#allocation148_spill] sm:$0xff] }
 0x5b9   :  { %2523 = vmatpush2.msra.mxu0 %v10932_v9  ;;  %2594 = vmatpush2.msra.mxu1 %v8254_v27  ;;  %v8276_v9 = vld [vmem:[#allocation5 + $0x3d8] sm:$0xff] }
 0x5ba   :  { %2524 = vmatprep.subr.mxu0 %v10934_v41  ;;  %2595 = vmatprep.subr.mxu1 %v8258_v49  ;;  %10943 = vst [vmem:[#allocation51_spill] sm:$0xff] %v8276_v9  ;;  %v10944_v41 = vld [vmem:[#allocation80_spill] sm:$0xff] }
 0x5bb   :  { %2525 = vmatpush2.msra.mxu0 %v10936_v2  ;;  %2596 = vmatpush2.msra.mxu1 %v8262_v20  ;;  %v8280_v2 = vld [vmem:[#allocation5 + $0x3d0] sm:$0xff]  ;;  %v11073_v49 = vld [vmem:[#allocation92_spill] sm:$0xff] }
 0x5bc   :  { %2526 = vmatprep.subr.mxu0 %v10938_v0  ;;  %2597 = vmatprep.subr.mxu1 %v8266_v30  ;;  %10945 = vst [vmem:[#allocation53_spill] sm:$0xff] %v8280_v2  ;;  %v10946_v0 = vld [vmem:[#allocation81_spill] sm:$0xff] }
 0x5bd   :  { %2527 = vmatpush2.msra.mxu0 %v10940_v32  ;;  %2598 = vmatpush2.msra.mxu1 %v8270_v5  ;;  %v8284_v32 = vld [vmem:[#allocation5 + $0x398] sm:$0xff] }
 0x5be   :  { %2529 = vmatmul.mubr.f32.vlgmr.msra.gmra.mxu0 %v8035_v8  ;;  %2600 = vmatmul.mubr.f32.vlgmr.msra.gmra.mxu1 %v8035_v8  ;;  %10947 = vst [vmem:[#allocation55_spill] sm:$0xff] %v8284_v32  ;;  %v8288_v8 = vld [vmem:[#allocation5 + $0x390] sm:$0xff] }
 0x5bf   :  { %2670 = vmatprep.subr.mxu0 %v10942_v59  ;;  %2741 = vmatprep.subr.mxu1 %v8276_v9  ;;  %10949 = vst [vmem:[#allocation57_spill] sm:$0xff] %v8288_v8  ;;  %v10950_v59 = vld [vmem:[#allocation86_spill] sm:$0xff] }
 0x5c0   :  { %2671 = vmatpush1.msra.mxu0 %v10944_v41  ;;  %2742 = vmatpush1.msra.mxu1 %v8280_v2  ;;  %v8292_v9 = vld [vmem:[#allocation5 + $0x358] sm:$0xff]  ;;  %v10952_v41 = vld [vmem:[#allocation89_spill] sm:$0xff] }
 0x5c1   :  { %2672 = vmatprep.subr.mxu0 %v10946_v0  ;;  %2743 = vmatprep.subr.mxu1 %v8284_v32  ;;  %10951 = vst [vmem:[#allocation59_spill] sm:$0xff] %v8292_v9  ;;  %v8296_v2 = vld [vmem:[#allocation5 + $0x350] sm:$0xff]  ;;  %v10954_v0 = vld [vmem:[#allocation91_spill] sm:$0xff]  ;;  %v8300_v32 = vld [vmem:[#allocation5 + $0x318] sm:$0xff] }
 0x5c2   :  { %2673 = vmatpush1.msra.mxu0 %v10948_v26  ;;  %2744 = vmatpush1.msra.mxu1 %v8288_v8  ;;  %10953 = vst [vmem:[#allocation61_spill] sm:$0xff] %v8296_v2  ;;  %10955 = vst [vmem:[#allocation63_spill] sm:$0xff] %v8300_v32  ;;  %v10956_v26 = vld [vmem:[#allocation94_spill] sm:$0xff]  ;;  %v8304_v8 = vld [vmem:[#allocation5 + $0x310] sm:$0xff] }
 0x5c3   :  { %2674 = vmatprep.subr.mxu0 %v10950_v59  ;;  %2745 = vmatprep.subr.mxu1 %v8292_v9  ;;  %10957 = vst [vmem:[#allocation65_spill] sm:$0xff] %v8304_v8  ;;  %v10958_v59 = vld [vmem:[#allocation96_spill] sm:$0xff]  ;;  %v8308_v9 = vld [vmem:[#allocation5 + $0x2d8] sm:$0xff] }
 0x5c4   :  { %2675 = vmatpush1.msra.mxu0 %v10952_v41  ;;  %2746 = vmatpush1.msra.mxu1 %v8296_v2  ;;  %10959 = vst [vmem:[#allocation67_spill] sm:$0xff] %v8308_v9  ;;  %v10960_v41 = vld [vmem:[#allocation100_spill] sm:$0xff]  ;;  %v8312_v2 = vld [vmem:[#allocation5 + $0x2d0] sm:$0xff] }
 0x5c5   :  { %2676 = vmatprep.subr.mxu0 %v10954_v0  ;;  %2747 = vmatprep.subr.mxu1 %v8300_v32  ;;  %10961 = vst [vmem:[#allocation69_spill] sm:$0xff] %v8312_v2  ;;  %v8315_v0 = vld [vmem:[#allocation5 + $0x288] sm:$0xff]  ;;  %v8411_v32 = vld [vmem:[#allocation5 + $0x80] sm:$0xff] }
 0x5c6   :  { %2677 = vmatpush1.msra.mxu0 %v10956_v26  ;;  %2748 = vmatpush1.msra.mxu1 %v8304_v8  ;;  %10962 = vst [vmem:[#allocation71_spill] sm:$0xff] %v8315_v0  ;;  %v8318_v26 = vld [vmem:[#allocation5 + $0x298] sm:$0xff]  ;;  %v8321_v8 = vld [vmem:[#allocation5 + $0x280] sm:$0xff]  ;;  %10996 = vst [vmem:[#allocation123_spill] sm:$0xff] %v8411_v32 }
 0x5c7   :  { %2678 = vmatprep.subr.mxu0 %v10958_v59  ;;  %2749 = vmatprep.subr.mxu1 %v8308_v9  ;;  %10963 = vst [vmem:[#allocation73_spill] sm:$0xff] %v8318_v26  ;;  %10964 = vst [vmem:[#allocation75_spill] sm:$0xff] %v8321_v8  ;;  %v8324_v59 = vld [vmem:[#allocation5 + $0x290] sm:$0xff]  ;;  %v8403_v9 = vld [vmem:[#allocation5 + $0xc0] sm:$0xff] }
 0x5c8   :  { %2679 = vmatpush1.msra.mxu0 %v10960_v41  ;;  %2750 = vmatpush1.msra.mxu1 %v8312_v2  ;;  %10965 = vst [vmem:[#allocation77_spill] sm:$0xff] %v8324_v59  ;;  %v8327_v41 = vld [vmem:[#allocation5 + $0x248] sm:$0xff]  ;;  %v8330_v2 = vld [vmem:[#allocation5 + $0x258] sm:$0xff]  ;;  %10992 = vst [vmem:[#allocation119_spill] sm:$0xff] %v8403_v9 }
 0x5c9   :  { %2680 = vmatprep.subr.mxu0 %v8315_v0  ;;  %2751 = vmatprep.subr.mxu1 %v8318_v26  ;;  %10966 = vst [vmem:[#allocation82_spill] sm:$0xff] %v8327_v41  ;;  %10967 = vst [vmem:[#allocation83_spill] sm:$0xff] %v8330_v2  ;;  %v8333_v0 = vld [vmem:[#allocation5 + $0x240] sm:$0xff]  ;;  %v8336_v26 = vld [vmem:[#allocation5 + $0x250] sm:$0xff] }
 0x5ca   :  { %2681 = vmatpush1.msra.mxu0 %v8321_v8  ;;  %2752 = vmatpush1.msra.mxu1 %v8324_v59  ;;  %10968 = vst [vmem:[#allocation85_spill] sm:$0xff] %v8333_v0  ;;  %10969 = vst [vmem:[#allocation88_spill] sm:$0xff] %v8336_v26  ;;  %v8339_v8 = vld [vmem:[#allocation5 + $0x208] sm:$0xff]  ;;  %v8342_v59 = vld [vmem:[#allocation5 + $0x218] sm:$0xff] }
 0x5cb   :  { %2682 = vmatprep.subr.mxu0 %v8327_v41  ;;  %2753 = vmatprep.subr.mxu1 %v8330_v2  ;;  %10970 = vst [vmem:[#allocation90_spill] sm:$0xff] %v8339_v8  ;;  %10971 = vst [vmem:[#allocation93_spill] sm:$0xff] %v8342_v59  ;;  %v8345_v41 = vld [vmem:[#allocation5 + $0x200] sm:$0xff]  ;;  %v8348_v2 = vld [vmem:[#allocation5 + $0x210] sm:$0xff] }
 0x5cc   :  { %2683 = vmatpush1.msra.mxu0 %v8333_v0  ;;  %2754 = vmatpush1.msra.mxu1 %v8336_v26  ;;  %10972 = vst [vmem:[#allocation95_spill] sm:$0xff] %v8345_v41  ;;  %10973 = vst [vmem:[#allocation99_spill] sm:$0xff] %v8348_v2  ;;  %v8351_v0 = vld [vmem:[#allocation5 + $0x1c8] sm:$0xff]  ;;  %v8354_v26 = vld [vmem:[#allocation5 + $0x1d8] sm:$0xff] }
 0x5cd   :  { %2684 = vmatprep.subr.mxu0 %v8339_v8  ;;  %2755 = vmatprep.subr.mxu1 %v8342_v59  ;;  %10974 = vst [vmem:[#allocation101_spill] sm:$0xff] %v8351_v0  ;;  %10975 = vst [vmem:[#allocation122_spill] sm:$0xff] %v8354_v26  ;;  %v8357_v8 = vld [vmem:[#allocation5 + $0x1c0] sm:$0xff]  ;;  %v8360_v59 = vld [vmem:[#allocation5 + $0x1d0] sm:$0xff] }
 0x5ce   :  { %2685 = vmatpush1.msra.mxu0 %v8345_v41  ;;  %2756 = vmatpush1.msra.mxu1 %v8348_v2  ;;  %10976 = vst [vmem:[#allocation128_spill] sm:$0xff] %v8357_v8  ;;  %10977 = vst [vmem:[#allocation146_spill] sm:$0xff] %v8360_v59  ;;  %v8363_v41 = vld [vmem:[#allocation5 + $0x188] sm:$0xff]  ;;  %v8366_v2 = vld [vmem:[#allocation5 + $0x198] sm:$0xff] }
 0x5cf   :  { %2686 = vmatprep.subr.mxu0 %v8351_v0  ;;  %2757 = vmatprep.subr.mxu1 %v8354_v26  ;;  %10978 = vst [vmem:[#allocation162_spill] sm:$0xff] %v8363_v41  ;;  %10979 = vst [vmem:[#allocation163_spill] sm:$0xff] %v8366_v2  ;;  %v8369_v0 = vld [vmem:[#allocation5 + $0x180] sm:$0xff]  ;;  %v8372_v26 = vld [vmem:[#allocation5 + $0x190] sm:$0xff] }
 0x5d0   :  { %2687 = vmatpush1.msra.mxu0 %v8357_v8  ;;  %2758 = vmatpush1.msra.mxu1 %v8360_v59  ;;  %10980 = vst [vmem:[#allocation175_spill] sm:$0xff] %v8369_v0  ;;  %10981 = vst [vmem:[#allocation174_spill] sm:$0xff] %v8372_v26  ;;  %v8375_v8 = vld [vmem:[#allocation5 + $0x148] sm:$0xff]  ;;  %v8378_v59 = vld [vmem:[#allocation5 + $0x158] sm:$0xff] }
 0x5d1   :  { %2688 = vmatprep.subr.mxu0 %v8363_v41  ;;  %2759 = vmatprep.subr.mxu1 %v8366_v2  ;;  %10982 = vst [vmem:[#allocation147_spill] sm:$0xff] %v8375_v8  ;;  %10983 = vst [vmem:[#allocation107_spill] sm:$0xff] %v8378_v59  ;;  %v8381_v41 = vld [vmem:[#allocation5 + $0x140] sm:$0xff]  ;;  %v8384_v2 = vld [vmem:[#allocation5 + $0x150] sm:$0xff] }
 0x5d2   :  { %2689 = vmatpush1.msra.mxu0 %v8369_v0  ;;  %2760 = vmatpush1.msra.mxu1 %v8372_v26  ;;  %10984 = vst [vmem:[#allocation48_spill] sm:$0xff] %v8381_v41  ;;  %10985 = vst [vmem:[#allocation111_spill] sm:$0xff] %v8384_v2  ;;  %v8387_v0 = vld [vmem:[#allocation5 + $0x108] sm:$0xff]  ;;  %v8390_v26 = vld [vmem:[#allocation5 + $0x118] sm:$0xff] }
 0x5d3   :  { %2690 = vmatprep.subr.mxu0 %v8375_v8  ;;  %2761 = vmatprep.subr.mxu1 %v8378_v59  ;;  %10986 = vst [vmem:[#allocation50_spill] sm:$0xff] %v8387_v0  ;;  %10987 = vst [vmem:[#allocation113_spill] sm:$0xff] %v8390_v26  ;;  %v8393_v8 = vld [vmem:[#allocation5 + $0x100] sm:$0xff]  ;;  %v8396_v59 = vld [vmem:[#allocation5 + $0x110] sm:$0xff] }
 0x5d4   :  { %2691 = vmatpush1.msra.mxu0 %v8381_v41  ;;  %2762 = vmatpush1.msra.mxu1 %v8384_v2  ;;  %10988 = vst [vmem:[#allocation52_spill] sm:$0xff] %v8393_v8  ;;  %10989 = vst [vmem:[#allocation117_spill] sm:$0xff] %v8396_v59  ;;  %v8399_v41 = vld [vmem:[#allocation5 + $0xc8] sm:$0xff]  ;;  %v10991_v2 = vld [vmem:[#allocation102_spill] sm:$0xff] }
 0x5d5   :  { %2692 = vmatprep.subr.mxu0 %v8387_v0  ;;  %2763 = vmatprep.subr.mxu1 %v8390_v26  ;;  %10990 = vst [vmem:[#allocation54_spill] sm:$0xff] %v8399_v41  ;;  %v10993_v0 = vld [vmem:[#allocation106_spill] sm:$0xff]  ;;  %v8407_v26 = vld [vmem:[#allocation5 + $0x88] sm:$0xff] }
 0x5d6   :  { %2693 = vmatpush1.msra.mxu0 %v8393_v8  ;;  %2764 = vmatpush1.msra.mxu1 %v8396_v59  ;;  %10994 = vst [vmem:[#allocation56_spill] sm:$0xff] %v8407_v26  ;;  %v10995_v8 = vld [vmem:[#allocation108_spill] sm:$0xff] }
 0x5d7   :  { %2694 = vmatprep.subr.mxu0 %v8399_v41  ;;  %2765 = vmatprep.subr.mxu1 %v10991_v2  ;;  %v10997_v59 = vld [vmem:[#allocation112_spill] sm:$0xff]  ;;  %v10999_v2 = vld [vmem:[#allocation114_spill] sm:$0xff] }
 0x5d8   :  { %2695 = vmatpush1.msra.mxu0 %v8403_v9  ;;  %2766 = vmatpush1.msra.mxu1 %v10993_v0  ;;  %v8415_v41 = vld [vmem:[#allocation5 + $0x48] sm:$0xff]  ;;  %v8419_v9 = vld [vmem:[#allocation5 + $0x40] sm:$0xff]  ;;  %v11001_v0 = vld [vmem:[#allocation118_spill] sm:$0xff] }
 0x5d9   :  { %2696 = vmatprep.subr.mxu0 %v8407_v26  ;;  %2767 = vmatprep.subr.mxu1 %v10995_v8  ;;  %10998 = vst [vmem:[#allocation58_spill] sm:$0xff] %v8415_v41  ;;  %11000 = vst [vmem:[#allocation125_spill] sm:$0xff] %v8419_v9  ;;  %v8423_v26 = vld [vmem:[#allocation5 + $0x8] sm:$0xff] }
 0x5da   :  { %2697 = vmatpush1.msra.mxu0 %v8411_v32  ;;  %2768 = vmatpush1.msra.mxu1 %v10997_v59  ;;  %11002 = vst [vmem:[#allocation60_spill] sm:$0xff] %v8423_v26  ;;  %v11003_v8 = vld [vmem:[#allocation120_spill] sm:$0xff]  ;;  %v8427_v32 = vld [vmem:[#allocation5] sm:$0xff] }
 0x5db   :  { %2698 = vmatprep.subr.mxu0 %v8415_v41  ;;  %2769 = vmatprep.subr.mxu1 %v10999_v2  ;;  %11004 = vst [vmem:[#allocation129_spill] sm:$0xff] %v8427_v32  ;;  %v11005_v59 = vld [vmem:[#allocation124_spill] sm:$0xff]  ;;  %v11007_v2 = vld [vmem:[#allocation126_spill] sm:$0xff] }
 0x5dc   :  { %2699 = vmatpush1.msra.mxu0 %v8419_v9  ;;  %2770 = vmatpush1.msra.mxu1 %v11001_v0  ;;  %v8431_v41 = vld [vmem:[#allocation5 + $0x7c8] sm:$0xff]  ;;  %v8435_v9 = vld [vmem:[#allocation5 + $0x7c0] sm:$0xff]  ;;  %v11009_v0 = vld [vmem:[#allocation130_spill] sm:$0xff] }
 0x5dd   :  { %2700 = vmatprep.subr.mxu0 %v8423_v26  ;;  %2771 = vmatprep.subr.mxu1 %v11003_v8  ;;  %11006 = vst [vmem:[#allocation62_spill] sm:$0xff] %v8431_v41  ;;  %11008 = vst [vmem:[#allocation131_spill] sm:$0xff] %v8435_v9  ;;  %v8439_v26 = vld [vmem:[#allocation5 + $0x788] sm:$0xff] }
 0x5de   :  { %2701 = vmatpush1.msra.mxu0 %v8427_v32  ;;  %2772 = vmatpush1.msra.mxu1 %v11005_v59  ;;  %11010 = vst [vmem:[#allocation64_spill] sm:$0xff] %v8439_v26  ;;  %v11011_v8 = vld [vmem:[#allocation132_spill] sm:$0xff]  ;;  %v8443_v32 = vld [vmem:[#allocation5 + $0x780] sm:$0xff]  ;;  %v11013_v59 = vld [vmem:[#allocation134_spill] sm:$0xff] }
 0x5df   :  { %2702 = vmatprep.subr.mxu0 %v8431_v41  ;;  %2773 = vmatprep.subr.mxu1 %v11007_v2  ;;  %11012 = vst [vmem:[#allocation133_spill] sm:$0xff] %v8443_v32  ;;  %v8447_v41 = vld [vmem:[#allocation5 + $0x748] sm:$0xff]  ;;  %v11015_v2 = vld [vmem:[#allocation137_spill] sm:$0xff] }
 0x5e0   :  { %2703 = vmatpush2.msra.mxu0 %v8435_v9  ;;  %2774 = vmatpush2.msra.mxu1 %v11009_v0  ;;  %11014 = vst [vmem:[#allocation66_spill] sm:$0xff] %v8447_v41  ;;  %v8451_v9 = vld [vmem:[#allocation5 + $0x740] sm:$0xff] }
 0x5e1   :  { %2704 = vmatprep.subr.mxu0 %v8439_v26  ;;  %2775 = vmatprep.subr.mxu1 %v11011_v8  ;;  %11016 = vst [vmem:[#allocation136_spill] sm:$0xff] %v8451_v9  ;;  %v11017_v0 = vld [vmem:[#allocation139_spill] sm:$0xff]  ;;  %v8455_v26 = vld [vmem:[#allocation5 + $0x708] sm:$0xff]  ;;  %v11019_v8 = vld [vmem:[#allocation142_spill] sm:$0xff] }
 0x5e2   :  { %2705 = vmatpush2.msra.mxu0 %v8443_v32  ;;  %2776 = vmatpush2.msra.mxu1 %v11013_v59  ;;  %11018 = vst [vmem:[#allocation68_spill] sm:$0xff] %v8455_v26  ;;  %v8459_v32 = vld [vmem:[#allocation5 + $0x700] sm:$0xff]  ;;  %v11021_v59 = vld [vmem:[#allocation98_spill] sm:$0xff] }
 0x5e3   :  { %2706 = vmatprep.subr.mxu0 %v8447_v41  ;;  %2777 = vmatprep.subr.mxu1 %v11015_v2  ;;  %11020 = vst [vmem:[#allocation138_spill] sm:$0xff] %v8459_v32  ;;  %v8463_v41 = vld [vmem:[#allocation5 + $0x6c8] sm:$0xff] }
 0x5e4   :  { %2707 = vmatpush2.msra.mxu0 %v8451_v9  ;;  %2778 = vmatpush2.msra.mxu1 %v11017_v0  ;;  %11022 = vst [vmem:[#allocation70_spill] sm:$0xff] %v8463_v41  ;;  %v11023_v2 = vld [vmem:[#allocation104_spill] sm:$0xff]  ;;  %v8467_v9 = vld [vmem:[#allocation5 + $0x6c0] sm:$0xff]  ;;  %v11025_v0 = vld [vmem:[#allocation141_spill] sm:$0xff] }
 0x5e5   :  { %2708 = vmatprep.subr.mxu0 %v8455_v26  ;;  %2779 = vmatprep.subr.mxu1 %v11019_v8  ;;  %11024 = vst [vmem:[#allocation72_spill] sm:$0xff] %v8467_v9  ;;  %v8471_v26 = vld [vmem:[#allocation5 + $0x688] sm:$0xff]  ;;  %v11027_v8 = vld [vmem:[#allocation143_spill] sm:$0xff] }
 0x5e6   :  { %2709 = vmatpush2.msra.mxu0 %v8459_v32  ;;  %2780 = vmatpush2.msra.mxu1 %v11021_v59  ;;  %11026 = vst [vmem:[#allocation110_spill] sm:$0xff] %v8471_v26  ;;  %v8475_v32 = vld [vmem:[#allocation5 + $0x680] sm:$0xff] }
 0x5e7   :  { %2710 = vmatprep.subr.mxu0 %v8463_v41  ;;  %2781 = vmatprep.subr.mxu1 %v11023_v2  ;;  %11028 = vst [vmem:[#allocation116_spill] sm:$0xff] %v8475_v32  ;;  %v11029_v59 = vld [vmem:[#allocation11_spill] sm:$0xff]  ;;  %v8479_v41 = vld [vmem:[#allocation5 + $0x648] sm:$0xff] }
 0x5e8   :  { %2711 = vmatpush2.msra.mxu0 %v8467_v9  ;;  %2782 = vmatpush2.msra.mxu1 %v11025_v0  ;;  %11030 = vst [vmem:[#allocation144_spill] sm:$0xff] %v8479_v41  ;;  %v11031_v2 = vld [vmem:[#allocation12_spill] sm:$0xff]  ;;  %v8483_v9 = vld [vmem:[#allocation5 + $0x640] sm:$0xff]  ;;  %v11033_v0 = vld [vmem:[#allocation13_spill] sm:$0xff] }
 0x5e9   :  { %2712 = vmatprep.subr.mxu0 %v8471_v26  ;;  %2783 = vmatprep.subr.mxu1 %v11027_v8  ;;  %11032 = vst [vmem:[#allocation164_spill] sm:$0xff] %v8483_v9  ;;  %v8487_v26 = vld [vmem:[#allocation5 + $0x608] sm:$0xff]  ;;  %v11035_v8 = vld [vmem:[#allocation14_spill] sm:$0xff] }
 0x5ea   :  { %2713 = vmatpush2.msra.mxu0 %v8475_v32  ;;  %2784 = vmatpush2.msra.mxu1 %v11029_v59  ;;  %11034 = vst [vmem:[#allocation165_spill] sm:$0xff] %v8487_v26  ;;  %v8491_v32 = vld [vmem:[#allocation5 + $0x600] sm:$0xff] }
 0x5eb   :  { %2714 = vmatprep.subr.mxu0 %v8479_v41  ;;  %2785 = vmatprep.subr.mxu1 %v11031_v2  ;;  %11036 = vst [vmem:[#allocation177_spill] sm:$0xff] %v8491_v32  ;;  %v11037_v59 = vld [vmem:[#allocation15_spill] sm:$0xff]  ;;  %v8495_v41 = vld [vmem:[#allocation5 + $0x5c8] sm:$0xff] }
 0x5ec   :  { %2715 = vmatpush2.msra.mxu0 %v8483_v9  ;;  %2786 = vmatpush2.msra.mxu1 %v11033_v0  ;;  %11038 = vst [vmem:[#allocation176_spill] sm:$0xff] %v8495_v41  ;;  %v11039_v2 = vld [vmem:[#allocation16_spill] sm:$0xff]  ;;  %v8499_v9 = vld [vmem:[#allocation5 + $0x5c0] sm:$0xff]  ;;  %v11041_v0 = vld [vmem:[#allocation17_spill] sm:$0xff] }
 0x5ed   :  { %2716 = vmatprep.subr.mxu0 %v8487_v26  ;;  %2787 = vmatprep.subr.mxu1 %v11035_v8  ;;  %11040 = vst [vmem:[#allocation145_spill] sm:$0xff] %v8499_v9  ;;  %v8503_v26 = vld [vmem:[#allocation5 + $0x588] sm:$0xff]  ;;  %v11043_v8 = vld [vmem:[#allocation18_spill] sm:$0xff] }
 0x5ee   :  { %2717 = vmatpush2.msra.mxu0 %v8491_v32  ;;  %2788 = vmatpush2.msra.mxu1 %v11037_v59  ;;  %11042 = vst [vmem:[#allocation78_spill] sm:$0xff] %v8503_v26  ;;  %v8507_v32 = vld [vmem:[#allocation5 + $0x580] sm:$0xff] }
 0x5ef   :  { %2718 = vmatprep.subr.mxu0 %v8495_v41  ;;  %2789 = vmatprep.subr.mxu1 %v11039_v2  ;;  %11044 = vst [vmem:[#allocation79_spill] sm:$0xff] %v8507_v32  ;;  %v11045_v59 = vld [vmem:[#allocation19_spill] sm:$0xff]  ;;  %v8511_v41 = vld [vmem:[#allocation5 + $0x548] sm:$0xff] }
 0x5f0   :  { %2719 = vmatpush2.msra.mxu0 %v8499_v9  ;;  %2790 = vmatpush2.msra.mxu1 %v11041_v0  ;;  %11046 = vst [vmem:[#allocation80_spill] sm:$0xff] %v8511_v41  ;;  %v11047_v2 = vld [vmem:[#allocation20_spill] sm:$0xff]  ;;  %v8515_v9 = vld [vmem:[#allocation5 + $0x540] sm:$0xff]  ;;  %v11049_v0 = vld [vmem:[#allocation21_spill] sm:$0xff] }
 0x5f1   :  { %2720 = vmatprep.subr.mxu0 %v8503_v26  ;;  %2791 = vmatprep.subr.mxu1 %v11043_v8  ;;  %11048 = vst [vmem:[#allocation81_spill] sm:$0xff] %v8515_v9  ;;  %v8519_v26 = vld [vmem:[#allocation5 + $0x508] sm:$0xff]  ;;  %v11051_v8 = vld [vmem:[#allocation22_spill] sm:$0xff] }
 0x5f2   :  { %2721 = vmatpush2.msra.mxu0 %v8507_v32  ;;  %2792 = vmatpush2.msra.mxu1 %v11045_v59  ;;  %11050 = vst [vmem:[#allocation84_spill] sm:$0xff] %v8519_v26  ;;  %v8523_v32 = vld [vmem:[#allocation5 + $0x500] sm:$0xff] }
 0x5f3   :  { %2722 = vmatprep.subr.mxu0 %v8511_v41  ;;  %2793 = vmatprep.subr.mxu1 %v11047_v2  ;;  %11052 = vst [vmem:[#allocation86_spill] sm:$0xff] %v8523_v32  ;;  %v11053_v59 = vld [vmem:[#allocation23_spill] sm:$0xff]  ;;  %v8527_v41 = vld [vmem:[#allocation5 + $0x4c8] sm:$0xff] }
 0x5f4   :  { %2723 = vmatpush2.msra.mxu0 %v8515_v9  ;;  %2794 = vmatpush2.msra.mxu1 %v11049_v0  ;;  %11054 = vst [vmem:[#allocation89_spill] sm:$0xff] %v8527_v41  ;;  %v11055_v2 = vld [vmem:[#allocation24_spill] sm:$0xff]  ;;  %v8531_v9 = vld [vmem:[#allocation5 + $0x4c0] sm:$0xff]  ;;  %v11057_v0 = vld [vmem:[#allocation25_spill] sm:$0xff] }
 0x5f5   :  { %2724 = vmatprep.subr.mxu0 %v8519_v26  ;;  %2795 = vmatprep.subr.mxu1 %v11051_v8  ;;  %11056 = vst [vmem:[#allocation91_spill] sm:$0xff] %v8531_v9  ;;  %v8535_v26 = vld [vmem:[#allocation5 + $0x488] sm:$0xff]  ;;  %v11059_v8 = vld [vmem:[#allocation26_spill] sm:$0xff] }
 0x5f6   :  { %2725 = vmatpush2.msra.mxu0 %v8523_v32  ;;  %2796 = vmatpush2.msra.mxu1 %v11053_v59  ;;  %11058 = vst [vmem:[#allocation94_spill] sm:$0xff] %v8535_v26  ;;  %v8539_v32 = vld [vmem:[#allocation5 + $0x480] sm:$0xff] }
 0x5f7   :  { %2726 = vmatprep.subr.mxu0 %v8527_v41  ;;  %2797 = vmatprep.subr.mxu1 %v11055_v2  ;;  %11060 = vst [vmem:[#allocation96_spill] sm:$0xff] %v8539_v32  ;;  %v11061_v59 = vld [vmem:[#allocation27_spill] sm:$0xff]  ;;  %v8543_v41 = vld [vmem:[#allocation5 + $0x448] sm:$0xff] }
 0x5f8   :  { %2727 = vmatpush2.msra.mxu0 %v8531_v9  ;;  %2798 = vmatpush2.msra.mxu1 %v11057_v0  ;;  %11062 = vst [vmem:[#allocation100_spill] sm:$0xff] %v8543_v41  ;;  %v11063_v2 = vld [vmem:[#allocation28_spill] sm:$0xff]  ;;  %v8547_v9 = vld [vmem:[#allocation5 + $0x440] sm:$0xff]  ;;  %v11065_v0 = vld [vmem:[#allocation29_spill] sm:$0xff] }
 0x5f9   :  { %2728 = vmatprep.subr.mxu0 %v8535_v26  ;;  %2799 = vmatprep.subr.mxu1 %v11059_v8  ;;  %11064 = vst [vmem:[#allocation102_spill] sm:$0xff] %v8547_v9  ;;  %v8551_v26 = vld [vmem:[#allocation5 + $0x408] sm:$0xff]  ;;  %v11067_v8 = vld [vmem:[#allocation30_spill] sm:$0xff] }
 0x5fa   :  { %2729 = vmatpush2.msra.mxu0 %v8539_v32  ;;  %2800 = vmatpush2.msra.mxu1 %v11061_v59  ;;  %11066 = vst [vmem:[#allocation106_spill] sm:$0xff] %v8551_v26  ;;  %v8555_v32 = vld [vmem:[#allocation5 + $0x400] sm:$0xff] }
 0x5fb   :  { %2730 = vmatprep.subr.mxu0 %v8543_v41  ;;  %2801 = vmatprep.subr.mxu1 %v11063_v2  ;;  %11068 = vst [vmem:[#allocation108_spill] sm:$0xff] %v8555_v32  ;;  %v11069_v59 = vld [vmem:[#allocation31_spill] sm:$0xff]  ;;  %v11070_v41 = vld [vmem:[#allocation32_spill] sm:$0xff]  ;;  %v11071_v2 = vld [vmem:[#allocation33_spill] sm:$0xff] }
 0x5fc   :  { %2731 = vmatpush2.msra.mxu0 %v8547_v9  ;;  %2802 = vmatpush2.msra.mxu1 %v11065_v0  ;;  %v11072_v9 = vld [vmem:[#allocation87_spill] sm:$0xff] }
 0x5fd   :  { %2732 = vmatprep.subr.mxu0 %v8551_v26  ;;  %2803 = vmatprep.subr.mxu1 %v11067_v8 }
 0x5fe   :  { %2733 = vmatpush2.msra.mxu0 %v8555_v32  ;;  %2804 = vmatpush2.msra.mxu1 %v11069_v59 }
 0x5ff   :  { %2812 = vmatprep.subr.mxu0 %v11070_v41  ;;  %2883 = vmatprep.subr.mxu1 %v11071_v2 }
 0x63d   :  { %v2388_v5 = vpop.f32.mrf.mxu0  ;;  %v2459_v8 = vpop.f32.mrf.mxu1 }
 0x63e   :  { %v2614_v30 = vadd.f32 %v2388_v5, %v11072_v9  ;;  %v2616_v50 = vadd.f32 %v2459_v8, %v11074_v51 }
 0x63f   :  { %v2390_v0 = vpop.f32.mrf.mxu0  ;;  %v2461_v51 = vpop.f32.mrf.mxu1 }
 0x640   :  { %v4018_v20 = vmul.f32 -1.442695, %v2614_v30  ;;  %v2615_v27 = vadd.f32 %v2390_v0, %v11073_v49 }
 0x642   :  { %4221 = vpow2.f32 %v4018_v20  ;;  %v4020_v26 = vmul.f32 -1.442695, %v2615_v27  ;;  %v11075_v20 = vld [vmem:[#allocation160_spill] sm:$0xff] }
 0x644   :  { %4223 = vpow2.f32 %v4020_v26 }
 0x645   :  { %4225 = vtanh.f32 %v2616_v50 }
 0x64f   :  { %v4222_v32 = vpop.eup %4221 }
 0x650   :  { %v2628_v37 = vadd.f32 1.0, %v4222_v32  ;;  %v11076_v32 = vld [vmem:[#allocation161_spill] sm:$0xff] }
 0x651   :  { %v4224_v59 = vpop.eup %4223 }
 0x652   :  { %4227 = vrcp.f32 %v2628_v37  ;;  %v2640_v41 = vadd.f32 1.0, %v4224_v59  ;;  %v4226_v2 = vpop.eup %4225 }
 0x654   :  { %4229 = vrcp.f32 %v2640_v41 }
 0x65f   :  { %v4228_v11 = vpop.eup %4227 }
 0x660   :  { %v2662_v5 = vmul.f32 %v4228_v11, %v4226_v2  ;;  %v11077_v11 = vld [vmem:[#allocation173_spill] sm:$0xff] }
 0x661   :  { %v4230_v9 = vpop.eup %4229  ;;  %v584_v41 = vadd.f32 %v11077_v11, %v6401_v55 }
 0x662   :  { %v2660_v30 = vmul.f32 %v4230_v9, %v8019_v16  ;;  %v11078_v16 = vld [vmem:[#allocation172_spill] sm:$0xff]  ;;  %v11079_v9 = vld [vmem:[#allocation149_spill] sm:$0xff] }
 0x664   :  { %v8565_v49 = vadd.f32 %v2662_v5, %v2660_v30  ;;  %v582_v5 = vadd.f32 %v11078_v16, %v6398_v17  ;;  %v2617_v30 = vadd.f32 %v2461_v51, %v11079_v9 }
 0x67e   :  { %v2530_v27 = vpop.f32.mrf.mxu0  ;;  %v2601_v37 = vpop.f32.mrf.mxu1 }
 0x67f   :  { %v2618_v26 = vadd.f32 %v2530_v27, %v11075_v20  ;;  %v2620_v27 = vadd.f32 %v2601_v37, %v582_v5 }
 0x680   :  { %v2532_v0 = vpop.f32.mrf.mxu0  ;;  %v2603_v59 = vpop.f32.mrf.mxu1 }
 0x681   :  { %v4019_v8 = vmul.f32 -1.442695, %v2618_v26  ;;  %v2619_v25 = vadd.f32 %v2532_v0, %v11076_v32  ;;  %v2621_v2 = vadd.f32 %v2603_v59, %v584_v41  ;;  %v4022_v26 = vmul.f32 -1.442695, %v2617_v30 }
 0x683   :  { %4231 = vpow2.f32 %v4019_v8  ;;  %v4021_v50 = vmul.f32 -1.442695, %v2619_v25  ;;  %v4023_v20 = vmul.f32 -1.442695, %v2621_v2 }
 0x685   :  { %4233 = vpow2.f32 %v4021_v50 }
 0x686   :  { %4235 = vtanh.f32 %v2620_v27 }
 0x687   :  { %4237 = vpow2.f32 %v4023_v20  ;;  %v8590_v20 = vld [vmem:[#allocation5 + $0x3f0] sm:$0xff] }
 0x690   :  { %v4232_v6 = vpop.eup %4231 }
 0x691   :  { %v2629_v61 = vadd.f32 1.0, %v4232_v6 }
 0x692   :  { %v4234_v0 = vpop.eup %4233 }
 0x693   :  { %4239 = vrcp.f32 %v2629_v61  ;;  %v2641_v25 = vadd.f32 1.0, %v4234_v0  ;;  %v4236_v8 = vpop.eup %4235  ;;  %v8597_v0 = vld [vmem:[#allocation5 + $0x3b8] sm:$0xff] }
 0x694   :  { %4241 = vpow2.f32 %v4022_v26  ;;  %v4238_v32 = vpop.eup %4237  ;;  %v8593_v26 = vld [vmem:[#allocation5 + $0x3a8] sm:$0xff] }
 0x695   :  { %4243 = vrcp.f32 %v2641_v25  ;;  %v2655_v16 = vadd.f32 1.0, %v4238_v32  ;;  %v8601_v25 = vld [vmem:[#allocation5 + $0x3a0] sm:$0xff]  ;;  %v8607_v32 = vld [vmem:[#allocation5 + $0x368] sm:$0xff] }
 0x696   :  { %4245 = vtanh.f32 %v8565_v49 }
 0x697   :  { %4247 = vrcp.f32 %v2655_v16  ;;  %v8622_v16 = vld [vmem:[#allocation5 + $0x338] sm:$0xff] }
 0x6a0   :  { %v4240_v50 = vpop.eup %4239 }
 0x6a1   :  { %v4242_v59 = vpop.eup %4241  ;;  %v2663_v11 = vmul.f32 %v4240_v50, %v4236_v8  ;;  %v8604_v8 = vld [vmem:[#allocation5 + $0x3b0] sm:$0xff]  ;;  %v8610_v50 = vld [vmem:[#allocation5 + $0x378] sm:$0xff] }
 0x6a2   :  { %v4244_v41 = vpop.eup %4243  ;;  %v2654_v37 = vadd.f32 1.0, %v4242_v59  ;;  %v8613_v59 = vld [vmem:[#allocation5 + $0x360] sm:$0xff] }
 0x6a3   :  { %v2661_v51 = vmul.f32 %v4244_v41, %v8030_v14  ;;  %v4246_v61 = vpop.eup %4245  ;;  %v8587_v14 = vld [vmem:[#allocation5 + $0x3e0] sm:$0xff]  ;;  %v8619_v41 = vld [vmem:[#allocation5 + $0x328] sm:$0xff] }
 0x6a4   :  { %v4248_v2 = vpop.eup %4247 }
 0x6a5   :  { %v8576_v6 = vadd.f32 %v2663_v11, %v2661_v51  ;;  %v8616_v11 = vld [vmem:[#allocation5 + $0x370] sm:$0xff]  ;;  %v8625_v51 = vld [vmem:[#allocation5 + $0x320] sm:$0xff] }
 0x6a7   :  { %4249 = vtanh.f32 %v8576_v6 }
 0x6a8   :  { %4251 = vrcp.f32 %v2654_v37  ;;  %v8628_v37 = vld [vmem:[#allocation5 + $0x330] sm:$0xff] }
 0x6a9   :  { %11082 = vst [vmem:[#allocation118_spill] sm:$0xff] %v8628_v37 }
 0x6b4   :  { %v4250_v5 = vpop.eup %4249 }
 0x6b5   :  { %v4252_v9 = vpop.eup %4251  ;;  %v8579_v30 = vmul.f32 %v4250_v5, %v4248_v2  ;;  %v8634_v2 = vld [vmem:[#allocation5 + $0x2f8] sm:$0xff]  ;;  %v8637_v5 = vld [vmem:[#allocation5 + $0x2e0] sm:$0xff] }
 0x6b6   :  { %v8581_v27 = vmul.f32 %v4252_v9, %v4246_v61  ;;  %v8631_v61 = vld [vmem:[#allocation5 + $0x2e8] sm:$0xff]  ;;  %11084 = vst [vmem:[#allocation124_spill] sm:$0xff] %v8634_v2  ;;  %11085 = vst [vmem:[#allocation126_spill] sm:$0xff] %v8637_v5  ;;  %v8640_v9 = vld [vmem:[#allocation5 + $0x2f0] sm:$0xff] }
 0x6b7   :  { %11080 = vst [vmem:[#allocation112_spill] sm:$0xff] %v8579_v30  ;;  %2734 = vmatprep.mubr.f32.mxu0 %v8579_v30  ;;  %2805 = vmatprep.mubr.f32.mxu1 %v8579_v30  ;;  %11083 = vst [vmem:[#allocation120_spill] sm:$0xff] %v8631_v61 }
 0x6b8   :  { %11081 = vst [vmem:[#allocation114_spill] sm:$0xff] %v8581_v27  ;;  %2735 = vmatmul.mubr.f32.vlgmr.msra.gmra.mxu0 %v8581_v27  ;;  %2806 = vmatmul.mubr.f32.vlgmr.msra.gmra.mxu1 %v8581_v27  ;;  %11086 = vst [vmem:[#allocation130_spill] sm:$0xff] %v8640_v9 }
 0x6b9   :  { %2813 = vmatpush1.msra.mxu0 %v8587_v14  ;;  %2884 = vmatpush1.msra.mxu1 %v8590_v20 }
 0x6ba   :  { %2814 = vmatprep.subr.mxu0 %v8593_v26  ;;  %2876 = vmatprep.mubr.f32.mxu0 %v8579_v30 }
 0x6bb   :  { %2885 = vmatprep.subr.mxu1 %v8597_v0  ;;  %2947 = vmatprep.mubr.f32.mxu1 %v8579_v30  ;;  %v8643_v30 = vld [vmem:[#allocation5 + $0x2a8] sm:$0xff] }
 0x6bc   :  { %2815 = vmatpush1.msra.mxu0 %v8601_v25  ;;  %2886 = vmatpush1.msra.mxu1 %v8604_v8 }
 0x6bd   :  { %2816 = vmatprep.subr.mxu0 %v8607_v32  ;;  %2887 = vmatprep.subr.mxu1 %v8610_v50 }
 0x6be   :  { %2817 = vmatpush1.msra.mxu0 %v8613_v59  ;;  %2888 = vmatpush1.msra.mxu1 %v8616_v11 }
 0x6bf   :  { %2818 = vmatprep.subr.mxu0 %v8619_v41  ;;  %2889 = vmatprep.subr.mxu1 %v8622_v16 }
 0x6c0   :  { %2819 = vmatpush1.msra.mxu0 %v8625_v51  ;;  %2890 = vmatpush1.msra.mxu1 %v8628_v37  ;;  %v8646_v37 = vld [vmem:[#allocation5 + $0x2b8] sm:$0xff] }
 0x6c1   :  { %2820 = vmatprep.subr.mxu0 %v8631_v61  ;;  %2891 = vmatprep.subr.mxu1 %v8634_v2  ;;  %11087 = vst [vmem:[#allocation132_spill] sm:$0xff] %v8646_v37  ;;  %v8649_v61 = vld [vmem:[#allocation5 + $0x2a0] sm:$0xff]  ;;  %v8652_v2 = vld [vmem:[#allocation5 + $0x2b0] sm:$0xff] }
 0x6c2   :  { %2821 = vmatpush1.msra.mxu0 %v8637_v5  ;;  %2892 = vmatpush1.msra.mxu1 %v8640_v9  ;;  %11088 = vst [vmem:[#allocation134_spill] sm:$0xff] %v8649_v61  ;;  %v8655_v5 = vld [vmem:[#allocation5 + $0x268] sm:$0xff]  ;;  %v8659_v9 = vld [vmem:[#allocation5 + $0x260] sm:$0xff] }
 0x6c3   :  { %2822 = vmatprep.subr.mxu0 %v8643_v30  ;;  %2893 = vmatprep.subr.mxu1 %v8646_v37  ;;  %11089 = vst [vmem:[#allocation137_spill] sm:$0xff] %v8655_v5  ;;  %v8663_v37 = vld [vmem:[#allocation5 + $0x228] sm:$0xff] }
 0x6c4   :  { %2823 = vmatpush1.msra.mxu0 %v8649_v61  ;;  %2894 = vmatpush1.msra.mxu1 %v8652_v2  ;;  %v8667_v61 = vld [vmem:[#allocation5 + $0x220] sm:$0xff] }
 0x6c5   :  { %2824 = vmatprep.subr.mxu0 %v8655_v5  ;;  %2895 = vmatprep.subr.mxu1 %v8066_v24  ;;  %v8671_v5 = vld [vmem:[#allocation5 + $0x1e8] sm:$0xff]  ;;  %v8675_v24 = vld [vmem:[#allocation5 + $0x1e0] sm:$0xff] }
 0x6c6   :  { %2825 = vmatpush1.msra.mxu0 %v8659_v9  ;;  %2896 = vmatpush1.msra.mxu1 %v8070_v60  ;;  %v8679_v60 = vld [vmem:[#allocation5 + $0x1a8] sm:$0xff] }
 0x6c7   :  { %2826 = vmatprep.subr.mxu0 %v8663_v37  ;;  %2897 = vmatprep.subr.mxu1 %v8074_v3  ;;  %v8683_v3 = vld [vmem:[#allocation5 + $0x1a0] sm:$0xff] }
 0x6c8   :  { %2827 = vmatpush1.msra.mxu0 %v8667_v61  ;;  %2898 = vmatpush1.msra.mxu1 %v8078_v15  ;;  %v8687_v15 = vld [vmem:[#allocation5 + $0x168] sm:$0xff] }
 0x6c9   :  { %2828 = vmatprep.subr.mxu0 %v8671_v5  ;;  %2899 = vmatprep.subr.mxu1 %v8082_v54  ;;  %v8691_v54 = vld [vmem:[#allocation5 + $0x160] sm:$0xff] }
 0x6ca   :  { %2829 = vmatpush1.msra.mxu0 %v8675_v24  ;;  %2900 = vmatpush1.msra.mxu1 %v8086_v52  ;;  %v8695_v52 = vld [vmem:[#allocation5 + $0x128] sm:$0xff] }
 0x6cb   :  { %2830 = vmatprep.subr.mxu0 %v8679_v60  ;;  %2901 = vmatprep.subr.mxu1 %v8090_v31  ;;  %v8699_v31 = vld [vmem:[#allocation5 + $0x120] sm:$0xff] }
 0x6cc   :  { %2831 = vmatpush1.msra.mxu0 %v8683_v3  ;;  %2902 = vmatpush1.msra.mxu1 %v8094_v18  ;;  %v8703_v18 = vld [vmem:[#allocation5 + $0xe8] sm:$0xff] }
 0x6cd   :  { %2832 = vmatprep.subr.mxu0 %v8687_v15  ;;  %2903 = vmatprep.subr.mxu1 %v8098_v39  ;;  %v8707_v39 = vld [vmem:[#allocation5 + $0xe0] sm:$0xff] }
 0x6ce   :  { %2833 = vmatpush1.msra.mxu0 %v8691_v54  ;;  %2904 = vmatpush1.msra.mxu1 %v8102_v1  ;;  %v8711_v1 = vld [vmem:[#allocation5 + $0xa8] sm:$0xff] }
 0x6cf   :  { %2834 = vmatprep.subr.mxu0 %v8695_v52  ;;  %2905 = vmatprep.subr.mxu1 %v8106_v10  ;;  %v8715_v10 = vld [vmem:[#allocation5 + $0xa0] sm:$0xff] }
 0x6d0   :  { %2835 = vmatpush1.msra.mxu0 %v8699_v31  ;;  %2906 = vmatpush1.msra.mxu1 %v8110_v57  ;;  %v8719_v57 = vld [vmem:[#allocation5 + $0x68] sm:$0xff] }
 0x6d1   :  { %2836 = vmatprep.subr.mxu0 %v8703_v18  ;;  %2907 = vmatprep.subr.mxu1 %v8114_v38  ;;  %v8723_v38 = vld [vmem:[#allocation5 + $0x60] sm:$0xff] }
 0x6d2   :  { %2837 = vmatpush1.msra.mxu0 %v8707_v39  ;;  %2908 = vmatpush1.msra.mxu1 %v8118_v45  ;;  %v8727_v45 = vld [vmem:[#allocation5 + $0x28] sm:$0xff] }
 0x6d3   :  { %2838 = vmatprep.subr.mxu0 %v8711_v1  ;;  %2909 = vmatprep.subr.mxu1 %v8122_v47  ;;  %v8731_v47 = vld [vmem:[#allocation5 + $0x20] sm:$0xff] }
 0x6d4   :  { %2839 = vmatpush1.msra.mxu0 %v8715_v10  ;;  %2910 = vmatpush1.msra.mxu1 %v8126_v42  ;;  %v8735_v42 = vld [vmem:[#allocation5 + $0x7e8] sm:$0xff] }
 0x6d5   :  { %2840 = vmatprep.subr.mxu0 %v8719_v57  ;;  %2911 = vmatprep.subr.mxu1 %v8130_v4  ;;  %v8739_v4 = vld [vmem:[#allocation5 + $0x7e0] sm:$0xff] }
 0x6d6   :  { %2841 = vmatpush1.msra.mxu0 %v8723_v38  ;;  %2912 = vmatpush1.msra.mxu1 %v8134_v48  ;;  %v8743_v48 = vld [vmem:[#allocation5 + $0x7a8] sm:$0xff] }
 0x6d7   :  { %2842 = vmatprep.subr.mxu0 %v8727_v45  ;;  %2913 = vmatprep.subr.mxu1 %v8138_v19  ;;  %v8747_v19 = vld [vmem:[#allocation5 + $0x7a0] sm:$0xff] }
 0x6d8   :  { %2843 = vmatpush1.msra.mxu0 %v8731_v47  ;;  %2914 = vmatpush1.msra.mxu1 %v8142_v23  ;;  %v8751_v23 = vld [vmem:[#allocation5 + $0x768] sm:$0xff] }
 0x6d9   :  { %2844 = vmatprep.subr.mxu0 %v8735_v42  ;;  %2915 = vmatprep.subr.mxu1 %v8146_v53  ;;  %v8755_v53 = vld [vmem:[#allocation5 + $0x760] sm:$0xff] }
 0x6da   :  { %2845 = vmatpush2.msra.mxu0 %v8739_v4  ;;  %2916 = vmatpush2.msra.mxu1 %v8150_v34  ;;  %v8759_v34 = vld [vmem:[#allocation5 + $0x728] sm:$0xff] }
 0x6db   :  { %2846 = vmatprep.subr.mxu0 %v8743_v48  ;;  %2917 = vmatprep.subr.mxu1 %v8154_v62  ;;  %11090 = vst [vmem:[#allocation139_spill] sm:$0xff] %v8759_v34  ;;  %v8763_v62 = vld [vmem:[#allocation5 + $0x720] sm:$0xff] }
 0x6dc   :  { %2847 = vmatpush2.msra.mxu0 %v8747_v19  ;;  %2918 = vmatpush2.msra.mxu1 %v8158_v12  ;;  %11091 = vst [vmem:[#allocation142_spill] sm:$0xff] %v8763_v62  ;;  %v8767_v12 = vld [vmem:[#allocation5 + $0x6e8] sm:$0xff] }
 0x6dd   :  { %2848 = vmatprep.subr.mxu0 %v8751_v23  ;;  %2919 = vmatprep.subr.mxu1 %v8162_v21  ;;  %11092 = vst [vmem:[#allocation98_spill] sm:$0xff] %v8767_v12  ;;  %v8771_v21 = vld [vmem:[#allocation5 + $0x6e0] sm:$0xff] }
 0x6de   :  { %2849 = vmatpush2.msra.mxu0 %v8755_v53  ;;  %2920 = vmatpush2.msra.mxu1 %v8166_v36  ;;  %11093 = vst [vmem:[#allocation104_spill] sm:$0xff] %v8771_v21  ;;  %v8775_v36 = vld [vmem:[#allocation5 + $0x6a8] sm:$0xff] }
 0x6df   :  { %2850 = vmatprep.subr.mxu0 %v8759_v34  ;;  %2921 = vmatprep.subr.mxu1 %v8170_v35  ;;  %11094 = vst [vmem:[#allocation141_spill] sm:$0xff] %v8775_v36  ;;  %v8779_v35 = vld [vmem:[#allocation5 + $0x6a0] sm:$0xff] }
 0x6e0   :  { %2851 = vmatpush2.msra.mxu0 %v8763_v62  ;;  %2922 = vmatpush2.msra.mxu1 %v8174_v40  ;;  %11095 = vst [vmem:[#allocation143_spill] sm:$0xff] %v8779_v35  ;;  %v8783_v40 = vld [vmem:[#allocation5 + $0x668] sm:$0xff] }
 0x6e1   :  { %2852 = vmatprep.subr.mxu0 %v8767_v12  ;;  %2923 = vmatprep.subr.mxu1 %v8178_v63  ;;  %11096 = vst [vmem:[#allocation11_spill] sm:$0xff] %v8783_v40  ;;  %v8787_v63 = vld [vmem:[#allocation5 + $0x660] sm:$0xff] }
 0x6e2   :  { %2853 = vmatpush2.msra.mxu0 %v8771_v21  ;;  %2924 = vmatpush2.msra.mxu1 %v8182_v43  ;;  %11097 = vst [vmem:[#allocation12_spill] sm:$0xff] %v8787_v63  ;;  %v8791_v43 = vld [vmem:[#allocation5 + $0x628] sm:$0xff] }
 0x6e3   :  { %2854 = vmatprep.subr.mxu0 %v8775_v36  ;;  %2925 = vmatprep.subr.mxu1 %v8186_v13  ;;  %11098 = vst [vmem:[#allocation13_spill] sm:$0xff] %v8791_v43  ;;  %v8795_v13 = vld [vmem:[#allocation5 + $0x620] sm:$0xff] }
 0x6e4   :  { %2855 = vmatpush2.msra.mxu0 %v8779_v35  ;;  %2926 = vmatpush2.msra.mxu1 %v8190_v29  ;;  %11099 = vst [vmem:[#allocation14_spill] sm:$0xff] %v8795_v13  ;;  %v8799_v29 = vld [vmem:[#allocation5 + $0x5e8] sm:$0xff] }
 0x6e5   :  { %2856 = vmatprep.subr.mxu0 %v8783_v40  ;;  %2927 = vmatprep.subr.mxu1 %v8194_v7  ;;  %11100 = vst [vmem:[#allocation15_spill] sm:$0xff] %v8799_v29  ;;  %v8803_v7 = vld [vmem:[#allocation5 + $0x5e0] sm:$0xff] }
 0x6e6   :  { %2857 = vmatpush2.msra.mxu0 %v8787_v63  ;;  %2928 = vmatpush2.msra.mxu1 %v8198_v58  ;;  %11101 = vst [vmem:[#allocation16_spill] sm:$0xff] %v8803_v7  ;;  %v8807_v58 = vld [vmem:[#allocation5 + $0x5a8] sm:$0xff] }
 0x6e7   :  { %2858 = vmatprep.subr.mxu0 %v8791_v43  ;;  %2929 = vmatprep.subr.mxu1 %v8202_v46  ;;  %11102 = vst [vmem:[#allocation17_spill] sm:$0xff] %v8807_v58  ;;  %v8811_v46 = vld [vmem:[#allocation5 + $0x5a0] sm:$0xff] }
 0x6e8   :  { %2859 = vmatpush2.msra.mxu0 %v8795_v13  ;;  %2930 = vmatpush2.msra.mxu1 %v8206_v22  ;;  %11103 = vst [vmem:[#allocation18_spill] sm:$0xff] %v8811_v46  ;;  %v8815_v22 = vld [vmem:[#allocation5 + $0x568] sm:$0xff]  ;;  %v11156_v13 = vld [vmem:[#allocation90_spill] sm:$0xff] }
 0x6e9   :  { %2860 = vmatprep.subr.mxu0 %v8799_v29  ;;  %2931 = vmatprep.subr.mxu1 %v8210_v56  ;;  %11104 = vst [vmem:[#allocation19_spill] sm:$0xff] %v8815_v22  ;;  %v11105_v56 = vld [vmem:[#allocation36_spill] sm:$0xff]  ;;  %v11153_v29 = vld [vmem:[#allocation83_spill] sm:$0xff] }
 0x6ea   :  { %2861 = vmatpush2.msra.mxu0 %v8803_v7  ;;  %2932 = vmatpush2.msra.mxu1 %v8214_v33  ;;  %v8819_v7 = vld [vmem:[#allocation5 + $0x560] sm:$0xff]  ;;  %v11107_v33 = vld [vmem:[#allocation37_spill] sm:$0xff] }
 0x6eb   :  { %2862 = vmatprep.subr.mxu0 %v8807_v58  ;;  %2933 = vmatprep.subr.mxu1 %v8218_v28  ;;  %11106 = vst [vmem:[#allocation20_spill] sm:$0xff] %v8819_v7  ;;  %v8823_v58 = vld [vmem:[#allocation5 + $0x528] sm:$0xff]  ;;  %v11109_v28 = vld [vmem:[#allocation38_spill] sm:$0xff] }
 0x6ec   :  { %2863 = vmatpush2.msra.mxu0 %v8811_v46  ;;  %2934 = vmatpush2.msra.mxu1 %v8222_v44  ;;  %11108 = vst [vmem:[#allocation21_spill] sm:$0xff] %v8823_v58  ;;  %v8827_v46 = vld [vmem:[#allocation5 + $0x520] sm:$0xff] }
 0x6ed   :  { %2864 = vmatprep.subr.mxu0 %v8815_v22  ;;  %2935 = vmatprep.subr.mxu1 %v11105_v56  ;;  %11110 = vst [vmem:[#allocation22_spill] sm:$0xff] %v8827_v46  ;;  %v11111_v44 = vld [vmem:[#allocation39_spill] sm:$0xff]  ;;  %v8831_v22 = vld [vmem:[#allocation5 + $0x4e8] sm:$0xff] }
 0x6ee   :  { %2865 = vmatpush2.msra.mxu0 %v8819_v7  ;;  %2936 = vmatpush2.msra.mxu1 %v11107_v33  ;;  %11112 = vst [vmem:[#allocation23_spill] sm:$0xff] %v8831_v22  ;;  %v11113_v56 = vld [vmem:[#allocation40_spill] sm:$0xff]  ;;  %v8835_v7 = vld [vmem:[#allocation5 + $0x4e0] sm:$0xff]  ;;  %v11115_v33 = vld [vmem:[#allocation41_spill] sm:$0xff] }
 0x6ef   :  { %2866 = vmatprep.subr.mxu0 %v8823_v58  ;;  %2937 = vmatprep.subr.mxu1 %v11109_v28  ;;  %11114 = vst [vmem:[#allocation24_spill] sm:$0xff] %v8835_v7  ;;  %v8839_v58 = vld [vmem:[#allocation5 + $0x4a8] sm:$0xff]  ;;  %v11117_v28 = vld [vmem:[#allocation42_spill] sm:$0xff] }
 0x6f0   :  { %2867 = vmatpush2.msra.mxu0 %v8827_v46  ;;  %2938 = vmatpush2.msra.mxu1 %v11111_v44  ;;  %11116 = vst [vmem:[#allocation25_spill] sm:$0xff] %v8839_v58  ;;  %v8843_v46 = vld [vmem:[#allocation5 + $0x4a0] sm:$0xff] }
 0x6f1   :  { %2868 = vmatprep.subr.mxu0 %v8831_v22  ;;  %2939 = vmatprep.subr.mxu1 %v11113_v56  ;;  %11118 = vst [vmem:[#allocation26_spill] sm:$0xff] %v8843_v46  ;;  %v11119_v44 = vld [vmem:[#allocation43_spill] sm:$0xff]  ;;  %v8847_v22 = vld [vmem:[#allocation5 + $0x468] sm:$0xff] }
 0x6f2   :  { %2869 = vmatpush2.msra.mxu0 %v8835_v7  ;;  %2940 = vmatpush2.msra.mxu1 %v11115_v33  ;;  %11120 = vst [vmem:[#allocation27_spill] sm:$0xff] %v8847_v22  ;;  %v11121_v56 = vld [vmem:[#allocation44_spill] sm:$0xff]  ;;  %v8851_v7 = vld [vmem:[#allocation5 + $0x460] sm:$0xff]  ;;  %v11123_v33 = vld [vmem:[#allocation45_spill] sm:$0xff] }
 0x6f3   :  { %2870 = vmatprep.subr.mxu0 %v8839_v58  ;;  %2941 = vmatprep.subr.mxu1 %v11117_v28  ;;  %11122 = vst [vmem:[#allocation28_spill] sm:$0xff] %v8851_v7  ;;  %v8855_v58 = vld [vmem:[#allocation5 + $0x428] sm:$0xff]  ;;  %v11125_v28 = vld [vmem:[#allocation47_spill] sm:$0xff] }
 0x6f4   :  { %2871 = vmatpush2.msra.mxu0 %v8843_v46  ;;  %2942 = vmatpush2.msra.mxu1 %v11119_v44  ;;  %11124 = vst [vmem:[#allocation29_spill] sm:$0xff] %v8855_v58  ;;  %v8859_v46 = vld [vmem:[#allocation5 + $0x420] sm:$0xff]  ;;  %v11127_v44 = vld [vmem:[#allocation49_spill] sm:$0xff] }
 0x6f5   :  { %2872 = vmatprep.subr.mxu0 %v8847_v22  ;;  %2943 = vmatprep.subr.mxu1 %v11121_v56  ;;  %11126 = vst [vmem:[#allocation30_spill] sm:$0xff] %v8859_v46  ;;  %v8865_v56 = vld [vmem:[#allocation5 + $0x3c8] sm:$0xff]  ;;  %v11150_v22 = vld [vmem:[#allocation75_spill] sm:$0xff] }
 0x6f6   :  { %2873 = vmatpush2.msra.mxu0 %v8851_v7  ;;  %2944 = vmatpush2.msra.mxu1 %v11123_v33  ;;  %11128 = vst [vmem:[#allocation31_spill] sm:$0xff] %v8865_v56  ;;  %v11129_v33 = vld [vmem:[#allocation51_spill] sm:$0xff] }
 0x6f7   :  { %2874 = vmatprep.subr.mxu0 %v8855_v58  ;;  %2945 = vmatprep.subr.mxu1 %v11125_v28  ;;  %v8869_v7 = vld [vmem:[#allocation5 + $0x3c0] sm:$0xff]  ;;  %v11131_v28 = vld [vmem:[#allocation53_spill] sm:$0xff]  ;;  %v8873_v58 = vld [vmem:[#allocation5 + $0x388] sm:$0xff] }
 0x6f8   :  { %2875 = vmatpush2.msra.mxu0 %v8859_v46  ;;  %2946 = vmatpush2.msra.mxu1 %v11127_v44  ;;  %11130 = vst [vmem:[#allocation32_spill] sm:$0xff] %v8869_v7  ;;  %11132 = vst [vmem:[#allocation33_spill] sm:$0xff] %v8873_v58  ;;  %v11133_v44 = vld [vmem:[#allocation55_spill] sm:$0xff] }
 0x6f9   :  { %2877 = vmatmul.mubr.f32.vlgmr.msra.gmra.mxu0 %v8581_v27  ;;  %2948 = vmatmul.mubr.f32.vlgmr.msra.gmra.mxu1 %v8581_v27  ;;  %v8877_v46 = vld [vmem:[#allocation5 + $0x380] sm:$0xff]  ;;  %v11135_v27 = vld [vmem:[#allocation57_spill] sm:$0xff] }
 0x6fa   :  { %3018 = vmatprep.subr.mxu0 %v8865_v56  ;;  %3089 = vmatprep.subr.mxu1 %v11129_v33  ;;  %11134 = vst [vmem:[#allocation87_spill] sm:$0xff] %v8877_v46  ;;  %v8881_v56 = vld [vmem:[#allocation5 + $0x348] sm:$0xff]  ;;  %v11137_v33 = vld [vmem:[#allocation59_spill] sm:$0xff] }
 0x6fb   :  { %3019 = vmatpush1.msra.mxu0 %v8869_v7  ;;  %3090 = vmatpush1.msra.mxu1 %v11131_v28  ;;  %11136 = vst [vmem:[#allocation92_spill] sm:$0xff] %v8881_v56  ;;  %v8885_v7 = vld [vmem:[#allocation5 + $0x340] sm:$0xff]  ;;  %v11139_v28 = vld [vmem:[#allocation61_spill] sm:$0xff] }
 0x6fc   :  { %3020 = vmatprep.subr.mxu0 %v8873_v58  ;;  %3091 = vmatprep.subr.mxu1 %v11133_v44  ;;  %11138 = vst [vmem:[#allocation148_spill] sm:$0xff] %v8885_v7  ;;  %v8889_v58 = vld [vmem:[#allocation5 + $0x308] sm:$0xff]  ;;  %v11141_v44 = vld [vmem:[#allocation63_spill] sm:$0xff] }
 0x6fd   :  { %3021 = vmatpush1.msra.mxu0 %v8877_v46  ;;  %3092 = vmatpush1.msra.mxu1 %v11135_v27  ;;  %11140 = vst [vmem:[#allocation160_spill] sm:$0xff] %v8889_v58  ;;  %v8893_v46 = vld [vmem:[#allocation5 + $0x300] sm:$0xff]  ;;  %v11143_v27 = vld [vmem:[#allocation65_spill] sm:$0xff] }
 0x6fe   :  { %3022 = vmatprep.subr.mxu0 %v8881_v56  ;;  %3093 = vmatprep.subr.mxu1 %v11137_v33  ;;  %11142 = vst [vmem:[#allocation161_spill] sm:$0xff] %v8893_v46  ;;  %v8897_v56 = vld [vmem:[#allocation5 + $0x2c8] sm:$0xff]  ;;  %v11145_v33 = vld [vmem:[#allocation67_spill] sm:$0xff] }
 0x6ff   :  { %3023 = vmatpush1.msra.mxu0 %v8885_v7  ;;  %3094 = vmatpush1.msra.mxu1 %v11139_v28  ;;  %11144 = vst [vmem:[#allocation173_spill] sm:$0xff] %v8897_v56  ;;  %v8901_v7 = vld [vmem:[#allocation5 + $0x2c0] sm:$0xff]  ;;  %v11147_v28 = vld [vmem:[#allocation69_spill] sm:$0xff] }
 0x700   :  { %3024 = vmatprep.subr.mxu0 %v8889_v58  ;;  %3095 = vmatprep.subr.mxu1 %v11141_v44  ;;  %11146 = vst [vmem:[#allocation172_spill] sm:$0xff] %v8901_v7  ;;  %v11148_v58 = vld [vmem:[#allocation71_spill] sm:$0xff]  ;;  %v11149_v44 = vld [vmem:[#allocation73_spill] sm:$0xff] }
 0x701   :  { %3025 = vmatpush1.msra.mxu0 %v8893_v46  ;;  %3096 = vmatpush1.msra.mxu1 %v11143_v27  ;;  %v11151_v46 = vld [vmem:[#allocation77_spill] sm:$0xff]  ;;  %v11152_v27 = vld [vmem:[#allocation82_spill] sm:$0xff] }
 0x702   :  { %3026 = vmatprep.subr.mxu0 %v8897_v56  ;;  %3097 = vmatprep.subr.mxu1 %v11145_v33  ;;  %v11154_v56 = vld [vmem:[#allocation85_spill] sm:$0xff]  ;;  %v11155_v33 = vld [vmem:[#allocation88_spill] sm:$0xff] }
 0x703   :  { %3027 = vmatpush1.msra.mxu0 %v8901_v7  ;;  %3098 = vmatpush1.msra.mxu1 %v11147_v28  ;;  %v11157_v7 = vld [vmem:[#allocation93_spill] sm:$0xff]  ;;  %v11158_v28 = vld [vmem:[#allocation95_spill] sm:$0xff] }
 0x704   :  { %3028 = vmatprep.subr.mxu0 %v11148_v58  ;;  %3099 = vmatprep.subr.mxu1 %v11149_v44  ;;  %v11159_v58 = vld [vmem:[#allocation99_spill] sm:$0xff]  ;;  %v11160_v44 = vld [vmem:[#allocation101_spill] sm:$0xff] }
 0x705   :  { %3029 = vmatpush1.msra.mxu0 %v11150_v22  ;;  %3100 = vmatpush1.msra.mxu1 %v11151_v46  ;;  %v11161_v22 = vld [vmem:[#allocation122_spill] sm:$0xff]  ;;  %v11162_v46 = vld [vmem:[#allocation128_spill] sm:$0xff] }
 0x706   :  { %3030 = vmatprep.subr.mxu0 %v11152_v27  ;;  %3101 = vmatprep.subr.mxu1 %v11153_v29  ;;  %v11163_v27 = vld [vmem:[#allocation146_spill] sm:$0xff] }
 0x707   :  { %3031 = vmatpush1.msra.mxu0 %v11154_v56  ;;  %3102 = vmatpush1.msra.mxu1 %v11155_v33  ;;  %v11164_v29 = vld [vmem:[#allocation162_spill] sm:$0xff]  ;;  %v11165_v56 = vld [vmem:[#allocation163_spill] sm:$0xff] }
 0x708   :  { %3032 = vmatprep.subr.mxu0 %v11156_v13  ;;  %3103 = vmatprep.subr.mxu1 %v11157_v7  ;;  %v11166_v33 = vld [vmem:[#allocation175_spill] sm:$0xff]  ;;  %v11167_v13 = vld [vmem:[#allocation174_spill] sm:$0xff] }
 0x709   :  { %3033 = vmatpush1.msra.mxu0 %v11158_v28  ;;  %3104 = vmatpush1.msra.mxu1 %v11159_v58  ;;  %v11168_v7 = vld [vmem:[#allocation147_spill] sm:$0xff]  ;;  %v11170_v58 = vld [vmem:[#allocation48_spill] sm:$0xff] }
 0x70a   :  { %3034 = vmatprep.subr.mxu0 %v11160_v44  ;;  %3105 = vmatprep.subr.mxu1 %v11161_v22  ;;  %v11169_v28 = vld [vmem:[#allocation107_spill] sm:$0xff]  ;;  %v11172_v22 = vld [vmem:[#allocation50_spill] sm:$0xff] }
 0x70b   :  { %3035 = vmatpush1.msra.mxu0 %v11162_v46  ;;  %3106 = vmatpush1.msra.mxu1 %v11163_v27  ;;  %v11171_v44 = vld [vmem:[#allocation111_spill] sm:$0xff]  ;;  %v11173_v46 = vld [vmem:[#allocation113_spill] sm:$0xff]  ;;  %v11174_v27 = vld [vmem:[#allocation52_spill] sm:$0xff] }
 0x70c   :  { %3036 = vmatprep.subr.mxu0 %v11164_v29  ;;  %3107 = vmatprep.subr.mxu1 %v11165_v56  ;;  %v11175_v29 = vld [vmem:[#allocation117_spill] sm:$0xff]  ;;  %v11176_v56 = vld [vmem:[#allocation54_spill] sm:$0xff] }
 0x70d   :  { %3037 = vmatpush1.msra.mxu0 %v11166_v33  ;;  %3108 = vmatpush1.msra.mxu1 %v11167_v13  ;;  %v8934_v33 = vld [vmem:[#allocation5 + $0xd8] sm:$0xff]  ;;  %v11178_v13 = vld [vmem:[#allocation119_spill] sm:$0xff] }
 0x70e   :  { %3038 = vmatprep.subr.mxu0 %v11168_v7  ;;  %3109 = vmatprep.subr.mxu1 %v11169_v28  ;;  %11177 = vst [vmem:[#allocation149_spill] sm:$0xff] %v8934_v33  ;;  %v8938_v7 = vld [vmem:[#allocation5 + $0xd0] sm:$0xff]  ;;  %v11180_v28 = vld [vmem:[#allocation56_spill] sm:$0xff] }
 0x70f   :  { %3039 = vmatpush1.msra.mxu0 %v11170_v58  ;;  %3110 = vmatpush1.msra.mxu1 %v11171_v44  ;;  %11179 = vst [vmem:[#allocation36_spill] sm:$0xff] %v8938_v7  ;;  %v8942_v58 = vld [vmem:[#allocation5 + $0x98] sm:$0xff]  ;;  %v11182_v44 = vld [vmem:[#allocation123_spill] sm:$0xff] }
 0x710   :  { %3040 = vmatprep.subr.mxu0 %v11172_v22  ;;  %3111 = vmatprep.subr.mxu1 %v11173_v46  ;;  %11181 = vst [vmem:[#allocation37_spill] sm:$0xff] %v8942_v58  ;;  %v8946_v22 = vld [vmem:[#allocation5 + $0x90] sm:$0xff]  ;;  %v11184_v46 = vld [vmem:[#allocation58_spill] sm:$0xff] }
 0x711   :  { %3041 = vmatpush1.msra.mxu0 %v11174_v27  ;;  %3112 = vmatpush1.msra.mxu1 %v11175_v29  ;;  %11183 = vst [vmem:[#allocation38_spill] sm:$0xff] %v8946_v22  ;;  %v8950_v27 = vld [vmem:[#allocation5 + $0x58] sm:$0xff]  ;;  %v11186_v29 = vld [vmem:[#allocation125_spill] sm:$0xff] }
 0x712   :  { %3042 = vmatprep.subr.mxu0 %v11176_v56  ;;  %3113 = vmatprep.subr.mxu1 %v8934_v33  ;;  %11185 = vst [vmem:[#allocation39_spill] sm:$0xff] %v8950_v27  ;;  %v8954_v56 = vld [vmem:[#allocation5 + $0x50] sm:$0xff] }
 0x713   :  { %3043 = vmatpush1.msra.mxu0 %v11178_v13  ;;  %3114 = vmatpush1.msra.mxu1 %v8938_v7  ;;  %11187 = vst [vmem:[#allocation40_spill] sm:$0xff] %v8954_v56  ;;  %v11188_v13 = vld [vmem:[#allocation60_spill] sm:$0xff] }
 0x714   :  { %3044 = vmatprep.subr.mxu0 %v11180_v28  ;;  %3115 = vmatprep.subr.mxu1 %v8942_v58  ;;  %v8958_v28 = vld [vmem:[#allocation5 + $0x18] sm:$0xff] }
 0x715   :  { %3045 = vmatpush1.msra.mxu0 %v11182_v44  ;;  %3116 = vmatpush1.msra.mxu1 %v8946_v22  ;;  %11189 = vst [vmem:[#allocation41_spill] sm:$0xff] %v8958_v28  ;;  %v11190_v44 = vld [vmem:[#allocation129_spill] sm:$0xff] }
 0x716   :  { %3046 = vmatprep.subr.mxu0 %v11184_v46  ;;  %3117 = vmatprep.subr.mxu1 %v8950_v27  ;;  %v8962_v22 = vld [vmem:[#allocation5 + $0x10] sm:$0xff]  ;;  %v11192_v46 = vld [vmem:[#allocation62_spill] sm:$0xff] }
 0x717   :  { %3047 = vmatpush1.msra.mxu0 %v11186_v29  ;;  %3118 = vmatpush1.msra.mxu1 %v8954_v56  ;;  %11191 = vst [vmem:[#allocation42_spill] sm:$0xff] %v8962_v22  ;;  %v8966_v27 = vld [vmem:[#allocation5 + $0x7d8] sm:$0xff]  ;;  %v11194_v29 = vld [vmem:[#allocation131_spill] sm:$0xff]  ;;  %v8970_v56 = vld [vmem:[#allocation5 + $0x7d0] sm:$0xff] }
 0x718   :  { %3048 = vmatprep.subr.mxu0 %v11188_v13  ;;  %3119 = vmatprep.subr.mxu1 %v8958_v28  ;;  %11193 = vst [vmem:[#allocation43_spill] sm:$0xff] %v8966_v27  ;;  %11195 = vst [vmem:[#allocation44_spill] sm:$0xff] %v8970_v56  ;;  %v11196_v13 = vld [vmem:[#allocation64_spill] sm:$0xff]  ;;  %v8974_v28 = vld [vmem:[#allocation5 + $0x798] sm:$0xff] }
 0x719   :  { %3049 = vmatpush1.msra.mxu0 %v11190_v44  ;;  %3120 = vmatpush1.msra.mxu1 %v8962_v22  ;;  %11197 = vst [vmem:[#allocation45_spill] sm:$0xff] %v8974_v28  ;;  %v11198_v44 = vld [vmem:[#allocation133_spill] sm:$0xff] }
 0x71a   :  { %3050 = vmatprep.subr.mxu0 %v11192_v46  ;;  %3121 = vmatprep.subr.mxu1 %v8966_v27  ;;  %v8978_v22 = vld [vmem:[#allocation5 + $0x790] sm:$0xff]  ;;  %v11200_v46 = vld [vmem:[#allocation66_spill] sm:$0xff] }
 0x71b   :  { %3051 = vmatpush2.msra.mxu0 %v11194_v29  ;;  %3122 = vmatpush2.msra.mxu1 %v8970_v56  ;;  %11199 = vst [vmem:[#allocation47_spill] sm:$0xff] %v8978_v22  ;;  %v8982_v27 = vld [vmem:[#allocation5 + $0x758] sm:$0xff]  ;;  %v11202_v29 = vld [vmem:[#allocation136_spill] sm:$0xff]  ;;  %v8986_v56 = vld [vmem:[#allocation5 + $0x750] sm:$0xff] }
 0x71c   :  { %3052 = vmatprep.subr.mxu0 %v11196_v13  ;;  %3123 = vmatprep.subr.mxu1 %v8974_v28  ;;  %11201 = vst [vmem:[#allocation49_spill] sm:$0xff] %v8982_v27  ;;  %11203 = vst [vmem:[#allocation51_spill] sm:$0xff] %v8986_v56  ;;  %v11204_v13 = vld [vmem:[#allocation68_spill] sm:$0xff]  ;;  %v8990_v28 = vld [vmem:[#allocation5 + $0x718] sm:$0xff] }
 0x71d   :  { %3053 = vmatpush2.msra.mxu0 %v11198_v44  ;;  %3124 = vmatpush2.msra.mxu1 %v8978_v22  ;;  %11205 = vst [vmem:[#allocation53_spill] sm:$0xff] %v8990_v28  ;;  %v11206_v44 = vld [vmem:[#allocation138_spill] sm:$0xff]  ;;  %v8994_v22 = vld [vmem:[#allocation5 + $0x710] sm:$0xff] }
 0x71e   :  { %3054 = vmatprep.subr.mxu0 %v11200_v46  ;;  %3125 = vmatprep.subr.mxu1 %v8982_v27  ;;  %11207 = vst [vmem:[#allocation55_spill] sm:$0xff] %v8994_v22  ;;  %v11208_v46 = vld [vmem:[#allocation70_spill] sm:$0xff] }
 0x71f   :  { %3055 = vmatpush2.msra.mxu0 %v11202_v29  ;;  %3126 = vmatpush2.msra.mxu1 %v8986_v56  ;;  %v8998_v27 = vld [vmem:[#allocation5 + $0x6d8] sm:$0xff]  ;;  %v11210_v29 = vld [vmem:[#allocation72_spill] sm:$0xff]  ;;  %v9002_v56 = vld [vmem:[#allocation5 + $0x6d0] sm:$0xff] }
 0x720   :  { %3056 = vmatprep.subr.mxu0 %v11204_v13  ;;  %3127 = vmatprep.subr.mxu1 %v8990_v28  ;;  %11209 = vst [vmem:[#allocation57_spill] sm:$0xff] %v8998_v27  ;;  %11211 = vst [vmem:[#allocation59_spill] sm:$0xff] %v9002_v56  ;;  %v11212_v13 = vld [vmem:[#allocation110_spill] sm:$0xff] }
 0x721   :  { %3057 = vmatpush2.msra.mxu0 %v11206_v44  ;;  %3128 = vmatpush2.msra.mxu1 %v8994_v22  ;;  %v9006_v28 = vld [vmem:[#allocation5 + $0x698] sm:$0xff]  ;;  %v11214_v44 = vld [vmem:[#allocation116_spill] sm:$0xff]  ;;  %v9010_v22 = vld [vmem:[#allocation5 + $0x690] sm:$0xff] }
 0x722   :  { %3058 = vmatprep.subr.mxu0 %v11208_v46  ;;  %3129 = vmatprep.subr.mxu1 %v8998_v27  ;;  %11213 = vst [vmem:[#allocation61_spill] sm:$0xff] %v9006_v28  ;;  %11215 = vst [vmem:[#allocation63_spill] sm:$0xff] %v9010_v22  ;;  %v11216_v46 = vld [vmem:[#allocation144_spill] sm:$0xff]  ;;  %v9014_v27 = vld [vmem:[#allocation5 + $0x658] sm:$0xff] }
 0x723   :  { %3059 = vmatpush2.msra.mxu0 %v11210_v29  ;;  %3130 = vmatpush2.msra.mxu1 %v9002_v56  ;;  %11217 = vst [vmem:[#allocation65_spill] sm:$0xff] %v9014_v27  ;;  %v11218_v29 = vld [vmem:[#allocation164_spill] sm:$0xff]  ;;  %v9018_v56 = vld [vmem:[#allocation5 + $0x650] sm:$0xff] }
 0x724   :  { %3060 = vmatprep.subr.mxu0 %v11212_v13  ;;  %3131 = vmatprep.subr.mxu1 %v9006_v28  ;;  %11219 = vst [vmem:[#allocation67_spill] sm:$0xff] %v9018_v56  ;;  %v11220_v13 = vld [vmem:[#allocation165_spill] sm:$0xff]  ;;  %v9022_v28 = vld [vmem:[#allocation5 + $0x618] sm:$0xff] }
 0x725   :  { %3061 = vmatpush2.msra.mxu0 %v11214_v44  ;;  %3132 = vmatpush2.msra.mxu1 %v9010_v22  ;;  %11221 = vst [vmem:[#allocation69_spill] sm:$0xff] %v9022_v28  ;;  %v11222_v44 = vld [vmem:[#allocation177_spill] sm:$0xff] }
 0x726   :  { %3062 = vmatprep.subr.mxu0 %v11216_v46  ;;  %3133 = vmatprep.subr.mxu1 %v9014_v27  ;;  %v9026_v22 = vld [vmem:[#allocation5 + $0x610] sm:$0xff]  ;;  %v11224_v46 = vld [vmem:[#allocation176_spill] sm:$0xff]  ;;  %v9030_v27 = vld [vmem:[#allocation5 + $0x5d8] sm:$0xff] }
 0x727   :  { %3063 = vmatpush2.msra.mxu0 %v11218_v29  ;;  %3134 = vmatpush2.msra.mxu1 %v9018_v56  ;;  %11223 = vst [vmem:[#allocation71_spill] sm:$0xff] %v9026_v22  ;;  %11225 = vst [vmem:[#allocation73_spill] sm:$0xff] %v9030_v27  ;;  %v11226_v29 = vld [vmem:[#allocation145_spill] sm:$0xff] }
 0x728   :  { %3064 = vmatprep.subr.mxu0 %v11220_v13  ;;  %3135 = vmatprep.subr.mxu1 %v9022_v28  ;;  %v9034_v56 = vld [vmem:[#allocation5 + $0x5d0] sm:$0xff]  ;;  %v11228_v13 = vld [vmem:[#allocation78_spill] sm:$0xff] }
 0x729   :  { %3065 = vmatpush2.msra.mxu0 %v11222_v44  ;;  %3136 = vmatpush2.msra.mxu1 %v9026_v22  ;;  %11227 = vst [vmem:[#allocation75_spill] sm:$0xff] %v9034_v56  ;;  %v9038_v28 = vld [vmem:[#allocation5 + $0x598] sm:$0xff]  ;;  %v11230_v44 = vld [vmem:[#allocation79_spill] sm:$0xff]  ;;  %v9042_v22 = vld [vmem:[#allocation5 + $0x590] sm:$0xff] }
 0x72a   :  { %3066 = vmatprep.subr.mxu0 %v11224_v46  ;;  %3137 = vmatprep.subr.mxu1 %v9030_v27  ;;  %11229 = vst [vmem:[#allocation77_spill] sm:$0xff] %v9038_v28  ;;  %11231 = vst [vmem:[#allocation82_spill] sm:$0xff] %v9042_v22  ;;  %v11232_v46 = vld [vmem:[#allocation80_spill] sm:$0xff]  ;;  %v9046_v27 = vld [vmem:[#allocation5 + $0x558] sm:$0xff] }
 0x72b   :  { %3067 = vmatpush2.msra.mxu0 %v11226_v29  ;;  %3138 = vmatpush2.msra.mxu1 %v9034_v56  ;;  %11233 = vst [vmem:[#allocation83_spill] sm:$0xff] %v9046_v27  ;;  %v11234_v29 = vld [vmem:[#allocation81_spill] sm:$0xff] }
 0x72c   :  { %3068 = vmatprep.subr.mxu0 %v11228_v13  ;;  %3139 = vmatprep.subr.mxu1 %v9038_v28  ;;  %v9050_v56 = vld [vmem:[#allocation5 + $0x550] sm:$0xff]  ;;  %v11236_v13 = vld [vmem:[#allocation84_spill] sm:$0xff]  ;;  %v9054_v28 = vld [vmem:[#allocation5 + $0x518] sm:$0xff] }
 0x72d   :  { %3069 = vmatpush2.msra.mxu0 %v11230_v44  ;;  %3140 = vmatpush2.msra.mxu1 %v9042_v22  ;;  %11235 = vst [vmem:[#allocation85_spill] sm:$0xff] %v9050_v56  ;;  %11237 = vst [vmem:[#allocation88_spill] sm:$0xff] %v9054_v28  ;;  %v11238_v44 = vld [vmem:[#allocation86_spill] sm:$0xff]  ;;  %v9058_v22 = vld [vmem:[#allocation5 + $0x510] sm:$0xff] }
 0x72e   :  { %3070 = vmatprep.subr.mxu0 %v11232_v46  ;;  %3141 = vmatprep.subr.mxu1 %v9046_v27  ;;  %11239 = vst [vmem:[#allocation90_spill] sm:$0xff] %v9058_v22  ;;  %v11240_v46 = vld [vmem:[#allocation89_spill] sm:$0xff]  ;;  %v9062_v27 = vld [vmem:[#allocation5 + $0x4d8] sm:$0xff] }
 0x72f   :  { %3071 = vmatpush2.msra.mxu0 %v11234_v29  ;;  %3142 = vmatpush2.msra.mxu1 %v9050_v56  ;;  %11241 = vst [vmem:[#allocation93_spill] sm:$0xff] %v9062_v27  ;;  %v11242_v29 = vld [vmem:[#allocation91_spill] sm:$0xff]  ;;  %v9066_v56 = vld [vmem:[#allocation5 + $0x4d0] sm:$0xff] }
 0x730   :  { %3072 = vmatprep.subr.mxu0 %v11236_v13  ;;  %3143 = vmatprep.subr.mxu1 %v9054_v28  ;;  %11243 = vst [vmem:[#allocation95_spill] sm:$0xff] %v9066_v56  ;;  %v11244_v13 = vld [vmem:[#allocation94_spill] sm:$0xff] }
 0x731   :  { %3073 = vmatpush2.msra.mxu0 %v11238_v44  ;;  %3144 = vmatpush2.msra.mxu1 %v9058_v22  ;;  %v9070_v28 = vld [vmem:[#allocation5 + $0x498] sm:$0xff]  ;;  %v11246_v44 = vld [vmem:[#allocation96_spill] sm:$0xff]  ;;  %v9074_v22 = vld [vmem:[#allocation5 + $0x490] sm:$0xff] }
 0x732   :  { %3074 = vmatprep.subr.mxu0 %v11240_v46  ;;  %3145 = vmatprep.subr.mxu1 %v9062_v27  ;;  %11245 = vst [vmem:[#allocation99_spill] sm:$0xff] %v9070_v28  ;;  %11247 = vst [vmem:[#allocation101_spill] sm:$0xff] %v9074_v22  ;;  %v11248_v46 = vld [vmem:[#allocation100_spill] sm:$0xff]  ;;  %v9078_v27 = vld [vmem:[#allocation5 + $0x458] sm:$0xff] }
 0x733   :  { %3075 = vmatpush2.msra.mxu0 %v11242_v29  ;;  %3146 = vmatpush2.msra.mxu1 %v9066_v56  ;;  %11249 = vst [vmem:[#allocation122_spill] sm:$0xff] %v9078_v27  ;;  %v11250_v29 = vld [vmem:[#allocation102_spill] sm:$0xff]  ;;  %v9082_v56 = vld [vmem:[#allocation5 + $0x450] sm:$0xff] }
 0x734   :  { %3076 = vmatprep.subr.mxu0 %v11244_v13  ;;  %3147 = vmatprep.subr.mxu1 %v9070_v28  ;;  %11251 = vst [vmem:[#allocation128_spill] sm:$0xff] %v9082_v56  ;;  %v11252_v13 = vld [vmem:[#allocation106_spill] sm:$0xff] }
 0x735   :  { %3077 = vmatpush2.msra.mxu0 %v11246_v44  ;;  %3148 = vmatpush2.msra.mxu1 %v9074_v22  ;;  %v9086_v28 = vld [vmem:[#allocation5 + $0x418] sm:$0xff]  ;;  %v11254_v44 = vld [vmem:[#allocation108_spill] sm:$0xff]  ;;  %v9090_v22 = vld [vmem:[#allocation5 + $0x410] sm:$0xff] }
 0x736   :  { %3078 = vmatprep.subr.mxu0 %v11248_v46  ;;  %3149 = vmatprep.subr.mxu1 %v9078_v27  ;;  %11253 = vst [vmem:[#allocation146_spill] sm:$0xff] %v9086_v28  ;;  %11255 = vst [vmem:[#allocation162_spill] sm:$0xff] %v9090_v22  ;;  %v9093_v46 = vld [vmem:[#allocation5 + $0x3e8] sm:$0xff] }
 0x737   :  { %3079 = vmatpush2.msra.mxu0 %v11250_v29  ;;  %3150 = vmatpush2.msra.mxu1 %v9082_v56  ;;  %11256 = vst [vmem:[#allocation163_spill] sm:$0xff] %v9093_v46  ;;  %v9096_v29 = vld [vmem:[#allocation5 + $0x3f8] sm:$0xff] }
 0x738   :  { %3080 = vmatprep.subr.mxu0 %v11252_v13  ;;  %3151 = vmatprep.subr.mxu1 %v9086_v28  ;;  %11257 = vst [vmem:[#allocation175_spill] sm:$0xff] %v9096_v29  ;;  %v11258_v13 = vld [vmem:[#allocation97_spill] sm:$0xff]  ;;  %v11259_v28 = vld [vmem:[#allocation103_spill] sm:$0xff] }
 0x739   :  { %3081 = vmatpush2.msra.mxu0 %v11254_v44  ;;  %3152 = vmatpush2.msra.mxu1 %v9090_v22  ;;  %v11260_v22 = vld [vmem:[#allocation150_spill] sm:$0xff] }
 0x73a   :  { %3160 = vmatprep.subr.mxu0 %v9093_v46  ;;  %3231 = vmatprep.subr.mxu1 %v9096_v29 }
 0x778   :  { %v2736_v56 = vpop.f32.mrf.mxu0  ;;  %v2807_v43 = vpop.f32.mrf.mxu1 }
 0x779   :  { %v2962_v27 = vadd.f32 %v2736_v56, %v11258_v13  ;;  %v2964_v63 = vadd.f32 %v2807_v43, %v11260_v22 }
 0x77a   :  { %v2738_v58 = vpop.f32.mrf.mxu0  ;;  %v2809_v43 = vpop.f32.mrf.mxu1 }
 0x77b   :  { %v4024_v7 = vmul.f32 -1.442695, %v2962_v27  ;;  %v2963_v33 = vadd.f32 %v2738_v58, %v11259_v28 }
 0x77d   :  { %4253 = vpow2.f32 %v4024_v7  ;;  %v4026_v44 = vmul.f32 -1.442695, %v2963_v33  ;;  %v11261_v7 = vld [vmem:[#allocation156_spill] sm:$0xff] }
 0x77f   :  { %4255 = vpow2.f32 %v4026_v44 }
 0x780   :  { %4257 = vtanh.f32 %v2964_v63 }
 0x78a   :  { %v4254_v40 = vpop.eup %4253 }
 0x78b   :  { %v2976_v35 = vadd.f32 1.0, %v4254_v40  ;;  %v11262_v40 = vld [vmem:[#allocation158_spill] sm:$0xff] }
 0x78c   :  { %v4256_v46 = vpop.eup %4255 }
 0x78d   :  { %4259 = vrcp.f32 %v2976_v35  ;;  %v2988_v36 = vadd.f32 1.0, %v4256_v46  ;;  %v4258_v29 = vpop.eup %4257 }
 0x78f   :  { %4261 = vrcp.f32 %v2988_v36 }
 0x79a   :  { %v4260_v21 = vpop.eup %4259 }
 0x79b   :  { %v3010_v56 = vmul.f32 %v4260_v21, %v4258_v29  ;;  %v11263_v21 = vld [vmem:[#allocation171_spill] sm:$0xff] }
 0x79c   :  { %v4262_v13 = vpop.eup %4261  ;;  %v578_v46 = vadd.f32 %v11263_v21, %v6401_v55 }
 0x79d   :  { %v3008_v27 = vmul.f32 %v4262_v13, %v8565_v49  ;;  %v11264_v49 = vld [vmem:[#allocation170_spill] sm:$0xff]  ;;  %v11265_v13 = vld [vmem:[#allocation151_spill] sm:$0xff] }
 0x79f   :  { %v9103_v58 = vadd.f32 %v3010_v56, %v3008_v27  ;;  %v576_v56 = vadd.f32 %v11264_v49, %v6398_v17  ;;  %v2965_v27 = vadd.f32 %v2809_v43, %v11265_v13 }
 0x7b9   :  { %v2878_v33 = vpop.f32.mrf.mxu0  ;;  %v2949_v35 = vpop.f32.mrf.mxu1 }
 0x7ba   :  { %v2966_v28 = vadd.f32 %v2878_v33, %v11261_v7  ;;  %v2968_v33 = vadd.f32 %v2949_v35, %v576_v56 }
 0x7bb   :  { %v2880_v44 = vpop.f32.mrf.mxu0  ;;  %v2951_v36 = vpop.f32.mrf.mxu1 }
 0x7bc   :  { %v4025_v22 = vmul.f32 -1.442695, %v2966_v28  ;;  %v2967_v12 = vadd.f32 %v2880_v44, %v11262_v40  ;;  %v2969_v29 = vadd.f32 %v2951_v36, %v578_v46  ;;  %v4028_v28 = vmul.f32 -1.442695, %v2965_v27 }
 0x7be   :  { %4263 = vpow2.f32 %v4025_v22  ;;  %v4027_v63 = vmul.f32 -1.442695, %v2967_v12  ;;  %v4029_v7 = vmul.f32 -1.442695, %v2969_v29 }
 0x7c0   :  { %4265 = vpow2.f32 %v4027_v63 }
 0x7c1   :  { %4267 = vtanh.f32 %v2968_v33 }
 0x7c2   :  { %4269 = vpow2.f32 %v4029_v7  ;;  %v9266_v7 = vld [vmem:[#allocation5 + $0x6f0] sm:$0xff] }
 0x7cb   :  { %v4264_v62 = vpop.eup %4263 }
 0x7cc   :  { %v2977_v34 = vadd.f32 1.0, %v4264_v62 }
 0x7cd   :  { %v4266_v44 = vpop.eup %4265 }
 0x7ce   :  { %4271 = vrcp.f32 %v2977_v34  ;;  %v2989_v12 = vadd.f32 1.0, %v4266_v44  ;;  %v4268_v22 = vpop.eup %4267  ;;  %v9270_v44 = vld [vmem:[#allocation5 + $0x6b8] sm:$0xff] }
 0x7cf   :  { %4273 = vpow2.f32 %v4028_v28  ;;  %v4270_v40 = vpop.eup %4269  ;;  %v11280_v28 = vld [vmem:[#allocation141_spill] sm:$0xff] }
 0x7d0   :  { %4275 = vrcp.f32 %v2989_v12  ;;  %v3003_v49 = vadd.f32 1.0, %v4270_v40  ;;  %v11281_v12 = vld [vmem:[#allocation143_spill] sm:$0xff] }
 0x7d1   :  { %4277 = vtanh.f32 %v9103_v58  ;;  %v11282_v40 = vld [vmem:[#allocation11_spill] sm:$0xff] }
 0x7d2   :  { %4279 = vrcp.f32 %v3003_v49  ;;  %v9286_v49 = vld [vmem:[#allocation5 + $0x638] sm:$0xff] }
 0x7db   :  { %v4272_v63 = vpop.eup %4271 }
 0x7dc   :  { %v4274_v36 = vpop.eup %4273  ;;  %v3011_v21 = vmul.f32 %v4272_v63, %v4268_v22  ;;  %v9274_v22 = vld [vmem:[#allocation5 + $0x6b0] sm:$0xff]  ;;  %v9278_v63 = vld [vmem:[#allocation5 + $0x678] sm:$0xff] }
 0x7dd   :  { %v4276_v46 = vpop.eup %4275  ;;  %v3002_v35 = vadd.f32 1.0, %v4274_v36  ;;  %v11283_v36 = vld [vmem:[#allocation12_spill] sm:$0xff] }
 0x7de   :  { %v3009_v43 = vmul.f32 %v4276_v46, %v8576_v6  ;;  %v4278_v34 = vpop.eup %4277  ;;  %v11268_v6 = vld [vmem:[#allocation118_spill] sm:$0xff]  ;;  %v11284_v46 = vld [vmem:[#allocation13_spill] sm:$0xff] }
 0x7df   :  { %v4280_v29 = vpop.eup %4279 }
 0x7e0   :  { %v9114_v62 = vadd.f32 %v3011_v21, %v3009_v43  ;;  %v9282_v21 = vld [vmem:[#allocation5 + $0x670] sm:$0xff]  ;;  %v11285_v43 = vld [vmem:[#allocation14_spill] sm:$0xff] }
 0x7e2   :  { %4281 = vtanh.f32 %v9114_v62 }
 0x7e3   :  { %4283 = vrcp.f32 %v3002_v35  ;;  %v9290_v35 = vld [vmem:[#allocation5 + $0x630] sm:$0xff] }
 0x7ef   :  { %v4282_v56 = vpop.eup %4281 }
 0x7f0   :  { %v4284_v13 = vpop.eup %4283  ;;  %v9117_v27 = vmul.f32 %v4282_v56, %v4280_v29  ;;  %v9294_v29 = vld [vmem:[#allocation5 + $0x5f8] sm:$0xff]  ;;  %v11287_v56 = vld [vmem:[#allocation16_spill] sm:$0xff] }
 0x7f1   :  { %v9119_v33 = vmul.f32 %v4284_v13, %v4278_v34  ;;  %v11286_v34 = vld [vmem:[#allocation15_spill] sm:$0xff]  ;;  %v9298_v13 = vld [vmem:[#allocation5 + $0x5f0] sm:$0xff] }
 0x7f2   :  { %11266 = vst [vmem:[#allocation174_spill] sm:$0xff] %v9117_v27  ;;  %3082 = vmatprep.mubr.f32.mxu0 %v9117_v27  ;;  %3153 = vmatprep.mubr.f32.mxu1 %v9117_v27 }
 0x7f3   :  { %11267 = vst [vmem:[#allocation147_spill] sm:$0xff] %v9119_v33  ;;  %3083 = vmatmul.mubr.f32.vlgmr.msra.gmra.mxu0 %v9119_v33  ;;  %3154 = vmatmul.mubr.f32.vlgmr.msra.gmra.mxu1 %v9119_v33 }
 0x7f4   :  { %3161 = vmatpush1.msra.mxu0 %v8587_v14  ;;  %3232 = vmatpush1.msra.mxu1 %v8590_v20  ;;  %v11269_v14 = vld [vmem:[#allocation120_spill] sm:$0xff] }
 0x7f5   :  { %3162 = vmatprep.subr.mxu0 %v8593_v26  ;;  %3224 = vmatprep.mubr.f32.mxu0 %v9117_v27  ;;  %v11270_v20 = vld [vmem:[#allocation124_spill] sm:$0xff]  ;;  %v11271_v26 = vld [vmem:[#allocation126_spill] sm:$0xff] }
 0x7f6   :  { %3233 = vmatprep.subr.mxu1 %v8597_v0  ;;  %3295 = vmatprep.mubr.f32.mxu1 %v9117_v27  ;;  %v11272_v0 = vld [vmem:[#allocation130_spill] sm:$0xff] }
 0x7f7   :  { %3163 = vmatpush1.msra.mxu0 %v8601_v25  ;;  %3234 = vmatpush1.msra.mxu1 %v8604_v8  ;;  %v11273_v25 = vld [vmem:[#allocation132_spill] sm:$0xff]  ;;  %v11274_v8 = vld [vmem:[#allocation134_spill] sm:$0xff] }
 0x7f8   :  { %3164 = vmatprep.subr.mxu0 %v8607_v32  ;;  %3235 = vmatprep.subr.mxu1 %v8610_v50  ;;  %v11275_v32 = vld [vmem:[#allocation137_spill] sm:$0xff]  ;;  %v9150_v50 = vld [vmem:[#allocation5 + $0x278] sm:$0xff] }
 0x7f9   :  { %3165 = vmatpush1.msra.mxu0 %v8613_v59  ;;  %3236 = vmatpush1.msra.mxu1 %v8616_v11  ;;  %v9154_v59 = vld [vmem:[#allocation5 + $0x270] sm:$0xff]  ;;  %v5148_v27 = vld [vmem:[#allocation5 + $0x398] sm:$0xff] }
 0x7fa   :  { %3166 = vmatprep.subr.mxu0 %v8619_v41  ;;  %3237 = vmatprep.subr.mxu1 %v8622_v16  ;;  %v9162_v11 = vld [vmem:[#allocation5 + $0x230] sm:$0xff]  ;;  %v9166_v41 = vld [vmem:[#allocation5 + $0x1f8] sm:$0xff] }
 0x7fb   :  { %3167 = vmatpush1.msra.mxu0 %v8625_v51  ;;  %3238 = vmatpush1.msra.mxu1 %v11268_v6  ;;  %v9170_v16 = vld [vmem:[#allocation5 + $0x1f0] sm:$0xff]  ;;  %v9174_v51 = vld [vmem:[#allocation5 + $0x1b8] sm:$0xff] }
 0x7fc   :  { %3168 = vmatprep.subr.mxu0 %v11269_v14  ;;  %3239 = vmatprep.subr.mxu1 %v11270_v20  ;;  %v11288_v6 = vld [vmem:[#allocation17_spill] sm:$0xff]  ;;  %v9302_v14 = vld [vmem:[#allocation5 + $0x5b8] sm:$0xff] }
 0x7fd   :  { %3169 = vmatpush1.msra.mxu0 %v11271_v26  ;;  %3240 = vmatpush1.msra.mxu1 %v11272_v0  ;;  %v11289_v20 = vld [vmem:[#allocation18_spill] sm:$0xff]  ;;  %v9306_v26 = vld [vmem:[#allocation5 + $0x5b0] sm:$0xff]  ;;  %v11290_v0 = vld [vmem:[#allocation19_spill] sm:$0xff] }
 0x7fe   :  { %3170 = vmatprep.subr.mxu0 %v8643_v30  ;;  %3241 = vmatprep.subr.mxu1 %v11273_v25  ;;  %v9158_v30 = vld [vmem:[#allocation5 + $0x238] sm:$0xff] }
 0x7ff   :  { %3171 = vmatpush1.msra.mxu0 %v11274_v8  ;;  %3242 = vmatpush1.msra.mxu1 %v8652_v2  ;;  %v9186_v2 = vld [vmem:[#allocation5 + $0x170] sm:$0xff]  ;;  %v9310_v25 = vld [vmem:[#allocation5 + $0x578] sm:$0xff]  ;;  %v11292_v8 = vld [vmem:[#allocation20_spill] sm:$0xff] }
 0x800   :  { %3172 = vmatprep.subr.mxu0 %v11275_v32  ;;  %3243 = vmatprep.subr.mxu1 %v9150_v50  ;;  %11291 = vst [vmem:[#allocation107_spill] sm:$0xff] %v9310_v25  ;;  %v9314_v32 = vld [vmem:[#allocation5 + $0x570] sm:$0xff] }
 0x801   :  { %3173 = vmatpush1.msra.mxu0 %v8659_v9  ;;  %3244 = vmatpush1.msra.mxu1 %v9154_v59  ;;  %v9194_v9 = vld [vmem:[#allocation5 + $0x130] sm:$0xff]  ;;  %11293 = vst [vmem:[#allocation48_spill] sm:$0xff] %v9314_v32 }
 0x802   :  { %3174 = vmatprep.subr.mxu0 %v8663_v37  ;;  %3245 = vmatprep.subr.mxu1 %v9158_v30  ;;  %v9178_v37 = vld [vmem:[#allocation5 + $0x1b0] sm:$0xff] }
 0x803   :  { %3175 = vmatpush1.msra.mxu0 %v8667_v61  ;;  %3246 = vmatpush1.msra.mxu1 %v9162_v11  ;;  %v9182_v61 = vld [vmem:[#allocation5 + $0x178] sm:$0xff] }
 0x804   :  { %3176 = vmatprep.subr.mxu0 %v8671_v5  ;;  %3247 = vmatprep.subr.mxu1 %v9166_v41  ;;  %v9190_v5 = vld [vmem:[#allocation5 + $0x138] sm:$0xff] }
 0x805   :  { %3177 = vmatpush1.msra.mxu0 %v8675_v24  ;;  %3248 = vmatpush1.msra.mxu1 %v9170_v16  ;;  %v9198_v24 = vld [vmem:[#allocation5 + $0xf8] sm:$0xff] }
 0x806   :  { %3178 = vmatprep.subr.mxu0 %v8679_v60  ;;  %3249 = vmatprep.subr.mxu1 %v9174_v51  ;;  %v9202_v60 = vld [vmem:[#allocation5 + $0xf0] sm:$0xff] }
 0x807   :  { %3179 = vmatpush1.msra.mxu0 %v8683_v3  ;;  %3250 = vmatpush1.msra.mxu1 %v9178_v37  ;;  %v9206_v3 = vld [vmem:[#allocation5 + $0xb8] sm:$0xff] }
 0x808   :  { %3180 = vmatprep.subr.mxu0 %v8687_v15  ;;  %3251 = vmatprep.subr.mxu1 %v9182_v61  ;;  %v9210_v15 = vld [vmem:[#allocation5 + $0xb0] sm:$0xff] }
 0x809   :  { %3181 = vmatpush1.msra.mxu0 %v8691_v54  ;;  %3252 = vmatpush1.msra.mxu1 %v9186_v2  ;;  %v9214_v54 = vld [vmem:[#allocation5 + $0x78] sm:$0xff] }
 0x80a   :  { %3182 = vmatprep.subr.mxu0 %v8695_v52  ;;  %3253 = vmatprep.subr.mxu1 %v9190_v5  ;;  %v9218_v52 = vld [vmem:[#allocation5 + $0x70] sm:$0xff] }
 0x80b   :  { %3183 = vmatpush1.msra.mxu0 %v8699_v31  ;;  %3254 = vmatpush1.msra.mxu1 %v9194_v9  ;;  %v9222_v31 = vld [vmem:[#allocation5 + $0x38] sm:$0xff] }
 0x80c   :  { %3184 = vmatprep.subr.mxu0 %v8703_v18  ;;  %3255 = vmatprep.subr.mxu1 %v9198_v24  ;;  %v9226_v18 = vld [vmem:[#allocation5 + $0x30] sm:$0xff] }
 0x80d   :  { %3185 = vmatpush1.msra.mxu0 %v8707_v39  ;;  %3256 = vmatpush1.msra.mxu1 %v9202_v60  ;;  %v9230_v39 = vld [vmem:[#allocation5 + $0x7f8] sm:$0xff] }
 0x80e   :  { %3186 = vmatprep.subr.mxu0 %v8711_v1  ;;  %3257 = vmatprep.subr.mxu1 %v9206_v3  ;;  %v9234_v1 = vld [vmem:[#allocation5 + $0x7f0] sm:$0xff] }
 0x80f   :  { %3187 = vmatpush1.msra.mxu0 %v8715_v10  ;;  %3258 = vmatpush1.msra.mxu1 %v9210_v15  ;;  %v9238_v10 = vld [vmem:[#allocation5 + $0x7b8] sm:$0xff] }
 0x810   :  { %3188 = vmatprep.subr.mxu0 %v8719_v57  ;;  %3259 = vmatprep.subr.mxu1 %v9214_v54  ;;  %v9242_v57 = vld [vmem:[#allocation5 + $0x7b0] sm:$0xff] }
 0x811   :  { %3189 = vmatpush1.msra.mxu0 %v8723_v38  ;;  %3260 = vmatpush1.msra.mxu1 %v9218_v52  ;;  %v9246_v38 = vld [vmem:[#allocation5 + $0x778] sm:$0xff] }
 0x812   :  { %3190 = vmatprep.subr.mxu0 %v8727_v45  ;;  %3261 = vmatprep.subr.mxu1 %v9222_v31  ;;  %v9250_v45 = vld [vmem:[#allocation5 + $0x770] sm:$0xff] }
 0x813   :  { %3191 = vmatpush1.msra.mxu0 %v8731_v47  ;;  %3262 = vmatpush1.msra.mxu1 %v9226_v18  ;;  %v11276_v47 = vld [vmem:[#allocation139_spill] sm:$0xff] }
 0x814   :  { %3192 = vmatprep.subr.mxu0 %v8735_v42  ;;  %3263 = vmatprep.subr.mxu1 %v9230_v39  ;;  %v9254_v42 = vld [vmem:[#allocation5 + $0x738] sm:$0xff] }
 0x815   :  { %3193 = vmatpush2.msra.mxu0 %v8739_v4  ;;  %3264 = vmatpush2.msra.mxu1 %v9234_v1  ;;  %v11277_v4 = vld [vmem:[#allocation142_spill] sm:$0xff] }
 0x816   :  { %3194 = vmatprep.subr.mxu0 %v8743_v48  ;;  %3265 = vmatprep.subr.mxu1 %v9238_v10  ;;  %v9258_v48 = vld [vmem:[#allocation5 + $0x730] sm:$0xff] }
 0x817   :  { %3195 = vmatpush2.msra.mxu0 %v8747_v19  ;;  %3266 = vmatpush2.msra.mxu1 %v9242_v57  ;;  %v11278_v19 = vld [vmem:[#allocation98_spill] sm:$0xff] }
 0x818   :  { %3196 = vmatprep.subr.mxu0 %v8751_v23  ;;  %3267 = vmatprep.subr.mxu1 %v9246_v38  ;;  %v9262_v23 = vld [vmem:[#allocation5 + $0x6f8] sm:$0xff] }
 0x819   :  { %3197 = vmatpush2.msra.mxu0 %v8755_v53  ;;  %3268 = vmatpush2.msra.mxu1 %v9250_v45  ;;  %v11279_v53 = vld [vmem:[#allocation104_spill] sm:$0xff] }
 0x81a   :  { %3198 = vmatprep.subr.mxu0 %v11276_v47  ;;  %3269 = vmatprep.subr.mxu1 %v9254_v42  ;;  %v11294_v47 = vld [vmem:[#allocation21_spill] sm:$0xff] }
 0x81b   :  { %3199 = vmatpush2.msra.mxu0 %v11277_v4  ;;  %3270 = vmatpush2.msra.mxu1 %v9258_v48  ;;  %v9318_v4 = vld [vmem:[#allocation5 + $0x538] sm:$0xff] }
 0x81c   :  { %3200 = vmatprep.subr.mxu0 %v11278_v19  ;;  %3271 = vmatprep.subr.mxu1 %v9262_v23  ;;  %11295 = vst [vmem:[#allocation111_spill] sm:$0xff] %v9318_v4  ;;  %v11296_v19 = vld [vmem:[#allocation22_spill] sm:$0xff] }
 0x81d   :  { %3201 = vmatpush2.msra.mxu0 %v11279_v53  ;;  %3272 = vmatpush2.msra.mxu1 %v9266_v7  ;;  %v9322_v53 = vld [vmem:[#allocation5 + $0x530] sm:$0xff] }
 0x81e   :  { %3202 = vmatprep.subr.mxu0 %v11280_v28  ;;  %3273 = vmatprep.subr.mxu1 %v9270_v44  ;;  %11297 = vst [vmem:[#allocation50_spill] sm:$0xff] %v9322_v53  ;;  %v11298_v28 = vld [vmem:[#allocation23_spill] sm:$0xff] }
 0x81f   :  { %3203 = vmatpush2.msra.mxu0 %v11281_v12  ;;  %3274 = vmatpush2.msra.mxu1 %v9274_v22  ;;  %v9326_v12 = vld [vmem:[#allocation5 + $0x4f8] sm:$0xff] }
 0x820   :  { %3204 = vmatprep.subr.mxu0 %v11282_v40  ;;  %3275 = vmatprep.subr.mxu1 %v9278_v63  ;;  %11299 = vst [vmem:[#allocation113_spill] sm:$0xff] %v9326_v12  ;;  %v11300_v40 = vld [vmem:[#allocation24_spill] sm:$0xff] }
 0x821   :  { %3205 = vmatpush2.msra.mxu0 %v11283_v36  ;;  %3276 = vmatpush2.msra.mxu1 %v9282_v21  ;;  %v9330_v36 = vld [vmem:[#allocation5 + $0x4f0] sm:$0xff] }
 0x822   :  { %3206 = vmatprep.subr.mxu0 %v11284_v46  ;;  %3277 = vmatprep.subr.mxu1 %v9286_v49  ;;  %11301 = vst [vmem:[#allocation52_spill] sm:$0xff] %v9330_v36  ;;  %v11302_v46 = vld [vmem:[#allocation25_spill] sm:$0xff] }
 0x823   :  { %3207 = vmatpush2.msra.mxu0 %v11285_v43  ;;  %3278 = vmatpush2.msra.mxu1 %v9290_v35  ;;  %v9334_v43 = vld [vmem:[#allocation5 + $0x4b8] sm:$0xff] }
 0x824   :  { %3208 = vmatprep.subr.mxu0 %v11286_v34  ;;  %3279 = vmatprep.subr.mxu1 %v9294_v29  ;;  %11303 = vst [vmem:[#allocation117_spill] sm:$0xff] %v9334_v43  ;;  %v11304_v34 = vld [vmem:[#allocation26_spill] sm:$0xff] }
 0x825   :  { %3209 = vmatpush2.msra.mxu0 %v11287_v56  ;;  %3280 = vmatpush2.msra.mxu1 %v9298_v13  ;;  %v9338_v56 = vld [vmem:[#allocation5 + $0x4b0] sm:$0xff] }
 0x826   :  { %3210 = vmatprep.subr.mxu0 %v11288_v6  ;;  %3281 = vmatprep.subr.mxu1 %v9302_v14  ;;  %11305 = vst [vmem:[#allocation54_spill] sm:$0xff] %v9338_v56  ;;  %v11306_v6 = vld [vmem:[#allocation27_spill] sm:$0xff] }
 0x827   :  { %3211 = vmatpush2.msra.mxu0 %v11289_v20  ;;  %3282 = vmatpush2.msra.mxu1 %v9306_v26  ;;  %v9342_v20 = vld [vmem:[#allocation5 + $0x478] sm:$0xff] }
 0x828   :  { %3212 = vmatprep.subr.mxu0 %v11290_v0  ;;  %3283 = vmatprep.subr.mxu1 %v9310_v25  ;;  %11307 = vst [vmem:[#allocation119_spill] sm:$0xff] %v9342_v20  ;;  %v11308_v0 = vld [vmem:[#allocation28_spill] sm:$0xff] }
 0x829   :  { %3213 = vmatpush2.msra.mxu0 %v11292_v8  ;;  %3284 = vmatpush2.msra.mxu1 %v9314_v32  ;;  %v9346_v8 = vld [vmem:[#allocation5 + $0x470] sm:$0xff] }
 0x82a   :  { %3214 = vmatprep.subr.mxu0 %v11294_v47  ;;  %3285 = vmatprep.subr.mxu1 %v9318_v4  ;;  %11309 = vst [vmem:[#allocation56_spill] sm:$0xff] %v9346_v8  ;;  %v11310_v47 = vld [vmem:[#allocation29_spill] sm:$0xff] }
 0x82b   :  { %3215 = vmatpush2.msra.mxu0 %v11296_v19  ;;  %3286 = vmatpush2.msra.mxu1 %v9322_v53  ;;  %v9350_v19 = vld [vmem:[#allocation5 + $0x438] sm:$0xff] }
 0x82c   :  { %3216 = vmatprep.subr.mxu0 %v11298_v28  ;;  %3287 = vmatprep.subr.mxu1 %v9326_v12  ;;  %11311 = vst [vmem:[#allocation123_spill] sm:$0xff] %v9350_v19  ;;  %v11312_v28 = vld [vmem:[#allocation30_spill] sm:$0xff] }
 0x82d   :  { %3217 = vmatpush2.msra.mxu0 %v11300_v40  ;;  %3288 = vmatpush2.msra.mxu1 %v9330_v36  ;;  %v9354_v40 = vld [vmem:[#allocation5 + $0x430] sm:$0xff] }
 0x82e   :  { %3218 = vmatprep.subr.mxu0 %v11302_v46  ;;  %3289 = vmatprep.subr.mxu1 %v9334_v43  ;;  %11313 = vst [vmem:[#allocation58_spill] sm:$0xff] %v9354_v40  ;;  %v11314_v46 = vld [vmem:[#allocation31_spill] sm:$0xff] }
 0x82f   :  { %3219 = vmatpush2.msra.mxu0 %v11304_v34  ;;  %3290 = vmatpush2.msra.mxu1 %v9338_v56  ;;  %v5146_v34 = vld [vmem:[#allocation5 + $0x3d8] sm:$0xff] }
 0x830   :  { %3220 = vmatprep.subr.mxu0 %v11306_v6  ;;  %3291 = vmatprep.subr.mxu1 %v9342_v20  ;;  %v11315_v6 = vld [vmem:[#allocation32_spill] sm:$0xff] }
 0x831   :  { %3221 = vmatpush2.msra.mxu0 %v11308_v0  ;;  %3292 = vmatpush2.msra.mxu1 %v9346_v8  ;;  %v5147_v0 = vld [vmem:[#allocation5 + $0x3d0] sm:$0xff]  ;;  %v5150_v8 = vld [vmem:[#allocation5 + $0x358] sm:$0xff] }
 0x832   :  { %3222 = vmatprep.subr.mxu0 %v11310_v47  ;;  %3293 = vmatprep.subr.mxu1 %v9350_v19  ;;  %v11316_v47 = vld [vmem:[#allocation33_spill] sm:$0xff] }
 0x833   :  { %3223 = vmatpush2.msra.mxu0 %v11312_v28  ;;  %3294 = vmatpush2.msra.mxu1 %v9354_v40  ;;  %v11317_v28 = vld [vmem:[#allocation87_spill] sm:$0xff]  ;;  %v5149_v19 = vld [vmem:[#allocation5 + $0x390] sm:$0xff]  ;;  %v11318_v40 = vld [vmem:[#allocation92_spill] sm:$0xff] }
 0x834   :  { %3225 = vmatmul.mubr.f32.vlgmr.msra.gmra.mxu0 %v9119_v33  ;;  %3296 = vmatmul.mubr.f32.vlgmr.msra.gmra.mxu1 %v9119_v33  ;;  %v11319_v33 = vld [vmem:[#allocation148_spill] sm:$0xff] }
 0x835   :  { %3366 = vmatprep.subr.mxu0 %v11314_v46  ;;  %3437 = vmatprep.subr.mxu1 %v5146_v34  ;;  %v5151_v46 = vld [vmem:[#allocation5 + $0x350] sm:$0xff]  ;;  %v11320_v34 = vld [vmem:[#allocation160_spill] sm:$0xff] }
 0x836   :  { %3367 = vmatpush1.msra.mxu0 %v11315_v6  ;;  %3438 = vmatpush1.msra.mxu1 %v5147_v0  ;;  %v5152_v6 = vld [vmem:[#allocation5 + $0x318] sm:$0xff]  ;;  %v11321_v0 = vld [vmem:[#allocation161_spill] sm:$0xff] }
 0x837   :  { %3368 = vmatprep.subr.mxu0 %v11316_v47  ;;  %3439 = vmatprep.subr.mxu1 %v5148_v27  ;;  %v5153_v47 = vld [vmem:[#allocation5 + $0x310] sm:$0xff] }
 0x838   :  { %3369 = vmatpush1.msra.mxu0 %v11317_v28  ;;  %3440 = vmatpush1.msra.mxu1 %v5149_v19  ;;  %v11322_v27 = vld [vmem:[#allocation173_spill] sm:$0xff]  ;;  %v5154_v28 = vld [vmem:[#allocation5 + $0x2d8] sm:$0xff]  ;;  %v11323_v19 = vld [vmem:[#allocation172_spill] sm:$0xff] }
 0x839   :  { %3370 = vmatprep.subr.mxu0 %v11318_v40  ;;  %3441 = vmatprep.subr.mxu1 %v5150_v8  ;;  %v5155_v40 = vld [vmem:[#allocation5 + $0x2d0] sm:$0xff]  ;;  %v5156_v8 = vld [vmem:[#allocation5 + $0x288] sm:$0xff] }
 0x83a   :  { %3371 = vmatpush1.msra.mxu0 %v11319_v33  ;;  %3442 = vmatpush1.msra.mxu1 %v5151_v46  ;;  %v5157_v33 = vld [vmem:[#allocation5 + $0x298] sm:$0xff]  ;;  %v5158_v46 = vld [vmem:[#allocation5 + $0x280] sm:$0xff] }
 0x83b   :  { %3372 = vmatprep.subr.mxu0 %v11320_v34  ;;  %3443 = vmatprep.subr.mxu1 %v5152_v6  ;;  %v5159_v34 = vld [vmem:[#allocation5 + $0x290] sm:$0xff]  ;;  %v5160_v6 = vld [vmem:[#allocation5 + $0x248] sm:$0xff] }
 0x83c   :  { %3373 = vmatpush1.msra.mxu0 %v11321_v0  ;;  %3444 = vmatpush1.msra.mxu1 %v5153_v47  ;;  %v5161_v0 = vld [vmem:[#allocation5 + $0x258] sm:$0xff]  ;;  %v5162_v47 = vld [vmem:[#allocation5 + $0x240] sm:$0xff] }
 0x83d   :  { %3374 = vmatprep.subr.mxu0 %v11322_v27  ;;  %3445 = vmatprep.subr.mxu1 %v5154_v28  ;;  %v5163_v27 = vld [vmem:[#allocation5 + $0x250] sm:$0xff]  ;;  %v5164_v28 = vld [vmem:[#allocation5 + $0x208] sm:$0xff] }
 0x83e   :  { %3375 = vmatpush1.msra.mxu0 %v11323_v19  ;;  %3446 = vmatpush1.msra.mxu1 %v5155_v40  ;;  %v5165_v19 = vld [vmem:[#allocation5 + $0x218] sm:$0xff]  ;;  %v5166_v40 = vld [vmem:[#allocation5 + $0x200] sm:$0xff] }
 0x83f   :  { %3376 = vmatprep.subr.mxu0 %v5156_v8  ;;  %3447 = vmatprep.subr.mxu1 %v5157_v33  ;;  %v5167_v8 = vld [vmem:[#allocation5 + $0x210] sm:$0xff]  ;;  %v5168_v33 = vld [vmem:[#allocation5 + $0x1c8] sm:$0xff] }
 0x840   :  { %3377 = vmatpush1.msra.mxu0 %v5158_v46  ;;  %3448 = vmatpush1.msra.mxu1 %v5159_v34  ;;  %v5169_v46 = vld [vmem:[#allocation5 + $0x1d8] sm:$0xff]  ;;  %v5170_v34 = vld [vmem:[#allocation5 + $0x1c0] sm:$0xff] }
 0x841   :  { %3378 = vmatprep.subr.mxu0 %v5160_v6  ;;  %3449 = vmatprep.subr.mxu1 %v5161_v0  ;;  %v5171_v6 = vld [vmem:[#allocation5 + $0x1d0] sm:$0xff]  ;;  %v5172_v0 = vld [vmem:[#allocation5 + $0x188] sm:$0xff] }
 0x842   :  { %3379 = vmatpush1.msra.mxu0 %v5162_v47  ;;  %3450 = vmatpush1.msra.mxu1 %v5163_v27  ;;  %v5173_v47 = vld [vmem:[#allocation5 + $0x198] sm:$0xff]  ;;  %v5174_v27 = vld [vmem:[#allocation5 + $0x180] sm:$0xff] }
 0x843   :  { %3380 = vmatprep.subr.mxu0 %v5164_v28  ;;  %3451 = vmatprep.subr.mxu1 %v5165_v19  ;;  %v5175_v28 = vld [vmem:[#allocation5 + $0x190] sm:$0xff]  ;;  %v5176_v19 = vld [vmem:[#allocation5 + $0x148] sm:$0xff] }
 0x844   :  { %3381 = vmatpush1.msra.mxu0 %v5166_v40  ;;  %3452 = vmatpush1.msra.mxu1 %v5167_v8  ;;  %v5177_v40 = vld [vmem:[#allocation5 + $0x158] sm:$0xff]  ;;  %v5178_v8 = vld [vmem:[#allocation5 + $0x140] sm:$0xff] }
 0x845   :  { %3382 = vmatprep.subr.mxu0 %v5168_v33  ;;  %3453 = vmatprep.subr.mxu1 %v5169_v46  ;;  %v5179_v33 = vld [vmem:[#allocation5 + $0x150] sm:$0xff]  ;;  %v5180_v46 = vld [vmem:[#allocation5 + $0x108] sm:$0xff] }
 0x846   :  { %3383 = vmatpush1.msra.mxu0 %v5170_v34  ;;  %3454 = vmatpush1.msra.mxu1 %v5171_v6  ;;  %v5181_v34 = vld [vmem:[#allocation5 + $0x118] sm:$0xff]  ;;  %v5182_v6 = vld [vmem:[#allocation5 + $0x100] sm:$0xff] }
 0x847   :  { %3384 = vmatprep.subr.mxu0 %v5172_v0  ;;  %3455 = vmatprep.subr.mxu1 %v5173_v47  ;;  %v5183_v0 = vld [vmem:[#allocation5 + $0x110] sm:$0xff]  ;;  %v5184_v47 = vld [vmem:[#allocation5 + $0xc8] sm:$0xff] }
 0x848   :  { %3385 = vmatpush1.msra.mxu0 %v5174_v27  ;;  %3456 = vmatpush1.msra.mxu1 %v5175_v28  ;;  %v11324_v27 = vld [vmem:[#allocation149_spill] sm:$0xff]  ;;  %v5185_v28 = vld [vmem:[#allocation5 + $0xc0] sm:$0xff] }
 0x849   :  { %3386 = vmatprep.subr.mxu0 %v5176_v19  ;;  %3457 = vmatprep.subr.mxu1 %v5177_v40  ;;  %v11325_v19 = vld [vmem:[#allocation36_spill] sm:$0xff] }
 0x84a   :  { %3387 = vmatpush1.msra.mxu0 %v5178_v8  ;;  %3458 = vmatpush1.msra.mxu1 %v5179_v33  ;;  %v5186_v40 = vld [vmem:[#allocation5 + $0x88] sm:$0xff]  ;;  %v11326_v8 = vld [vmem:[#allocation37_spill] sm:$0xff]  ;;  %v5187_v33 = vld [vmem:[#allocation5 + $0x80] sm:$0xff] }
 0x84b   :  { %3388 = vmatprep.subr.mxu0 %v5180_v46  ;;  %3459 = vmatprep.subr.mxu1 %v5181_v34  ;;  %v11327_v46 = vld [vmem:[#allocation38_spill] sm:$0xff]  ;;  %v5188_v34 = vld [vmem:[#allocation5 + $0x48] sm:$0xff] }
 0x84c   :  { %3389 = vmatpush1.msra.mxu0 %v5182_v6  ;;  %3460 = vmatpush1.msra.mxu1 %v5183_v0  ;;  %v11328_v6 = vld [vmem:[#allocation39_spill] sm:$0xff] }
 0x84d   :  { %3390 = vmatprep.subr.mxu0 %v5184_v47  ;;  %3461 = vmatprep.subr.mxu1 %v11324_v27  ;;  %v5189_v0 = vld [vmem:[#allocation5 + $0x40] sm:$0xff]  ;;  %v11329_v47 = vld [vmem:[#allocation40_spill] sm:$0xff] }
 0x84e   :  { %3391 = vmatpush1.msra.mxu0 %v5185_v28  ;;  %3462 = vmatpush1.msra.mxu1 %v11325_v19  ;;  %v5190_v27 = vld [vmem:[#allocation5 + $0x8] sm:$0xff]  ;;  %v11330_v28 = vld [vmem:[#allocation41_spill] sm:$0xff]  ;;  %v5191_v19 = vld [vmem:[#allocation5] sm:$0xff] }
 0x84f   :  { %3392 = vmatprep.subr.mxu0 %v5186_v40  ;;  %3463 = vmatprep.subr.mxu1 %v11326_v8  ;;  %v11331_v40 = vld [vmem:[#allocation42_spill] sm:$0xff]  ;;  %v5192_v8 = vld [vmem:[#allocation5 + $0x7c8] sm:$0xff] }
 0x850   :  { %3393 = vmatpush1.msra.mxu0 %v5187_v33  ;;  %3464 = vmatpush1.msra.mxu1 %v11327_v46  ;;  %v11332_v33 = vld [vmem:[#allocation43_spill] sm:$0xff] }
 0x851   :  { %3394 = vmatprep.subr.mxu0 %v5188_v34  ;;  %3465 = vmatprep.subr.mxu1 %v11328_v6  ;;  %v5193_v46 = vld [vmem:[#allocation5 + $0x7c0] sm:$0xff]  ;;  %v11333_v34 = vld [vmem:[#allocation44_spill] sm:$0xff] }
 0x852   :  { %3395 = vmatpush1.msra.mxu0 %v5189_v0  ;;  %3466 = vmatpush1.msra.mxu1 %v11329_v47  ;;  %v5194_v6 = vld [vmem:[#allocation5 + $0x788] sm:$0xff]  ;;  %v11334_v0 = vld [vmem:[#allocation45_spill] sm:$0xff]  ;;  %v5195_v47 = vld [vmem:[#allocation5 + $0x780] sm:$0xff] }
 0x853   :  { %3396 = vmatprep.subr.mxu0 %v5190_v27  ;;  %3467 = vmatprep.subr.mxu1 %v11330_v28  ;;  %v11335_v27 = vld [vmem:[#allocation47_spill] sm:$0xff]  ;;  %v5196_v28 = vld [vmem:[#allocation5 + $0x748] sm:$0xff] }
 0x854   :  { %3397 = vmatpush1.msra.mxu0 %v5191_v19  ;;  %3468 = vmatpush1.msra.mxu1 %v11331_v40  ;;  %v11336_v19 = vld [vmem:[#allocation49_spill] sm:$0xff]  ;;  %v5197_v40 = vld [vmem:[#allocation5 + $0x740] sm:$0xff] }
 0x855   :  { %3398 = vmatprep.subr.mxu0 %v5192_v8  ;;  %3469 = vmatprep.subr.mxu1 %v11332_v33  ;;  %v11337_v8 = vld [vmem:[#allocation51_spill] sm:$0xff]  ;;  %v5198_v33 = vld [vmem:[#allocation5 + $0x708] sm:$0xff] }
 0x856   :  { %3399 = vmatpush2.msra.mxu0 %v5193_v46  ;;  %3470 = vmatpush2.msra.mxu1 %v11333_v34  ;;  %v11338_v46 = vld [vmem:[#allocation53_spill] sm:$0xff]  ;;  %v5199_v34 = vld [vmem:[#allocation5 + $0x700] sm:$0xff] }
 0x857   :  { %3400 = vmatprep.subr.mxu0 %v5194_v6  ;;  %3471 = vmatprep.subr.mxu1 %v11334_v0  ;;  %v11339_v6 = vld [vmem:[#allocation55_spill] sm:$0xff]  ;;  %v5200_v0 = vld [vmem:[#allocation5 + $0x6c8] sm:$0xff] }
 0x858   :  { %3401 = vmatpush2.msra.mxu0 %v5195_v47  ;;  %3472 = vmatpush2.msra.mxu1 %v11335_v27  ;;  %v11340_v47 = vld [vmem:[#allocation57_spill] sm:$0xff]  ;;  %v5201_v27 = vld [vmem:[#allocation5 + $0x6c0] sm:$0xff] }
 0x859   :  { %3402 = vmatprep.subr.mxu0 %v5196_v28  ;;  %3473 = vmatprep.subr.mxu1 %v11336_v19  ;;  %v11341_v28 = vld [vmem:[#allocation59_spill] sm:$0xff]  ;;  %v5202_v19 = vld [vmem:[#allocation5 + $0x688] sm:$0xff] }
 0x85a   :  { %3403 = vmatpush2.msra.mxu0 %v5197_v40  ;;  %3474 = vmatpush2.msra.mxu1 %v11337_v8  ;;  %v11342_v40 = vld [vmem:[#allocation61_spill] sm:$0xff]  ;;  %v5203_v8 = vld [vmem:[#allocation5 + $0x680] sm:$0xff] }
 0x85b   :  { %3404 = vmatprep.subr.mxu0 %v5198_v33  ;;  %3475 = vmatprep.subr.mxu1 %v11338_v46  ;;  %v11343_v33 = vld [vmem:[#allocation63_spill] sm:$0xff]  ;;  %v5204_v46 = vld [vmem:[#allocation5 + $0x648] sm:$0xff] }
 0x85c   :  { %3405 = vmatpush2.msra.mxu0 %v5199_v34  ;;  %3476 = vmatpush2.msra.mxu1 %v11339_v6  ;;  %v11344_v34 = vld [vmem:[#allocation65_spill] sm:$0xff]  ;;  %v5205_v6 = vld [vmem:[#allocation5 + $0x640] sm:$0xff] }
 0x85d   :  { %3406 = vmatprep.subr.mxu0 %v5200_v0  ;;  %3477 = vmatprep.subr.mxu1 %v11340_v47  ;;  %v11345_v0 = vld [vmem:[#allocation67_spill] sm:$0xff]  ;;  %v5206_v47 = vld [vmem:[#allocation5 + $0x608] sm:$0xff] }
 0x85e   :  { %3407 = vmatpush2.msra.mxu0 %v5201_v27  ;;  %3478 = vmatpush2.msra.mxu1 %v11341_v28  ;;  %v11346_v27 = vld [vmem:[#allocation69_spill] sm:$0xff]  ;;  %v5207_v28 = vld [vmem:[#allocation5 + $0x600] sm:$0xff] }
 0x85f   :  { %3408 = vmatprep.subr.mxu0 %v5202_v19  ;;  %3479 = vmatprep.subr.mxu1 %v11342_v40  ;;  %v11347_v19 = vld [vmem:[#allocation71_spill] sm:$0xff]  ;;  %v5208_v40 = vld [vmem:[#allocation5 + $0x5c8] sm:$0xff] }
 0x860   :  { %3409 = vmatpush2.msra.mxu0 %v5203_v8  ;;  %3480 = vmatpush2.msra.mxu1 %v11343_v33  ;;  %v11348_v8 = vld [vmem:[#allocation73_spill] sm:$0xff]  ;;  %v5209_v33 = vld [vmem:[#allocation5 + $0x5c0] sm:$0xff] }
 0x861   :  { %3410 = vmatprep.subr.mxu0 %v5204_v46  ;;  %3481 = vmatprep.subr.mxu1 %v11344_v34  ;;  %v11349_v46 = vld [vmem:[#allocation75_spill] sm:$0xff]  ;;  %v5210_v34 = vld [vmem:[#allocation5 + $0x588] sm:$0xff] }
 0x862   :  { %3411 = vmatpush2.msra.mxu0 %v5205_v6  ;;  %3482 = vmatpush2.msra.mxu1 %v11345_v0  ;;  %v11350_v6 = vld [vmem:[#allocation77_spill] sm:$0xff]  ;;  %v5211_v0 = vld [vmem:[#allocation5 + $0x580] sm:$0xff] }
 0x863   :  { %3412 = vmatprep.subr.mxu0 %v5206_v47  ;;  %3483 = vmatprep.subr.mxu1 %v11346_v27  ;;  %v11351_v47 = vld [vmem:[#allocation82_spill] sm:$0xff]  ;;  %v5212_v27 = vld [vmem:[#allocation5 + $0x548] sm:$0xff] }
 0x864   :  { %3413 = vmatpush2.msra.mxu0 %v5207_v28  ;;  %3484 = vmatpush2.msra.mxu1 %v11347_v19  ;;  %v11352_v28 = vld [vmem:[#allocation83_spill] sm:$0xff] }
 0x865   :  { %3414 = vmatprep.subr.mxu0 %v5208_v40  ;;  %3485 = vmatprep.subr.mxu1 %v11348_v8  ;;  %v5213_v19 = vld [vmem:[#allocation5 + $0x540] sm:$0xff]  ;;  %v11353_v40 = vld [vmem:[#allocation85_spill] sm:$0xff]  ;;  %v5214_v8 = vld [vmem:[#allocation5 + $0x508] sm:$0xff] }
 0x866   :  { %3415 = vmatpush2.msra.mxu0 %v5209_v33  ;;  %3486 = vmatpush2.msra.mxu1 %v11349_v46  ;;  %v11354_v33 = vld [vmem:[#allocation88_spill] sm:$0xff]  ;;  %v5215_v46 = vld [vmem:[#allocation5 + $0x500] sm:$0xff] }
 0x867   :  { %3416 = vmatprep.subr.mxu0 %v5210_v34  ;;  %3487 = vmatprep.subr.mxu1 %v11350_v6  ;;  %v11355_v34 = vld [vmem:[#allocation90_spill] sm:$0xff]  ;;  %v5216_v6 = vld [vmem:[#allocation5 + $0x4c8] sm:$0xff] }
 0x868   :  { %3417 = vmatpush2.msra.mxu0 %v5211_v0  ;;  %3488 = vmatpush2.msra.mxu1 %v11351_v47  ;;  %v11356_v0 = vld [vmem:[#allocation93_spill] sm:$0xff]  ;;  %v5217_v47 = vld [vmem:[#allocation5 + $0x4c0] sm:$0xff] }
 0x869   :  { %3418 = vmatprep.subr.mxu0 %v5212_v27  ;;  %3489 = vmatprep.subr.mxu1 %v11352_v28  ;;  %v11357_v27 = vld [vmem:[#allocation95_spill] sm:$0xff]  ;;  %v5218_v28 = vld [vmem:[#allocation5 + $0x488] sm:$0xff] }
 0x86a   :  { %3419 = vmatpush2.msra.mxu0 %v5213_v19  ;;  %3490 = vmatpush2.msra.mxu1 %v11353_v40  ;;  %v11358_v19 = vld [vmem:[#allocation99_spill] sm:$0xff] }
 0x86b   :  { %3420 = vmatprep.subr.mxu0 %v5214_v8  ;;  %3491 = vmatprep.subr.mxu1 %v11354_v33  ;;  %v5219_v40 = vld [vmem:[#allocation5 + $0x480] sm:$0xff]  ;;  %v11359_v8 = vld [vmem:[#allocation101_spill] sm:$0xff]  ;;  %v5220_v33 = vld [vmem:[#allocation5 + $0x448] sm:$0xff] }
 0x86c   :  { %3421 = vmatpush2.msra.mxu0 %v5215_v46  ;;  %3492 = vmatpush2.msra.mxu1 %v11355_v34  ;;  %v11360_v46 = vld [vmem:[#allocation122_spill] sm:$0xff]  ;;  %v5221_v34 = vld [vmem:[#allocation5 + $0x440] sm:$0xff] }
 0x86d   :  { %3422 = vmatprep.subr.mxu0 %v5216_v6  ;;  %3493 = vmatprep.subr.mxu1 %v11356_v0  ;;  %v11361_v6 = vld [vmem:[#allocation128_spill] sm:$0xff] }
 0x86e   :  { %3423 = vmatpush2.msra.mxu0 %v5217_v47  ;;  %3494 = vmatpush2.msra.mxu1 %v11357_v27  ;;  %v5222_v0 = vld [vmem:[#allocation5 + $0x408] sm:$0xff]  ;;  %v11362_v47 = vld [vmem:[#allocation146_spill] sm:$0xff]  ;;  %v5223_v27 = vld [vmem:[#allocation5 + $0x400] sm:$0xff] }
 0x86f   :  { %3424 = vmatprep.subr.mxu0 %v5218_v28  ;;  %3495 = vmatprep.subr.mxu1 %v11358_v19  ;;  %v11363_v28 = vld [vmem:[#allocation162_spill] sm:$0xff]  ;;  %v11364_v19 = vld [vmem:[#allocation163_spill] sm:$0xff] }
 0x870   :  { %3425 = vmatpush2.msra.mxu0 %v5219_v40  ;;  %3496 = vmatpush2.msra.mxu1 %v11359_v8  ;;  %v11365_v40 = vld [vmem:[#allocation175_spill] sm:$0xff] }
 0x871   :  { %3426 = vmatprep.subr.mxu0 %v5220_v33  ;;  %3497 = vmatprep.subr.mxu1 %v11360_v46  ;;  %v11366_v33 = vld [vmem:[#allocation109_spill] sm:$0xff] }
 0x872   :  { %3427 = vmatpush2.msra.mxu0 %v5221_v34  ;;  %3498 = vmatpush2.msra.mxu1 %v11361_v6  ;;  %v11367_v34 = vld [vmem:[#allocation115_spill] sm:$0xff] }
 0x873   :  { %3428 = vmatprep.subr.mxu0 %v5222_v0  ;;  %3499 = vmatprep.subr.mxu1 %v11362_v47  ;;  %v11368_v47 = vld [vmem:[#allocation153_spill] sm:$0xff] }
 0x874   :  { %3429 = vmatpush2.msra.mxu0 %v5223_v27  ;;  %3500 = vmatpush2.msra.mxu1 %v11363_v28 }
 0x875   :  { %3508 = vmatprep.subr.mxu0 %v11364_v19  ;;  %3579 = vmatprep.subr.mxu1 %v11365_v40 }
 0x8b3   :  { %v3084_v8 = vpop.f32.mrf.mxu0  ;;  %v3155_v0 = vpop.f32.mrf.mxu1 }
 0x8b4   :  { %v3310_v20 = vadd.f32 %v3084_v8, %v11366_v33  ;;  %v3312_v36 = vadd.f32 %v3155_v0, %v11368_v47 }
 0x8b5   :  { %v3086_v46 = vpop.f32.mrf.mxu0  ;;  %v3157_v0 = vpop.f32.mrf.mxu1 }
 0x8b6   :  { %v4030_v56 = vmul.f32 -1.442695, %v3310_v20  ;;  %v3311_v43 = vadd.f32 %v3086_v46, %v11367_v34 }
 0x8b8   :  { %4285 = vpow2.f32 %v4030_v56  ;;  %v4032_v6 = vmul.f32 -1.442695, %v3311_v43  ;;  %v11369_v56 = vld [vmem:[#allocation152_spill] sm:$0xff] }
 0x8ba   :  { %4287 = vpow2.f32 %v4032_v6 }
 0x8bb   :  { %4289 = vtanh.f32 %v3312_v36 }
 0x8c5   :  { %v4286_v27 = vpop.eup %4285 }
 0x8c6   :  { %v3324_v12 = vadd.f32 1.0, %v4286_v27  ;;  %v11370_v27 = vld [vmem:[#allocation154_spill] sm:$0xff] }
 0x8c7   :  { %v4288_v28 = vpop.eup %4287 }
 0x8c8   :  { %4291 = vrcp.f32 %v3324_v12  ;;  %v3336_v19 = vadd.f32 1.0, %v4288_v28  ;;  %v4290_v40 = vpop.eup %4289 }
 0x8ca   :  { %4293 = vrcp.f32 %v3336_v19 }
 0x8d5   :  { %v4292_v53 = vpop.eup %4291 }
 0x8d6   :  { %v3358_v8 = vmul.f32 %v4292_v53, %v4290_v40  ;;  %v11371_v53 = vld [vmem:[#allocation169_spill] sm:$0xff] }
 0x8d7   :  { %v4294_v33 = vpop.eup %4293  ;;  %v572_v19 = vadd.f32 %v11371_v53, %v6401_v55 }
 0x8d8   :  { %v3356_v20 = vmul.f32 %v4294_v33, %v9103_v58  ;;  %v11372_v58 = vld [vmem:[#allocation168_spill] sm:$0xff]  ;;  %v11373_v33 = vld [vmem:[#allocation155_spill] sm:$0xff] }
 0x8da   :  { %v9415_v46 = vadd.f32 %v3358_v8, %v3356_v20  ;;  %v570_v8 = vadd.f32 %v11372_v58, %v6398_v17  ;;  %v3313_v20 = vadd.f32 %v3157_v0, %v11373_v33 }
 0x8f4   :  { %v3226_v43 = vpop.f32.mrf.mxu0  ;;  %v3297_v12 = vpop.f32.mrf.mxu1 }
 0x8f5   :  { %v3314_v34 = vadd.f32 %v3226_v43, %v11369_v56  ;;  %v3316_v43 = vadd.f32 %v3297_v12, %v570_v8 }
 0x8f6   :  { %v3228_v6 = vpop.f32.mrf.mxu0  ;;  %v3299_v28 = vpop.f32.mrf.mxu1 }
 0x8f7   :  { %v4031_v47 = vmul.f32 -1.442695, %v3314_v34  ;;  %v3315_v4 = vadd.f32 %v3228_v6, %v11370_v27  ;;  %v3317_v40 = vadd.f32 %v3299_v28, %v572_v19  ;;  %v4034_v34 = vmul.f32 -1.442695, %v3313_v20 }
 0x8f9   :  { %4295 = vpow2.f32 %v4031_v47  ;;  %v4033_v36 = vmul.f32 -1.442695, %v3315_v4  ;;  %v4035_v56 = vmul.f32 -1.442695, %v3317_v40 }
 0x8fb   :  { %4297 = vpow2.f32 %v4033_v36 }
 0x8fc   :  { %4299 = vtanh.f32 %v3316_v43 }
 0x8fd   :  { %4301 = vpow2.f32 %v4035_v56  ;;  %v5225_v56 = vld [vmem:[#allocation5 + $0x3f0] sm:$0xff] }
 0x906   :  { %v4296_v32 = vpop.eup %4295 }
 0x907   :  { %v3325_v25 = vadd.f32 1.0, %v4296_v32 }
 0x908   :  { %v4298_v6 = vpop.eup %4297 }
 0x909   :  { %4303 = vrcp.f32 %v3325_v25  ;;  %v3337_v4 = vadd.f32 1.0, %v4298_v6  ;;  %v4300_v47 = vpop.eup %4299  ;;  %v5227_v6 = vld [vmem:[#allocation5 + $0x3b8] sm:$0xff] }
 0x90a   :  { %4305 = vpow2.f32 %v4034_v34  ;;  %v4302_v27 = vpop.eup %4301  ;;  %v5226_v34 = vld [vmem:[#allocation5 + $0x3a8] sm:$0xff] }
 0x90b   :  { %4307 = vrcp.f32 %v3337_v4  ;;  %v3351_v58 = vadd.f32 1.0, %v4302_v27  ;;  %v5228_v4 = vld [vmem:[#allocation5 + $0x3a0] sm:$0xff]  ;;  %v5230_v27 = vld [vmem:[#allocation5 + $0x368] sm:$0xff] }
 0x90c   :  { %4309 = vtanh.f32 %v9415_v46 }
 0x90d   :  { %4311 = vrcp.f32 %v3351_v58  ;;  %v5235_v58 = vld [vmem:[#allocation5 + $0x338] sm:$0xff] }
 0x916   :  { %v4304_v36 = vpop.eup %4303 }
 0x917   :  { %v4306_v28 = vpop.eup %4305  ;;  %v3359_v53 = vmul.f32 %v4304_v36, %v4300_v47  ;;  %v5229_v47 = vld [vmem:[#allocation5 + $0x3b0] sm:$0xff]  ;;  %v5231_v36 = vld [vmem:[#allocation5 + $0x378] sm:$0xff] }
 0x918   :  { %v4308_v19 = vpop.eup %4307  ;;  %v3350_v12 = vadd.f32 1.0, %v4306_v28  ;;  %v5232_v28 = vld [vmem:[#allocation5 + $0x360] sm:$0xff] }
 0x919   :  { %v3357_v0 = vmul.f32 %v4308_v19, %v9114_v62  ;;  %v4310_v25 = vpop.eup %4309  ;;  %v5224_v62 = vld [vmem:[#allocation5 + $0x3e0] sm:$0xff]  ;;  %v5234_v19 = vld [vmem:[#allocation5 + $0x328] sm:$0xff] }
 0x91a   :  { %v4312_v40 = vpop.eup %4311 }
 0x91b   :  { %v9426_v32 = vadd.f32 %v3359_v53, %v3357_v0  ;;  %v5233_v53 = vld [vmem:[#allocation5 + $0x370] sm:$0xff]  ;;  %v5236_v0 = vld [vmem:[#allocation5 + $0x320] sm:$0xff] }
 0x91d   :  { %4313 = vtanh.f32 %v9426_v32 }
 0x91e   :  { %4315 = vrcp.f32 %v3350_v12  ;;  %v5237_v12 = vld [vmem:[#allocation5 + $0x330] sm:$0xff] }
 0x92a   :  { %v4314_v8 = vpop.eup %4313 }
 0x92b   :  { %v4316_v33 = vpop.eup %4315  ;;  %v9429_v20 = vmul.f32 %v4314_v8, %v4312_v40  ;;  %v5239_v40 = vld [vmem:[#allocation5 + $0x2f8] sm:$0xff]  ;;  %v5240_v8 = vld [vmem:[#allocation5 + $0x2e0] sm:$0xff] }
 0x92c   :  { %v9431_v43 = vmul.f32 %v4316_v33, %v4310_v25  ;;  %v5238_v25 = vld [vmem:[#allocation5 + $0x2e8] sm:$0xff]  ;;  %v5241_v33 = vld [vmem:[#allocation5 + $0x2f0] sm:$0xff] }
 0x92d   :  { %3430 = vmatprep.mubr.f32.mxu0 %v9429_v20  ;;  %3501 = vmatprep.mubr.f32.mxu1 %v9429_v20 }
 0x92e   :  { %3431 = vmatmul.mubr.f32.vlgmr.msra.gmra.mxu0 %v9431_v43  ;;  %3502 = vmatmul.mubr.f32.vlgmr.msra.gmra.mxu1 %v9431_v43 }
 0x92f   :  { %3509 = vmatpush1.msra.mxu0 %v5224_v62  ;;  %3580 = vmatpush1.msra.mxu1 %v5225_v56  ;;  %v5242_v62 = vld [vmem:[#allocation5 + $0x2a8] sm:$0xff]  ;;  %v5243_v56 = vld [vmem:[#allocation5 + $0x2b8] sm:$0xff] }
 0x930   :  { %3510 = vmatprep.subr.mxu0 %v5226_v34  ;;  %3572 = vmatprep.mubr.f32.mxu0 %v9429_v20  ;;  %v5244_v34 = vld [vmem:[#allocation5 + $0x2a0] sm:$0xff] }
 0x931   :  { %3581 = vmatprep.subr.mxu1 %v5227_v6  ;;  %3643 = vmatprep.mubr.f32.mxu1 %v9429_v20  ;;  %v5245_v6 = vld [vmem:[#allocation5 + $0x2b0] sm:$0xff] }
 0x932   :  { %3511 = vmatpush1.msra.mxu0 %v5228_v4  ;;  %3582 = vmatpush1.msra.mxu1 %v5229_v47  ;;  %v5246_v4 = vld [vmem:[#allocation5 + $0x268] sm:$0xff]  ;;  %v5247_v47 = vld [vmem:[#allocation5 + $0x260] sm:$0xff] }
 0x933   :  { %3512 = vmatprep.subr.mxu0 %v5230_v27  ;;  %3583 = vmatprep.subr.mxu1 %v5231_v36  ;;  %v5248_v27 = vld [vmem:[#allocation5 + $0x228] sm:$0xff]  ;;  %v5249_v36 = vld [vmem:[#allocation5 + $0x220] sm:$0xff] }
 0x934   :  { %3513 = vmatpush1.msra.mxu0 %v5232_v28  ;;  %3584 = vmatpush1.msra.mxu1 %v5233_v53  ;;  %v5250_v28 = vld [vmem:[#allocation5 + $0x1e8] sm:$0xff]  ;;  %v5251_v53 = vld [vmem:[#allocation5 + $0x1e0] sm:$0xff] }
 0x935   :  { %3514 = vmatprep.subr.mxu0 %v5234_v19  ;;  %3585 = vmatprep.subr.mxu1 %v5235_v58  ;;  %v11374_v19 = vld [vmem:[#allocation107_spill] sm:$0xff]  ;;  %v11375_v58 = vld [vmem:[#allocation48_spill] sm:$0xff] }
 0x936   :  { %3515 = vmatpush1.msra.mxu0 %v5236_v0  ;;  %3586 = vmatpush1.msra.mxu1 %v5237_v12  ;;  %v11376_v0 = vld [vmem:[#allocation111_spill] sm:$0xff]  ;;  %v11377_v12 = vld [vmem:[#allocation50_spill] sm:$0xff] }
 0x937   :  { %3516 = vmatprep.subr.mxu0 %v5238_v25  ;;  %3587 = vmatprep.subr.mxu1 %v5239_v40  ;;  %v11378_v25 = vld [vmem:[#allocation113_spill] sm:$0xff]  ;;  %v11379_v40 = vld [vmem:[#allocation52_spill] sm:$0xff] }
 0x938   :  { %3517 = vmatpush1.msra.mxu0 %v5240_v8  ;;  %3588 = vmatpush1.msra.mxu1 %v5241_v33  ;;  %v5292_v8 = vld [vmem:[#allocation5 + $0x4a8] sm:$0xff]  ;;  %v11380_v33 = vld [vmem:[#allocation117_spill] sm:$0xff] }
 0x939   :  { %3518 = vmatprep.subr.mxu0 %v5242_v62  ;;  %3589 = vmatprep.subr.mxu1 %v5243_v56  ;;  %v5293_v62 = vld [vmem:[#allocation5 + $0x4a0] sm:$0xff]  ;;  %v11381_v56 = vld [vmem:[#allocation54_spill] sm:$0xff] }
 0x93a   :  { %3519 = vmatpush1.msra.mxu0 %v5244_v34  ;;  %3590 = vmatpush1.msra.mxu1 %v5245_v6  ;;  %v5294_v34 = vld [vmem:[#allocation5 + $0x468] sm:$0xff]  ;;  %v11382_v6 = vld [vmem:[#allocation119_spill] sm:$0xff] }
 0x93b   :  { %3520 = vmatprep.subr.mxu0 %v5246_v4  ;;  %3591 = vmatprep.subr.mxu1 %v9150_v50  ;;  %v5252_v50 = vld [vmem:[#allocation5 + $0x1a8] sm:$0xff]  ;;  %v5295_v4 = vld [vmem:[#allocation5 + $0x460] sm:$0xff] }
 0x93c   :  { %3521 = vmatpush1.msra.mxu0 %v5247_v47  ;;  %3592 = vmatpush1.msra.mxu1 %v9154_v59  ;;  %v5253_v59 = vld [vmem:[#allocation5 + $0x1a0] sm:$0xff]  ;;  %v11383_v47 = vld [vmem:[#allocation56_spill] sm:$0xff] }
 0x93d   :  { %3522 = vmatprep.subr.mxu0 %v5248_v27  ;;  %3593 = vmatprep.subr.mxu1 %v9158_v30  ;;  %v5254_v30 = vld [vmem:[#allocation5 + $0x168] sm:$0xff] }
 0x93e   :  { %3523 = vmatpush1.msra.mxu0 %v5249_v36  ;;  %3594 = vmatpush1.msra.mxu1 %v9162_v11  ;;  %v5255_v11 = vld [vmem:[#allocation5 + $0x160] sm:$0xff]  ;;  %v5296_v27 = vld [vmem:[#allocation5 + $0x428] sm:$0xff] }
 0x93f   :  { %3524 = vmatprep.subr.mxu0 %v5250_v28  ;;  %3595 = vmatprep.subr.mxu1 %v9166_v41  ;;  %v5256_v41 = vld [vmem:[#allocation5 + $0x128] sm:$0xff]  ;;  %v11384_v36 = vld [vmem:[#allocation123_spill] sm:$0xff] }
 0x940   :  { %3525 = vmatpush1.msra.mxu0 %v5251_v53  ;;  %3596 = vmatpush1.msra.mxu1 %v9170_v16  ;;  %v5257_v16 = vld [vmem:[#allocation5 + $0x120] sm:$0xff]  ;;  %v11385_v53 = vld [vmem:[#allocation58_spill] sm:$0xff] }
 0x941   :  { %3526 = vmatprep.subr.mxu0 %v5252_v50  ;;  %3597 = vmatprep.subr.mxu1 %v9174_v51  ;;  %v5258_v51 = vld [vmem:[#allocation5 + $0xe8] sm:$0xff]  ;;  %v5297_v28 = vld [vmem:[#allocation5 + $0x420] sm:$0xff] }
 0x942   :  { %3527 = vmatpush1.msra.mxu0 %v5253_v59  ;;  %3598 = vmatpush1.msra.mxu1 %v9178_v37  ;;  %v5259_v37 = vld [vmem:[#allocation5 + $0xe0] sm:$0xff]  ;;  %v11386_v59 = vld [vmem:[#allocation121_spill] sm:$0xff] }
 0x943   :  { %3528 = vmatprep.subr.mxu0 %v5254_v30  ;;  %3599 = vmatprep.subr.mxu1 %v9182_v61  ;;  %v5260_v61 = vld [vmem:[#allocation5 + $0xa8] sm:$0xff] }
 0x944   :  { %3529 = vmatpush1.msra.mxu0 %v5255_v11  ;;  %3600 = vmatpush1.msra.mxu1 %v9186_v2  ;;  %v5261_v2 = vld [vmem:[#allocation5 + $0xa0] sm:$0xff] }
 0x945   :  { %3530 = vmatprep.subr.mxu0 %v5256_v41  ;;  %3601 = vmatprep.subr.mxu1 %v9190_v5  ;;  %v5262_v5 = vld [vmem:[#allocation5 + $0x68] sm:$0xff] }
 0x946   :  { %3531 = vmatpush1.msra.mxu0 %v5257_v16  ;;  %3602 = vmatpush1.msra.mxu1 %v9194_v9  ;;  %v5263_v9 = vld [vmem:[#allocation5 + $0x60] sm:$0xff] }
 0x947   :  { %3532 = vmatprep.subr.mxu0 %v5258_v51  ;;  %3603 = vmatprep.subr.mxu1 %v9198_v24  ;;  %v5264_v24 = vld [vmem:[#allocation5 + $0x28] sm:$0xff]  ;;  %v11387_v16 = vld [vmem:[#allocation127_spill] sm:$0xff] }
 0x948   :  { %3533 = vmatpush1.msra.mxu0 %v5259_v37  ;;  %3604 = vmatpush1.msra.mxu1 %v9202_v60  ;;  %v5265_v60 = vld [vmem:[#allocation5 + $0x20] sm:$0xff] }
 0x949   :  { %3534 = vmatprep.subr.mxu0 %v5260_v61  ;;  %3605 = vmatprep.subr.mxu1 %v9206_v3  ;;  %v5266_v3 = vld [vmem:[#allocation5 + $0x7e8] sm:$0xff] }
 0x94a   :  { %3535 = vmatpush1.msra.mxu0 %v5261_v2  ;;  %3606 = vmatpush1.msra.mxu1 %v9210_v15  ;;  %v5267_v15 = vld [vmem:[#allocation5 + $0x7e0] sm:$0xff] }
 0x94b   :  { %3536 = vmatprep.subr.mxu0 %v5262_v5  ;;  %3607 = vmatprep.subr.mxu1 %v9214_v54  ;;  %v5268_v54 = vld [vmem:[#allocation5 + $0x7a8] sm:$0xff]  ;;  %v11388_v5 = vld [vmem:[#allocation159_spill] sm:$0xff] }
 0x94c   :  { %3537 = vmatpush1.msra.mxu0 %v5263_v9  ;;  %3608 = vmatpush1.msra.mxu1 %v9218_v52  ;;  %v5269_v52 = vld [vmem:[#allocation5 + $0x7a0] sm:$0xff] }
 0x94d   :  { %3538 = vmatprep.subr.mxu0 %v5264_v24  ;;  %3609 = vmatprep.subr.mxu1 %v9222_v31  ;;  %v5270_v31 = vld [vmem:[#allocation5 + $0x768] sm:$0xff]  ;;  %v11389_v24 = vld [vmem:[#allocation157_spill] sm:$0xff] }
 0x94e   :  { %3539 = vmatpush1.msra.mxu0 %v5265_v60  ;;  %3610 = vmatpush1.msra.mxu1 %v9226_v18  ;;  %v5271_v18 = vld [vmem:[#allocation5 + $0x760] sm:$0xff] }
 0x94f   :  { %3540 = vmatprep.subr.mxu0 %v5266_v3  ;;  %3611 = vmatprep.subr.mxu1 %v9230_v39  ;;  %v5272_v39 = vld [vmem:[#allocation5 + $0x728] sm:$0xff] }
 0x950   :  { %3541 = vmatpush2.msra.mxu0 %v5267_v15  ;;  %3612 = vmatpush2.msra.mxu1 %v9234_v1  ;;  %v5273_v1 = vld [vmem:[#allocation5 + $0x720] sm:$0xff] }
 0x951   :  { %3542 = vmatprep.subr.mxu0 %v5268_v54  ;;  %3613 = vmatprep.subr.mxu1 %v9238_v10  ;;  %v5274_v10 = vld [vmem:[#allocation5 + $0x6e8] sm:$0xff] }
 0x952   :  { %3543 = vmatpush2.msra.mxu0 %v5269_v52  ;;  %3614 = vmatpush2.msra.mxu1 %v9242_v57  ;;  %v5275_v57 = vld [vmem:[#allocation5 + $0x6e0] sm:$0xff] }
 0x953   :  { %3544 = vmatprep.subr.mxu0 %v5270_v31  ;;  %3615 = vmatprep.subr.mxu1 %v9246_v38  ;;  %v5276_v38 = vld [vmem:[#allocation5 + $0x6a8] sm:$0xff] }
 0x954   :  { %3545 = vmatpush2.msra.mxu0 %v5271_v18  ;;  %3616 = vmatpush2.msra.mxu1 %v9250_v45  ;;  %v5277_v45 = vld [vmem:[#allocation5 + $0x6a0] sm:$0xff] }
 0x955   :  { %3546 = vmatprep.subr.mxu0 %v5272_v39  ;;  %3617 = vmatprep.subr.mxu1 %v9254_v42  ;;  %v5278_v42 = vld [vmem:[#allocation5 + $0x668] sm:$0xff] }
 0x956   :  { %3547 = vmatpush2.msra.mxu0 %v5273_v1  ;;  %3618 = vmatpush2.msra.mxu1 %v9258_v48  ;;  %v5279_v48 = vld [vmem:[#allocation5 + $0x660] sm:$0xff] }
 0x957   :  { %3548 = vmatprep.subr.mxu0 %v5274_v10  ;;  %3619 = vmatprep.subr.mxu1 %v9262_v23  ;;  %v5280_v23 = vld [vmem:[#allocation5 + $0x628] sm:$0xff] }
 0x958   :  { %3549 = vmatpush2.msra.mxu0 %v5275_v57  ;;  %3620 = vmatpush2.msra.mxu1 %v9266_v7  ;;  %v5281_v7 = vld [vmem:[#allocation5 + $0x620] sm:$0xff] }
 0x959   :  { %3550 = vmatprep.subr.mxu0 %v5276_v38  ;;  %3621 = vmatprep.subr.mxu1 %v9270_v44  ;;  %v5282_v44 = vld [vmem:[#allocation5 + $0x5e8] sm:$0xff] }
 0x95a   :  { %3551 = vmatpush2.msra.mxu0 %v5277_v45  ;;  %3622 = vmatpush2.msra.mxu1 %v9274_v22  ;;  %v5283_v22 = vld [vmem:[#allocation5 + $0x5e0] sm:$0xff] }
 0x95b   :  { %3552 = vmatprep.subr.mxu0 %v5278_v42  ;;  %3623 = vmatprep.subr.mxu1 %v9278_v63  ;;  %v5284_v63 = vld [vmem:[#allocation5 + $0x5a8] sm:$0xff] }
 0x95c   :  { %3553 = vmatpush2.msra.mxu0 %v5279_v48  ;;  %3624 = vmatpush2.msra.mxu1 %v9282_v21  ;;  %v5285_v21 = vld [vmem:[#allocation5 + $0x5a0] sm:$0xff] }
 0x95d   :  { %3554 = vmatprep.subr.mxu0 %v5280_v23  ;;  %3625 = vmatprep.subr.mxu1 %v9286_v49  ;;  %v5286_v49 = vld [vmem:[#allocation5 + $0x568] sm:$0xff] }
 0x95e   :  { %3555 = vmatpush2.msra.mxu0 %v5281_v7  ;;  %3626 = vmatpush2.msra.mxu1 %v9290_v35  ;;  %v5287_v35 = vld [vmem:[#allocation5 + $0x560] sm:$0xff] }
 0x95f   :  { %3556 = vmatprep.subr.mxu0 %v5282_v44  ;;  %3627 = vmatprep.subr.mxu1 %v9294_v29  ;;  %v5288_v29 = vld [vmem:[#allocation5 + $0x528] sm:$0xff] }
 0x960   :  { %3557 = vmatpush2.msra.mxu0 %v5283_v22  ;;  %3628 = vmatpush2.msra.mxu1 %v9298_v13  ;;  %v5289_v13 = vld [vmem:[#allocation5 + $0x520] sm:$0xff] }
 0x961   :  { %3558 = vmatprep.subr.mxu0 %v5284_v63  ;;  %3629 = vmatprep.subr.mxu1 %v9302_v14  ;;  %v5290_v14 = vld [vmem:[#allocation5 + $0x4e8] sm:$0xff] }
 0x962   :  { %3559 = vmatpush2.msra.mxu0 %v5285_v21  ;;  %3630 = vmatpush2.msra.mxu1 %v9306_v26  ;;  %v5291_v26 = vld [vmem:[#allocation5 + $0x4e0] sm:$0xff] }
 0x963   :  { %3560 = vmatprep.subr.mxu0 %v5286_v49  ;;  %3631 = vmatprep.subr.mxu1 %v11374_v19  ;;  %v11390_v21 = vld [vmem:[#allocation135_spill] sm:$0xff] }
 0x964   :  { %3561 = vmatpush2.msra.mxu0 %v5287_v35  ;;  %3632 = vmatpush2.msra.mxu1 %v11375_v58  ;;  %v11391_v58 = vld [vmem:[#allocation140_spill] sm:$0xff] }
 0x965   :  { %3562 = vmatprep.subr.mxu0 %v5288_v29  ;;  %3633 = vmatprep.subr.mxu1 %v11376_v0 }
 0x966   :  { %3563 = vmatpush2.msra.mxu0 %v5289_v13  ;;  %3634 = vmatpush2.msra.mxu1 %v11377_v12  ;;  %v11392_v12 = vld [vmem:[#allocation167_spill] sm:$0xff] }
 0x967   :  { %3564 = vmatprep.subr.mxu0 %v5290_v14  ;;  %3635 = vmatprep.subr.mxu1 %v11378_v25  ;;  %v566_v14 = vadd.f32 %v11392_v12, %v6401_v55 }
 0x968   :  { %3565 = vmatpush2.msra.mxu0 %v5291_v26  ;;  %3636 = vmatpush2.msra.mxu1 %v11379_v40  ;;  %v11393_v26 = vld [vmem:[#allocation166_spill] sm:$0xff] }
 0x969   :  { %3566 = vmatprep.subr.mxu0 %v5292_v8  ;;  %3637 = vmatprep.subr.mxu1 %v11380_v33  ;;  %v564_v40 = vadd.f32 %v11393_v26, %v6398_v17  ;;  %v3876_v26 = vld [vmem:[#allocation7 + $0xf0] sm:$0xff] }
 0x96a   :  { %3567 = vmatpush2.msra.mxu0 %v5293_v62  ;;  %3638 = vmatpush2.msra.mxu1 %v11381_v56 }
 0x96b   :  { %3568 = vmatprep.subr.mxu0 %v5294_v34  ;;  %3639 = vmatprep.subr.mxu1 %v11382_v6 }
 0x96c   :  { %3569 = vmatpush2.msra.mxu0 %v5295_v4  ;;  %3640 = vmatpush2.msra.mxu1 %v11383_v47 }
 0x96d   :  { %3570 = vmatprep.subr.mxu0 %v5296_v27  ;;  %3641 = vmatprep.subr.mxu1 %v11384_v36 }
 0x96e   :  { %3571 = vmatpush2.msra.mxu0 %v5297_v28  ;;  %3642 = vmatpush2.msra.mxu1 %v11385_v53 }
 0x96f   :  { %3573 = vmatmul.mubr.f32.vlgmr.msra.gmra.mxu0 %v9431_v43  ;;  %3644 = vmatmul.mubr.f32.vlgmr.msra.gmra.mxu1 %v9431_v43 }
 0x9ee   :  { %v3432_v50 = vpop.f32.mrf.mxu0  ;;  %v3503_v37 = vpop.f32.mrf.mxu1 }
 0x9ef   :  { %v3658_v30 = vadd.f32 %v3432_v50, %v11386_v59  ;;  %v3660_v60 = vadd.f32 %v3503_v37, %v11389_v24  ;;  %v11394_v37 = vld [vmem:[#allocation46_spill] sm:$0xff] }
 0x9f0   :  { %v3434_v11 = vpop.f32.mrf.mxu0  ;;  %v3505_v2 = vpop.f32.mrf.mxu1 }
 0x9f1   :  { %v4036_v41 = vmul.f32 -1.442695, %v3658_v30  ;;  %v3659_v51 = vadd.f32 %v3434_v11, %v11387_v16  ;;  %v3661_v9 = vadd.f32 %v3505_v2, %v11388_v5  ;;  %v11395_v2 = vld [vmem:[#allocation174_spill] sm:$0xff] }
 0x9f3   :  { %4317 = vpow2.f32 %v4036_v41  ;;  %v4038_v61 = vmul.f32 -1.442695, %v3659_v51  ;;  %v4040_v3 = vmul.f32 -1.442695, %v3661_v9 }
 0x9f5   :  { %4319 = vpow2.f32 %v4038_v61 }
 0x9f6   :  { %4321 = vtanh.f32 %v3660_v60  ;;  %v11397_v60 = vld [vmem:[#allocation35_spill] sm:$0xff] }
 0x9f7   :  { %4323 = vpow2.f32 %v4040_v3 }
 0xa00   :  { %v4318_v15 = vpop.eup %4317 }
 0xa01   :  { %v3672_v54 = vadd.f32 1.0, %v4318_v15  ;;  %v11398_v15 = vld [vmem:[#allocation112_spill] sm:$0xff] }
 0xa02   :  { %v4320_v52 = vpop.eup %4319 }
 0xa03   :  { %4325 = vrcp.f32 %v3672_v54  ;;  %v3684_v31 = vadd.f32 1.0, %v4320_v52  ;;  %v4322_v18 = vpop.eup %4321 }
 0xa04   :  { %v4324_v39 = vpop.eup %4323 }
 0xa05   :  { %4327 = vrcp.f32 %v3684_v31  ;;  %v3698_v38 = vadd.f32 1.0, %v4324_v39 }
 0xa07   :  { %4329 = vrcp.f32 %v3698_v38  ;;  %v11401_v38 = vld [vmem:[#allocation105_spill] sm:$0xff] }
 0xa10   :  { %v4326_v1 = vpop.eup %4325 }
 0xa11   :  { %v3706_v10 = vmul.f32 %v4326_v1, %v4322_v18  ;;  %v11399_v18 = vld [vmem:[#allocation76_spill] sm:$0xff] }
 0xa12   :  { %v4328_v57 = vpop.eup %4327 }
 0xa13   :  { %v3704_v45 = vmul.f32 %v4328_v57, %v9415_v46 }
 0xa14   :  { %v4330_v48 = vpop.eup %4329 }
 0xa15   :  { %v3708_v42 = vadd.f32 %v3706_v10, %v3704_v45  ;;  %v11400_v10 = vld [vmem:[#allocation147_spill] sm:$0xff] }
 0xa17   :  { %4331 = vtanh.f32 %v3708_v42 }
 0xa24   :  { %v4332_v23 = vpop.eup %4331 }
 0xa25   :  { %v9498_v7 = vmul.f32 %v4332_v23, %v4330_v48  ;;  %v11402_v23 = vld [vmem:[#allocation114_spill] sm:$0xff] }
 0xa27   :  { %3714 = vst [vmem:[#allocation3] sm:$0xff] %v9498_v7 }
 0xa2e   :  { %v3718_v44 = vld [vmem:[#allocation3] ss:$0 sm:$0xff]  ;;  %v3720_v22 = vld [vmem:[#allocation3 + $0x1] ss:$0 sm:$0xff] }
 0xa2f   :  { %v3574_v63 = vpop.f32.mrf.mxu0  ;;  %3719 = vst [vmem:[#allocation4] sm:$0x1] %v3718_v44  ;;  %3721 = vst [vmem:[#allocation4 + $0x8] sm:$0x1] %v3720_v22  ;;  %v3645_v29 = vpop.f32.mrf.mxu1  ;;  %v11403_v22 = vld [vmem:[#allocation34_spill] sm:$0xff] }
 0xa30   :  { %v3662_v49 = vadd.f32 %v3574_v63, %v11390_v21  ;;  %v3664_v8 = vadd.f32 %v3645_v29, %v564_v40  ;;  %v11405_v29 = vld [vmem:[#allocation74_spill] sm:$0xff]  ;;  %v3860_v40 = vld [vmem:[#allocation7 + $0x70] sm:$0xff] }
 0xa31   :  { %v3576_v19 = vpop.f32.mrf.mxu0  ;;  %v3647_v13 = vpop.f32.mrf.mxu1 }
 0xa32   :  { %v4037_v35 = vmul.f32 -1.442695, %v3662_v49  ;;  %v3663_v46 = vadd.f32 %v3576_v19, %v11391_v58  ;;  %v3665_v25 = vadd.f32 %v3647_v13, %v566_v14  ;;  %v3877_v14 = vld [vmem:[#allocation7 + $0xf8] sm:$0xff] }
 0xa33   :  { %4043 = vmatprep.subr.mxu0 %v3877_v14 }
 0xa34   :  { %4333 = vpow2.f32 %v4037_v35  ;;  %v4039_v0 = vmul.f32 -1.442695, %v3663_v46  ;;  %v4041_v33 = vmul.f32 -1.442695, %v3665_v25  ;;  %v11404_v35 = vld [vmem:[#allocation178_spill] sm:$0xff] }
 0xa35   :  { %v3861_v25 = vld [vmem:[#allocation7 + $0x78] sm:$0xff] }
 0xa36   :  { %4335 = vpow2.f32 %v4039_v0  ;;  %4044 = vmatpush3.msra.mxu0 %v3861_v25 }
 0xa37   :  { %4337 = vtanh.f32 %v3664_v8  ;;  %v3875_v8 = vld [vmem:[#allocation7 + $0xe8] sm:$0xff]  ;;  %4045 = vmatprep.subr.mxu0 %v3876_v26 }
 0xa38   :  { %4339 = vpow2.f32 %v4041_v33  ;;  %v3859_v33 = vld [vmem:[#allocation7 + $0x68] sm:$0xff]  ;;  %4046 = vmatpush3.msra.mxu0 %v3860_v40 }
 0xa39   :  { %4047 = vmatprep.subr.mxu0 %v3875_v8 }
 0xa3a   :  { %4048 = vmatpush3.msra.mxu0 %v3859_v33 }
 0xa41   :  { %v4334_v62 = vpop.eup %4333 }
 0xa42   :  { %v3673_v56 = vadd.f32 1.0, %v4334_v62  ;;  %v3874_v62 = vld [vmem:[#allocation7 + $0xe0] sm:$0xff] }
 0xa43   :  { %v4336_v34 = vpop.eup %4335  ;;  %4049 = vmatprep.subr.mxu0 %v3874_v62 }
 0xa44   :  { %4341 = vrcp.f32 %v3673_v56  ;;  %v3685_v6 = vadd.f32 1.0, %v4336_v34  ;;  %v4338_v4 = vpop.eup %4337  ;;  %v3858_v56 = vld [vmem:[#allocation7 + $0x60] sm:$0xff]  ;;  %v3873_v34 = vld [vmem:[#allocation7 + $0xd8] sm:$0xff] }
 0xa45   :  { %v4340_v47 = vpop.eup %4339  ;;  %4050 = vmatpush3.msra.mxu0 %v3858_v56 }
 0xa46   :  { %4343 = vrcp.f32 %v3685_v6  ;;  %v3699_v55 = vadd.f32 1.0, %v4340_v47  ;;  %v3857_v6 = vld [vmem:[#allocation7 + $0x58] sm:$0xff]  ;;  %4051 = vmatprep.subr.mxu0 %v3873_v34  ;;  %v3856_v47 = vld [vmem:[#allocation7 + $0x50] sm:$0xff] }
 0xa47   :  { %4052 = vmatpush3.msra.mxu0 %v3857_v6 }
 0xa48   :  { %4345 = vrcp.f32 %v3699_v55  ;;  %v3854_v55 = vld [vmem:[#allocation7 + $0x40] sm:$0xff] }
 0xa51   :  { %v4342_v27 = vpop.eup %4341 }
 0xa52   :  { %v3707_v36 = vmul.f32 %v4342_v27, %v4338_v4  ;;  %v3872_v4 = vld [vmem:[#allocation7 + $0xd0] sm:$0xff]  ;;  %v3871_v27 = vld [vmem:[#allocation7 + $0xc8] sm:$0xff] }
 0xa53   :  { %v4344_v28 = vpop.eup %4343  ;;  %4053 = vmatprep.subr.mxu0 %v3872_v4 }
 0xa54   :  { %v3705_v53 = vmul.f32 %v4344_v28, %v9426_v32  ;;  %v11396_v32 = vld [vmem:[#allocation179_spill] sm:$0xff]  ;;  %4054 = vmatpush3.msra.mxu0 %v3856_v47 }
 0xa55   :  { %v4346_v17 = vpop.eup %4345  ;;  %v3870_v28 = vld [vmem:[#allocation7 + $0xc0] sm:$0xff]  ;;  %4055 = vmatprep.subr.mxu0 %v3871_v27 }
 0xa56   :  { %v3709_v50 = vadd.f32 %v3707_v36, %v3705_v53  ;;  %v3855_v36 = vld [vmem:[#allocation7 + $0x48] sm:$0xff]  ;;  %v3869_v53 = vld [vmem:[#allocation7 + $0xb8] sm:$0xff] }
 0xa57   :  { %4056 = vmatpush3.msra.mxu0 %v3855_v36 }
 0xa58   :  { %4347 = vtanh.f32 %v3709_v50  ;;  %4057 = vmatprep.subr.mxu0 %v3870_v28  ;;  %v3853_v50 = vld [vmem:[#allocation7 + $0x38] sm:$0xff] }
 0xa59   :  { %4058 = vmatpush3.msra.mxu0 %v3854_v55 }
 0xa5a   :  { %4059 = vmatprep.subr.mxu0 %v3869_v53 }
 0xa5b   :  { %4060 = vmatpush3.msra.mxu0 %v3853_v50 }
 0xa65   :  { %v4348_v59 = vpop.eup %4347 }
 0xa66   :  { %v9508_v30 = vmul.f32 %v4348_v59, %v4346_v17  ;;  %v3868_v17 = vld [vmem:[#allocation7 + $0xb0] sm:$0xff] }
 0xa67   :  { %v3852_v59 = vld [vmem:[#allocation7 + $0x30] sm:$0xff]  ;;  %4061 = vmatprep.subr.mxu0 %v3868_v17 }
 0xa68   :  { %3715 = vst [vmem:[#allocation3 + $0x8] sm:$0xff] %v9508_v30  ;;  %4062 = vmatpush3.msra.mxu0 %v3852_v59 }
 0xa6f   :  { %v3722_v11 = vld [vmem:[#allocation3 + $0x8] ss:$0 sm:$0xff]  ;;  %v3724_v41 = vld [vmem:[#allocation3 + $0x9] ss:$0 sm:$0xff] }
 0xa70   :  { %3723 = vst [vmem:[#allocation4 + $0x1] sm:$0x1] %v3722_v11  ;;  %3725 = vst [vmem:[#allocation4 + $0x9] sm:$0x1] %v3724_v41  ;;  %v3867_v11 = vld [vmem:[#allocation7 + $0xa8] sm:$0xff] }
 0xa71   :  { %v3851_v41 = vld [vmem:[#allocation7 + $0x28] sm:$0xff]  ;;  %4063 = vmatprep.subr.mxu0 %v3867_v11 }
 0xa72   :  { %4064 = vmatpush3.msra.mxu0 %v3851_v41 }
 0xa77   :  { %v3726_v16 = vld [vmem:[#allocation4] sm:$0xff]  ;;  %v3727_v51 = vld [vmem:[#allocation4 + $0x8] sm:$0xff] }
 0xa78   :  { %v3738_v61 = vmul.f32 %v3726_v16, %v11394_v37  ;;  %v3739_v5 = vmul.f32 %v3727_v51, %v11395_v2  ;;  %v3728_v9 = vmul.f32 %v3726_v16, %v11396_v32  ;;  %v3729_v24 = vmul.f32 %v3727_v51, %v9508_v30 }
 0xa79   :  { %v3743_v3 = vmul.f32 %v3726_v16, %v11397_v60  ;;  %v3744_v54 = vmul.f32 %v3727_v51, %v11398_v15  ;;  %v3733_v39 = vmul.f32 %v3726_v16, %v11399_v18  ;;  %v3734_v1 = vmul.f32 %v3727_v51, %v9429_v20 }
 0xa7a   :  { %v3740_v52 = vadd.f32 %v3739_v5, %v3738_v61  ;;  %v3730_v31 = vadd.f32 %v3729_v24, %v3728_v9  ;;  %v3753_v57 = vmul.f32 %v3726_v16, %v11400_v10  ;;  %v3754_v45 = vmul.f32 %v3727_v51, %v11401_v38  ;;  %v3865_v61 = vld [vmem:[#allocation7 + $0x98] sm:$0xff]  ;;  %v3864_v9 = vld [vmem:[#allocation7 + $0x90] sm:$0xff] }
 0xa7b   :  { %v3745_v42 = vadd.f32 %v3744_v54, %v3743_v3  ;;  %v3735_v48 = vadd.f32 %v3734_v1, %v3733_v39  ;;  %v3748_v44 = vmul.f32 %v3726_v16, %v11402_v23  ;;  %v3749_v63 = vmul.f32 %v3727_v51, %v11403_v22  ;;  %v3849_v5 = vld [vmem:[#allocation7 + $0x18] sm:$0xff]  ;;  %v3848_v24 = vld [vmem:[#allocation7 + $0x10] sm:$0xff]  ;;  %v3863_v3 = vld [vmem:[#allocation7 + $0x88] sm:$0xff] }
 0xa7c   :  { %3741 = vadd.xlane.f32.xlu1 %v3740_v52  ;;  %3731 = vadd.xlane.f32.xlu0 %v3730_v31  ;;  %v3755_v21 = vadd.f32 %v3754_v45, %v3753_v57  ;;  %v3763_v49 = vmul.f32 %v3726_v16, %v9498_v7  ;;  %v3764_v58 = vmul.f32 %v3727_v51, %v11404_v35  ;;  %v3847_v54 = vld [vmem:[#allocation7 + $0x8] sm:$0xff]  ;;  %v3862_v52 = vld [vmem:[#allocation7 + $0x80] sm:$0xff] }
 0xa7d   :  { %v3750_v19 = vadd.f32 %v3749_v63, %v3748_v44  ;;  %v3758_v46 = vmul.f32 %v3726_v16, %v9431_v43  ;;  %v3759_v0 = vmul.f32 %v3727_v51, %v11405_v29  ;;  %v3866_v16 = vld [vmem:[#allocation7 + $0xa0] sm:$0xff] }
 0xa7e   :  { %v3765_v13 = vadd.f32 %v3764_v58, %v3763_v49  ;;  %v3850_v51 = vld [vmem:[#allocation7 + $0x20] sm:$0xff]  ;;  %4065 = vmatprep.subr.mxu0 %v3866_v16 }
 0xa7f   :  { %v3760_v12 = vadd.f32 %v3759_v0, %v3758_v46  ;;  %4066 = vmatpush3.msra.mxu0 %v3850_v51  ;;  %v3846_v31 = vld [vmem:[#allocation7] sm:$0xff] }
 0xa80   :  { %3746 = vadd.xlane.f32.xlu1 %v3745_v42  ;;  %3736 = vadd.xlane.f32.xlu0 %v3735_v48 }
 0xa81   :  { %4067 = vmatprep.subr.mxu0 %v3865_v61 }
 0xa82   :  { %4068 = vmatpush3.msra.mxu0 %v3849_v5 }
 0xa83   :  { %4069 = vmatprep.subr.mxu0 %v3864_v9 }
 0xa84   :  { %3756 = vadd.xlane.f32.xlu1 %v3755_v21  ;;  %3751 = vadd.xlane.f32.xlu0 %v3750_v19 }
 0xa85   :  { %4070 = vmatpush3.msra.mxu0 %v3848_v24 }
 0xa86   :  { %4071 = vmatprep.subr.mxu0 %v3863_v3 }
 0xa87   :  { %4072 = vmatpush3.msra.mxu0 %v3847_v54 }
 0xa88   :  { %3766 = vadd.xlane.f32.xlu1 %v3765_v13  ;;  %3761 = vadd.xlane.f32.xlu0 %v3760_v12 }
 0xa89   :  { %4073 = vmatprep.subr.mxu0 %v3862_v52 }
 0xa8a   :  { %4074 = vmatpush3.msra.mxu0 %v3846_v31 }
 0xb05   :  { %v3742_v39 = vpop.xlane.xlu1 %3741  ;;  %v3732_v1 = vpop.xlane.xlu0 %3731 }
 0xb09   :  { %v3747_v57 = vpop.xlane.xlu1 %3746  ;;  %v3737_v45 = vpop.xlane.xlu0 %3736 }
 0xb0a   :  { %v3768_v42 = vmax.f32 %v3732_v1, %v3737_v45 }
 0xb0c   :  { %v3769_v48 = vmax.f32 %v3768_v42, %v3742_v39 }
 0xb0d   :  { %v3752_v44 = vpop.xlane.xlu0 %3751  ;;  %v3757_v21 = vpop.xlane.xlu1 %3756 }
 0xb0e   :  { %v3770_v63 = vmax.f32 %v3769_v48, %v3747_v57 }
 0xb10   :  { %v3771_v49 = vmax.f32 %v3770_v63, %v3752_v44 }
 0xb11   :  { %v3762_v58 = vpop.xlane.xlu0 %3761  ;;  %v3767_v0 = vpop.xlane.xlu1 %3766 }
 0xb12   :  { %v3772_v19 = vmax.f32 %v3771_v49, %v3757_v21 }
 0xb14   :  { %v3773_v46 = vmax.f32 %v3772_v19, %v3762_v58 }
 0xb16   :  { %v3774_v13 = vmax.f32 %v3773_v46, %v3767_v0 }
 0xb18   :  { %v3775_v12 = vsub.f32 %v3732_v1, %v3774_v13  ;;  %v3778_v14 = vsub.f32 %v3737_v45, %v3774_v13  ;;  %v3781_v25 = vsub.f32 %v3742_v39, %v3774_v13  ;;  %v3784_v26 = vsub.f32 %v3747_v57, %v3774_v13 }
 0xb19   :  { %v3787_v62 = vsub.f32 %v3752_v44, %v3774_v13  ;;  %v3790_v34 = vsub.f32 %v3757_v21, %v3774_v13  ;;  %v3793_v4 = vsub.f32 %v3762_v58, %v3774_v13  ;;  %v3796_v27 = vsub.f32 %v3767_v0, %v3774_v13 }
 0xb1a   :  { %v3776_v40 = vmul.f32 1.442695, %v3775_v12  ;;  %v3779_v8 = vmul.f32 1.442695, %v3778_v14  ;;  %v3782_v33 = vmul.f32 1.442695, %v3781_v25 }
 0xb1b   :  { %v3785_v56 = vmul.f32 1.442695, %v3784_v26  ;;  %v3788_v6 = vmul.f32 1.442695, %v3787_v62  ;;  %v3791_v47 = vmul.f32 1.442695, %v3790_v34 }
 0xb1c   :  { %4349 = vpow2.f32 %v3776_v40  ;;  %v3794_v36 = vmul.f32 1.442695, %v3793_v4  ;;  %v3797_v28 = vmul.f32 1.442695, %v3796_v27 }
 0xb1d   :  { %4351 = vpow2.f32 %v3779_v8 }
 0xb1e   :  { %4353 = vpow2.f32 %v3782_v33 }
 0xb1f   :  { %4355 = vpow2.f32 %v3785_v56 }
 0xb20   :  { %4357 = vpow2.f32 %v3788_v6 }
 0xb21   :  { %4359 = vpow2.f32 %v3791_v47 }
 0xb22   :  { %4361 = vpow2.f32 %v3794_v36 }
 0xb23   :  { %4363 = vpow2.f32 %v3797_v28 }
 0xb29   :  { %v4350_v55 = vpop.eup %4349 }
 0xb2a   :  { %v4352_v53 = vpop.eup %4351 }
 0xb2b   :  { %v3799_v50 = vadd.f32 %v4352_v53, %v4350_v55  ;;  %v4354_v17 = vpop.eup %4353 }
 0xb2c   :  { %v4356_v11 = vpop.eup %4355 }
 0xb2d   :  { %v3800_v59 = vadd.f32 %v4354_v17, %v3799_v50  ;;  %v4358_v16 = vpop.eup %4357 }
 0xb2e   :  { %v4360_v61 = vpop.eup %4359 }
 0xb2f   :  { %v3801_v41 = vadd.f32 %v4356_v11, %v3800_v59  ;;  %v4362_v9 = vpop.eup %4361 }
 0xb30   :  { %v4364_v3 = vpop.eup %4363 }
 0xb31   :  { %v3802_v51 = vadd.f32 %v4358_v16, %v3801_v41 }
 0xb33   :  { %v3803_v5 = vadd.f32 %v4360_v61, %v3802_v51 }
 0xb35   :  { %v3804_v24 = vadd.f32 %v4362_v9, %v3803_v5 }
 0xb37   :  { %v3805_v54 = vadd.f32 %v4364_v3, %v3804_v24 }
 0xb39   :  { %4365 = vrcp.f32 %v3805_v54 }
 0xb46   :  { %v4366_v52 = vpop.eup %4365 }
 0xb47   :  { %v3808_v31 = vmul.f32 %v4366_v52, %v4350_v55  ;;  %v3811_v39 = vmul.f32 %v4366_v52, %v4352_v53  ;;  %v3816_v1 = vmul.f32 %v4366_v52, %v4354_v17  ;;  %v3821_v42 = vmul.f32 %v4366_v52, %v4356_v11 }
 0xb48   :  { %v3826_v48 = vmul.f32 %v4366_v52, %v4358_v16  ;;  %v3831_v19 = vmul.f32 %v4366_v52, %v4360_v61  ;;  %v3836_v12 = vmul.f32 %v4366_v52, %v4362_v9  ;;  %v3841_v26 = vmul.f32 %v4366_v52, %v4364_v3 }
 0xb49   :  { %v3810_v57 = vmul.f32 %v3808_v31, %v9508_v30  ;;  %v3813_v45 = vmul.f32 %v3811_v39, %v9429_v20  ;;  %v3818_v63 = vmul.f32 %v3816_v1, %v11395_v2  ;;  %v3809_v21 = vmul.f32 %v3808_v31, %v11396_v32 }
 0xb4a   :  { %v3812_v49 = vmul.f32 %v3811_v39, %v11399_v18  ;;  %v3823_v46 = vmul.f32 %v3821_v42, %v11398_v15  ;;  %v3817_v13 = vmul.f32 %v3816_v1, %v11394_v37  ;;  %v3828_v20 = vmul.f32 %v3826_v48, %v11403_v22 }
 0xb4b   :  { %v3815_v44 = vadd.f32 %v3813_v45, %v3810_v57  ;;  %v3822_v25 = vmul.f32 %v3821_v42, %v11397_v60  ;;  %v3833_v32 = vmul.f32 %v3831_v19, %v11401_v38  ;;  %v3827_v18 = vmul.f32 %v3826_v48, %v11402_v23 }
 0xb4c   :  { %v3814_v0 = vadd.f32 %v3812_v49, %v3809_v21  ;;  %v3838_v15 = vmul.f32 %v3836_v12, %v11405_v29  ;;  %v3832_v37 = vmul.f32 %v3831_v19, %v11400_v10  ;;  %v3843_v56 = vmul.f32 %v3841_v26, %v11404_v35  ;;  %v4042_v29 = vld [vmem:[%s9554_s5] ss:$0 sm:$0xff] }
 0xb4d   :  { %v3820_v58 = vadd.f32 %v3818_v63, %v3815_v44  ;;  %v3837_v34 = vmul.f32 %v3836_v12, %v9431_v43  ;;  %v3842_v4 = vmul.f32 %v3841_v26, %v9498_v7 }
 0xb4e   :  { %v3819_v14 = vadd.f32 %v3817_v13, %v3814_v0 }
 0xb4f   :  { %v3825_v30 = vadd.f32 %v3823_v46, %v3820_v58 }
 0xb50   :  { %v3824_v40 = vadd.f32 %v3822_v25, %v3819_v14 }
 0xb51   :  { %v3830_v2 = vadd.f32 %v3828_v20, %v3825_v30 }
 0xb52   :  { %v3829_v33 = vadd.f32 %v3827_v18, %v3824_v40 }
 0xb53   :  { %v3835_v8 = vadd.f32 %v3833_v32, %v3830_v2 }
 0xb54   :  { %v3834_v22 = vadd.f32 %v3832_v37, %v3829_v33 }
 0xb55   :  { %v3840_v62 = vadd.f32 %v3838_v15, %v3835_v8 }
 0xb56   :  { %v3839_v6 = vadd.f32 %v3837_v34, %v3834_v22 }
 0xb57   :  { %v3845_v60 = vadd.f32 %v3843_v56, %v3840_v62 }
 0xb58   :  { %v3844_v38 = vadd.f32 %v3842_v4, %v3839_v6 }
 0xb59   :  { %3949 = vmatprep.mubr.f32.mxu0 %v3845_v60 }
 0xb5a   :  { %3950 = vmatmul.mubr.f32.vlgmr.msra.gmra.mxu0 %v3844_v38 }
 0xc1a   :  { %v4075_v23 = vpop.f32.mrf.mxu0 }
 0xc1c   :  { %v4076_v47 = vpop.f32.mrf.mxu0 }
 0xc1d   :  { %v4077_v10 = vadd.f32 %v4076_v47, %v4075_v23 }
 0xc1f   :  { %v3952_v27 = vadd.f32 %v4077_v10, %v4042_v29 }
 0xc21   :  { %3955 = vst [vmem:[%s9555_s6] sm:$0xff] %v3952_v27 }
 0xc22   :  { %3960 = vsyncpa [#allocation6], 1 }
 0xc23   :  { %3961 = vsyncpa [#allocation8], 1 }

</bundles_post_ra>
